<compile_context>
chip_gen: v7x
topology: tpu7x:2x2x1
jax: 0.10.0
libtpu: 0.0.40
codegen_flags: <defaults>
</compile_context>

<pallas_src>
import jax
import jax.numpy as jnp
from jax.experimental import pallas as pl
from jax.experimental.pallas import tpu as pltpu

Z_DIM = 32  # z_dim global in the reference code


def _round_up(a, m):
    return (a + m - 1) // m * m


# ---------------------------------------------------------------------------
# Fused kernel: pointwise conv stack + max-pool over points + VAE head
# ---------------------------------------------------------------------------
def _make_kernel(n_valid, tile, masked):
    def kernel(x_ref,
               w1, b1, w2, b2, w3, b3, w4, b4, w5, b5,
               wf, bf, wmu, bmu, wlv, blv, eps_ref,
               z_ref, mu_ref, lv_ref,
               acc_ref):
        t = pl.program_id(1)          # point-tile axis (reduction, last in grid)

        @pl.when(t == 0)
        def _():
            acc_ref[...] = jnp.full(acc_ref.shape, -jnp.inf, jnp.float32)

        x = x_ref[0]                  # (3, T) f32, points are lane-dense

        # ----- layer 1 (K = 3): three VPU broadcast multiply-adds (skip MXU) -----
        w1v = w1[...]                                         # (64, 3) f32
        h = (w1v[:, 0:1] * x[0:1, :] +
             w1v[:, 1:2] * x[1:2, :] +
             w1v[:, 2:3] * x[2:3, :] + b1[...])               # (64, T)
        h = jnp.maximum(h, 0.0)

        # ----- layers 2..5: MXU matmuls, bf16 operands, f32 accumulation -----
        def mm(w_ref, a):
            return jnp.dot(w_ref[...], a.astype(w_ref.dtype),
                           preferred_element_type=jnp.float32)

        h = jnp.maximum(mm(w2, h) + b2[...], 0.0)             # (128, T)
        h = jnp.maximum(mm(w3, h) + b3[...], 0.0)             # (256, T)
        h = jnp.maximum(mm(w4, h) + b4[...], 0.0)             # (256, T)
        h = mm(w5, h) + b5[...]                               # (512, T), no ReLU

        if masked:  # trace-time static: only emitted when N was padded
            col = jax.lax.broadcasted_iota(jnp.int32, (1, tile), 1) + t * tile
            h = jnp.where(col < n_valid, h, -jnp.inf)

        acc_ref[...] = jnp.maximum(acc_ref[...],
                                   jnp.max(h, axis=1, keepdims=True))  # (512, 1)

        # ----- fused head: once per batch row, on its last point tile -----
        @pl.when(t == pl.num_programs(1) - 1)
        def _():
            feat = acc_ref[...]                               # (512, 1), max over points
            # fc 512->256 with no transpose: broadcast the pooled column across
            # wf's output axis, then reduce over the 512 input sublanes.
            g = jnp.sum(wf[...] * feat, axis=0, keepdims=True) + bf[...]   # (1, 256)
            g = jnp.maximum(g, 0.0)
            mu = jnp.dot(g, wmu[...], preferred_element_type=jnp.float32) + bmu[...]
            lv = jnp.dot(g, wlv[...], preferred_element_type=jnp.float32) + blv[...]
            eps = eps_ref[0]                                  # (1, Z)
            z = eps * jnp.exp(0.5 * lv) + mu                  # eps * std + mu
            z_ref[0] = z
            mu_ref[0] = mu
            lv_ref[0] = lv

    return kernel


# ---------------------------------------------------------------------------
# Wrapper
# ---------------------------------------------------------------------------
def encoder_forward(x_bcn, params, eps, *, point_tile=512, conv_dtype=jnp.bfloat16):
    """x_bcn: (B, 3, N) float32 (PyTorch NCW).  eps: (B, Z_DIM) standard normal."""
    B, c_in, N = x_bcn.shape
    assert c_in == 3
    assert point_tile % 128 == 0

    (w1, b1, w2, b2, w3, b3, w4, b4, w5, b5,
     wf, bf, wmu, bmu, wlv, blv) = params

    # bf16 MXU operands for the big conv matmuls (f32 accumulation in-kernel).
    w2c, w3c, w4c, w5c = (w.astype(conv_dtype) for w in (w2, w3, w4, w5))

    tile = min(point_tile, _round_up(N, 128))
    n_pad = _round_up(N, tile)
    if n_pad != N:  # padded points are masked to -inf inside the kernel
        x_bcn = jnp.pad(x_bcn, ((0, 0), (0, 0), (0, n_pad - N)))
    n_tiles = n_pad // tile

    eps3 = eps.reshape(B, 1, Z_DIM)

    def full_spec(a):
        nd = a.ndim
        return pl.BlockSpec(a.shape, lambda b, t, _nd=nd: (0,) * _nd)

    def row_spec():
        return pl.BlockSpec((1, 1, Z_DIM), lambda b, t: (b, 0, 0))

    kernel = _make_kernel(N, tile, n_pad != N)

    out_shape = tuple(jax.ShapeDtypeStruct((B, 1, Z_DIM), jnp.float32)
                      for _ in range(3))

    # TODO(synk): if B == 1 on v7x, split the point axis into a leading parallel
    # grid axis of size 2 (per-core partial maxes) so both TensorCores are used.
    z, mu, logvar = pl.pallas_call(
        kernel,
        out_shape=out_shape,
        grid_spec=pltpu.PrefetchScalarGridSpec(
            num_scalar_prefetch=0,
            grid=(B, n_tiles),                               # reduction axis last
            in_specs=[pl.BlockSpec((1, 3, tile), lambda b, t: (b, 0, t))]
                     + [full_spec(a) for a in (w1, b1, w2c, b2, w3c, b3, w4c, b4,
                                               w5c, b5, wf, bf, wmu, bmu, wlv, blv)]
                     + [row_spec()],
            out_specs=(row_spec(), row_spec(), row_spec()),
            scratch_shapes=[pltpu.VMEM((512, 1), jnp.float32)],
        ),
        compiler_params=pltpu.CompilerParams(
            dimension_semantics=("parallel", "arbitrary"),
            vmem_limit_bytes=32 * 1024 * 1024),
    )(x_bcn, w1, b1, w2c, b2, w3c, b3, w4c, b4, w5c, b5,
      wf, bf, wmu, bmu, wlv, blv, eps3)

    return (z.reshape(B, Z_DIM), mu.reshape(B, Z_DIM), logvar.reshape(B, Z_DIM))


# ---------------------------------------------------------------------------
# Deterministic parameter init, in the layouts the kernel consumes:
#   conv:  w (C_out, C_in) f32 (PyTorch Conv1d weight, kernel dim squeezed), b (C_out, 1)
#   head:  wf (512, 256), bf (1, 256); wmu/wlv (256, Z_DIM), bmu/blv (1, Z_DIM)
# ---------------------------------------------------------------------------
def init_params(key):
    conv_dims = [(64, 3), (128, 64), (256, 128), (256, 256), (512, 256)]
    head_dims = [(512, 256), (256, Z_DIM), (256, Z_DIM)]
    params = []
    for (cout, cin) in conv_dims:
        key, kw = jax.random.split(key)
        params += [jax.random.normal(kw, (cout, cin), jnp.float32) / jnp.sqrt(float(cin)),
                   jnp.full((cout, 1), 0.01, jnp.float32)]
    for (cin, cout) in head_dims:
        key, kw = jax.random.split(key)
        params += [jax.random.normal(kw, (cin, cout), jnp.float32) / jnp.sqrt(float(cin)),
                   jnp.full((1, cout), 0.01, jnp.float32)]
    return tuple(params)


# Pure-JAX reference.  conv_dtype=bfloat16 mirrors the kernel's bf16-operand /
# f32-accumulate MXU path for a tight comparison; float32 is PyTorch semantics.
def reference_forward(x_bcn, params, eps, conv_dtype=jnp.float32):
    (w1, b1, w2, b2, w3, b3, w4, b4, w5, b5,
     wf, bf, wmu, bmu, wlv, blv) = params
    hp = jax.lax.Precision.HIGHEST

    h = jnp.einsum('oc,bcn->bon', w1, x_bcn, precision=hp) + b1[None]     # layer 1 in f32
    h = jnp.maximum(h, 0.0)
    for w, b, relu in ((w2, b2, True), (w3, b3, True), (w4, b4, True), (w5, b5, False)):
        h = jnp.einsum('oc,bcn->bon', w.astype(conv_dtype), h.astype(conv_dtype),
                       precision=hp, preferred_element_type=jnp.float32) + b[None]
        if relu:
            h = jnp.maximum(h, 0.0)
    feat = jnp.max(h, axis=2)                                             # (B, 512)
    g = jnp.maximum(jnp.dot(feat, wf, precision=hp) + bf, 0.0)
    mu = jnp.dot(g, wmu, precision=hp) + bmu
    lv = jnp.dot(g, wlv, precision=hp) + blv
    z = eps * jnp.exp(0.5 * lv) + mu
    return z, mu, lv


if __name__ == "__main__":
    key = jax.random.PRNGKey(0)
    k_param, k_x, k_eps = jax.random.split(key, 3)

    B, N = 2, 1000          # N is not a tile multiple -> exercises the masked last tile
    params = init_params(k_param)
    x = jax.random.normal(k_x, (B, 3, N), jnp.float32)        # PyTorch NCW layout
    eps = jax.random.normal(k_eps, (B, Z_DIM), jnp.float32)   # reparameterization noise

    z, mu, logvar = jax.block_until_ready(encoder_forward(x, params, eps))
    assert z.shape == (B, Z_DIM) and mu.shape == (B, Z_DIM) and logvar.shape == (B, Z_DIM)

    # Tight check vs a reference that applies the same bf16-operand matmuls.
    z_m, mu_m, lv_m = reference_forward(x, params, eps, conv_dtype=jnp.bfloat16)
    assert jnp.allclose(mu, mu_m, atol=3e-2, rtol=3e-2)
    assert jnp.allclose(logvar, lv_m, atol=3e-2, rtol=3e-2)
    assert jnp.allclose(z, z_m, atol=3e-2, rtol=3e-2)

    # Coarse check vs the pure-f32 reference (PyTorch semantics); mu/logvar only,
    # since z = eps*exp(0.5*logvar)+mu amplifies the bf16 rounding through exp().
    z_f, mu_f, lv_f = reference_forward(x, params, eps, conv_dtype=jnp.float32)
    assert jnp.allclose(mu, mu_f, atol=2e-1, rtol=2e-1)
    assert jnp.allclose(logvar, lv_f, atol=2e-1, rtol=2e-1)

    print("KERNEL_OK")
</pallas_src>

<mosaic_0001>
module attributes {stable_mosaic.version = 11 : i64} {
  func.func @kernel(%arg0: i32, %arg1: i32, %arg2: memref<1x3x512xf32, #tpu.memory_space<vmem>>, %arg3: memref<64x3xf32, #tpu.memory_space<vmem>>, %arg4: memref<64x1xf32, #tpu.memory_space<vmem>>, %arg5: memref<128x64xbf16, #tpu.memory_space<vmem>>, %arg6: memref<128x1xf32, #tpu.memory_space<vmem>>, %arg7: memref<256x128xbf16, #tpu.memory_space<vmem>>, %arg8: memref<256x1xf32, #tpu.memory_space<vmem>>, %arg9: memref<256x256xbf16, #tpu.memory_space<vmem>>, %arg10: memref<256x1xf32, #tpu.memory_space<vmem>>, %arg11: memref<512x256xbf16, #tpu.memory_space<vmem>>, %arg12: memref<512x1xf32, #tpu.memory_space<vmem>>, %arg13: memref<512x256xf32, #tpu.memory_space<vmem>>, %arg14: memref<1x256xf32, #tpu.memory_space<vmem>>, %arg15: memref<256x32xf32, #tpu.memory_space<vmem>>, %arg16: memref<1x32xf32, #tpu.memory_space<vmem>>, %arg17: memref<256x32xf32, #tpu.memory_space<vmem>>, %arg18: memref<1x32xf32, #tpu.memory_space<vmem>>, %arg19: memref<1x1x32xf32, #tpu.memory_space<vmem>>, %arg20: memref<1x1x32xf32, #tpu.memory_space<vmem>>, %arg21: memref<1x1x32xf32, #tpu.memory_space<vmem>>, %arg22: memref<1x1x32xf32, #tpu.memory_space<vmem>>, %arg23: memref<512x1xf32, #tpu.memory_space<vmem>>) attributes {dimension_semantics = [#tpu.dimension_semantics<parallel>, #tpu.dimension_semantics<arbitrary>], iteration_bounds = array<i64: 2, 2>, scalar_prefetch = 0 : i64, scratch_operands = 1 : i64, tpu.core_type = #tpu.core_type<tc>, window_params = [{transform_indices = @transform_0, window_bounds = array<i64: 1, 3, 512>}, {pipeline_mode = #tpu.pipeline_mode<synchronous>, transform_indices = @transform_1, window_bounds = array<i64: 64, 3>}, {pipeline_mode = #tpu.pipeline_mode<synchronous>, transform_indices = @transform_2, window_bounds = array<i64: 64, 1>}, {pipeline_mode = #tpu.pipeline_mode<synchronous>, transform_indices = @transform_3, window_bounds = array<i64: 128, 64>}, {pipeline_mode = #tpu.pipeline_mode<synchronous>, transform_indices = @transform_4, window_bounds = array<i64: 128, 1>}, {pipeline_mode = #tpu.pipeline_mode<synchronous>, transform_indices = @transform_5, window_bounds = array<i64: 256, 128>}, {pipeline_mode = #tpu.pipeline_mode<synchronous>, transform_indices = @transform_6, window_bounds = array<i64: 256, 1>}, {pipeline_mode = #tpu.pipeline_mode<synchronous>, transform_indices = @transform_7, window_bounds = array<i64: 256, 256>}, {pipeline_mode = #tpu.pipeline_mode<synchronous>, transform_indices = @transform_8, window_bounds = array<i64: 256, 1>}, {pipeline_mode = #tpu.pipeline_mode<synchronous>, transform_indices = @transform_9, window_bounds = array<i64: 512, 256>}, {pipeline_mode = #tpu.pipeline_mode<synchronous>, transform_indices = @transform_10, window_bounds = array<i64: 512, 1>}, {pipeline_mode = #tpu.pipeline_mode<synchronous>, transform_indices = @transform_11, window_bounds = array<i64: 512, 256>}, {pipeline_mode = #tpu.pipeline_mode<synchronous>, transform_indices = @transform_12, window_bounds = array<i64: 1, 256>}, {pipeline_mode = #tpu.pipeline_mode<synchronous>, transform_indices = @transform_13, window_bounds = array<i64: 256, 32>}, {pipeline_mode = #tpu.pipeline_mode<synchronous>, transform_indices = @transform_14, window_bounds = array<i64: 1, 32>}, {pipeline_mode = #tpu.pipeline_mode<synchronous>, transform_indices = @transform_15, window_bounds = array<i64: 256, 32>}, {pipeline_mode = #tpu.pipeline_mode<synchronous>, transform_indices = @transform_16, window_bounds = array<i64: 1, 32>}, {transform_indices = @transform_17, window_bounds = array<i64: 1, 1, 32>}, {transform_indices = @transform_18, window_bounds = array<i64: 1, 1, 32>}, {transform_indices = @transform_19, window_bounds = array<i64: 1, 1, 32>}, {transform_indices = @transform_20, window_bounds = array<i64: 1, 1, 32>}]} {
    %c0_i32 = arith.constant 0 : i32
    %0 = arith.cmpi eq, %arg1, %c0_i32 : i32
    %1 = arith.extui %0 : i1 to i32
    %c0_i32_0 = arith.constant 0 : i32
    %2 = arith.cmpi ne, %1, %c0_i32_0 : i32
    scf.if %2 {
      %cst_37 = arith.constant 0xFF800000 : f32
      %76 = vector.broadcast %cst_37 : f32 to vector<512x1xf32>
      %c0_38 = arith.constant 0 : index
      %c0_39 = arith.constant 0 : index
      %77 = vector.load %arg23[%c0_38, %c0_39] : memref<512x1xf32, #tpu.memory_space<vmem>>, vector<512x1xf32>
      tpu.vector_store %arg23[%c0_38, %c0_39], %76 {strides = array<i32>} : memref<512x1xf32, #tpu.memory_space<vmem>>, vector<512x1xf32>,
    } else {
    }
    %c0 = arith.constant 0 : index
    %c0_1 = arith.constant 0 : index
    %c0_2 = arith.constant 0 : index
    %3 = vector.load %arg2[%c0, %c0_1, %c0_2] : memref<1x3x512xf32, #tpu.memory_space<vmem>>, vector<1x3x512xf32>
    %4 = vector.shape_cast %3 : vector<1x3x512xf32> to vector<3x512xf32>
    %c0_3 = arith.constant 0 : index
    %c0_4 = arith.constant 0 : index
    %5 = vector.load %arg3[%c0_3, %c0_4] : memref<64x3xf32, #tpu.memory_space<vmem>>, vector<64x3xf32>
    %6 = vector.extract_strided_slice %5 {offsets = [0, 0], sizes = [64, 1], strides = [1, 1]} : vector<64x3xf32> to vector<64x1xf32>
    %7 = vector.extract_strided_slice %4 {offsets = [0, 0], sizes = [1, 512], strides = [1, 1]} : vector<3x512xf32> to vector<1x512xf32>
    %8 = vector.broadcast %6 : vector<64x1xf32> to vector<64x512xf32>
    %9 = vector.broadcast %7 : vector<1x512xf32> to vector<64x512xf32>
    %10 = arith.mulf %8, %9 : vector<64x512xf32>
    %11 = vector.extract_strided_slice %5 {offsets = [0, 1], sizes = [64, 1], strides = [1, 1]} : vector<64x3xf32> to vector<64x1xf32>
    %12 = vector.extract_strided_slice %4 {offsets = [1, 0], sizes = [1, 512], strides = [1, 1]} : vector<3x512xf32> to vector<1x512xf32>
    %13 = vector.broadcast %11 : vector<64x1xf32> to vector<64x512xf32>
    %14 = vector.broadcast %12 : vector<1x512xf32> to vector<64x512xf32>
    %15 = arith.mulf %13, %14 : vector<64x512xf32>
    %16 = arith.addf %10, %15 : vector<64x512xf32>
    %17 = vector.extract_strided_slice %5 {offsets = [0, 2], sizes = [64, 1], strides = [1, 1]} : vector<64x3xf32> to vector<64x1xf32>
    %18 = vector.extract_strided_slice %4 {offsets = [2, 0], sizes = [1, 512], strides = [1, 1]} : vector<3x512xf32> to vector<1x512xf32>
    %19 = vector.broadcast %17 : vector<64x1xf32> to vector<64x512xf32>
    %20 = vector.broadcast %18 : vector<1x512xf32> to vector<64x512xf32>
    %21 = arith.mulf %19, %20 : vector<64x512xf32>
    %22 = arith.addf %16, %21 : vector<64x512xf32>
    %c0_5 = arith.constant 0 : index
    %c0_6 = arith.constant 0 : index
    %23 = vector.load %arg4[%c0_5, %c0_6] : memref<64x1xf32, #tpu.memory_space<vmem>>, vector<64x1xf32>
    %24 = vector.broadcast %23 : vector<64x1xf32> to vector<64x512xf32>
    %25 = arith.addf %22, %24 : vector<64x512xf32>
    %cst = arith.constant 0.000000e+00 : f32
    %26 = vector.broadcast %cst : f32 to vector<64x512xf32>
    %27 = arith.maximumf %25, %26 : vector<64x512xf32>
    %c0_7 = arith.constant 0 : index
    %c0_8 = arith.constant 0 : index
    %28 = vector.load %arg5[%c0_7, %c0_8] : memref<128x64xbf16, #tpu.memory_space<vmem>>, vector<128x64xbf16>
    %29 = arith.truncf %27 : vector<64x512xf32> to vector<64x512xbf16>
    %cst_9 = arith.constant dense<0.000000e+00> : vector<128x512xf32>
    %30 = tpu.matmul %28, %29, %cst_9 {dimension_numbers = #tpu.dot_dimension_numbers<[1], [0], [0], [1], [0, 0, 1, 1], [], []>} : vector<128x64xbf16>, vector<64x512xbf16>, vector<128x512xf32> -> vector<128x512xf32>
    %c0_10 = arith.constant 0 : index
    %c0_11 = arith.constant 0 : index
    %31 = vector.load %arg6[%c0_10, %c0_11] : memref<128x1xf32, #tpu.memory_space<vmem>>, vector<128x1xf32>
    %32 = vector.broadcast %31 : vector<128x1xf32> to vector<128x512xf32>
    %33 = arith.addf %30, %32 : vector<128x512xf32>
    %cst_12 = arith.constant 0.000000e+00 : f32
    %34 = vector.broadcast %cst_12 : f32 to vector<128x512xf32>
    %35 = arith.maximumf %33, %34 : vector<128x512xf32>
    %c0_13 = arith.constant 0 : index
    %c0_14 = arith.constant 0 : index
    %36 = vector.load %arg7[%c0_13, %c0_14] : memref<256x128xbf16, #tpu.memory_space<vmem>>, vector<256x128xbf16>
    %37 = arith.truncf %35 : vector<128x512xf32> to vector<128x512xbf16>
    %cst_15 = arith.constant dense<0.000000e+00> : vector<256x512xf32>
    %38 = tpu.matmul %36, %37, %cst_15 {dimension_numbers = #tpu.dot_dimension_numbers<[1], [0], [0], [1], [0, 0, 1, 1], [], []>} : vector<256x128xbf16>, vector<128x512xbf16>, vector<256x512xf32> -> vector<256x512xf32>
    %c0_16 = arith.constant 0 : index
    %c0_17 = arith.constant 0 : index
    %39 = vector.load %arg8[%c0_16, %c0_17] : memref<256x1xf32, #tpu.memory_space<vmem>>, vector<256x1xf32>
    %40 = vector.broadcast %39 : vector<256x1xf32> to vector<256x512xf32>
    %41 = arith.addf %38, %40 : vector<256x512xf32>
    %cst_18 = arith.constant 0.000000e+00 : f32
    %42 = vector.broadcast %cst_18 : f32 to vector<256x512xf32>
    %43 = arith.maximumf %41, %42 : vector<256x512xf32>
    %c0_19 = arith.constant 0 : index
    %c0_20 = arith.constant 0 : index
    %44 = vector.load %arg9[%c0_19, %c0_20] : memref<256x256xbf16, #tpu.memory_space<vmem>>, vector<256x256xbf16>
    %45 = arith.truncf %43 : vector<256x512xf32> to vector<256x512xbf16>
    %cst_21 = arith.constant dense<0.000000e+00> : vector<256x512xf32>
    %46 = tpu.matmul %44, %45, %cst_21 {dimension_numbers = #tpu.dot_dimension_numbers<[1], [0], [0], [1], [0, 0, 1, 1], [], []>} : vector<256x256xbf16>, vector<256x512xbf16>, vector<256x512xf32> -> vector<256x512xf32>
    %c0_22 = arith.constant 0 : index
    %c0_23 = arith.constant 0 : index
    %47 = vector.load %arg10[%c0_22, %c0_23] : memref<256x1xf32, #tpu.memory_space<vmem>>, vector<256x1xf32>
    %48 = vector.broadcast %47 : vector<256x1xf32> to vector<256x512xf32>
    %49 = arith.addf %46, %48 : vector<256x512xf32>
    %cst_24 = arith.constant 0.000000e+00 : f32
    %50 = vector.broadcast %cst_24 : f32 to vector<256x512xf32>
    %51 = arith.maximumf %49, %50 : vector<256x512xf32>
    %c0_25 = arith.constant 0 : index
    %c0_26 = arith.constant 0 : index
    %52 = vector.load %arg11[%c0_25, %c0_26] : memref<512x256xbf16, #tpu.memory_space<vmem>>, vector<512x256xbf16>
    %53 = arith.truncf %51 : vector<256x512xf32> to vector<256x512xbf16>
    %cst_27 = arith.constant dense<0.000000e+00> : vector<512x512xf32>
    %54 = tpu.matmul %52, %53, %cst_27 {dimension_numbers = #tpu.dot_dimension_numbers<[1], [0], [0], [1], [0, 0, 1, 1], [], []>} : vector<512x256xbf16>, vector<256x512xbf16>, vector<512x512xf32> -> vector<512x512xf32>
    %c0_28 = arith.constant 0 : index
    %c0_29 = arith.constant 0 : index
    %55 = vector.load %arg12[%c0_28, %c0_29] : memref<512x1xf32, #tpu.memory_space<vmem>>, vector<512x1xf32>
    %56 = vector.broadcast %55 : vector<512x1xf32> to vector<512x512xf32>
    %57 = arith.addf %54, %56 : vector<512x512xf32>
    %58 = tpu.iota {dimensions = array<i32: 1>} : vector<1x512xi32>
    %c512_i32 = arith.constant 512 : i32
    %59 = arith.muli %arg1, %c512_i32 : i32
    %60 = vector.broadcast %59 : i32 to vector<1x512xi32>
    %61 = arith.addi %58, %60 : vector<1x512xi32>
    %c1000_i32 = arith.constant 1000 : i32
    %62 = vector.broadcast %c1000_i32 : i32 to vector<1x512xi32>
    %63 = arith.cmpi slt, %61, %62 : vector<1x512xi32>
    %cst_30 = arith.constant 0xFF800000 : f32
    %64 = vector.shape_cast %63 : vector<1x512xi1> to vector<1x512xi1>
    %65 = vector.broadcast %64 : vector<1x512xi1> to vector<512x512xi1>
    %66 = vector.broadcast %cst_30 : f32 to vector<512x512xf32>
    %67 = arith.select %65, %57, %66 : vector<512x512xi1>, vector<512x512xf32>
    %c0_31 = arith.constant 0 : index
    %c0_32 = arith.constant 0 : index
    %68 = vector.load %arg23[%c0_31, %c0_32] : memref<512x1xf32, #tpu.memory_space<vmem>>, vector<512x1xf32>
    %cst_33 = arith.constant dense<0xFF800000> : vector<512xf32>
    %69 = vector.multi_reduction <maximumf>, %67, %cst_33 [1] : vector<512x512xf32> to vector<512xf32>
    %70 = vector.shape_cast %69 : vector<512xf32> to vector<512x1xf32>
    %71 = arith.maximumf %68, %70 : vector<512x1xf32>
    %c0_34 = arith.constant 0 : index
    %c0_35 = arith.constant 0 : index
    %72 = vector.load %arg23[%c0_34, %c0_35] : memref<512x1xf32, #tpu.memory_space<vmem>>, vector<512x1xf32>
    tpu.vector_store %arg23[%c0_34, %c0_35], %71 {strides = array<i32>} : memref<512x1xf32, #tpu.memory_space<vmem>>, vector<512x1xf32>,
    %c1_i32 = arith.constant 1 : i32
    %73 = arith.cmpi eq, %arg1, %c1_i32 : i32
    %74 = arith.extui %73 : i1 to i32
    %c0_i32_36 = arith.constant 0 : i32
    %75 = arith.cmpi ne, %74, %c0_i32_36 : i32
    scf.if %75 {
      %c0_37 = arith.constant 0 : index
      %c0_38 = arith.constant 0 : index
      %76 = vector.load %arg23[%c0_37, %c0_38] : memref<512x1xf32, #tpu.memory_space<vmem>>, vector<512x1xf32>
      %c0_39 = arith.constant 0 : index
      %c0_40 = arith.constant 0 : index
      %77 = vector.load %arg13[%c0_39, %c0_40] : memref<512x256xf32, #tpu.memory_space<vmem>>, vector<512x256xf32>
      %78 = vector.broadcast %76 : vector<512x1xf32> to vector<512x256xf32>
      %79 = arith.mulf %77, %78 : vector<512x256xf32>
      %cst_41 = arith.constant dense<0.000000e+00> : vector<256xf32>
      %80 = vector.multi_reduction <add>, %79, %cst_41 [0] : vector<512x256xf32> to vector<256xf32>
      %81 = vector.shape_cast %80 : vector<256xf32> to vector<1x256xf32>
      %c0_42 = arith.constant 0 : index
      %c0_43 = arith.constant 0 : index
      %82 = vector.load %arg14[%c0_42, %c0_43] : memref<1x256xf32, #tpu.memory_space<vmem>>, vector<1x256xf32>
      %83 = arith.addf %81, %82 : vector<1x256xf32>
      %cst_44 = arith.constant 0.000000e+00 : f32
      %84 = vector.broadcast %cst_44 : f32 to vector<1x256xf32>
      %85 = arith.maximumf %83, %84 : vector<1x256xf32>
      %c0_45 = arith.constant 0 : index
      %c0_46 = arith.constant 0 : index
      %86 = vector.load %arg15[%c0_45, %c0_46] : memref<256x32xf32, #tpu.memory_space<vmem>>, vector<256x32xf32>
      %cst_47 = arith.constant dense<0.000000e+00> : vector<1x32xf32>
      %87 = tpu.matmul %85, %86, %cst_47 {dimension_numbers = #tpu.dot_dimension_numbers<[1], [0], [0], [1], [0, 0, 1, 1], [], []>} : vector<1x256xf32>, vector<256x32xf32>, vector<1x32xf32> -> vector<1x32xf32>
      %c0_48 = arith.constant 0 : index
      %c0_49 = arith.constant 0 : index
      %88 = vector.load %arg16[%c0_48, %c0_49] : memref<1x32xf32, #tpu.memory_space<vmem>>, vector<1x32xf32>
      %89 = arith.addf %87, %88 : vector<1x32xf32>
      %c0_50 = arith.constant 0 : index
      %c0_51 = arith.constant 0 : index
      %90 = vector.load %arg17[%c0_50, %c0_51] : memref<256x32xf32, #tpu.memory_space<vmem>>, vector<256x32xf32>
      %cst_52 = arith.constant dense<0.000000e+00> : vector<1x32xf32>
      %91 = tpu.matmul %85, %90, %cst_52 {dimension_numbers = #tpu.dot_dimension_numbers<[1], [0], [0], [1], [0, 0, 1, 1], [], []>} : vector<1x256xf32>, vector<256x32xf32>, vector<1x32xf32> -> vector<1x32xf32>
      %c0_53 = arith.constant 0 : index
      %c0_54 = arith.constant 0 : index
      %92 = vector.load %arg18[%c0_53, %c0_54] : memref<1x32xf32, #tpu.memory_space<vmem>>, vector<1x32xf32>
      %93 = arith.addf %91, %92 : vector<1x32xf32>
      %c0_55 = arith.constant 0 : index
      %c0_56 = arith.constant 0 : index
      %c0_57 = arith.constant 0 : index
      %94 = vector.load %arg19[%c0_55, %c0_56, %c0_57] : memref<1x1x32xf32, #tpu.memory_space<vmem>>, vector<1x1x32xf32>
      %95 = vector.shape_cast %94 : vector<1x1x32xf32> to vector<1x32xf32>
      %cst_58 = arith.constant 5.000000e-01 : f32
      %96 = vector.broadcast %cst_58 : f32 to vector<1x32xf32>
      %97 = arith.mulf %96, %93 : vector<1x32xf32>
      %98 = math.exp %97 : vector<1x32xf32>
      %99 = arith.mulf %95, %98 : vector<1x32xf32>
      %100 = arith.addf %99, %89 : vector<1x32xf32>
      %c0_59 = arith.constant 0 : index
      %c0_60 = arith.constant 0 : index
      %c0_61 = arith.constant 0 : index
      %101 = vector.load %arg20[%c0_59, %c0_60, %c0_61] : memref<1x1x32xf32, #tpu.memory_space<vmem>>, vector<1x1x32xf32>
      %102 = vector.shape_cast %101 : vector<1x1x32xf32> to vector<1x32xf32>
      %103 = vector.shape_cast %100 : vector<1x32xf32> to vector<1x1x32xf32>
      tpu.vector_store %arg20[%c0_59, %c0_60, %c0_61], %103 {strides = array<i32>} : memref<1x1x32xf32, #tpu.memory_space<vmem>>, vector<1x1x32xf32>,
      %c0_62 = arith.constant 0 : index
      %c0_63 = arith.constant 0 : index
      %c0_64 = arith.constant 0 : index
      %104 = vector.load %arg21[%c0_62, %c0_63, %c0_64] : memref<1x1x32xf32, #tpu.memory_space<vmem>>, vector<1x1x32xf32>
      %105 = vector.shape_cast %104 : vector<1x1x32xf32> to vector<1x32xf32>
      %106 = vector.shape_cast %89 : vector<1x32xf32> to vector<1x1x32xf32>
      tpu.vector_store %arg21[%c0_62, %c0_63, %c0_64], %106 {strides = array<i32>} : memref<1x1x32xf32, #tpu.memory_space<vmem>>, vector<1x1x32xf32>,
      %c0_65 = arith.constant 0 : index
      %c0_66 = arith.constant 0 : index
      %c0_67 = arith.constant 0 : index
      %107 = vector.load %arg22[%c0_65, %c0_66, %c0_67] : memref<1x1x32xf32, #tpu.memory_space<vmem>>, vector<1x1x32xf32>
      %108 = vector.shape_cast %107 : vector<1x1x32xf32> to vector<1x32xf32>
      %109 = vector.shape_cast %93 : vector<1x32xf32> to vector<1x1x32xf32>
      tpu.vector_store %arg22[%c0_65, %c0_66, %c0_67], %109 {strides = array<i32>} : memref<1x1x32xf32, #tpu.memory_space<vmem>>, vector<1x1x32xf32>,
    } else {
    }
    return
  }
  func.func @transform_0(%arg0: i32, %arg1: i32) -> (i32, i32, i32) {
    %c0_i32 = arith.constant 0 : i32
    %c0_i32_0 = arith.constant 0 : i32
    return %arg0, %c0_i32, %arg1 : i32, i32, i32
  }
  func.func @transform_1(%arg0: i32, %arg1: i32) -> (i32, i32) {
    %c0_i32 = arith.constant 0 : i32
    %c0_i32_0 = arith.constant 0 : i32
    %c0_i32_1 = arith.constant 0 : i32
    return %c0_i32, %c0_i32_0 : i32, i32
  }
  func.func @transform_2(%arg0: i32, %arg1: i32) -> (i32, i32) {
    %c0_i32 = arith.constant 0 : i32
    %c0_i32_0 = arith.constant 0 : i32
    %c0_i32_1 = arith.constant 0 : i32
    return %c0_i32, %c0_i32_0 : i32, i32
  }
  func.func @transform_3(%arg0: i32, %arg1: i32) -> (i32, i32) {
    %c0_i32 = arith.constant 0 : i32
    %c0_i32_0 = arith.constant 0 : i32
    %c0_i32_1 = arith.constant 0 : i32
    return %c0_i32, %c0_i32_0 : i32, i32
  }
  func.func @transform_4(%arg0: i32, %arg1: i32) -> (i32, i32) {
    %c0_i32 = arith.constant 0 : i32
    %c0_i32_0 = arith.constant 0 : i32
    %c0_i32_1 = arith.constant 0 : i32
    return %c0_i32, %c0_i32_0 : i32, i32
  }
  func.func @transform_5(%arg0: i32, %arg1: i32) -> (i32, i32) {
    %c0_i32 = arith.constant 0 : i32
    %c0_i32_0 = arith.constant 0 : i32
    %c0_i32_1 = arith.constant 0 : i32
    return %c0_i32, %c0_i32_0 : i32, i32
  }
  func.func @transform_6(%arg0: i32, %arg1: i32) -> (i32, i32) {
    %c0_i32 = arith.constant 0 : i32
    %c0_i32_0 = arith.constant 0 : i32
    %c0_i32_1 = arith.constant 0 : i32
    return %c0_i32, %c0_i32_0 : i32, i32
  }
  func.func @transform_7(%arg0: i32, %arg1: i32) -> (i32, i32) {
    %c0_i32 = arith.constant 0 : i32
    %c0_i32_0 = arith.constant 0 : i32
    %c0_i32_1 = arith.constant 0 : i32
    return %c0_i32, %c0_i32_0 : i32, i32
  }
  func.func @transform_8(%arg0: i32, %arg1: i32) -> (i32, i32) {
    %c0_i32 = arith.constant 0 : i32
    %c0_i32_0 = arith.constant 0 : i32
    %c0_i32_1 = arith.constant 0 : i32
    return %c0_i32, %c0_i32_0 : i32, i32
  }
  func.func @transform_9(%arg0: i32, %arg1: i32) -> (i32, i32) {
    %c0_i32 = arith.constant 0 : i32
    %c0_i32_0 = arith.constant 0 : i32
    %c0_i32_1 = arith.constant 0 : i32
    return %c0_i32, %c0_i32_0 : i32, i32
  }
  func.func @transform_10(%arg0: i32, %arg1: i32) -> (i32, i32) {
    %c0_i32 = arith.constant 0 : i32
    %c0_i32_0 = arith.constant 0 : i32
    %c0_i32_1 = arith.constant 0 : i32
    return %c0_i32, %c0_i32_0 : i32, i32
  }
  func.func @transform_11(%arg0: i32, %arg1: i32) -> (i32, i32) {
    %c0_i32 = arith.constant 0 : i32
    %c0_i32_0 = arith.constant 0 : i32
    %c0_i32_1 = arith.constant 0 : i32
    return %c0_i32, %c0_i32_0 : i32, i32
  }
  func.func @transform_12(%arg0: i32, %arg1: i32) -> (i32, i32) {
    %c0_i32 = arith.constant 0 : i32
    %c0_i32_0 = arith.constant 0 : i32
    %c0_i32_1 = arith.constant 0 : i32
    return %c0_i32, %c0_i32_0 : i32, i32
  }
  func.func @transform_13(%arg0: i32, %arg1: i32) -> (i32, i32) {
    %c0_i32 = arith.constant 0 : i32
    %c0_i32_0 = arith.constant 0 : i32
    %c0_i32_1 = arith.constant 0 : i32
    return %c0_i32, %c0_i32_0 : i32, i32
  }
  func.func @transform_14(%arg0: i32, %arg1: i32) -> (i32, i32) {
    %c0_i32 = arith.constant 0 : i32
    %c0_i32_0 = arith.constant 0 : i32
    %c0_i32_1 = arith.constant 0 : i32
    return %c0_i32, %c0_i32_0 : i32, i32
  }
  func.func @transform_15(%arg0: i32, %arg1: i32) -> (i32, i32) {
    %c0_i32 = arith.constant 0 : i32
    %c0_i32_0 = arith.constant 0 : i32
    %c0_i32_1 = arith.constant 0 : i32
    return %c0_i32, %c0_i32_0 : i32, i32
  }
  func.func @transform_16(%arg0: i32, %arg1: i32) -> (i32, i32) {
    %c0_i32 = arith.constant 0 : i32
    %c0_i32_0 = arith.constant 0 : i32
    %c0_i32_1 = arith.constant 0 : i32
    return %c0_i32, %c0_i32_0 : i32, i32
  }
  func.func @transform_17(%arg0: i32, %arg1: i32) -> (i32, i32, i32) {
    %c0_i32 = arith.constant 0 : i32
    %c0_i32_0 = arith.constant 0 : i32
    %c0_i32_1 = arith.constant 0 : i32
    return %arg0, %c0_i32, %c0_i32_0 : i32, i32, i32
  }
  func.func @transform_18(%arg0: i32, %arg1: i32) -> (i32, i32, i32) {
    %c0_i32 = arith.constant 0 : i32
    %c0_i32_0 = arith.constant 0 : i32
    %c0_i32_1 = arith.constant 0 : i32
    return %arg0, %c0_i32, %c0_i32_0 : i32, i32, i32
  }
  func.func @transform_19(%arg0: i32, %arg1: i32) -> (i32, i32, i32) {
    %c0_i32 = arith.constant 0 : i32
    %c0_i32_0 = arith.constant 0 : i32
    %c0_i32_1 = arith.constant 0 : i32
    return %arg0, %c0_i32, %c0_i32_0 : i32, i32, i32
  }
  func.func @transform_20(%arg0: i32, %arg1: i32) -> (i32, i32, i32) {
    %c0_i32 = arith.constant 0 : i32
    %c0_i32_0 = arith.constant 0 : i32
    %c0_i32_1 = arith.constant 0 : i32
    return %arg0, %c0_i32, %c0_i32_0 : i32, i32, i32
  }
}

</mosaic_0001>

<bundles_post_ra>
// kernel: tpu_custom_call.1
= control target key start
LH: loop header
LB: loop body
LE: loop exit
PB: predicated region body
PF: predicated region fallthrough
CT: control target
= control target key end

     0   :  { %s11346_s0 = inlined_call_operand.vmem [shape: f32[2,3,1024], index: 0, kind: input, shape index: {}]   ;;  %s11347_s1 = inlined_call_operand.vmem [shape: f32[64,3], index: 1, kind: input, shape index: {}]   ;;  %s11348_s2 = inlined_call_operand.vmem [shape: f32[64,1], index: 2, kind: input, shape index: {}]   ;;  %s11349_s3 = inlined_call_operand.vmem [shape: bf16[128,64], index: 3, kind: input, shape index: {}]   ;;  %s11350_s4 = inlined_call_operand.vmem [shape: f32[128,1], index: 4, kind: input, shape index: {}]   ;;  %s11351_s5 = inlined_call_operand.vmem [shape: bf16[256,128], index: 5, kind: input, shape index: {}]   ;;  %s11352_s6 = inlined_call_operand.vmem [shape: f32[256,1], index: 6, kind: input, shape index: {}]   ;;  %s11353_s7 = inlined_call_operand.vmem [shape: bf16[256,256], index: 7, kind: input, shape index: {}]   ;;  %s11354_s8 = inlined_call_operand.vmem [shape: f32[256,1], index: 8, kind: input, shape index: {}]   ;;  %s11355_s9 = inlined_call_operand.vmem [shape: bf16[512,256], index: 9, kind: input, shape index: {}]   ;;  %s11356_s10 = inlined_call_operand.vmem [shape: f32[512,1], index: 10, kind: input, shape index: {}]   ;;  %s11357_s11 = inlined_call_operand.vmem [shape: f32[512,256], index: 11, kind: input, shape index: {}]   ;;  %s11358_s12 = inlined_call_operand.vmem [shape: f32[1,256], index: 12, kind: input, shape index: {}]   ;;  %s11359_s13 = inlined_call_operand.vmem [shape: f32[256,32], index: 13, kind: input, shape index: {}]   ;;  %s11360_s14 = inlined_call_operand.vmem [shape: f32[1,32], index: 14, kind: input, shape index: {}]   ;;  %s11361_s15 = inlined_call_operand.vmem [shape: f32[256,32], index: 15, kind: input, shape index: {}]   ;;  %s11362_s16 = inlined_call_operand.vmem [shape: f32[1,32], index: 16, kind: input, shape index: {}]   ;;  %s11363_s17 = inlined_call_operand.vmem [shape: f32[2,1,32], index: 17, kind: input, shape index: {}]   ;;  %s11364_s18 = inlined_call_operand.hbm [shape: f32[2,1,32], index: 18, kind: output, shape index: {0}]   ;;  %s11365_s19 = inlined_call_operand.hbm [shape: f32[2,1,32], index: 19, kind: output, shape index: {1}]   ;;  %s11366_s20 = inlined_call_operand.hbm [shape: f32[2,1,32], index: 20, kind: output, shape index: {2}]  }
   0x1   :  { %11401 = sst [smem:[#allocation31_spill]] %s11346_s0 }
   0x2   :  { %11402 = sst [smem:[#allocation32_spill]] %s11347_s1 }
   0x3   :  { %11403 = sst [smem:[#allocation33_spill]] %s11348_s2 }
   0x4   :  { %11404 = sst [smem:[#allocation34_spill]] %s11349_s3 }
   0x5   :  { %11405 = sst [smem:[#allocation35_spill]] %s11350_s4 }
   0x6   :  { %11406 = sst [smem:[#allocation36_spill]] %s11351_s5 }
   0x7   :  { %11407 = sst [smem:[#allocation37_spill]] %s11352_s6 }
   0x8   :  { %11408 = sst [smem:[#allocation38_spill]] %s11353_s7 }
   0x9   :  { %11409 = sst [smem:[#allocation39_spill]] %s11354_s8 }
   0xa   :  { %11410 = sst [smem:[#allocation40_spill]] %s11355_s9 }
   0xb   :  { %11411 = sst [smem:[#allocation41_spill]] %s11356_s10 }
   0xc   :  { %11412 = sst [smem:[#allocation42_spill]] %s11364_s18 }
   0xd   :  { %11413 = sst [smem:[#allocation43_spill]] %s11365_s19 }
   0xe   :  { %11414 = sst [smem:[#allocation44_spill]] %s11366_s20 }
   0xf   :  { %26 = vsyncpa [#allocation4], 0 }
  0x10   :  { %28 = vsyncpa [#allocation4 + $0x1], 0 }
  0x11   :  { %29 = vsyncpa [#allocation6], 0 }
  0x12   :  { %31 = vsyncpa [#allocation6 + $0x1], 0  ;;  %s7915_s1 = smov 0   ;;  %s7917_s22 = smov 0  }
  0x13   :  { %s7919_s23 = smov 0   ;;  %s7921_s24 = smov 0  }
  0x14   :  { %s7923_s2 = smov 0   ;;  %s7925_s25 = smov 0  }
  0x15   :  { %s7927_s3 = smov 0   ;;  %s7929_s26 = smov 0  }
  0x16 LB: > { %11415 = sst [smem:[#allocation10_spill]] %s7772_s1  ;;  %s11371_s27 = sadd.s32 4294967295, %s7800_s26   ;;  %s7800_s26 = sphi %s7929_s26, %s37_s26   ;;  %s7796_s3 = sphi %s7927_s3, %s11491_s3   ;;  %s7792_s25 = sphi %s7925_s25, %s11490_s25   ;;  %s7788_s2 = sphi %s7923_s2, %s11489_s2   ;;  %s7784_s24 = sphi %s7921_s24, %s11488_s24   ;;  %s7780_s23 = sphi %s7919_s23, %s11487_s23   ;;  %s7776_s22 = sphi %s7917_s22, %s11486_s22   ;;  %s7772_s1 = sphi %s7915_s1, %s11485_s1  }
  0x17   : > { %11416 = sst [smem:[#allocation11_spill]] %s7776_s22  ;;  %s11372_s28 = sadd.s32 4294967294, %s7800_s26  }
  0x18   : > { %11417 = sst [smem:[#allocation12_spill]] %s7780_s23  ;;  %s46_s4 = sadd.s32 1, %s7792_s25 }
  0x19   : > { %11418 = sst [smem:[#allocation13_spill]] %s7792_s25  ;;  %p47_p0 = scmp.ge.s32.totalorder %s46_s4, 2 }
  0x1a   : > { %11419 = sst [smem:[#allocation14_spill]] %s7796_s3  ;;  %s49_s29 = sadd.s32 1, %s7796_s3 }
  0x1b   : > { %11420 = sst [smem:[#allocation15_spill]] %s7800_s26  ;;  %p456_p1 = scmp.ne.s32.totalorder %s7780_s23, %s7776_s22 }
  0x1c   : > { %p457_p2 = scmp.eq.s32.totalorder %s11371_s27, 3  ;;  %s11493_s4 = smov (%p47_p0, %s46_s4), 0 }
  0x1d   : > { %11421 = sst [smem:[#allocation16_spill]] %s11493_s4  ;;  %s11495_s29 = smov (!%p47_p0, %s49_s29), %s7796_s3 }
  0x1e   : > { %p7966_p3 = por %p457_p2, %p456_p1  ;;  %p462_p4 = scmp.ne.s32.totalorder %s7776_s22, %s7772_s1 }
  0x1f   : > { %p51_p5 = scmp.ge.s32.totalorder %s11495_s29, 2  ;;  %p463_p6 = scmp.eq.s32.totalorder %s11372_s28, 3 }
  0x20   : > { %s11422_s30 = scalar_select %p7966_p3, 1, 0 }
  0x21   : > { %p7091_p7 = scmp.ge.s32.totalorder %s7800_s26, 1  ;;  %p600_p8 = scmp.lt.s32.totalorder %s7800_s26, 5 }
  0x22   : > { %11423 = sst [smem:[#allocation17_spill]] %s11422_s30  ;;  %s11497_s29 = smov (%p51_p5, %s11495_s29), 0 }
  0x23   : > { %11424 = sst [smem:[#allocation18_spill]] %s11497_s29  ;;  %p7978_p9 = por %p463_p6, %p462_p4 }
  0x24   : > { %p601_p10 = pnand %p7091_p7, %p600_p8  ;;  %s443_s21 = ssub.s32 %s7796_s3, %s11497_s29 }
  0x25   : > { %s11425_s0 = scalar_select %p7978_p9, 1, 0 }
  0x26   : > { %s446_s27 = sadd.s32 1, %s7780_s23  ;;  %p444_p11 = scmp.eq.s32.totalorder %s443_s21, 0 }
  0x27   : > { %11426 = sst [smem:[#allocation19_spill]] %s11425_s0  ;;  %604 = sbr.rel (%p601_p10) target bundleno = 2418 (0x972), region = 92 }
  0x28   : > { %s7986_s4 = scalar_select %p444_p11, %s7780_s23, %s446_s27  }
  0x2a   : > { %11427 = sst [smem:[#allocation20_spill]] %s7986_s4 }
  0x2e   : > { %s7989_s28 = sand.u32 1, %s7776_s22   ;;  %s7092_s25 = sshll.u32 %s7784_s24, 2 }
  0x2f   : > { %p673_p12 = scmp.lt.s32.totalorder %s7788_s2, 1  ;;  %p675_p13 = scmp.lt.s32.totalorder %s7092_s25, 7 }
  0x30   : > { %s11428_s20 = sld [smem:[#allocation31_spill]]  ;;  %p7095_p0 = scmp.ne.s32.totalorder %s7784_s24, 0 }
  0x31   : > { %s7994_s0 = scalar_select %p673_p12, %s7788_s2, 1 }
  0x32   : > { %s11499_s25 = smov (!%p675_p13, %s7092_s25), 7  ;;  %689 = sbr.rel (%p7095_p0) target bundleno = 84 (0x54), region = 96 }
  0x33   : > { %s7093_s27 = sshll.u32 %s7994_s0, 3  ;;  %vm690_vm0 = vcmask (!%p7095_p0), 7168   ;;  %v7802_v0 = vmov (!%p7095_p0), -inf  }
  0x34   : > { %s678_s4 = sadd.s32 %s7093_s27, %s11499_s25  ;;  %691 = vst.msk [vmem:[#allocation2] sm:$0xff] (!%p7095_p0), %vm690_vm0, %v7802_v0  ;;  %692 = vst.msk [vmem:[#allocation2 + $0x8] sm:$0xff] (!%p7095_p0), %vm690_vm0, %v7802_v0 }
  0x35   : > { %s7094_s23 = sshll.u32 %s678_s4, 2  ;;  %693 = vst.msk [vmem:[#allocation2 + $0x10] sm:$0xff] (!%p7095_p0), %vm690_vm0, %v7802_v0  ;;  %694 = vst.msk [vmem:[#allocation2 + $0x18] sm:$0xff] (!%p7095_p0), %vm690_vm0, %v7802_v0 }
  0x36   : > { %s8004_s18 = scalar_lea.vmem %s11428_s20, %s7094_s23  ;;  %695 = vst.msk [vmem:[#allocation2 + $0x20] sm:$0xff] (!%p7095_p0), %vm690_vm0, %v7802_v0  ;;  %696 = vst.msk [vmem:[#allocation2 + $0x28] sm:$0xff] (!%p7095_p0), %vm690_vm0, %v7802_v0 }
  0x37   : > { %697 = vst.msk [vmem:[#allocation2 + $0x30] sm:$0xff] (!%p7095_p0), %vm690_vm0, %v7802_v0  ;;  %698 = vst.msk [vmem:[#allocation2 + $0x38] sm:$0xff] (!%p7095_p0), %vm690_vm0, %v7802_v0 }
  0x38   : > { %699 = vst.msk [vmem:[#allocation2 + $0x40] sm:$0xff] (!%p7095_p0), %vm690_vm0, %v7802_v0  ;;  %700 = vst.msk [vmem:[#allocation2 + $0x48] sm:$0xff] (!%p7095_p0), %vm690_vm0, %v7802_v0 }
  0x39   : > { %701 = vst.msk [vmem:[#allocation2 + $0x50] sm:$0xff] %vm690_vm0, %v7802_v0  ;;  %702 = vst.msk [vmem:[#allocation2 + $0x58] sm:$0xff] %vm690_vm0, %v7802_v0 }
  0x3a   : > { %703 = vst.msk [vmem:[#allocation2 + $0x60] sm:$0xff] %vm690_vm0, %v7802_v0  ;;  %704 = vst.msk [vmem:[#allocation2 + $0x68] sm:$0xff] %vm690_vm0, %v7802_v0 }
  0x3b   : > { %705 = vst.msk [vmem:[#allocation2 + $0x70] sm:$0xff] %vm690_vm0, %v7802_v0  ;;  %706 = vst.msk [vmem:[#allocation2 + $0x78] sm:$0xff] %vm690_vm0, %v7802_v0 }
  0x3c   : > { %707 = vst.msk [vmem:[#allocation2 + $0x80] sm:$0xff] %vm690_vm0, %v7802_v0  ;;  %708 = vst.msk [vmem:[#allocation2 + $0x88] sm:$0xff] %vm690_vm0, %v7802_v0 }
  0x3d   : > { %709 = vst.msk [vmem:[#allocation2 + $0x90] sm:$0xff] %vm690_vm0, %v7802_v0  ;;  %710 = vst.msk [vmem:[#allocation2 + $0x98] sm:$0xff] %vm690_vm0, %v7802_v0 }
  0x3e   : > { %711 = vst.msk [vmem:[#allocation2 + $0xa0] sm:$0xff] %vm690_vm0, %v7802_v0  ;;  %712 = vst.msk [vmem:[#allocation2 + $0xa8] sm:$0xff] %vm690_vm0, %v7802_v0 }
  0x3f   : > { %713 = vst.msk [vmem:[#allocation2 + $0xb0] sm:$0xff] %vm690_vm0, %v7802_v0  ;;  %714 = vst.msk [vmem:[#allocation2 + $0xb8] sm:$0xff] %vm690_vm0, %v7802_v0 }
  0x40   : > { %715 = vst.msk [vmem:[#allocation2 + $0xc0] sm:$0xff] %vm690_vm0, %v7802_v0  ;;  %716 = vst.msk [vmem:[#allocation2 + $0xc8] sm:$0xff] %vm690_vm0, %v7802_v0 }
  0x41   : > { %717 = vst.msk [vmem:[#allocation2 + $0xd0] sm:$0xff] %vm690_vm0, %v7802_v0  ;;  %718 = vst.msk [vmem:[#allocation2 + $0xd8] sm:$0xff] %vm690_vm0, %v7802_v0 }
  0x42   : > { %719 = vst.msk [vmem:[#allocation2 + $0xe0] sm:$0xff] %vm690_vm0, %v7802_v0  ;;  %720 = vst.msk [vmem:[#allocation2 + $0xe8] sm:$0xff] %vm690_vm0, %v7802_v0 }
  0x43   : > { %721 = vst.msk [vmem:[#allocation2 + $0xf0] sm:$0xff] %vm690_vm0, %v7802_v0  ;;  %722 = vst.msk [vmem:[#allocation2 + $0xf8] sm:$0xff] %vm690_vm0, %v7802_v0 }
  0x44   : > { %723 = vst.msk [vmem:[#allocation2 + $0x100] sm:$0xff] %vm690_vm0, %v7802_v0  ;;  %724 = vst.msk [vmem:[#allocation2 + $0x108] sm:$0xff] %vm690_vm0, %v7802_v0 }
  0x45   : > { %725 = vst.msk [vmem:[#allocation2 + $0x110] sm:$0xff] %vm690_vm0, %v7802_v0  ;;  %726 = vst.msk [vmem:[#allocation2 + $0x118] sm:$0xff] %vm690_vm0, %v7802_v0 }
  0x46   : > { %727 = vst.msk [vmem:[#allocation2 + $0x120] sm:$0xff] %vm690_vm0, %v7802_v0  ;;  %728 = vst.msk [vmem:[#allocation2 + $0x128] sm:$0xff] %vm690_vm0, %v7802_v0 }
  0x47   : > { %729 = vst.msk [vmem:[#allocation2 + $0x130] sm:$0xff] %vm690_vm0, %v7802_v0  ;;  %730 = vst.msk [vmem:[#allocation2 + $0x138] sm:$0xff] %vm690_vm0, %v7802_v0 }
  0x48   : > { %731 = vst.msk [vmem:[#allocation2 + $0x140] sm:$0xff] %vm690_vm0, %v7802_v0  ;;  %732 = vst.msk [vmem:[#allocation2 + $0x148] sm:$0xff] %vm690_vm0, %v7802_v0 }
  0x49   : > { %733 = vst.msk [vmem:[#allocation2 + $0x150] sm:$0xff] %vm690_vm0, %v7802_v0  ;;  %734 = vst.msk [vmem:[#allocation2 + $0x158] sm:$0xff] %vm690_vm0, %v7802_v0 }
  0x4a   : > { %735 = vst.msk [vmem:[#allocation2 + $0x160] sm:$0xff] %vm690_vm0, %v7802_v0  ;;  %736 = vst.msk [vmem:[#allocation2 + $0x168] sm:$0xff] %vm690_vm0, %v7802_v0 }
  0x4b   : > { %737 = vst.msk [vmem:[#allocation2 + $0x170] sm:$0xff] %vm690_vm0, %v7802_v0  ;;  %738 = vst.msk [vmem:[#allocation2 + $0x178] sm:$0xff] %vm690_vm0, %v7802_v0 }
  0x4c   : > { %739 = vst.msk [vmem:[#allocation2 + $0x180] sm:$0xff] %vm690_vm0, %v7802_v0  ;;  %740 = vst.msk [vmem:[#allocation2 + $0x188] sm:$0xff] %vm690_vm0, %v7802_v0 }
  0x4d   : > { %741 = vst.msk [vmem:[#allocation2 + $0x190] sm:$0xff] %vm690_vm0, %v7802_v0  ;;  %742 = vst.msk [vmem:[#allocation2 + $0x198] sm:$0xff] %vm690_vm0, %v7802_v0 }
  0x4e   : > { %743 = vst.msk [vmem:[#allocation2 + $0x1a0] sm:$0xff] %vm690_vm0, %v7802_v0  ;;  %744 = vst.msk [vmem:[#allocation2 + $0x1a8] sm:$0xff] %vm690_vm0, %v7802_v0 }
  0x4f   : > { %745 = vst.msk [vmem:[#allocation2 + $0x1b0] sm:$0xff] %vm690_vm0, %v7802_v0  ;;  %746 = vst.msk [vmem:[#allocation2 + $0x1b8] sm:$0xff] %vm690_vm0, %v7802_v0 }
  0x50   : > { %747 = vst.msk [vmem:[#allocation2 + $0x1c0] sm:$0xff] %vm690_vm0, %v7802_v0  ;;  %748 = vst.msk [vmem:[#allocation2 + $0x1c8] sm:$0xff] %vm690_vm0, %v7802_v0 }
  0x51   : > { %749 = vst.msk [vmem:[#allocation2 + $0x1d0] sm:$0xff] %vm690_vm0, %v7802_v0  ;;  %750 = vst.msk [vmem:[#allocation2 + $0x1d8] sm:$0xff] %vm690_vm0, %v7802_v0 }
  0x52   : > { %751 = vst.msk [vmem:[#allocation2 + $0x1e0] sm:$0xff] %vm690_vm0, %v7802_v0  ;;  %752 = vst.msk [vmem:[#allocation2 + $0x1e8] sm:$0xff] %vm690_vm0, %v7802_v0 }
  0x53   : > { %753 = vst.msk [vmem:[#allocation2 + $0x1f0] sm:$0xff] %vm690_vm0, %v7802_v0  ;;  %754 = vst.msk [vmem:[#allocation2 + $0x1f8] sm:$0xff] %vm690_vm0, %v7802_v0 }
  0x54 PF: > { %s11429_s22 = sld [smem:[#allocation32_spill]]  ;;  %v7803_v2 = vmov 2   ;;  %v7804_v3 = vmov 1   ;;  %v11388_v6 = vmov 0   ;;  %s11431_s1 = sld [smem:[#allocation33_spill]]  ;;  %v11387_v54 = vlaneseq }
  0x55   : > { %7460 = vset.pattern.permute.xlu0 %v7803_v2  ;;  %7459 = vset.pattern.permute.xlu1 %v7804_v3  ;;  %s11433_s23 = sld [smem:[#allocation35_spill]]  ;;  %s11435_s6 = sld [smem:[#allocation37_spill]]  ;;  %vm1419_vm1 = vcmask 523264   ;;  %vm5827_vm6 = vcmask 7168  }
  0x56   : > { %1476 = vmatprep.mubr.bf16.mxu0 %v11388_v6  ;;  %1589 = vmatprep.mubr.bf16.mxu1 %v11388_v6  ;;  %v808_v59 = vshrl.u32 %v11387_v54, 7  ;;  %s11438_s8 = sld [smem:[#allocation39_spill]]  ;;  %s11439_s10 = sld [smem:[#allocation41_spill]] }
  0x57   : > { %s11451_s5 = sld [smem:[#allocation36_spill]]  ;;  %s11452_s7 = sld [smem:[#allocation38_spill]] }
  0x58   : > { %v8324_v0 = vsub.s32 1, %v808_v59  ;;  %s11461_s9 = sld [smem:[#allocation40_spill]]  ;;  %p7233_p1 = scmp.ne.s32.totalorder %s7784_s24, 1 }
  0x59   : > { %vm6902_vm7 = vcmask (!%p7233_p1), 253952   ;;  %s11465_s21 = scalar_lea.vmem (!%p7233_p1), [#allocation5], %s7989_s28  ;;  %s11466_s20 = scalar_lea.vmem (!%p7233_p1), [#allocation7], %s7989_s28 }
  0x5a   : > { %s11430_s4 = smov %s11429_s22  ;;  %v757_v1 = vld [vmem:[%s11429_s22] sm:$0xff]  ;;  %s11432_s19 = smov %s11431_s1  ;;  %11436 = vst [vmem:[#allocation21_spill] sm:$0xff] %v8324_v0 }
  0x5b   : > { %1008 = vperm.xlu0 %7460, %v757_v1   ;;  %876 = vperm.xlu1 %7459, %v757_v1   ;;  %v759_v4 = vld [vmem:[%s11430_s4 + $0x10] sm:$0xff]  ;;  %v758_v5 = vld [vmem:[%s11430_s4 + $0x8] sm:$0xff]  ;;  %v761_v8 = vld [vmem:[%s11430_s4 + $0x20] sm:$0xff]  ;;  %s11434_s29 = smov %s11433_s23  ;;  %s7232_s22 = sshll.u32 %s7784_s24, 9 }
  0x5c   : > { %v762_v7 = vld [vmem:[%s11430_s4 + $0x28] sm:$0xff]  ;;  %v764_v9 = vld [vmem:[%s11430_s4 + $0x38] sm:$0xff]  ;;  %v1139_v11 = vld [vmem:[%s11431_s1] sm:$0xff]  ;;  %s11468_s3 = scalar_lea.vmem (!%p7233_p1), [#allocation3], %s7989_s28 }
  0x5d   : > { %v760_v10 = vld [vmem:[%s11430_s4 + $0x18] sm:$0xff]  ;;  %v1140_v12 = vld [vmem:[%s11432_s19 + $0x8] sm:$0xff]  ;;  %v763_v13 = vld [vmem:[%s11430_s4 + $0x30] sm:$0xff] }
  0x5e   : > { %v1143_v14 = vld [vmem:[%s11432_s19 + $0x20] sm:$0xff]  ;;  %v1146_v15 = vld [vmem:[%s11432_s19 + $0x38] sm:$0xff]  ;;  %v1284_v16 = vld [vmem:[%s11433_s23 + $0x8] sm:$0xff]  ;;  %s11440_s23 = sld [smem:[#allocation34_spill]] }
  0x5f   : > { %1016 = vperm.xlu0 %7460, %v759_v4   ;;  %880 = vperm.xlu1 %7459, %v758_v5   ;;  %v1286_v17 = vld [vmem:[%s11434_s29 + $0x18] sm:$0xff]  ;;  %v1141_v18 = vld [vmem:[%s11432_s19 + $0x10] sm:$0xff]  ;;  %v1288_v19 = vld [vmem:[%s11434_s29 + $0x28] sm:$0xff] }
  0x60   : > { %v1142_v20 = vld [vmem:[%s11432_s19 + $0x18] sm:$0xff]  ;;  %v1292_v22 = vld [vmem:[%s11434_s29 + $0x48] sm:$0xff]  ;;  %v1145_v29 = vld [vmem:[%s11432_s19 + $0x30] sm:$0xff] }
  0x61   : > { %v1290_v21 = vld [vmem:[%s11434_s29 + $0x38] sm:$0xff]  ;;  %v1296_v24 = vld [vmem:[%s11434_s29 + $0x68] sm:$0xff]  ;;  %v1283_v31 = vld [vmem:[%s11434_s29] sm:$0xff] }
  0x62   : > { %v1294_v23 = vld [vmem:[%s11434_s29 + $0x58] sm:$0xff]  ;;  %v1799_v26 = vld [vmem:[%s11435_s6 + $0x8] sm:$0xff]  ;;  %v1285_v33 = vld [vmem:[%s11434_s29 + $0x10] sm:$0xff] }
  0x63   : > { %1028 = vperm.xlu0 %7460, %v762_v7   ;;  %7461 = vset.pattern.permute.xlu1 %v7803_v2  ;;  %v1298_v25 = vld [vmem:[%s11434_s29 + $0x78] sm:$0xff]  ;;  %v1144_v27 = vld [vmem:[%s11432_s19 + $0x28] sm:$0xff]  ;;  %v1287_v35 = vld [vmem:[%s11434_s29 + $0x20] sm:$0xff] }
  0x64   : > { %1012 = vperm.xlu1 %7461, %v758_v5   ;;  %v1801_v28 = vld [vmem:[%s11435_s6 + $0x18] sm:$0xff]  ;;  %v1803_v30 = vld [vmem:[%s11435_s6 + $0x28] sm:$0xff]  ;;  %v1289_v37 = vld [vmem:[%s11434_s29 + $0x30] sm:$0xff]  ;;  %s11441_s30 = smov %s11440_s23 }
  0x65   : > { %v1805_v32 = vld [vmem:[%s11435_s6 + $0x38] sm:$0xff]  ;;  %v1807_v34 = vld [vmem:[%s11435_s6 + $0x48] sm:$0xff]  ;;  %v1291_v39 = vld [vmem:[%s11434_s29 + $0x40] sm:$0xff] }
  0x66   : > { %v1809_v36 = vld [vmem:[%s11435_s6 + $0x58] sm:$0xff]  ;;  %v1811_v38 = vld [vmem:[%s11435_s6 + $0x68] sm:$0xff]  ;;  %v1293_v41 = vld [vmem:[%s11434_s29 + $0x50] sm:$0xff] }
  0x67   : > { %7468 = vset.pattern.permute.xlu0 %v7804_v3  ;;  %v1813_v40 = vld [vmem:[%s11435_s6 + $0x78] sm:$0xff]  ;;  %v1815_v42 = vld [vmem:[%s11435_s6 + $0x88] sm:$0xff]  ;;  %v1295_v43 = vld [vmem:[%s11434_s29 + $0x60] sm:$0xff] }
  0x68   : > { %892 = vperm.xlu0 %7468, %v761_v8   ;;  %7462 = vset.pattern.permute.xlu1 %v11388_v6  ;;  %v1817_v44 = vld [vmem:[%s11435_s6 + $0x98] sm:$0xff]  ;;  %v1297_v45 = vld [vmem:[%s11434_s29 + $0x70] sm:$0xff]  ;;  %v1819_v46 = vld [vmem:[%s11435_s6 + $0xa8] sm:$0xff] }
  0x69   : > { %777 = vperm.xlu1 %7462, %v759_v4   ;;  %v1798_v47 = vld [vmem:[%s11435_s6] sm:$0xff]  ;;  %v1821_v48 = vld [vmem:[%s11435_s6 + $0xb8] sm:$0xff]  ;;  %v1800_v49 = vld [vmem:[%s11435_s6 + $0x10] sm:$0xff] }
  0x6a   : > { %v1823_v52 = vld [vmem:[%s11435_s6 + $0xc8] sm:$0xff]  ;;  %v1802_v53 = vld [vmem:[%s11435_s6 + $0x20] sm:$0xff]  ;;  %v1825_v57 = vld [vmem:[%s11435_s6 + $0xd8] sm:$0xff] }
  0x6b   : > { %v1804_v58 = vld [vmem:[%s11435_s6 + $0x30] sm:$0xff]  ;;  %v1827_v61 = vld [vmem:[%s11435_s6 + $0xe8] sm:$0xff]  ;;  %v1806_v63 = vld [vmem:[%s11435_s6 + $0x40] sm:$0xff] }
  0x6c   : > { %904 = vperm.xlu0 %7468, %v764_v9  }
  0x6d   : > { %7463 = vset.pattern.permute.xlu1 %v7804_v3 }
  0x6e   : > { %884 = vperm.xlu1 %7463, %v759_v4   ;;  %v1041_v4 = vsub.s32 2, %v808_v59 }
  0x70   : > { %7471 = vset.pattern.permute.xlu0 %v11388_v6 }
  0x71   : > { %767 = vperm.xlu0 %7471, %v757_v1   ;;  %v913_v1 = vsub.s32 5, %v808_v59 }
  0x72   : > { %888 = vperm.xlu1 %7463, %v760_v10  }
  0x75   : > { %772 = vperm.xlu0 %7471, %v758_v5   ;;  %v1829_v5 = vld [vmem:[%s11435_s6 + $0xf8] sm:$0xff] }
  0x76   : > { %7464 = vset.pattern.permute.xlu1 %v7803_v2 }
  0x77   : > { %1020 = vperm.xlu1 %7464, %v760_v10  }
  0x79   : > { %782 = vperm.xlu0 %7471, %v760_v10   ;;  %v1808_v10 = vld [vmem:[%s11435_s6 + $0x50] sm:$0xff] }
  0x7b   : > { %7465 = vset.pattern.permute.xlu1 %v11388_v6 }
  0x7c   : > { %1149 = vperm.xlu1 %7465, %v1139_v11   ;;  %v8336_v11 = vsub.s32 0, %v808_v59 }
  0x7d   : > { %1154 = vperm.xlu0 %7471, %v1140_v12  }
  0x7e   : > { %11437 = vst [vmem:[#allocation22_spill] sm:$0xff] %v8336_v11 }
  0x80   : > { %787 = vperm.xlu1 %7465, %v761_v8  }
  0x81   : > { %797 = vperm.xlu0 %7471, %v763_v13  }
  0x84   : > { %792 = vperm.xlu1 %7465, %v762_v7  }
  0x85   : > { %1169 = vperm.xlu0 %7471, %v1143_v14  }
  0x88   : > { %7466 = vset.pattern.permute.xlu1 %v7804_v3 }
  0x89   : > { %1184 = vperm.xlu0 %7471, %v1146_v15   ;;  %896 = vperm.xlu1 %7466, %v762_v7   ;;  %v1045_v7 = vsub.s32 6, %v808_v59 }
  0x8d   : > { %1306 = vperm.xlu0 %7471, %v1284_v16   ;;  %7467 = vset.pattern.permute.xlu1 %v7803_v2 }
  0x8e   : > { %1024 = vperm.xlu1 %7467, %v761_v8  }
  0x91   : > { %1316 = vperm.xlu0 %7471, %v1286_v17   ;;  %v2697_v17 = vld [vmem:[%s11438_s8 + $0x8] sm:$0xff] }
  0x92   : > { %7469 = vset.pattern.permute.xlu1 %v11388_v6 }
  0x93   : > { %1159 = vperm.xlu1 %7469, %v1141_v18  }
  0x95   : > { %1326 = vperm.xlu0 %7471, %v1288_v19  }
  0x97   : > { %1164 = vperm.xlu1 %7469, %v1142_v20  }
  0x99   : > { %1336 = vperm.xlu0 %7471, %v1290_v21  }
  0x9b   : > { %802 = vperm.xlu1 %7469, %v764_v9  }
  0x9d   : > { %1346 = vperm.xlu0 %7471, %v1292_v22  }
  0x9f   : > { %7470 = vset.pattern.permute.xlu1 %v7804_v3  ;;  %v756_v3 = vld [vmem:[%s8004_s18 + $0x8] sm:$0x77] }
  0xa0   : > { %900 = vperm.xlu1 %7470, %v763_v13   ;;  %v918_v14 = vrot.slane %v756_v3, %v8324_v0  ;;  %v1050_v19 = vrot.slane %v756_v3, %v1041_v4  ;;  %v922_v20 = vrot.slane %v756_v3, %v913_v1 }
  0xa1   : > { %1356 = vperm.xlu0 %7471, %v1294_v23   ;;  %v1810_v23 = vld [vmem:[%s11435_s6 + $0x60] sm:$0xff] }
  0xa4   : > { %7472 = vset.pattern.permute.xlu1 %v7803_v2  ;;  %v755_v2 = vld [vmem:[%s8004_s18] sm:$0x77] }
  0xa5   : > { %1366 = vperm.xlu0 %7471, %v1296_v24   ;;  %1032 = vperm.xlu1 %7472, %v763_v13   ;;  %v910_v13 = vrot.slane %v755_v2, %v8324_v0  ;;  %v914_v15 = vrot.slane %v755_v2, %v913_v1  ;;  %v1042_v16 = vrot.slane %v755_v2, %v1041_v4 }
  0xa6   : > { %v1046_v18 = vrot.slane %v755_v2, %v1045_v7  ;;  %v1054_v24 = vrot.slane %v756_v3, %v1045_v7 }
  0xa9   : > { %1376 = vperm.xlu0 %7471, %v1298_v25   ;;  %1036 = vperm.xlu1 %7472, %v764_v9   ;;  %v813_v9 = vsub.s32 4, %v808_v59  ;;  %v810_v25 = vrot.slane %v755_v2, %v8336_v11  ;;  %v1814_v59 = vld [vmem:[%s11435_s6 + $0x80] sm:$0xff] }
  0xab   : > { %v814_v21 = vrot.slane %v755_v2, %v813_v9 }
  0xad   : > { %1837 = vperm.xlu0 %7471, %v1799_v26   ;;  %7473 = vset.pattern.permute.xlu1 %v11388_v6  ;;  %v818_v26 = vrot.slane %v756_v3, %v8336_v11  ;;  %v2719_v6 = vld [vmem:[%s11438_s8 + $0xb8] sm:$0xff] }
  0xae   : > { %1174 = vperm.xlu1 %7473, %v1144_v27   ;;  %v822_v27 = vrot.slane %v756_v3, %v813_v9 }
  0xb1   : > { %1847 = vperm.xlu0 %7471, %v1801_v28   ;;  %v8353_v28 = vrot.slane %v910_v13, %v8324_v0 }
  0xb2   : > { %1179 = vperm.xlu1 %7473, %v1145_v29   ;;  %v8356_v29 = vrot.slane %v918_v14, %v8324_v0 }
  0xb5   : > { %1857 = vperm.xlu0 %7471, %v1803_v30   ;;  %v8359_v30 = vrot.slane %v914_v15, %v8324_v0  ;;  %v2703_v15 = vld [vmem:[%s11438_s8 + $0x38] sm:$0xff] }
  0xb6   : > { %1301 = vperm.xlu1 %7473, %v1283_v31  }
  0xb9   : > { %1867 = vperm.xlu0 %7471, %v1805_v32   ;;  %v8363_v32 = vrot.slane %v1042_v16, %v1041_v4 }
  0xba   : > { %1311 = vperm.xlu1 %7473, %v1285_v33   ;;  %v2699_v33 = vld [vmem:[%s11438_s8 + $0x18] sm:$0xff] }
  0xbd   : > { %1877 = vperm.xlu0 %7471, %v1807_v34   ;;  %v8368_v34 = vrot.slane %v1046_v18, %v1041_v4 }
  0xbe   : > { %1321 = vperm.xlu1 %7473, %v1287_v35   ;;  %v8370_v35 = vrot.slane %v1050_v19, %v1041_v4  ;;  %v1816_v19 = vld [vmem:[%s11435_s6 + $0x90] sm:$0xff] }
  0xc1   : > { %1887 = vperm.xlu0 %7471, %v1809_v36   ;;  %v8373_v36 = vrot.slane %v922_v20, %v8324_v0 }
  0xc2   : > { %1331 = vperm.xlu1 %7473, %v1289_v37   ;;  %v8376_v37 = vrot.slane %v814_v21, %v8336_v11 }
  0xc5   : > { %1897 = vperm.xlu0 %7471, %v1811_v38   ;;  %v1812_v38 = vld [vmem:[%s11435_s6 + $0x70] sm:$0xff] }
  0xc6   : > { %1341 = vperm.xlu1 %7473, %v1291_v39   ;;  %v8381_v39 = vrot.slane %v1054_v24, %v1041_v4 }
  0xc9   : > { %1907 = vperm.xlu0 %7471, %v1813_v40   ;;  %v8384_v40 = vrot.slane %v810_v25, %v8336_v11 }
  0xca   : > { %1351 = vperm.xlu1 %7473, %v1293_v41   ;;  %v8387_v41 = vrot.slane %v818_v26, %v8336_v11 }
  0xcd   : > { %1917 = vperm.xlu0 %7471, %v1815_v42   ;;  %v8390_v42 = vrot.slane %v822_v27, %v8336_v11 }
  0xce   : > { %1361 = vperm.xlu1 %7473, %v1295_v43  }
  0xd1   : > { %1927 = vperm.xlu0 %7471, %v1817_v44  }
  0xd2   : > { %1371 = vperm.xlu1 %7473, %v1297_v45  }
  0xd5   : > { %1937 = vperm.xlu0 %7471, %v1819_v46  }
  0xd6   : > { %1832 = vperm.xlu1 %7473, %v1798_v47  }
  0xd9   : > { %1947 = vperm.xlu0 %7471, %v1821_v48  }
  0xda   : > { %1842 = vperm.xlu1 %7473, %v1800_v49   ;;  %v8293_v50 = vpop.permute.xlu1 %876  ;;  %v8295_v51 = vpop.permute.xlu0 %1008 }
  0xdb   : > { %v943_v44 = vmul.f32 %v8353_v28, %v8293_v50  ;;  %v945_v45 = vmul.f32 %v8356_v29, %v8293_v50  ;;  %v944_v48 = vmul.f32 %v8359_v30, %v8293_v50  ;;  %v1075_v1 = vmul.f32 %v8363_v32, %v8295_v51 }
  0xdc   : > { %v1077_v2 = vmul.f32 %v8370_v35, %v8295_v51 }
  0xdd   : > { %1957 = vperm.xlu0 %7471, %v1823_v52  }
  0xde   : > { %1852 = vperm.xlu1 %7473, %v1802_v53   ;;  %v8303_v55 = vpop.permute.xlu1 %880  ;;  %v8305_v56 = vpop.permute.xlu0 %1016  ;;  %v2701_v53 = vld [vmem:[%s11438_s8 + $0x28] sm:$0xff] }
  0xdf   : > { %v947_v3 = vmul.f32 %v8353_v28, %v8303_v55  ;;  %v949_v4 = vmul.f32 %v8356_v29, %v8303_v55  ;;  %v948_v7 = vmul.f32 %v8359_v30, %v8303_v55 }
  0xe1   : > { %1967 = vperm.xlu0 %7471, %v1825_v57   ;;  %v1076_v57 = vmul.f32 %v8368_v34, %v8295_v51 }
  0xe2   : > { %1862 = vperm.xlu1 %7473, %v1804_v58   ;;  %v8314_v60 = vpop.permute.xlu0 %1028 }
  0xe3   : > { %v8319_v62 = vpop.permute.xlu1 %1012 }
  0xe4   : > { %v1080_v26 = vmul.f32 %v8368_v34, %v8319_v62  ;;  %v1082_v27 = vmul.f32 %v8381_v39, %v8319_v62 }
  0xe5   : > { %1977 = vperm.xlu0 %7471, %v1827_v61   ;;  %v946_v61 = vmul.f32 %v8373_v36, %v8293_v50  ;;  %v950_v50 = vmul.f32 %v8373_v36, %v8303_v55 }
  0xe6   : > { %1872 = vperm.xlu1 %7473, %v1806_v63   ;;  %v1078_v63 = vmul.f32 %v8381_v39, %v8295_v51 }
  0xe7   : > { %v8331_v8 = vpop.permute.xlu0 %892 }
  0xe8   : > { %v8338_v12 = vpop.permute.xlu1 %777 }
  0xe9   : > { %1987 = vperm.xlu0 %7471, %v1829_v5  }
  0xea   : > { %1882 = vperm.xlu1 %7473, %v1808_v10  }
  0xeb   : > { %v8345_v22 = vpop.permute.xlu0 %904 }
  0xed   : > { %2735 = vperm.xlu0 %7471, %v2697_v17   ;;  %v8361_v31 = vpop.permute.xlu1 %884 }
  0xee   : > { %1892 = vperm.xlu1 %7473, %v1810_v23  }
  0xf0   : > { %v768_v43 = vpop.permute.xlu0 %767 }
  0xf1   : > { %2745 = vperm.xlu0 %7471, %v2699_v33   ;;  %v8396_v46 = vpop.permute.xlu1 %888  ;;  %v844_v47 = vmul.f32 %v8376_v37, %v768_v43  ;;  %v843_v49 = vmul.f32 %v8384_v40, %v768_v43  ;;  %v845_v52 = vmul.f32 %v8387_v41, %v768_v43  ;;  %v846_v58 = vmul.f32 %v8390_v42, %v768_v43  ;;  %v2705_v43 = vld [vmem:[%s11438_s8 + $0x48] sm:$0xff] }
  0xf2   : > { %1902 = vperm.xlu1 %7473, %v1812_v38   ;;  %v1079_v33 = vmul.f32 %v8363_v32, %v8319_v62  ;;  %v1081_v38 = vmul.f32 %v8370_v35, %v8319_v62 }
  0xf3   : > { %v976_v13 = vadd.f32 %v944_v48, %v844_v47  ;;  %v978_v17 = vadd.f32 %v946_v61, %v846_v58  ;;  %v975_v18 = vadd.f32 %v943_v44, %v843_v49  ;;  %v977_v55 = vadd.f32 %v945_v45, %v845_v52  ;;  %v1818_v52 = vld [vmem:[%s11435_s6 + $0xa0] sm:$0xff] }
  0xf4   : > { %v773_v5 = vpop.permute.xlu0 %772 }
  0xf5   : > { %v847_v9 = vmul.f32 %v8384_v40, %v773_v5  ;;  %v849_v10 = vmul.f32 %v8387_v41, %v773_v5  ;;  %2755 = vperm.xlu0 %7471, %v2701_v53   ;;  %v848_v51 = vmul.f32 %v8376_v37, %v773_v5  ;;  %v850_v16 = vmul.f32 %v8390_v42, %v773_v5 }
  0xf6   : > { %1912 = vperm.xlu1 %7473, %v1814_v59   ;;  %v8431_v14 = vpop.permute.xlu1 %1020  ;;  %v1108_v44 = vadd.f32 %v1076_v57, %v976_v13  ;;  %v1110_v45 = vadd.f32 %v1078_v63, %v978_v17  ;;  %v1107_v47 = vadd.f32 %v1075_v1, %v975_v18  ;;  %v1109_v48 = vadd.f32 %v1077_v2, %v977_v55  ;;  %v2707_v2 = vld [vmem:[%s11438_s8 + $0x58] sm:$0xff] }
  0xf7   : > { %v980_v21 = vadd.f32 %v948_v7, %v848_v51  ;;  %v982_v23 = vadd.f32 %v950_v50, %v850_v16  ;;  %v979_v24 = vadd.f32 %v947_v3, %v847_v9  ;;  %v981_v25 = vadd.f32 %v949_v4, %v849_v10  ;;  %v1820_v16 = vld [vmem:[%s11435_s6 + $0xb0] sm:$0xff] }
  0xf8   : > { %v8440_v20 = vpop.permute.xlu0 %782 }
  0xf9   : > { %2765 = vperm.xlu0 %7471, %v2703_v15   ;;  %v1112_v53 = vadd.f32 %v1080_v26, %v980_v21  ;;  %v1114_v58 = vadd.f32 %v1082_v27, %v982_v23  ;;  %v1111_v59 = vadd.f32 %v1079_v33, %v979_v24  ;;  %v1113_v61 = vadd.f32 %v1081_v38, %v981_v25  ;;  %v2709_v27 = vld [vmem:[%s11438_s8 + $0x68] sm:$0xff]  ;;  %v1822_v33 = vld [vmem:[%s11435_s6 + $0xc0] sm:$0xff]  ;;  %v2711_v38 = vld [vmem:[%s11438_s8 + $0x78] sm:$0xff] }
  0xfa   : > { %1922 = vperm.xlu1 %7473, %v1816_v19  }
  0xfb   : > { %v1150_v49 = vpop.permute.xlu1 %1149 }
  0xfc   : > { %v1155_v3 = vpop.permute.xlu0 %1154  ;;  %v1188_v62 = vadd.f32 %v1150_v49, %v1108_v44  ;;  %v1190_v4 = vadd.f32 %v1150_v49, %v1110_v45  ;;  %v1187_v5 = vadd.f32 %v1150_v49, %v1107_v47  ;;  %v1189_v7 = vadd.f32 %v1150_v49, %v1109_v48  ;;  %v1824_v44 = vld [vmem:[%s11435_s6 + $0xd0] sm:$0xff] }
  0xfd   : > { %2775 = vperm.xlu0 %7471, %v2705_v43   ;;  %v1192_v50 = vadd.f32 %v1155_v3, %v1112_v53  ;;  %v1194_v57 = vadd.f32 %v1155_v3, %v1114_v58  ;;  %v1191_v63 = vadd.f32 %v1155_v3, %v1111_v59  ;;  %v1193_v1 = vadd.f32 %v1155_v3, %v1113_v61 }
  0xfe   : > { %1932 = vperm.xlu1 %7473, %v1818_v52   ;;  %v1220_v9 = vmax.f32 %v1188_v62, 0.0  ;;  %v1222_v10 = vmax.f32 %v1190_v4, 0.0  ;;  %v1219_v51 = vmax.f32 %v1187_v5, 0.0  ;;  %v1221_v13 = vmax.f32 %v1189_v7, 0.0  ;;  %v2713_v62 = vld [vmem:[%s11438_s8 + $0x88] sm:$0xff] }
  0xff   : > { %v8459_v15 = vpop.permute.xlu1 %787  ;;  %v1224_v17 = vmax.f32 %v1192_v50, 0.0  ;;  %v1226_v18 = vmax.f32 %v1194_v57, 0.0  ;;  %v1223_v55 = vmax.f32 %v1191_v63, 0.0  ;;  %v1225_v19 = vmax.f32 %v1193_v1, 0.0  ;;  %v1826_v50 = vld [vmem:[%s11435_s6 + $0xe0] sm:$0xff] }
 0x100   : > { %v1083_v45 = vmul.f32 %v8363_v32, %v8305_v56  ;;  %v1084_v47 = vmul.f32 %v8368_v34, %v8305_v56  ;;  %v1085_v48 = vmul.f32 %v8370_v35, %v8305_v56  ;;  %v1086_v49 = vmul.f32 %v8381_v39, %v8305_v56 }
 0x101   : > { %2785 = vperm.xlu0 %7471, %v2707_v2   ;;  %v1268_v21 = vpack.c.bf16 %v1224_v17, %v1220_v9  ;;  %v1270_v23 = vpack.c.bf16 %v1226_v18, %v1222_v10  ;;  %v1267_v24 = vpack.c.bf16 %v1223_v55, %v1219_v51  ;;  %v1269_v25 = vpack.c.bf16 %v1225_v19, %v1221_v13  ;;  %v2715_v55 = vld [vmem:[%s11438_s8 + $0x98] sm:$0xff] }
 0x102   : > { %1942 = vperm.xlu1 %7473, %v1820_v16   ;;  %v8490_v52 = vmul.f32 %v8363_v32, %v8314_v60  ;;  %v8494_v53 = vmul.f32 %v8368_v34, %v8314_v60  ;;  %v8498_v58 = vmul.f32 %v8370_v35, %v8314_v60  ;;  %v8502_v59 = vmul.f32 %v8381_v39, %v8314_v60 }
 0x103   : > { %v8464_v26 = vpop.permute.xlu1 %792  ;;  %1444 = vmatprep.subr.bf16.mxu0 %v1268_v21  ;;  %1557 = vmatprep.subr.bf16.mxu1 %v1270_v23  ;;  %v8506_v56 = vmul.f32 %v8353_v28, %v8331_v8  ;;  %v8510_v61 = vmul.f32 %v8359_v30, %v8331_v8  ;;  %v8514_v3 = vmul.f32 %v8356_v29, %v8331_v8 }
 0x104   : > { %1445 = vmatpush1.bf16.msra.mxu0 %v1267_v24  ;;  %1558 = vmatpush1.bf16.msra.mxu1 %v1269_v25  ;;  %v951_v60 = vmul.f32 %v8353_v28, %v8361_v31  ;;  %v952_v4 = vmul.f32 %v8359_v30, %v8361_v31  ;;  %v953_v5 = vmul.f32 %v8356_v29, %v8361_v31 }
 0x105   : > { %2795 = vperm.xlu0 %7471, %v2709_v27   ;;  %v954_v7 = vmul.f32 %v8373_v36, %v8361_v31  ;;  %v855_v57 = vmul.f32 %v8384_v40, %v8440_v20  ;;  %v856_v63 = vmul.f32 %v8376_v37, %v8440_v20  ;;  %v857_v1 = vmul.f32 %v8387_v41, %v8440_v20 }
 0x106   : > { %1952 = vperm.xlu1 %7473, %v1822_v33   ;;  %v858_v2 = vmul.f32 %v8390_v42, %v8440_v20  ;;  %v851_v31 = vmul.f32 %v8384_v40, %v8338_v12  ;;  %v852_v10 = vmul.f32 %v8376_v37, %v8338_v12  ;;  %v853_v51 = vmul.f32 %v8387_v41, %v8338_v12 }
 0x107   : > { %v854_v13 = vmul.f32 %v8390_v42, %v8338_v12  ;;  %v955_v16 = vmul.f32 %v8353_v28, %v8396_v46  ;;  %v956_v20 = vmul.f32 %v8359_v30, %v8396_v46  ;;  %v957_v17 = vmul.f32 %v8356_v29, %v8396_v46  ;;  %v1828_v12 = vld [vmem:[%s11435_s6 + $0xf0] sm:$0xff] }
 0x108   : > { %v8475_v43 = vpop.permute.xlu1 %896  ;;  %v958_v18 = vmul.f32 %v8373_v36, %v8396_v46  ;;  %v984_v19 = vadd.f32 %v952_v4, %v852_v10  ;;  %v983_v23 = vadd.f32 %v951_v60, %v851_v31  ;;  %v985_v24 = vadd.f32 %v953_v5, %v853_v51 }
 0x109   : > { %2805 = vperm.xlu0 %7471, %v2711_v38   ;;  %v986_v21 = vadd.f32 %v954_v7, %v854_v13  ;;  %v988_v25 = vadd.f32 %v956_v20, %v856_v63  ;;  %v987_v33 = vadd.f32 %v955_v16, %v855_v57  ;;  %v989_v38 = vadd.f32 %v957_v17, %v857_v1  ;;  %v2717_v57 = vld [vmem:[%s11438_s8 + $0xa8] sm:$0xff]  ;;  %v8589_v63 = vpop.permute.xlu0 %797  ;;  %v2696_v1 = vld [vmem:[%s11438_s8] sm:$0xff] }
 0x10a   : > { %1962 = vperm.xlu1 %7473, %v1824_v44   ;;  %v990_v27 = vadd.f32 %v958_v18, %v858_v2  ;;  %v8564_v46 = vmul.f32 %v8373_v36, %v8331_v8  ;;  %v8568_v44 = vmul.f32 %v8353_v28, %v8345_v22  ;;  %v8576_v60 = vmul.f32 %v8356_v29, %v8345_v22 }
 0x10b   : > { %v1087_v5 = vmul.f32 %v8363_v32, %v8431_v14  ;;  %v1088_v8 = vmul.f32 %v8368_v34, %v8431_v14  ;;  %v1089_v7 = vmul.f32 %v8370_v35, %v8431_v14  ;;  %v1116_v2 = vadd.f32 %v1084_v47, %v984_v19 }
 0x10c   : > { %v1118_v31 = vadd.f32 %v1086_v49, %v986_v21  ;;  %v1115_v10 = vadd.f32 %v1083_v45, %v983_v23  ;;  %v1117_v51 = vadd.f32 %v1085_v48, %v985_v24  ;;  %v8599_v48 = vmul.f32 %v8373_v36, %v8345_v22  ;;  %v2698_v24 = vld [vmem:[%s11438_s8 + $0x10] sm:$0xff] }
 0x10d   : > { %v8538_v9 = vpop.permute.xlu1 %1024  ;;  %2815 = vperm.xlu0 %7471, %v2713_v62   ;;  %v8572_v62 = vmul.f32 %v8359_v30, %v8345_v22  ;;  %v1120_v13 = vadd.f32 %v1088_v8, %v988_v25  ;;  %v1119_v20 = vadd.f32 %v1087_v5, %v987_v33  ;;  %v1121_v17 = vadd.f32 %v1089_v7, %v989_v38 }
 0x10e   : > { %1972 = vperm.xlu1 %7473, %v1826_v50   ;;  %v1090_v50 = vmul.f32 %v8381_v39, %v8431_v14  ;;  %v859_v19 = vmul.f32 %v8384_v40, %v8459_v15  ;;  %v860_v21 = vmul.f32 %v8376_v37, %v8459_v15  ;;  %v861_v23 = vmul.f32 %v8387_v41, %v8459_v15 }
 0x110   : > { %v1122_v16 = vadd.f32 %v1090_v50, %v990_v27 }
 0x111   : > { %2825 = vperm.xlu0 %7471, %v2715_v55  }
 0x112   : > { %v1160_v4 = vpop.permute.xlu1 %1159  ;;  %1982 = vperm.xlu1 %7473, %v1828_v12  }
 0x113   : > { %v1196_v18 = vadd.f32 %v1160_v4, %v1116_v2  ;;  %v1198_v55 = vadd.f32 %v1160_v4, %v1118_v31  ;;  %v1195_v12 = vadd.f32 %v1160_v4, %v1115_v10  ;;  %v1197_v54 = vadd.f32 %v1160_v4, %v1117_v51  ;;  %v8610_v4 = vpop.permute.xlu0 %1169 }
 0x114   : > { %v963_v2 = vmul.f32 %v8353_v28, %v8475_v43 }
 0x115   : > { %2835 = vperm.xlu0 %7471, %v2717_v57   ;;  %v1228_v5 = vmax.f32 %v1196_v18, 0.0  ;;  %v1230_v8 = vmax.f32 %v1198_v55, 0.0  ;;  %v1227_v7 = vmax.f32 %v1195_v12, 0.0  ;;  %v1229_v50 = vmax.f32 %v1197_v54, 0.0  ;;  %v2700_v54 = vld [vmem:[%s11438_s8 + $0x20] sm:$0xff] }
 0x116   : > { %v1165_v14 = vpop.permute.xlu1 %1164  ;;  %2730 = vperm.xlu1 %7473, %v2696_v1   ;;  %v862_v57 = vmul.f32 %v8390_v42, %v8459_v15  ;;  %v863_v1 = vmul.f32 %v8384_v40, %v8464_v26  ;;  %v1093_v18 = vmul.f32 %v8370_v35, %v8538_v9  ;;  %v1094_v55 = vmul.f32 %v8381_v39, %v8538_v9 }
 0x117   : > { %v1200_v0 = vadd.f32 %v1165_v14, %v1120_v13  ;;  %v1202_v47 = vadd.f32 %v1165_v14, %v1122_v16  ;;  %v1199_v49 = vadd.f32 %v1165_v14, %v1119_v20  ;;  %v1201_v45 = vadd.f32 %v1165_v14, %v1121_v17 }
 0x118   : > { %v964_v13 = vmul.f32 %v8359_v30, %v8475_v43  ;;  %v965_v16 = vmul.f32 %v8356_v29, %v8475_v43  ;;  %v966_v20 = vmul.f32 %v8373_v36, %v8475_v43  ;;  %v1091_v17 = vmul.f32 %v8363_v32, %v8538_v9 }
 0x119   : > { %v1232_v25 = vmax.f32 %v1200_v0, 0.0  ;;  %v1234_v27 = vmax.f32 %v1202_v47, 0.0  ;;  %v1231_v33 = vmax.f32 %v1199_v49, 0.0  ;;  %v1233_v38 = vmax.f32 %v1201_v45, 0.0  ;;  %2845 = vperm.xlu0 %7471, %v2719_v6   ;;  %v2721_v6 = vld [vmem:[%s11438_s8 + $0xc8] sm:$0xff]  ;;  %v2723_v49 = vld [vmem:[%s11438_s8 + $0xd8] sm:$0xff] }
 0x11a   : > { %v803_v22 = vpop.permute.xlu1 %802  ;;  %v864_v0 = vmul.f32 %v8376_v37, %v8464_v26  ;;  %2740 = vperm.xlu1 %7473, %v2698_v24   ;;  %v1092_v14 = vmul.f32 %v8368_v34, %v8538_v9  ;;  %v865_v12 = vmul.f32 %v8387_v41, %v8464_v26  ;;  %v866_v43 = vmul.f32 %v8390_v42, %v8464_v26  ;;  %v8648_v24 = vpop.permute.xlu0 %1184  ;;  %v2702_v9 = vld [vmem:[%s11438_s8 + $0x30] sm:$0xff] }
 0x11b   : > { %v1272_v31 = vpack.c.bf16 %v1232_v25, %v1228_v5  ;;  %v1274_v10 = vpack.c.bf16 %v1234_v27, %v1230_v8  ;;  %v1271_v15 = vpack.c.bf16 %v1231_v33, %v1227_v7  ;;  %v1273_v51 = vpack.c.bf16 %v1233_v38, %v1229_v50 }
 0x11c   : > { %v992_v45 = vadd.f32 %v8510_v61, %v860_v21  ;;  %v994_v25 = vadd.f32 %v8564_v46, %v862_v57  ;;  %v991_v26 = vadd.f32 %v8506_v56, %v859_v19  ;;  %v993_v27 = vadd.f32 %v8514_v3, %v861_v23  ;;  %v2725_v56 = vld [vmem:[%s11438_s8 + $0xe8] sm:$0xff] }
 0x11d   : > { %2855 = vperm.xlu0 %7471, %v2721_v6   ;;  %1446 = vmatprep.subr.bf16.mxu0 %v1272_v31  ;;  %v996_v33 = vadd.f32 %v964_v13, %v864_v0  ;;  %v998_v38 = vadd.f32 %v966_v20, %v866_v43  ;;  %v995_v5 = vadd.f32 %v963_v2, %v863_v1 }
 0x11e   : > { %1559 = vmatprep.subr.bf16.mxu1 %v1274_v10  ;;  %2750 = vperm.xlu1 %7473, %v2700_v54   ;;  %v997_v8 = vadd.f32 %v965_v16, %v865_v12  ;;  %v1124_v61 = vadd.f32 %v1092_v14, %v992_v45  ;;  %v1126_v21 = vadd.f32 %v1094_v55, %v994_v25  ;;  %v2706_v14 = vld [vmem:[%s11438_s8 + $0x50] sm:$0xff]  ;;  %v2708_v45 = vld [vmem:[%s11438_s8 + $0x60] sm:$0xff] }
 0x11f   : > { %v901_v47 = vpop.permute.xlu1 %900  ;;  %1447 = vmatpush1.bf16.msra.mxu0 %v1271_v15  ;;  %1560 = vmatpush1.bf16.msra.mxu1 %v1273_v51  ;;  %v1123_v7 = vadd.f32 %v1091_v17, %v991_v26  ;;  %v1125_v50 = vadd.f32 %v1093_v18, %v993_v27  ;;  %v871_v6 = vmul.f32 %v8384_v40, %v803_v22  ;;  %v3691_v18 = vld [vmem:[%s11439_s10 + $0x8] sm:$0xff] }
 0x120   : > { %v872_v31 = vmul.f32 %v8376_v37, %v803_v22  ;;  %v873_v10 = vmul.f32 %v8387_v41, %v803_v22  ;;  %v874_v46 = vmul.f32 %v8390_v42, %v803_v22  ;;  %v867_v3 = vmul.f32 %v8384_v40, %v8589_v63  ;;  %v2704_v22 = vld [vmem:[%s11438_s8 + $0x40] sm:$0xff] }
 0x121   : > { %2865 = vperm.xlu0 %7471, %v2723_v49   ;;  %v868_v19 = vmul.f32 %v8376_v37, %v8589_v63  ;;  %v869_v23 = vmul.f32 %v8387_v41, %v8589_v63  ;;  %v870_v57 = vmul.f32 %v8390_v42, %v8589_v63  ;;  %v1128_v0 = vadd.f32 %v8494_v53, %v996_v33  ;;  %v8678_v37 = vpop.permute.xlu0 %1306 }
 0x122   : > { %2760 = vperm.xlu1 %7473, %v2702_v9   ;;  %v1130_v2 = vadd.f32 %v8502_v59, %v998_v38  ;;  %v1127_v40 = vadd.f32 %v8490_v52, %v995_v5  ;;  %v1129_v54 = vadd.f32 %v8498_v58, %v997_v8  ;;  %v8681_v41 = vadd.f32 %v8610_v4, %v1124_v61  ;;  %v2727_v52 = vld [vmem:[%s11438_s8 + $0xf8] sm:$0xff] }
 0x123   : > { %v8684_v42 = vadd.f32 %v8610_v4, %v1126_v21  ;;  %v8687_v63 = vadd.f32 %v8610_v4, %v1123_v7  ;;  %v8690_v53 = vadd.f32 %v8610_v4, %v1125_v50  ;;  %v1004_v58 = vadd.f32 %v8572_v62, %v872_v31  ;;  %v3693_v31 = vld [vmem:[%s11439_s10 + $0x18] sm:$0xff] }
 0x124   : > { %v1033_v1 = vpop.permute.xlu1 %1032  ;;  %v1006_v59 = vadd.f32 %v8599_v48, %v874_v46  ;;  %v1003_v15 = vadd.f32 %v8568_v44, %v871_v6  ;;  %v1005_v51 = vadd.f32 %v8576_v60, %v873_v10  ;;  %v967_v13 = vmul.f32 %v8353_v28, %v901_v47 }
 0x125   : > { %2875 = vperm.xlu0 %7471, %v2725_v56   ;;  %v968_v16 = vmul.f32 %v8359_v30, %v901_v47  ;;  %v969_v4 = vmul.f32 %v8356_v29, %v901_v47  ;;  %v970_v20 = vmul.f32 %v8373_v36, %v901_v47  ;;  %v1236_v28 = vmax.f32 %v8681_v41, 0.0  ;;  %v8717_v49 = vpop.permute.xlu0 %1316 }
 0x126   : > { %2770 = vperm.xlu1 %7473, %v2704_v22   ;;  %v1238_v29 = vmax.f32 %v8684_v42, 0.0  ;;  %v1235_v30 = vmax.f32 %v8687_v63, 0.0  ;;  %v1237_v36 = vmax.f32 %v8690_v53, 0.0  ;;  %v999_v26 = vadd.f32 %v967_v13, %v867_v3  ;;  %v3695_v42 = vld [vmem:[%s11439_s10 + $0x28] sm:$0xff] }
 0x127   : > { %v1000_v9 = vadd.f32 %v968_v16, %v868_v19  ;;  %v1002_v25 = vadd.f32 %v970_v20, %v870_v57  ;;  %v1001_v27 = vadd.f32 %v969_v4, %v869_v23  ;;  %v1099_v33 = vmul.f32 %v8363_v32, %v1033_v1 }
 0x128   : > { %v1037_v17 = vpop.permute.xlu1 %1036  ;;  %v1100_v38 = vmul.f32 %v8368_v34, %v1033_v1  ;;  %v1101_v5 = vmul.f32 %v8370_v35, %v1033_v1  ;;  %v1102_v8 = vmul.f32 %v8381_v39, %v1033_v1 }
 0x129   : > { %v1103_v62 = vmul.f32 %v8363_v32, %v1037_v17  ;;  %v1104_v48 = vmul.f32 %v8368_v34, %v1037_v17  ;;  %v1105_v44 = vmul.f32 %v8370_v35, %v1037_v17  ;;  %v1106_v60 = vmul.f32 %v8381_v39, %v1037_v17  ;;  %2885 = vperm.xlu0 %7471, %v2727_v52   ;;  %v2710_v39 = vld [vmem:[%s11438_s8 + $0x70] sm:$0xff] }
 0x12a   : > { %2780 = vperm.xlu1 %7473, %v2706_v14   ;;  %v1132_v57 = vadd.f32 %v1100_v38, %v1000_v9  ;;  %v1134_v1 = vadd.f32 %v1102_v8, %v1002_v25  ;;  %v1131_v22 = vadd.f32 %v1099_v33, %v999_v26  ;;  %v7475_v9 = vld [vmem:[%s11441_s30 + $0x8] sm:$0xff]   ;;  %v3705_v33 = vld [vmem:[%s11439_s10 + $0x78] sm:$0xff]  ;;  %v2722_v38 = vld [vmem:[%s11438_s8 + $0xd0] sm:$0xff] }
 0x12b   : > { %v1136_v55 = vadd.f32 %v1104_v48, %v1004_v58  ;;  %v1138_v12 = vadd.f32 %v1106_v60, %v1006_v59  ;;  %v1135_v43 = vadd.f32 %v1103_v62, %v1003_v15  ;;  %v1137_v47 = vadd.f32 %v1105_v44, %v1005_v51  ;;  %v2712_v59 = vld [vmem:[%s11438_s8 + $0x80] sm:$0xff]  ;;  %v3697_v44 = vld [vmem:[%s11439_s10 + $0x38] sm:$0xff]  ;;  %v3703_v25 = vld [vmem:[%s11439_s10 + $0x68] sm:$0xff] }
 0x12d   : > { %v1175_v61 = vpop.permute.xlu1 %1174  ;;  %3761 = vperm.xlu0 %7471, %v3691_v18   ;;  %v1216_v10 = vadd.f32 %v8648_v24, %v1136_v55  ;;  %v1218_v32 = vadd.f32 %v8648_v24, %v1138_v12  ;;  %v1215_v34 = vadd.f32 %v8648_v24, %v1135_v43  ;;  %v1217_v35 = vadd.f32 %v8648_v24, %v1137_v47  ;;  %v3699_v18 = vld [vmem:[%s11439_s10 + $0x48] sm:$0xff]  ;;  %v2716_v55 = vld [vmem:[%s11438_s8 + $0xa0] sm:$0xff]  ;;  %v3701_v43 = vld [vmem:[%s11439_s10 + $0x58] sm:$0xff] }
 0x12e   : > { %v1208_v21 = vadd.f32 %v1175_v61, %v1128_v0  ;;  %v1210_v7 = vadd.f32 %v1175_v61, %v1130_v2  ;;  %v1207_v50 = vadd.f32 %v1175_v61, %v1127_v40  ;;  %v1209_v6 = vadd.f32 %v1175_v61, %v1129_v54  ;;  %2790 = vperm.xlu1 %7473, %v2708_v45   ;;  %v8736_v2 = vpop.permute.xlu0 %1326  ;;  %v2718_v45 = vld [vmem:[%s11438_s8 + $0xb0] sm:$0xff]  ;;  %v3707_v61 = vld [vmem:[%s11439_s10 + $0x88] sm:$0xff] }
 0x12f   : > { %v1133_v0 = vadd.f32 %v1101_v5, %v1001_v27  ;;  %v1248_v15 = vmax.f32 %v1216_v10, 0.0  ;;  %v1250_v51 = vmax.f32 %v1218_v32, 0.0  ;;  %v1247_v13 = vmax.f32 %v1215_v34, 0.0  ;;  %v2720_v27 = vld [vmem:[%s11438_s8 + $0xc0] sm:$0xff]  ;;  %v7476_v5 = vld [vmem:[%s11441_s30 + $0x10] sm:$0xff]   ;;  %v7477_v10 = vld [vmem:[%s11441_s30 + $0x18] sm:$0xff]  }
 0x130   : > { %v1240_v46 = vmax.f32 %v1208_v21, 0.0  ;;  %v1242_v56 = vmax.f32 %v1210_v7, 0.0  ;;  %v1239_v3 = vmax.f32 %v1207_v50, 0.0  ;;  %v1241_v19 = vmax.f32 %v1209_v6, 0.0  ;;  %v2724_v21 = vld [vmem:[%s11438_s8 + $0xe0] sm:$0xff]  ;;  %v3709_v50 = vld [vmem:[%s11439_s10 + $0x98] sm:$0xff] }
 0x131   : > { %v1180_v23 = vpop.permute.xlu1 %1179  ;;  %3771 = vperm.xlu0 %7471, %v3693_v31   ;;  %v1249_v16 = vmax.f32 %v1217_v35, 0.0  ;;  %v11442_v47 = vmov 0   ;;  %v2726_v31 = vld [vmem:[%s11438_s8 + $0xf0] sm:$0xff]  ;;  %v3711_v32 = vld [vmem:[%s11439_s10 + $0xa8] sm:$0xff]  ;;  %v3690_v34 = vld [vmem:[%s11439_s10] sm:$0xff] }
 0x132   : > { %v1276_v40 = vpack.c.bf16 %v1240_v46, %v1236_v28  ;;  %v1278_v54 = vpack.c.bf16 %v1242_v56, %v1238_v29  ;;  %v1275_v41 = vpack.c.bf16 %v1239_v3, %v1235_v30  ;;  %v1277_v24 = vpack.c.bf16 %v1241_v19, %v1237_v36  ;;  %2800 = vperm.xlu1 %7473, %v2710_v39   ;;  %v8747_v29 = vpop.permute.xlu0 %1336  ;;  %v2714_v30 = vld [vmem:[%s11438_s8 + $0x90] sm:$0xff]  ;;  %v7474_v36 = vld [vmem:[%s11440_s23] sm:$0xff]   ;;  %v3713_v46 = vld [vmem:[%s11439_s10 + $0xb8] sm:$0xff]  ;;  %s11467_s23 = scalar_lea.vmem (!%p7233_p1), %s11363_s17, %s7994_s0 }
 0x133   : > { %v1212_v63 = vadd.f32 %v1180_v23, %v1132_v57  ;;  %v1214_v53 = vadd.f32 %v1180_v23, %v1134_v1  ;;  %v1211_v52 = vadd.f32 %v1180_v23, %v1131_v22  ;;  %v1213_v58 = vadd.f32 %v1180_v23, %v1133_v0  ;;  %v3692_v56 = vld [vmem:[%s11439_s10 + $0x10] sm:$0xff]  ;;  %v7478_v3 = vld [vmem:[%s11441_s30 + $0x20] sm:$0xff]   ;;  %v3715_v23 = vld [vmem:[%s11439_s10 + $0xc8] sm:$0xff] }
 0x134   : > { %1448 = vmatprep.subr.bf16.mxu0 %v1276_v40  ;;  %1561 = vmatprep.subr.bf16.mxu1 %v1278_v54  ;;  %v3694_v1 = vld [vmem:[%s11439_s10 + $0x20] sm:$0xff]  ;;  %v3717_v22 = vld [vmem:[%s11439_s10 + $0xd8] sm:$0xff]  ;;  %v3696_v0 = vld [vmem:[%s11439_s10 + $0x30] sm:$0xff] }
 0x135   : > { %1449 = vmatpush1.bf16.msra.mxu0 %v1275_v41  ;;  %1562 = vmatpush1.bf16.msra.mxu1 %v1277_v24  ;;  %v1244_v4 = vmax.f32 %v1212_v63, 0.0  ;;  %v1246_v20 = vmax.f32 %v1214_v53, 0.0  ;;  %v1243_v17 = vmax.f32 %v1211_v52, 0.0  ;;  %v1245_v14 = vmax.f32 %v1213_v58, 0.0  ;;  %v8807_v7 = vpop.permute.xlu1 %1301  ;;  %v7479_v54 = vld [vmem:[%s11441_s30 + $0x28] sm:$0xff]   ;;  %v3721_v53 = vld [vmem:[%s11439_s10 + $0xf8] sm:$0xff] }
 0x136   : > { %3781 = vperm.xlu0 %7471, %v3695_v42   ;;  %2810 = vperm.xlu1 %7473, %v2712_v59   ;;  %v8762_v12 = vpop.permute.xlu0 %1346  ;;  %v3719_v24 = vld [vmem:[%s11439_s10 + $0xe8] sm:$0xff]  ;;  %v3698_v42 = vld [vmem:[%s11439_s10 + $0x40] sm:$0xff]  ;;  %v3700_v58 = vld [vmem:[%s11439_s10 + $0x50] sm:$0xff] }
 0x137   : > { %v1280_v62 = vpack.c.bf16 %v1248_v15, %v1244_v4  ;;  %v1282_v48 = vpack.c.bf16 %v1250_v51, %v1246_v20  ;;  %v1279_v60 = vpack.c.bf16 %v1247_v13, %v1243_v17  ;;  %v1281_v28 = vpack.c.bf16 %v1249_v16, %v1245_v14  ;;  %v7480_v59 = vld [vmem:[%s11441_s30 + $0x30] sm:$0xff]   ;;  %v3723_v15 = vld [vmem:[%s11439_s10 + $0x108] sm:$0xff]  ;;  %v3702_v51 = vld [vmem:[%s11439_s10 + $0x60] sm:$0xff] }
 0x138   : > { %v3725_v4 = vld [vmem:[%s11439_s10 + $0x118] sm:$0xff]  ;;  %v3704_v20 = vld [vmem:[%s11439_s10 + $0x70] sm:$0xff] }
 0x139   : > { %1450 = vmatprep.subr.bf16.mxu0 %v1280_v62  ;;  %1563 = vmatprep.subr.bf16.mxu1 %v1282_v48  ;;  %v8828_v35 = vpop.permute.xlu1 %1311  ;;  %v7481_v17 = vld [vmem:[%s11441_s30 + $0x38] sm:$0xff]   ;;  %v3727_v62 = vld [vmem:[%s11439_s10 + $0x128] sm:$0xff] }
 0x13a   : > { %3791 = vperm.xlu0 %7471, %v3697_v44   ;;  %1451 = vmatpush1.bf16.msra.mxu0 %v1279_v60  ;;  %v8779_v26 = vpop.permute.xlu0 %1356  ;;  %v3706_v44 = vld [vmem:[%s11439_s10 + $0x80] sm:$0xff]  ;;  %v3729_v60 = vld [vmem:[%s11439_s10 + $0x138] sm:$0xff] }
 0x13b   : > { %1564 = vmatpush1.bf16.msra.mxu1 %v1281_v28  ;;  %2820 = vperm.xlu1 %7473, %v2714_v30   ;;  %v3708_v28 = vld [vmem:[%s11439_s10 + $0x90] sm:$0xff] }
 0x13d   : > { %7104 = vmatmul.mubr.msk.bf16.vlgmr.msra.gmra.mrb[0].mxu0 %vm1419_vm1, %v7474_v36  ;;  %v8845_v19 = vpop.permute.xlu1 %1321 }
 0x13e   : > { %7112 = vmatmul.mubr.msk.bf16.vlgmr.msra.gmra.mrb[0].mxu1 %vm1419_vm1, %v7474_v36  ;;  %3801 = vperm.xlu0 %7471, %v3699_v18   ;;  %v8797_v8 = vpop.permute.xlu0 %1366  ;;  %v3731_v18 = vld [vmem:[%s11439_s10 + $0x148] sm:$0xff] }
 0x13f   : > { %2830 = vperm.xlu1 %7473, %v2716_v55   ;;  %1486 = vmatprep.mubr.bf16.mxu0 %v11442_v47  ;;  %v3710_v55 = vld [vmem:[%s11439_s10 + $0xa0] sm:$0xff] }
 0x140   : > { %1599 = vmatprep.mubr.bf16.mxu1 %v11442_v47 }
 0x141   : > { %v8865_v40 = vpop.permute.xlu1 %1331 }
 0x142   : > { %3811 = vperm.xlu0 %7471, %v3701_v43   ;;  %v8813_v6 = vpop.permute.xlu0 %1376 }
 0x143   : > { %2840 = vperm.xlu1 %7473, %v2718_v45   ;;  %v3733_v45 = vld [vmem:[%s11439_s10 + $0x158] sm:$0xff] }
 0x145   : > { %7105 = vmatmul.mubr.msk.bf16.gmra.mrb[4].mxu0 %vm1419_vm1, %v7475_v9  ;;  %v8880_v63 = vpop.permute.xlu1 %1341 }
 0x146   : > { %7113 = vmatmul.mubr.msk.bf16.gmra.mrb[4].mxu1 %vm1419_vm1, %v7475_v9  ;;  %3821 = vperm.xlu0 %7471, %v3703_v25   ;;  %v8831_v39 = vpop.permute.xlu0 %1837  ;;  %v3712_v25 = vld [vmem:[%s11439_s10 + $0xb0] sm:$0xff] }
 0x147   : > { %2850 = vperm.xlu1 %7473, %v2720_v27   ;;  %1496 = vmatprep.mubr.bf16.mxu0 %v11442_v47  ;;  %v3735_v27 = vld [vmem:[%s11439_s10 + $0x168] sm:$0xff] }
 0x148   : > { %1609 = vmatprep.mubr.bf16.mxu1 %v11442_v47 }
 0x149   : > { %v8901_v13 = vpop.permute.xlu1 %1351 }
 0x14a   : > { %3831 = vperm.xlu0 %7471, %v3705_v33   ;;  %v8850_v57 = vpop.permute.xlu0 %1847  ;;  %v3714_v33 = vld [vmem:[%s11439_s10 + $0xc0] sm:$0xff] }
 0x14b   : > { %2860 = vperm.xlu1 %7473, %v2722_v38  }
 0x14d   : > { %7106 = vmatmul.mubr.msk.bf16.gmra.mrb[8].mxu0 %vm1419_vm1, %v7476_v5  ;;  %v8918_v14 = vpop.permute.xlu1 %1361 }
 0x14e   : > { %7114 = vmatmul.mubr.msk.bf16.gmra.mrb[8].mxu1 %vm1419_vm1, %v7476_v5  ;;  %3841 = vperm.xlu0 %7471, %v3707_v61   ;;  %v8870_v41 = vpop.permute.xlu0 %1857  ;;  %v3737_v61 = vld [vmem:[%s11439_s10 + $0x178] sm:$0xff] }
 0x14f   : > { %2870 = vperm.xlu1 %7473, %v2724_v21   ;;  %1506 = vmatprep.mubr.bf16.mxu0 %v11442_v47  ;;  %v3716_v21 = vld [vmem:[%s11439_s10 + $0xd0] sm:$0xff] }
 0x150   : > { %1619 = vmatprep.mubr.bf16.mxu1 %v11442_v47 }
 0x151   : > { %v8938_v30 = vpop.permute.xlu1 %1371 }
 0x152   : > { %3851 = vperm.xlu0 %7471, %v3709_v50   ;;  %v8886_v52 = vpop.permute.xlu0 %1867 }
 0x153   : > { %2880 = vperm.xlu1 %7473, %v2726_v31   ;;  %v3739_v31 = vld [vmem:[%s11439_s10 + $0x188] sm:$0xff] }
 0x155   : > { %7107 = vmatmul.mubr.msk.bf16.gmra.mrb[12].mxu0 %vm1419_vm1, %v7477_v10  ;;  %v8948_v43 = vpop.permute.xlu1 %1832 }
 0x156   : > { %7115 = vmatmul.mubr.msk.bf16.gmra.mrb[12].mxu1 %vm1419_vm1, %v7477_v10  ;;  %3861 = vperm.xlu0 %7471, %v3711_v32   ;;  %v8904_v16 = vpop.permute.xlu0 %1877  ;;  %v3718_v32 = vld [vmem:[%s11439_s10 + $0xe0] sm:$0xff] }
 0x157   : > { %3756 = vperm.xlu1 %7473, %v3690_v34   ;;  %1516 = vmatprep.mubr.bf16.mxu0 %v11442_v47  ;;  %v3741_v34 = vld [vmem:[%s11439_s10 + $0x198] sm:$0xff] }
 0x158   : > { %1629 = vmatprep.mubr.bf16.mxu1 %v11442_v47 }
 0x159   : > { %v8964_v38 = vpop.permute.xlu1 %1842 }
 0x15a   : > { %3871 = vperm.xlu0 %7471, %v3713_v46   ;;  %v8923_v48 = vpop.permute.xlu0 %1887  ;;  %v3720_v46 = vld [vmem:[%s11439_s10 + $0xf0] sm:$0xff] }
 0x15b   : > { %3766 = vperm.xlu1 %7473, %v3692_v56  }
 0x15d   : > { %7108 = vmatmul.mubr.msk.bf16.gmra.mrb[16].mxu0 %vm1419_vm1, %v7478_v3  ;;  %v8974_v50 = vpop.permute.xlu1 %1852 }
 0x15e   : > { %7116 = vmatmul.mubr.msk.bf16.gmra.mrb[16].mxu1 %vm1419_vm1, %v7478_v3  ;;  %3881 = vperm.xlu0 %7471, %v3715_v23   ;;  %v8940_v36 = vpop.permute.xlu0 %1897  ;;  %v3743_v23 = vld [vmem:[%s11439_s10 + $0x1a8] sm:$0xff] }
 0x15f   : > { %3776 = vperm.xlu1 %7473, %v3694_v1   ;;  %1526 = vmatprep.mubr.bf16.mxu0 %v11442_v47  ;;  %v3722_v1 = vld [vmem:[%s11439_s10 + $0x100] sm:$0xff] }
 0x160   : > { %1639 = vmatprep.mubr.bf16.mxu1 %v11442_v47 }
 0x161   : > { %v8990_v56 = vpop.permute.xlu1 %1862 }
 0x162   : > { %3891 = vperm.xlu0 %7471, %v3717_v22   ;;  %v8953_v9 = vpop.permute.xlu0 %1907 }
 0x163   : > { %3786 = vperm.xlu1 %7473, %v3696_v0   ;;  %v3745_v0 = vld [vmem:[%s11439_s10 + $0x1b8] sm:$0xff] }
 0x165   : > { %7109 = vmatmul.mubr.msk.bf16.gmra.mrb[20].mxu0 %vm1419_vm1, %v7479_v54  ;;  %v9000_v22 = vpop.permute.xlu1 %1872 }
 0x166   : > { %7117 = vmatmul.mubr.msk.bf16.gmra.mrb[20].mxu1 %vm1419_vm1, %v7479_v54  ;;  %3901 = vperm.xlu0 %7471, %v3719_v24   ;;  %v8966_v5 = vpop.permute.xlu0 %1917  ;;  %v3724_v24 = vld [vmem:[%s11439_s10 + $0x110] sm:$0xff] }
 0x167   : > { %3796 = vperm.xlu1 %7473, %v3698_v42   ;;  %1536 = vmatprep.mubr.bf16.mxu0 %v11442_v47  ;;  %v3747_v42 = vld [vmem:[%s11439_s10 + $0x1c8] sm:$0xff] }
 0x168   : > { %1649 = vmatprep.mubr.bf16.mxu1 %v11442_v47 }
 0x16a   : > { %3911 = vperm.xlu0 %7471, %v3721_v53   ;;  %v8979_v10 = vpop.permute.xlu0 %1927  ;;  %v3726_v53 = vld [vmem:[%s11439_s10 + $0x120] sm:$0xff] }
 0x16b   : > { %3806 = vperm.xlu1 %7473, %v3700_v58   ;;  %v9016_v58 = vpop.permute.xlu1 %1882 }
 0x16d   : > { %7110 = vmatmul.mubr.msk.bf16.gmra.mrb[24].mxu0 %vm1419_vm1, %v7480_v59 }
 0x16e   : > { %7118 = vmatmul.mubr.msk.bf16.gmra.mrb[24].mxu1 %vm1419_vm1, %v7480_v59  ;;  %3921 = vperm.xlu0 %7471, %v3723_v15   ;;  %v8992_v3 = vpop.permute.xlu0 %1937  ;;  %v3749_v15 = vld [vmem:[%s11439_s10 + $0x1d8] sm:$0xff] }
 0x16f   : > { %3816 = vperm.xlu1 %7473, %v3702_v51   ;;  %1546 = vmatprep.mubr.bf16.mxu0 %v11442_v47  ;;  %v3728_v51 = vld [vmem:[%s11439_s10 + $0x130] sm:$0xff] }
 0x170   : > { %1659 = vmatprep.mubr.bf16.mxu1 %v11442_v47 }
 0x172   : > { %3931 = vperm.xlu0 %7471, %v3725_v4   ;;  %v9005_v54 = vpop.permute.xlu0 %1947  ;;  %v9026_v4 = vpop.permute.xlu1 %1892 }
 0x173   : > { %3826 = vperm.xlu1 %7473, %v3704_v20   ;;  %11443 = vst [vmem:[#allocation23_spill] sm:$0xff] %v9005_v54  ;;  %v3751_v20 = vld [vmem:[%s11439_s10 + $0x1e8] sm:$0xff] }
 0x175   : > { %7111 = vmatmul.mubr.msk.bf16.gmra.mrb[28].mxu0 %vm1419_vm1, %v7481_v17 }
 0x176   : > { %7119 = vmatmul.mubr.msk.bf16.gmra.mrb[28].mxu1 %vm1419_vm1, %v7481_v17  ;;  %3941 = vperm.xlu0 %7471, %v3727_v62   ;;  %v9018_v59 = vpop.permute.xlu0 %1957  ;;  %v3730_v62 = vld [vmem:[%s11439_s10 + $0x140] sm:$0xff] }
 0x177   : > { %3836 = vperm.xlu1 %7473, %v3706_v44   ;;  %2118 = vmatprep.mubr.bf16.mxu0 %v11442_v47  ;;  %11444 = vst [vmem:[#allocation24_spill] sm:$0xff] %v9018_v59  ;;  %v3753_v44 = vld [vmem:[%s11439_s10 + $0x1f8] sm:$0xff] }
 0x178   : > { %2311 = vmatprep.mubr.bf16.mxu1 %v11442_v47 }
 0x17a   : > { %3951 = vperm.xlu0 %7471, %v3729_v60   ;;  %v9031_v17 = vpop.permute.xlu0 %1967  ;;  %v3732_v60 = vld [vmem:[%s11439_s10 + $0x150] sm:$0xff] }
 0x17b   : > { %3846 = vperm.xlu1 %7473, %v3708_v28   ;;  %11445 = vst [vmem:[#allocation25_spill] sm:$0xff] %v9031_v17  ;;  %v9042_v28 = vpop.permute.xlu1 %1902 }
 0x17e   : > { %3961 = vperm.xlu0 %7471, %v3731_v18   ;;  %v9044_v18 = vpop.permute.xlu0 %1977 }
 0x17f   : > { %3856 = vperm.xlu1 %7473, %v3710_v55   ;;  %11446 = vst [vmem:[#allocation26_spill] sm:$0xff] %v9044_v18  ;;  %v3734_v55 = vld [vmem:[%s11439_s10 + $0x160] sm:$0xff] }
 0x182   : > { %3971 = vperm.xlu0 %7471, %v3733_v45   ;;  %v9049_v45 = vpop.permute.xlu1 %1912 }
 0x183   : > { %3866 = vperm.xlu1 %7473, %v3712_v25   ;;  %v3736_v25 = vld [vmem:[%s11439_s10 + $0x170] sm:$0xff] }
 0x186   : > { %3981 = vperm.xlu0 %7471, %v3735_v27   ;;  %v3738_v27 = vld [vmem:[%s11439_s10 + $0x180] sm:$0xff] }
 0x187   : > { %3876 = vperm.xlu1 %7473, %v3714_v33   ;;  %v9057_v33 = vpop.permute.xlu1 %1922 }
 0x18a   : > { %3991 = vperm.xlu0 %7471, %v3737_v61   ;;  %v3740_v61 = vld [vmem:[%s11439_s10 + $0x190] sm:$0xff] }
 0x18b   : > { %3886 = vperm.xlu1 %7473, %v3716_v21   ;;  %v9062_v21 = vpop.permute.xlu1 %1932 }
 0x18e   : > { %4001 = vperm.xlu0 %7471, %v3739_v31   ;;  %v3742_v31 = vld [vmem:[%s11439_s10 + $0x1a0] sm:$0xff] }
 0x18f   : > { %3896 = vperm.xlu1 %7473, %v3718_v32   ;;  %v3744_v32 = vld [vmem:[%s11439_s10 + $0x1b0] sm:$0xff] }
 0x192   : > { %4011 = vperm.xlu0 %7471, %v3741_v34   ;;  %v9070_v34 = vpop.permute.xlu1 %1942 }
 0x193   : > { %3906 = vperm.xlu1 %7473, %v3720_v46   ;;  %11447 = vst [vmem:[#allocation27_spill] sm:$0xff] %v9070_v34  ;;  %v3746_v46 = vld [vmem:[%s11439_s10 + $0x1c0] sm:$0xff] }
 0x196   : > { %4021 = vperm.xlu0 %7471, %v3743_v23   ;;  %v9075_v23 = vpop.permute.xlu1 %1952 }
 0x197   : > { %3916 = vperm.xlu1 %7473, %v3722_v1   ;;  %11448 = vst [vmem:[#allocation28_spill] sm:$0xff] %v9075_v23  ;;  %v3748_v1 = vld [vmem:[%s11439_s10 + $0x1d0] sm:$0xff] }
 0x19a   : > { %4031 = vperm.xlu0 %7471, %v3745_v0   ;;  %v3750_v0 = vld [vmem:[%s11439_s10 + $0x1e0] sm:$0xff] }
 0x19b   : > { %3926 = vperm.xlu1 %7473, %v3724_v24   ;;  %v9083_v24 = vpop.permute.xlu1 %1962 }
 0x19c   : > { %11449 = vst [vmem:[#allocation29_spill] sm:$0xff] %v9083_v24 }
 0x19e   : > { %4041 = vperm.xlu0 %7471, %v3747_v42   ;;  %v3752_v42 = vld [vmem:[%s11439_s10 + $0x1f0] sm:$0xff] }
 0x19f   : > { %3936 = vperm.xlu1 %7473, %v3726_v53   ;;  %v9088_v53 = vpop.permute.xlu1 %1972 }
 0x1a0   : > { %11450 = vst [vmem:[#allocation30_spill] sm:$0xff] %v9088_v53 }
 0x1a2   : > { %4051 = vperm.xlu0 %7471, %v3749_v15  }
 0x1a3   : > { %3946 = vperm.xlu1 %7473, %v3728_v51  }
 0x1a6   : > { %4061 = vperm.xlu0 %7471, %v3751_v20  }
 0x1a7   : > { %3956 = vperm.xlu1 %7473, %v3730_v62  }
 0x1aa   : > { %4071 = vperm.xlu0 %7471, %v3753_v44  }
 0x1ab   : > { %3966 = vperm.xlu1 %7473, %v3732_v60  }
 0x1af   : > { %3976 = vperm.xlu1 %7473, %v3734_v55  }
 0x1b3   : > { %3986 = vperm.xlu1 %7473, %v3736_v25  }
 0x1b7   : > { %3996 = vperm.xlu1 %7473, %v3738_v27  }
 0x1bb   : > { %4006 = vperm.xlu1 %7473, %v3740_v61  }
 0x1bf   : > { %4016 = vperm.xlu1 %7473, %v3742_v31  }
 0x1c3   : > { %4026 = vperm.xlu1 %7473, %v3744_v32  }
 0x1c7   : > { %4036 = vperm.xlu1 %7473, %v3746_v46  }
 0x1cb   : > { %4046 = vperm.xlu1 %7473, %v3748_v1  }
 0x1cf   : > { %4056 = vperm.xlu1 %7473, %v3750_v0  }
 0x1d3   : > { %4066 = vperm.xlu1 %7473, %v3752_v42  }
 0x210   : > { %v1478_v15 = vpop.f32.mrb[0].mxu0 }
 0x211   : > { %v1591_v51 = vpop.f32.mrb[0].mxu1  ;;  %v1479_v20 = vadd.f32 %v1478_v15, %v8807_v7  ;;  %v1480_v62 = vpop.f32.mrb[1].mxu0 }
 0x212   : > { %v1593_v44 = vpop.f32.mrb[1].mxu1  ;;  %v1592_v60 = vadd.f32 %v1591_v51, %v8807_v7  ;;  %v1481_v55 = vadd.f32 %v1480_v62, %v8807_v7  ;;  %v1482_v25 = vpop.f32.mrb[2].mxu0 }
 0x213   : > { %v1594_v27 = vadd.f32 %v1593_v44, %v8807_v7  ;;  %v1483_v61 = vadd.f32 %v1482_v25, %v8678_v37  ;;  %v1595_v31 = vpop.f32.mrb[2].mxu1  ;;  %v1484_v32 = vpop.f32.mrb[3].mxu0  ;;  %v1670_v42 = vmax.f32 %v1479_v20, 0.0 }
 0x214   : > { %v1596_v46 = vadd.f32 %v1595_v31, %v8678_v37  ;;  %v1485_v1 = vadd.f32 %v1484_v32, %v8678_v37  ;;  %v1597_v0 = vpop.f32.mrb[3].mxu1  ;;  %v1672_v18 = vmax.f32 %v1592_v60, 0.0  ;;  %v1671_v51 = vmax.f32 %v1481_v55, 0.0 }
 0x215   : > { %v1674_v15 = vmax.f32 %v1483_v61, 0.0  ;;  %v1598_v11 = vadd.f32 %v1597_v0, %v8678_v37  ;;  %v1673_v17 = vmax.f32 %v1594_v27, 0.0 }
 0x216   : > { %v1676_v53 = vmax.f32 %v1596_v46, 0.0  ;;  %v1675_v62 = vmax.f32 %v1485_v1, 0.0 }
 0x217   : > { %v1766_v24 = vpack.c.bf16 %v1674_v15, %v1670_v42  ;;  %v1677_v7 = vmax.f32 %v1598_v11, 0.0 }
 0x218   : > { %v1488_v44 = vpop.f32.mrb[4].mxu0  ;;  %v1768_v25 = vpack.c.bf16 %v1676_v53, %v1672_v18  ;;  %v1767_v23 = vpack.c.bf16 %v1675_v62, %v1671_v51 }
 0x219   : > { %v1601_v59 = vpop.f32.mrb[4].mxu1  ;;  %v1489_v31 = vadd.f32 %v1488_v44, %v8828_v35  ;;  %v1490_v54 = vpop.f32.mrb[5].mxu0  ;;  %v1769_v34 = vpack.c.bf16 %v1677_v7, %v1673_v17 }
 0x21a   : > { %v1603_v32 = vpop.f32.mrb[5].mxu1  ;;  %v1602_v20 = vadd.f32 %v1601_v59, %v8828_v35  ;;  %v1491_v37 = vadd.f32 %v1490_v54, %v8828_v35  ;;  %v1492_v60 = vpop.f32.mrb[6].mxu0  ;;  %2086 = vmatprep.subr.bf16.mxu0 %v1767_v23 }
 0x21b   : > { %v1604_v55 = vadd.f32 %v1603_v32, %v8828_v35  ;;  %v1493_v27 = vadd.f32 %v1492_v60, %v8717_v49  ;;  %v1605_v11 = vpop.f32.mrb[6].mxu1  ;;  %2279 = vmatprep.subr.bf16.mxu1 %v1769_v34  ;;  %v1494_v18 = vpop.f32.mrb[7].mxu0  ;;  %2087 = vmatpush1.bf16.msra.mxu0 %v1766_v24  ;;  %v1678_v17 = vmax.f32 %v1489_v31, 0.0 }
 0x21c   : > { %v1606_v53 = vadd.f32 %v1605_v11, %v8717_v49  ;;  %v1495_v61 = vadd.f32 %v1494_v18, %v8717_v49  ;;  %v1607_v46 = vpop.f32.mrb[7].mxu1  ;;  %2280 = vmatpush1.bf16.msra.mxu1 %v1768_v25  ;;  %v1680_v1 = vmax.f32 %v1602_v20, 0.0  ;;  %v1679_v23 = vmax.f32 %v1491_v37, 0.0 }
 0x21d   : > { %v1682_v59 = vmax.f32 %v1493_v27, 0.0  ;;  %v1608_v54 = vadd.f32 %v1607_v46, %v8717_v49  ;;  %v1681_v42 = vmax.f32 %v1604_v55, 0.0 }
 0x21e   : > { %v1684_v0 = vmax.f32 %v1606_v53, 0.0  ;;  %v1683_v35 = vmax.f32 %v1495_v61, 0.0 }
 0x21f   : > { %v1770_v15 = vpack.c.bf16 %v1682_v59, %v1678_v17  ;;  %v1685_v51 = vmax.f32 %v1608_v54, 0.0 }
 0x220   : > { %v1498_v34 = vpop.f32.mrb[8].mxu0  ;;  %v1772_v62 = vpack.c.bf16 %v1684_v0, %v1680_v1  ;;  %v1771_v7 = vpack.c.bf16 %v1683_v35, %v1679_v23 }
 0x221   : > { %v1611_v24 = vpop.f32.mrb[8].mxu1  ;;  %v1499_v44 = vadd.f32 %v1498_v34, %v8845_v19  ;;  %v1500_v32 = vpop.f32.mrb[9].mxu0  ;;  %v1773_v25 = vpack.c.bf16 %v1685_v51, %v1681_v42 }
 0x222   : > { %v1613_v60 = vpop.f32.mrb[9].mxu1  ;;  %v1612_v31 = vadd.f32 %v1611_v24, %v8845_v19  ;;  %v1501_v49 = vadd.f32 %v1500_v32, %v8845_v19  ;;  %v1502_v20 = vpop.f32.mrb[10].mxu0  ;;  %2088 = vmatprep.subr.bf16.mxu0 %v1771_v7 }
 0x223   : > { %v1614_v37 = vadd.f32 %v1613_v60, %v8845_v19  ;;  %v1503_v55 = vadd.f32 %v1502_v20, %v8736_v2  ;;  %v1615_v27 = vpop.f32.mrb[10].mxu1  ;;  %2281 = vmatprep.subr.bf16.mxu1 %v1773_v25  ;;  %v1504_v11 = vpop.f32.mrb[11].mxu0  ;;  %2089 = vmatpush1.bf16.msra.mxu0 %v1770_v15  ;;  %v1686_v46 = vmax.f32 %v1499_v44, 0.0 }
 0x224   : > { %v1616_v18 = vadd.f32 %v1615_v27, %v8736_v2  ;;  %v1505_v53 = vadd.f32 %v1504_v11, %v8736_v2  ;;  %v1617_v61 = vpop.f32.mrb[11].mxu1  ;;  %2282 = vmatpush1.bf16.msra.mxu1 %v1772_v62  ;;  %v1688_v54 = vmax.f32 %v1612_v31, 0.0  ;;  %v1687_v1 = vmax.f32 %v1501_v49, 0.0 }
 0x225   : > { %v1690_v17 = vmax.f32 %v1503_v55, 0.0  ;;  %v1618_v59 = vadd.f32 %v1617_v61, %v8736_v2  ;;  %v1689_v0 = vmax.f32 %v1614_v37, 0.0 }
 0x226   : > { %v1692_v23 = vmax.f32 %v1616_v18, 0.0  ;;  %v1691_v19 = vmax.f32 %v1505_v53, 0.0 }
 0x227   : > { %v1774_v35 = vpack.c.bf16 %v1690_v17, %v1686_v46  ;;  %v1693_v42 = vmax.f32 %v1618_v59, 0.0 }
 0x228   : > { %v1508_v51 = vpop.f32.mrb[12].mxu0  ;;  %v1776_v34 = vpack.c.bf16 %v1692_v23, %v1688_v54  ;;  %v1775_v24 = vpack.c.bf16 %v1691_v19, %v1687_v1 }
 0x229   : > { %v1621_v15 = vpop.f32.mrb[12].mxu1  ;;  %v1509_v7 = vadd.f32 %v1508_v51, %v8865_v40  ;;  %v1510_v32 = vpop.f32.mrb[13].mxu0  ;;  %v1777_v62 = vpack.c.bf16 %v1693_v42, %v1689_v0 }
 0x22a   : > { %v1623_v60 = vpop.f32.mrb[13].mxu1  ;;  %v1622_v44 = vadd.f32 %v1621_v15, %v8865_v40  ;;  %v1511_v2 = vadd.f32 %v1510_v32, %v8865_v40  ;;  %v1512_v25 = vpop.f32.mrb[14].mxu0  ;;  %2090 = vmatprep.subr.bf16.mxu0 %v1775_v24 }
 0x22b   : > { %v1624_v31 = vadd.f32 %v1623_v60, %v8865_v40  ;;  %v1513_v49 = vadd.f32 %v1512_v25, %v8747_v29  ;;  %v1625_v20 = vpop.f32.mrb[14].mxu1  ;;  %2283 = vmatprep.subr.bf16.mxu1 %v1777_v62  ;;  %v1514_v37 = vpop.f32.mrb[15].mxu0  ;;  %2091 = vmatpush1.bf16.msra.mxu0 %v1774_v35  ;;  %v1694_v18 = vmax.f32 %v1509_v7, 0.0 }
 0x22c   : > { %v1626_v55 = vadd.f32 %v1625_v20, %v8747_v29  ;;  %v1515_v27 = vadd.f32 %v1514_v37, %v8747_v29  ;;  %v1627_v11 = vpop.f32.mrb[15].mxu1  ;;  %2284 = vmatpush1.bf16.msra.mxu1 %v1776_v34  ;;  %v1696_v46 = vmax.f32 %v1622_v44, 0.0  ;;  %v1695_v17 = vmax.f32 %v1511_v2, 0.0 }
 0x22d   : > { %v1698_v53 = vmax.f32 %v1513_v49, 0.0  ;;  %v1628_v61 = vadd.f32 %v1627_v11, %v8747_v29  ;;  %v1697_v54 = vmax.f32 %v1624_v31, 0.0 }
 0x22e   : > { %v1700_v59 = vmax.f32 %v1626_v55, 0.0  ;;  %v1699_v40 = vmax.f32 %v1515_v27, 0.0 }
 0x22f   : > { %v1778_v1 = vpack.c.bf16 %v1698_v53, %v1694_v18  ;;  %v1701_v23 = vmax.f32 %v1628_v61, 0.0 }
 0x230   : > { %v1518_v19 = vpop.f32.mrb[16].mxu0  ;;  %v1780_v0 = vpack.c.bf16 %v1700_v59, %v1696_v46  ;;  %v1779_v15 = vpack.c.bf16 %v1699_v40, %v1695_v17 }
 0x231   : > { %v1519_v35 = vadd.f32 %v1518_v19, %v8880_v63  ;;  %v1631_v42 = vpop.f32.mrb[16].mxu1  ;;  %v1520_v51 = vpop.f32.mrb[17].mxu0  ;;  %v1781_v32 = vpack.c.bf16 %v1701_v23, %v1697_v54 }
 0x232   : > { %v1632_v34 = vadd.f32 %v1631_v42, %v8880_v63  ;;  %v1521_v24 = vadd.f32 %v1520_v51, %v8880_v63  ;;  %v1633_v7 = vpop.f32.mrb[17].mxu1  ;;  %v1522_v29 = vpop.f32.mrb[18].mxu0  ;;  %2092 = vmatprep.subr.bf16.mxu0 %v1779_v15 }
 0x233   : > { %v1634_v60 = vadd.f32 %v1633_v7, %v8880_v63  ;;  %v1523_v62 = vadd.f32 %v1522_v29, %v8762_v12  ;;  %v1635_v44 = vpop.f32.mrb[18].mxu1  ;;  %2285 = vmatprep.subr.bf16.mxu1 %v1781_v32  ;;  %v1524_v25 = vpop.f32.mrb[19].mxu0  ;;  %2093 = vmatpush1.bf16.msra.mxu0 %v1778_v1  ;;  %v1702_v49 = vmax.f32 %v1519_v35, 0.0 }
 0x234   : > { %v1636_v2 = vadd.f32 %v1635_v44, %v8762_v12  ;;  %v1637_v31 = vpop.f32.mrb[19].mxu1  ;;  %v1525_v37 = vadd.f32 %v1524_v25, %v8762_v12  ;;  %2286 = vmatpush1.bf16.msra.mxu1 %v1780_v0  ;;  %v1704_v27 = vmax.f32 %v1632_v34, 0.0  ;;  %v1703_v11 = vmax.f32 %v1521_v24, 0.0 }
 0x235   : > { %v1706_v20 = vmax.f32 %v1523_v62, 0.0  ;;  %v1638_v55 = vadd.f32 %v1637_v31, %v8762_v12  ;;  %v1705_v18 = vmax.f32 %v1634_v60, 0.0 }
 0x236   : > { %v1708_v63 = vmax.f32 %v1636_v2, 0.0  ;;  %v1707_v61 = vmax.f32 %v1525_v37, 0.0 }
 0x237   : > { %v1782_v53 = vpack.c.bf16 %v1706_v20, %v1702_v49  ;;  %v1709_v46 = vmax.f32 %v1638_v55, 0.0 }
 0x238   : > { %v1784_v17 = vpack.c.bf16 %v1708_v63, %v1704_v27  ;;  %v1528_v59 = vpop.f32.mrb[20].mxu0  ;;  %v1783_v23 = vpack.c.bf16 %v1707_v61, %v1703_v11 }
 0x239   : > { %v1529_v40 = vadd.f32 %v1528_v59, %v8901_v13  ;;  %v1641_v54 = vpop.f32.mrb[20].mxu1  ;;  %v1530_v1 = vpop.f32.mrb[21].mxu0  ;;  %v1785_v19 = vpack.c.bf16 %v1709_v46, %v1705_v18 }
 0x23a   : > { %v1642_v35 = vadd.f32 %v1641_v54, %v8901_v13  ;;  %v1531_v12 = vadd.f32 %v1530_v1, %v8901_v13  ;;  %v1643_v0 = vpop.f32.mrb[21].mxu1  ;;  %v1532_v42 = vpop.f32.mrb[22].mxu0  ;;  %2094 = vmatprep.subr.bf16.mxu0 %v1783_v23 }
 0x23b   : > { %v1644_v51 = vadd.f32 %v1643_v0, %v8901_v13  ;;  %v1533_v15 = vadd.f32 %v1532_v42, %v8779_v26  ;;  %v1645_v34 = vpop.f32.mrb[22].mxu1  ;;  %2287 = vmatprep.subr.bf16.mxu1 %v1785_v19  ;;  %v1534_v7 = vpop.f32.mrb[23].mxu0  ;;  %2095 = vmatpush1.bf16.msra.mxu0 %v1782_v53  ;;  %v1710_v32 = vmax.f32 %v1529_v40, 0.0 }
 0x23c   : > { %v1646_v24 = vadd.f32 %v1645_v34, %v8779_v26  ;;  %v1647_v29 = vpop.f32.mrb[23].mxu1  ;;  %2288 = vmatpush1.bf16.msra.mxu1 %v1784_v17  ;;  %v1535_v62 = vadd.f32 %v1534_v7, %v8779_v26  ;;  %v1712_v2 = vmax.f32 %v1642_v35, 0.0  ;;  %v1711_v25 = vmax.f32 %v1531_v12, 0.0 }
 0x23d   : > { %v1714_v60 = vmax.f32 %v1533_v15, 0.0  ;;  %v1648_v44 = vadd.f32 %v1647_v29, %v8779_v26  ;;  %v1713_v31 = vmax.f32 %v1644_v51, 0.0 }
 0x23e   : > { %v1716_v13 = vmax.f32 %v1646_v24, 0.0  ;;  %v1715_v20 = vmax.f32 %v1535_v62, 0.0 }
 0x23f   : > { %v1786_v49 = vpack.c.bf16 %v1714_v60, %v1710_v32  ;;  %v1717_v37 = vmax.f32 %v1648_v44, 0.0 }
 0x240   : > { %v1788_v55 = vpack.c.bf16 %v1716_v13, %v1712_v2  ;;  %v1538_v27 = vpop.f32.mrb[24].mxu0  ;;  %v1787_v53 = vpack.c.bf16 %v1715_v20, %v1711_v25 }
 0x241   : > { %v1539_v11 = vadd.f32 %v1538_v27, %v8918_v14  ;;  %v1651_v63 = vpop.f32.mrb[24].mxu1  ;;  %v1540_v18 = vpop.f32.mrb[25].mxu0  ;;  %v1789_v61 = vpack.c.bf16 %v1717_v37, %v1713_v31 }
 0x242   : > { %v1652_v46 = vadd.f32 %v1651_v63, %v8918_v14  ;;  %v1541_v17 = vadd.f32 %v1540_v18, %v8918_v14  ;;  %v1653_v26 = vpop.f32.mrb[25].mxu1  ;;  %v1542_v59 = vpop.f32.mrb[26].mxu0  ;;  %2096 = vmatprep.subr.bf16.mxu0 %v1787_v53 }
 0x243   : > { %v1654_v40 = vadd.f32 %v1653_v26, %v8918_v14  ;;  %v1543_v54 = vadd.f32 %v1542_v59, %v8797_v8  ;;  %v1655_v1 = vpop.f32.mrb[26].mxu1  ;;  %2289 = vmatprep.subr.bf16.mxu1 %v1789_v61  ;;  %v1544_v19 = vpop.f32.mrb[27].mxu0  ;;  %2097 = vmatpush1.bf16.msra.mxu0 %v1786_v49  ;;  %v1718_v12 = vmax.f32 %v1539_v11, 0.0 }
 0x244   : > { %v1656_v23 = vadd.f32 %v1655_v1, %v8797_v8  ;;  %v1657_v35 = vpop.f32.mrb[27].mxu1  ;;  %2290 = vmatpush1.bf16.msra.mxu1 %v1788_v55  ;;  %v1545_v42 = vadd.f32 %v1544_v19, %v8797_v8  ;;  %v1720_v15 = vmax.f32 %v1652_v46, 0.0  ;;  %v1719_v34 = vmax.f32 %v1541_v17, 0.0 }
 0x245   : > { %v1722_v0 = vmax.f32 %v1543_v54, 0.0  ;;  %v1658_v51 = vadd.f32 %v1657_v35, %v8797_v8  ;;  %v1721_v24 = vmax.f32 %v1654_v40, 0.0 }
 0x246   : > { %v1724_v14 = vmax.f32 %v1656_v23, 0.0  ;;  %v1723_v29 = vmax.f32 %v1545_v42, 0.0  ;;  %v7482_v42 = vld [vmem:[%s11451_s5] sm:$0xff]  }
 0x247   : > { %v1790_v7 = vpack.c.bf16 %v1722_v0, %v1718_v12  ;;  %v1725_v32 = vmax.f32 %v1658_v51, 0.0  ;;  %v7484_v51 = vld [vmem:[%s11451_s5 + $0x10] sm:$0xff]  }
 0x248   : > { %v1792_v60 = vpack.c.bf16 %v1724_v14, %v1720_v15  ;;  %v1548_v62 = vpop.f32.mrb[28].mxu0  ;;  %v1791_v13 = vpack.c.bf16 %v1723_v29, %v1719_v34  ;;  %v7485_v15 = vld [vmem:[%s11451_s5 + $0x18] sm:$0xff]   ;;  %v7486_v34 = vld [vmem:[%s11451_s5 + $0x20] sm:$0xff]   ;;  %v7487_v14 = vld [vmem:[%s11451_s5 + $0x28] sm:$0xff]  }
 0x249   : > { %v1549_v44 = vadd.f32 %v1548_v62, %v8938_v30  ;;  %v1661_v2 = vpop.f32.mrb[28].mxu1  ;;  %v1550_v25 = vpop.f32.mrb[29].mxu0  ;;  %v1793_v31 = vpack.c.bf16 %v1725_v32, %v1721_v24  ;;  %v7488_v24 = vld [vmem:[%s11451_s5 + $0x30] sm:$0xff]   ;;  %v7490_v29 = vld [vmem:[%s11451_s5 + $0x40] sm:$0xff]   ;;  %v7491_v32 = vld [vmem:[%s11451_s5 + $0x48] sm:$0xff]  }
 0x24a   : > { %v1662_v49 = vadd.f32 %v1661_v2, %v8938_v30  ;;  %v1551_v20 = vadd.f32 %v1550_v25, %v8938_v30  ;;  %v1663_v8 = vpop.f32.mrb[29].mxu1  ;;  %v1552_v37 = vpop.f32.mrb[30].mxu0  ;;  %2098 = vmatprep.subr.bf16.mxu0 %v1791_v13  ;;  %v7493_v62 = vld [vmem:[%s11451_s5 + $0x58] sm:$0xff]   ;;  %v7495_v2 = vld [vmem:[%s11451_s5 + $0x68] sm:$0xff]   ;;  %v7496_v25 = vld [vmem:[%s11451_s5 + $0x70] sm:$0xff]  }
 0x24b   : > { %v1664_v55 = vadd.f32 %v1663_v8, %v8938_v30  ;;  %v1553_v27 = vadd.f32 %v1552_v37, %v8813_v6  ;;  %v1665_v11 = vpop.f32.mrb[30].mxu1  ;;  %2291 = vmatprep.subr.bf16.mxu1 %v1793_v31  ;;  %v1554_v18 = vpop.f32.mrb[31].mxu0  ;;  %2099 = vmatpush1.bf16.msra.mxu0 %v1790_v7  ;;  %v1726_v61 = vmax.f32 %v1549_v44, 0.0  ;;  %v7489_v7 = vld [vmem:[%s11451_s5 + $0x38] sm:$0xff]   ;;  %v7494_v44 = vld [vmem:[%s11451_s5 + $0x60] sm:$0xff]  }
 0x24c   : > { %v1666_v63 = vadd.f32 %v1665_v11, %v8813_v6  ;;  %v1667_v53 = vpop.f32.mrb[31].mxu1  ;;  %2292 = vmatpush1.bf16.msra.mxu1 %v1792_v60  ;;  %v1555_v17 = vadd.f32 %v1554_v18, %v8813_v6  ;;  %v1728_v59 = vmax.f32 %v1662_v49, 0.0  ;;  %v1727_v40 = vmax.f32 %v1551_v20, 0.0  ;;  %v7492_v60 = vld [vmem:[%s11451_s5 + $0x50] sm:$0xff]   ;;  %v7497_v13 = vld [vmem:[%s11451_s5 + $0x78] sm:$0xff]  }
 0x24d   : > { %v1730_v46 = vmax.f32 %v1553_v27, 0.0  ;;  %v1668_v26 = vadd.f32 %v1667_v53, %v8813_v6  ;;  %v1729_v54 = vmax.f32 %v1664_v55, 0.0  ;;  %v7483_v6 = vld [vmem:[%s11451_s5 + $0x8] sm:$0xff]  }
 0x24e   : > { %v1732_v30 = vmax.f32 %v1666_v63, 0.0  ;;  %v1731_v23 = vmax.f32 %v1555_v17, 0.0 }
 0x24f   : > { %v1794_v1 = vpack.c.bf16 %v1730_v46, %v1726_v61  ;;  %v1733_v19 = vmax.f32 %v1668_v26, 0.0 }
 0x250   : > { %v1796_v35 = vpack.c.bf16 %v1732_v30, %v1728_v59  ;;  %v1795_v12 = vpack.c.bf16 %v1731_v23, %v1727_v40  ;;  %v7500_v59 = vld [vmem:[%s11452_s7 + $0x4] ss:$8 sps:$4 sm:$0xff]  }
 0x251   : > { %v1797_v0 = vpack.c.bf16 %v1733_v19, %v1729_v54 }
 0x252   : > { %2100 = vmatprep.subr.bf16.mxu0 %v1795_v12 }
 0x253   : > { %2293 = vmatprep.subr.bf16.mxu1 %v1797_v0  ;;  %2101 = vmatpush1.bf16.msra.mxu0 %v1794_v1 }
 0x254   : > { %2294 = vmatpush1.bf16.msra.mxu1 %v1796_v35 }
 0x256   : > { %2119 = vmatmul.mubr.bf16.vlgmr.msra.gmra.mrb[32].mxu0 %v7482_v42 }
 0x257   : > { %2312 = vmatmul.mubr.bf16.vlgmr.msra.gmra.mrb[32].mxu1 %v7482_v42  ;;  %2128 = vmatprep.mubr.bf16.mxu0 %v11442_v47 }
 0x258   : > { %2321 = vmatprep.mubr.bf16.mxu1 %v11442_v47 }
 0x25e   : > { %2129 = vmatmul.mubr.bf16.gmra.mrb[36].mxu0 %v7483_v6 }
 0x25f   : > { %2322 = vmatmul.mubr.bf16.gmra.mrb[36].mxu1 %v7483_v6  ;;  %2138 = vmatprep.mubr.bf16.mxu0 %v11442_v47 }
 0x260   : > { %2331 = vmatprep.mubr.bf16.mxu1 %v11442_v47 }
 0x266   : > { %2139 = vmatmul.mubr.bf16.gmra.mrb[40].mxu0 %v7484_v51 }
 0x267   : > { %2332 = vmatmul.mubr.bf16.gmra.mrb[40].mxu1 %v7484_v51  ;;  %2148 = vmatprep.mubr.bf16.mxu0 %v11442_v47 }
 0x268   : > { %2341 = vmatprep.mubr.bf16.mxu1 %v11442_v47 }
 0x26e   : > { %2149 = vmatmul.mubr.bf16.gmra.mrb[44].mxu0 %v7485_v15 }
 0x26f   : > { %2342 = vmatmul.mubr.bf16.gmra.mrb[44].mxu1 %v7485_v15  ;;  %2158 = vmatprep.mubr.bf16.mxu0 %v11442_v47 }
 0x270   : > { %2351 = vmatprep.mubr.bf16.mxu1 %v11442_v47 }
 0x276   : > { %2159 = vmatmul.mubr.bf16.gmra.mrb[48].mxu0 %v7486_v34 }
 0x277   : > { %2352 = vmatmul.mubr.bf16.gmra.mrb[48].mxu1 %v7486_v34  ;;  %2168 = vmatprep.mubr.bf16.mxu0 %v11442_v47 }
 0x278   : > { %2361 = vmatprep.mubr.bf16.mxu1 %v11442_v47 }
 0x27e   : > { %2169 = vmatmul.mubr.bf16.gmra.mrb[52].mxu0 %v7487_v14 }
 0x27f   : > { %2362 = vmatmul.mubr.bf16.gmra.mrb[52].mxu1 %v7487_v14  ;;  %2178 = vmatprep.mubr.bf16.mxu0 %v11442_v47 }
 0x280   : > { %2371 = vmatprep.mubr.bf16.mxu1 %v11442_v47 }
 0x286   : > { %2179 = vmatmul.mubr.bf16.gmra.mrb[56].mxu0 %v7488_v24 }
 0x287   : > { %2372 = vmatmul.mubr.bf16.gmra.mrb[56].mxu1 %v7488_v24  ;;  %2188 = vmatprep.mubr.bf16.mxu0 %v11442_v47 }
 0x288   : > { %2381 = vmatprep.mubr.bf16.mxu1 %v11442_v47 }
 0x28e   : > { %2189 = vmatmul.mubr.bf16.gmra.mrb[60].mxu0 %v7489_v7 }
 0x28f   : > { %2382 = vmatmul.mubr.bf16.gmra.mrb[60].mxu1 %v7489_v7  ;;  %2198 = vmatprep.mubr.bf16.mxu0 %v11442_v47 }
 0x290   : > { %2391 = vmatprep.mubr.bf16.mxu1 %v11442_v47 }
 0x296   : > { %2199 = vmatmul.mubr.bf16.gmra.mrb[64].mxu0 %v7490_v29 }
 0x297   : > { %2392 = vmatmul.mubr.bf16.gmra.mrb[64].mxu1 %v7490_v29  ;;  %2208 = vmatprep.mubr.bf16.mxu0 %v11442_v47 }
 0x298   : > { %2401 = vmatprep.mubr.bf16.mxu1 %v11442_v47 }
 0x29e   : > { %2209 = vmatmul.mubr.bf16.gmra.mrb[68].mxu0 %v7491_v32 }
 0x29f   : > { %2402 = vmatmul.mubr.bf16.gmra.mrb[68].mxu1 %v7491_v32  ;;  %2218 = vmatprep.mubr.bf16.mxu0 %v11442_v47 }
 0x2a0   : > { %2411 = vmatprep.mubr.bf16.mxu1 %v11442_v47 }
 0x2a6   : > { %2219 = vmatmul.mubr.bf16.gmra.mrb[72].mxu0 %v7492_v60 }
 0x2a7   : > { %2412 = vmatmul.mubr.bf16.gmra.mrb[72].mxu1 %v7492_v60  ;;  %2228 = vmatprep.mubr.bf16.mxu0 %v11442_v47 }
 0x2a8   : > { %2421 = vmatprep.mubr.bf16.mxu1 %v11442_v47 }
 0x2ae   : > { %2229 = vmatmul.mubr.bf16.gmra.mrb[76].mxu0 %v7493_v62 }
 0x2af   : > { %2422 = vmatmul.mubr.bf16.gmra.mrb[76].mxu1 %v7493_v62  ;;  %2238 = vmatprep.mubr.bf16.mxu0 %v11442_v47 }
 0x2b0   : > { %2431 = vmatprep.mubr.bf16.mxu1 %v11442_v47 }
 0x2b6   : > { %2239 = vmatmul.mubr.bf16.gmra.mrb[80].mxu0 %v7494_v44 }
 0x2b7   : > { %2432 = vmatmul.mubr.bf16.gmra.mrb[80].mxu1 %v7494_v44  ;;  %2248 = vmatprep.mubr.bf16.mxu0 %v11442_v47 }
 0x2b8   : > { %2441 = vmatprep.mubr.bf16.mxu1 %v11442_v47 }
 0x2be   : > { %2249 = vmatmul.mubr.bf16.gmra.mrb[84].mxu0 %v7495_v2 }
 0x2bf   : > { %2442 = vmatmul.mubr.bf16.gmra.mrb[84].mxu1 %v7495_v2  ;;  %2258 = vmatprep.mubr.bf16.mxu0 %v11442_v47 }
 0x2c0   : > { %2451 = vmatprep.mubr.bf16.mxu1 %v11442_v47 }
 0x2c6   : > { %2259 = vmatmul.mubr.bf16.gmra.mrb[88].mxu0 %v7496_v25 }
 0x2c7   : > { %2452 = vmatmul.mubr.bf16.gmra.mrb[88].mxu1 %v7496_v25  ;;  %2268 = vmatprep.mubr.bf16.mxu0 %v11442_v47 }
 0x2c8   : > { %2461 = vmatprep.mubr.bf16.mxu1 %v11442_v47 }
 0x2ce   : > { %2269 = vmatmul.mubr.bf16.gmra.mrb[92].mxu0 %v7497_v13 }
 0x2cf   : > { %2462 = vmatmul.mubr.bf16.gmra.mrb[92].mxu1 %v7497_v13  ;;  %3080 = vmatprep.mubr.bf16.mxu0 %v7500_v59 }
 0x2d0   : > { %3273 = vmatprep.mubr.bf16.mxu1 %v7500_v59 }
 0x329   : > { %v2120_v31 = vpop.f32.mrb[32].mxu0 }
 0x32a   : > { %v2313_v49 = vpop.f32.mrb[32].mxu1  ;;  %v2121_v20 = vadd.f32 %v2120_v31, %v8948_v43  ;;  %v2122_v37 = vpop.f32.mrb[33].mxu0 }
 0x32b   : > { %v2314_v8 = vadd.f32 %v2313_v49, %v8948_v43  ;;  %v2315_v55 = vpop.f32.mrb[33].mxu1  ;;  %v2123_v27 = vadd.f32 %v2122_v37, %v8948_v43  ;;  %v2124_v63 = vpop.f32.mrb[34].mxu0 }
 0x32c   : > { %v2316_v11 = vadd.f32 %v2315_v55, %v8948_v43  ;;  %v2317_v47 = vpop.f32.mrb[34].mxu1  ;;  %v2125_v18 = vadd.f32 %v2124_v63, %v8831_v39  ;;  %v2126_v61 = vpop.f32.mrb[35].mxu0  ;;  %v2472_v40 = vmax.f32 %v2121_v20, 0.0 }
 0x32d   : > { %v2318_v53 = vadd.f32 %v2317_v47, %v8831_v39  ;;  %v2319_v46 = vpop.f32.mrb[35].mxu1  ;;  %v2127_v17 = vadd.f32 %v2126_v61, %v8831_v39  ;;  %v2474_v30 = vmax.f32 %v2314_v8, 0.0  ;;  %v2473_v1 = vmax.f32 %v2123_v27, 0.0 }
 0x32e   : > { %v2320_v26 = vadd.f32 %v2319_v46, %v8831_v39  ;;  %v2476_v54 = vmax.f32 %v2125_v18, 0.0  ;;  %v2475_v23 = vmax.f32 %v2316_v11, 0.0 }
 0x32f   : > { %v2478_v43 = vmax.f32 %v2318_v53, 0.0  ;;  %v2477_v19 = vmax.f32 %v2127_v17, 0.0 }
 0x330   : > { %v2479_v35 = vmax.f32 %v2320_v26, 0.0  ;;  %v2632_v12 = vpack.c.bf16 %v2476_v54, %v2472_v40 }
 0x331   : > { %v2634_v0 = vpack.c.bf16 %v2478_v43, %v2474_v30  ;;  %v2633_v42 = vpack.c.bf16 %v2477_v19, %v2473_v1  ;;  %v2130_v51 = vpop.f32.mrb[36].mxu0 }
 0x332   : > { %v2635_v6 = vpack.c.bf16 %v2479_v35, %v2475_v23  ;;  %v2323_v39 = vpop.f32.mrb[36].mxu1  ;;  %v2131_v15 = vadd.f32 %v2130_v51, %v8964_v38  ;;  %v2132_v14 = vpop.f32.mrb[37].mxu0 }
 0x333   : > { %v2324_v34 = vadd.f32 %v2323_v39, %v8964_v38  ;;  %v2325_v24 = vpop.f32.mrb[37].mxu1  ;;  %v2133_v7 = vadd.f32 %v2132_v14, %v8964_v38  ;;  %v2134_v32 = vpop.f32.mrb[38].mxu0  ;;  %3048 = vmatprep.subr.bf16.mxu0 %v2633_v42 }
 0x334   : > { %v2326_v29 = vadd.f32 %v2325_v24, %v8964_v38  ;;  %v2327_v60 = vpop.f32.mrb[38].mxu1  ;;  %3241 = vmatprep.subr.bf16.mxu1 %v2635_v6  ;;  %v2135_v62 = vadd.f32 %v2134_v32, %v8850_v57  ;;  %v2136_v2 = vpop.f32.mrb[39].mxu0  ;;  %3049 = vmatpush1.bf16.msra.mxu0 %v2632_v12  ;;  %v2480_v49 = vmax.f32 %v2131_v15, 0.0 }
 0x335   : > { %v2328_v44 = vadd.f32 %v2327_v60, %v8850_v57  ;;  %v2329_v25 = vpop.f32.mrb[39].mxu1  ;;  %3242 = vmatpush1.bf16.msra.mxu1 %v2634_v0  ;;  %v2137_v13 = vadd.f32 %v2136_v2, %v8850_v57  ;;  %v2482_v20 = vmax.f32 %v2324_v34, 0.0  ;;  %v2481_v37 = vmax.f32 %v2133_v7, 0.0 }
 0x336   : > { %v2330_v31 = vadd.f32 %v2329_v25, %v8850_v57  ;;  %v2484_v8 = vmax.f32 %v2135_v62, 0.0  ;;  %v2483_v55 = vmax.f32 %v2326_v29, 0.0 }
 0x337   : > { %v2486_v38 = vmax.f32 %v2328_v44, 0.0  ;;  %v2485_v27 = vmax.f32 %v2137_v13, 0.0 }
 0x338   : > { %v2487_v11 = vmax.f32 %v2330_v31, 0.0  ;;  %v2636_v63 = vpack.c.bf16 %v2484_v8, %v2480_v49 }
 0x339   : > { %v2638_v47 = vpack.c.bf16 %v2486_v38, %v2482_v20  ;;  %v2637_v18 = vpack.c.bf16 %v2485_v27, %v2481_v37  ;;  %v2140_v61 = vpop.f32.mrb[40].mxu0 }
 0x33a   : > { %v2639_v53 = vpack.c.bf16 %v2487_v11, %v2483_v55  ;;  %v2333_v46 = vpop.f32.mrb[40].mxu1  ;;  %v2141_v17 = vadd.f32 %v2140_v61, %v8974_v50  ;;  %v2142_v59 = vpop.f32.mrb[41].mxu0 }
 0x33b   : > { %v2334_v26 = vadd.f32 %v2333_v46, %v8974_v50  ;;  %v2335_v57 = vpop.f32.mrb[41].mxu1  ;;  %v2143_v40 = vadd.f32 %v2142_v59, %v8974_v50  ;;  %v2144_v54 = vpop.f32.mrb[42].mxu0  ;;  %3050 = vmatprep.subr.bf16.mxu0 %v2637_v18 }
 0x33c   : > { %v2336_v30 = vadd.f32 %v2335_v57, %v8974_v50  ;;  %v2337_v43 = vpop.f32.mrb[42].mxu1  ;;  %3243 = vmatprep.subr.bf16.mxu1 %v2639_v53  ;;  %v2145_v1 = vadd.f32 %v2144_v54, %v8870_v41  ;;  %v2146_v19 = vpop.f32.mrb[43].mxu0  ;;  %3051 = vmatpush1.bf16.msra.mxu0 %v2636_v63  ;;  %v2488_v42 = vmax.f32 %v2141_v17, 0.0 }
 0x33d   : > { %v2338_v23 = vadd.f32 %v2337_v43, %v8870_v41  ;;  %v2339_v35 = vpop.f32.mrb[43].mxu1  ;;  %3244 = vmatpush1.bf16.msra.mxu1 %v2638_v47  ;;  %v2147_v12 = vadd.f32 %v2146_v19, %v8870_v41  ;;  %v2490_v6 = vmax.f32 %v2334_v26, 0.0  ;;  %v2489_v39 = vmax.f32 %v2143_v40, 0.0 }
 0x33e   : > { %v2340_v0 = vadd.f32 %v2339_v35, %v8870_v41  ;;  %v2492_v51 = vmax.f32 %v2145_v1, 0.0  ;;  %v2491_v15 = vmax.f32 %v2336_v30, 0.0 }
 0x33f   : > { %v2494_v50 = vmax.f32 %v2338_v23, 0.0  ;;  %v2493_v34 = vmax.f32 %v2147_v12, 0.0 }
 0x340   : > { %v2495_v14 = vmax.f32 %v2340_v0, 0.0  ;;  %v2640_v24 = vpack.c.bf16 %v2492_v51, %v2488_v42 }
 0x341   : > { %v2642_v7 = vpack.c.bf16 %v2494_v50, %v2490_v6  ;;  %v2641_v29 = vpack.c.bf16 %v2493_v34, %v2489_v39  ;;  %v2150_v60 = vpop.f32.mrb[44].mxu0 }
 0x342   : > { %v2643_v32 = vpack.c.bf16 %v2495_v14, %v2491_v15  ;;  %v2343_v62 = vpop.f32.mrb[44].mxu1  ;;  %v2151_v44 = vadd.f32 %v2150_v60, %v8990_v56  ;;  %v2152_v25 = vpop.f32.mrb[45].mxu0 }
 0x343   : > { %v2344_v2 = vadd.f32 %v2343_v62, %v8990_v56  ;;  %v2345_v41 = vpop.f32.mrb[45].mxu1  ;;  %v2153_v13 = vadd.f32 %v2152_v25, %v8990_v56  ;;  %v2154_v49 = vpop.f32.mrb[46].mxu0  ;;  %3052 = vmatprep.subr.bf16.mxu0 %v2641_v29 }
 0x344   : > { %v2346_v31 = vadd.f32 %v2345_v41, %v8990_v56  ;;  %v2347_v20 = vpop.f32.mrb[46].mxu1  ;;  %3245 = vmatprep.subr.bf16.mxu1 %v2643_v32  ;;  %v2155_v8 = vadd.f32 %v2154_v49, %v8886_v52  ;;  %v2156_v37 = vpop.f32.mrb[47].mxu0  ;;  %3053 = vmatpush1.bf16.msra.mxu0 %v2640_v24  ;;  %v2496_v63 = vmax.f32 %v2151_v44, 0.0 }
 0x345   : > { %v2348_v38 = vadd.f32 %v2347_v20, %v8886_v52  ;;  %v2349_v55 = vpop.f32.mrb[47].mxu1  ;;  %3246 = vmatpush1.bf16.msra.mxu1 %v2642_v7  ;;  %v2157_v27 = vadd.f32 %v2156_v37, %v8886_v52  ;;  %v2498_v47 = vmax.f32 %v2344_v2, 0.0  ;;  %v2497_v53 = vmax.f32 %v2153_v13, 0.0 }
 0x346   : > { %v2350_v11 = vadd.f32 %v2349_v55, %v8886_v52  ;;  %v2500_v18 = vmax.f32 %v2155_v8, 0.0  ;;  %v2499_v61 = vmax.f32 %v2346_v31, 0.0 }
 0x347   : > { %v2502_v56 = vmax.f32 %v2348_v38, 0.0  ;;  %v2501_v46 = vmax.f32 %v2157_v27, 0.0 }
 0x348   : > { %v2503_v17 = vmax.f32 %v2350_v11, 0.0  ;;  %v2644_v26 = vpack.c.bf16 %v2500_v18, %v2496_v63 }
 0x349   : > { %v2646_v59 = vpack.c.bf16 %v2502_v56, %v2498_v47  ;;  %v2645_v57 = vpack.c.bf16 %v2501_v46, %v2497_v53  ;;  %v2160_v30 = vpop.f32.mrb[48].mxu0 }
 0x34a   : > { %v2647_v40 = vpack.c.bf16 %v2503_v17, %v2499_v61  ;;  %v2353_v54 = vpop.f32.mrb[48].mxu1  ;;  %v2161_v43 = vadd.f32 %v2160_v30, %v9000_v22  ;;  %v2162_v23 = vpop.f32.mrb[49].mxu0 }
 0x34b   : > { %v2354_v1 = vadd.f32 %v2353_v54, %v9000_v22  ;;  %v2355_v52 = vpop.f32.mrb[49].mxu1  ;;  %v2163_v19 = vadd.f32 %v2162_v23, %v9000_v22  ;;  %v2164_v12 = vpop.f32.mrb[50].mxu0  ;;  %3054 = vmatprep.subr.bf16.mxu0 %v2645_v57 }
 0x34c   : > { %v2356_v35 = vadd.f32 %v2355_v52, %v9000_v22  ;;  %v2357_v0 = vpop.f32.mrb[50].mxu1  ;;  %3247 = vmatprep.subr.bf16.mxu1 %v2647_v40  ;;  %v2165_v42 = vadd.f32 %v2164_v12, %v8904_v16  ;;  %v2166_v51 = vpop.f32.mrb[51].mxu0  ;;  %3055 = vmatpush1.bf16.msra.mxu0 %v2644_v26  ;;  %v2504_v34 = vmax.f32 %v2161_v43, 0.0 }
 0x34d   : > { %v2358_v6 = vadd.f32 %v2357_v0, %v8904_v16  ;;  %v2359_v50 = vpop.f32.mrb[51].mxu1  ;;  %3248 = vmatpush1.bf16.msra.mxu1 %v2646_v59  ;;  %v2167_v39 = vadd.f32 %v2166_v51, %v8904_v16  ;;  %v2506_v14 = vmax.f32 %v2354_v1, 0.0  ;;  %v2505_v7 = vmax.f32 %v2163_v19, 0.0 }
 0x34e   : > { %v2360_v15 = vadd.f32 %v2359_v50, %v8904_v16  ;;  %v2508_v24 = vmax.f32 %v2165_v42, 0.0  ;;  %v2507_v29 = vmax.f32 %v2356_v35, 0.0 }
 0x34f   : > { %v2510_v22 = vmax.f32 %v2358_v6, 0.0  ;;  %v2509_v32 = vmax.f32 %v2167_v39, 0.0 }
 0x350   : > { %v2511_v60 = vmax.f32 %v2360_v15, 0.0  ;;  %v2648_v62 = vpack.c.bf16 %v2508_v24, %v2504_v34 }
 0x351   : > { %v2650_v44 = vpack.c.bf16 %v2510_v22, %v2506_v14  ;;  %v2649_v2 = vpack.c.bf16 %v2509_v32, %v2505_v7  ;;  %v2170_v41 = vpop.f32.mrb[52].mxu0 }
 0x352   : > { %v2651_v25 = vpack.c.bf16 %v2511_v60, %v2507_v29  ;;  %v2363_v13 = vpop.f32.mrb[52].mxu1  ;;  %v2171_v31 = vadd.f32 %v2170_v41, %v9016_v58  ;;  %v2172_v20 = vpop.f32.mrb[53].mxu0 }
 0x353   : > { %v2364_v49 = vadd.f32 %v2363_v13, %v9016_v58  ;;  %v2365_v16 = vpop.f32.mrb[53].mxu1  ;;  %v2173_v8 = vadd.f32 %v2172_v20, %v9016_v58  ;;  %v2174_v37 = vpop.f32.mrb[54].mxu0  ;;  %3056 = vmatprep.subr.bf16.mxu0 %v2649_v2 }
 0x354   : > { %v2366_v38 = vadd.f32 %v2365_v16, %v9016_v58  ;;  %v2367_v55 = vpop.f32.mrb[54].mxu1  ;;  %3249 = vmatprep.subr.bf16.mxu1 %v2651_v25  ;;  %v2175_v27 = vadd.f32 %v2174_v37, %v8923_v48  ;;  %v2176_v63 = vpop.f32.mrb[55].mxu0  ;;  %3057 = vmatpush1.bf16.msra.mxu0 %v2648_v62  ;;  %v2512_v53 = vmax.f32 %v2171_v31, 0.0 }
 0x355   : > { %v2368_v11 = vadd.f32 %v2367_v55, %v8923_v48  ;;  %v2369_v47 = vpop.f32.mrb[55].mxu1  ;;  %3250 = vmatpush1.bf16.msra.mxu1 %v2650_v44  ;;  %v2177_v18 = vadd.f32 %v2176_v63, %v8923_v48  ;;  %v2514_v61 = vmax.f32 %v2364_v49, 0.0  ;;  %v2513_v17 = vmax.f32 %v2173_v8, 0.0 }
 0x356   : > { %v2370_v56 = vadd.f32 %v2369_v47, %v8923_v48  ;;  %v2516_v46 = vmax.f32 %v2175_v27, 0.0  ;;  %v2515_v26 = vmax.f32 %v2366_v38, 0.0 }
 0x357   : > { %v2518_v58 = vmax.f32 %v2368_v11, 0.0  ;;  %v2517_v59 = vmax.f32 %v2177_v18, 0.0 }
 0x358   : > { %v2519_v57 = vmax.f32 %v2370_v56, 0.0  ;;  %v2652_v40 = vpack.c.bf16 %v2516_v46, %v2512_v53 }
 0x359   : > { %v2654_v30 = vpack.c.bf16 %v2518_v58, %v2514_v61  ;;  %v2653_v54 = vpack.c.bf16 %v2517_v59, %v2513_v17  ;;  %v2180_v1 = vpop.f32.mrb[56].mxu0 }
 0x35a   : > { %v2655_v43 = vpack.c.bf16 %v2519_v57, %v2515_v26  ;;  %v2373_v23 = vpop.f32.mrb[56].mxu1  ;;  %v2181_v52 = vadd.f32 %v2180_v1, %v9026_v4  ;;  %v2182_v35 = vpop.f32.mrb[57].mxu0 }
 0x35b   : > { %v2374_v19 = vadd.f32 %v2373_v23, %v9026_v4  ;;  %v2375_v48 = vpop.f32.mrb[57].mxu1  ;;  %v2183_v12 = vadd.f32 %v2182_v35, %v9026_v4  ;;  %v2184_v42 = vpop.f32.mrb[58].mxu0  ;;  %3058 = vmatprep.subr.bf16.mxu0 %v2653_v54 }
 0x35c   : > { %v2376_v0 = vadd.f32 %v2375_v48, %v9026_v4  ;;  %v2377_v6 = vpop.f32.mrb[58].mxu1  ;;  %3251 = vmatprep.subr.bf16.mxu1 %v2655_v43  ;;  %v2185_v51 = vadd.f32 %v2184_v42, %v8940_v36  ;;  %v2186_v39 = vpop.f32.mrb[59].mxu0  ;;  %3059 = vmatpush1.bf16.msra.mxu0 %v2652_v40  ;;  %v2520_v24 = vmax.f32 %v2181_v52, 0.0 }
 0x35d   : > { %v2378_v50 = vadd.f32 %v2377_v6, %v8940_v36  ;;  %v2379_v15 = vpop.f32.mrb[59].mxu1  ;;  %3252 = vmatpush1.bf16.msra.mxu1 %v2654_v30  ;;  %v2187_v34 = vadd.f32 %v2186_v39, %v8940_v36  ;;  %v2522_v22 = vmax.f32 %v2374_v19, 0.0  ;;  %v2521_v29 = vmax.f32 %v2183_v12, 0.0 }
 0x35e   : > { %v2380_v14 = vadd.f32 %v2379_v15, %v8940_v36  ;;  %v2524_v7 = vmax.f32 %v2185_v51, 0.0  ;;  %v2523_v32 = vmax.f32 %v2376_v0, 0.0 }
 0x35f   : > { %v2526_v4 = vmax.f32 %v2378_v50, 0.0  ;;  %v2525_v60 = vmax.f32 %v2187_v34, 0.0 }
 0x360   : > { %v2527_v62 = vmax.f32 %v2380_v14, 0.0  ;;  %v2656_v44 = vpack.c.bf16 %v2524_v7, %v2520_v24 }
 0x361   : > { %v2658_v2 = vpack.c.bf16 %v2526_v4, %v2522_v22  ;;  %v2657_v25 = vpack.c.bf16 %v2525_v60, %v2521_v29  ;;  %v2190_v13 = vpop.f32.mrb[60].mxu0 }
 0x362   : > { %v2659_v41 = vpack.c.bf16 %v2527_v62, %v2523_v32  ;;  %v2383_v31 = vpop.f32.mrb[60].mxu1  ;;  %v2191_v49 = vadd.f32 %v2190_v13, %v9042_v28  ;;  %v2192_v16 = vpop.f32.mrb[61].mxu0 }
 0x363   : > { %v2384_v20 = vadd.f32 %v2383_v31, %v9042_v28  ;;  %v2385_v36 = vpop.f32.mrb[61].mxu1  ;;  %v2193_v8 = vadd.f32 %v2192_v16, %v9042_v28  ;;  %v2194_v37 = vpop.f32.mrb[62].mxu0  ;;  %3060 = vmatprep.subr.bf16.mxu0 %v2657_v25 }
 0x364   : > { %v2386_v38 = vadd.f32 %v2385_v36, %v9042_v28  ;;  %v2387_v55 = vpop.f32.mrb[62].mxu1  ;;  %3253 = vmatprep.subr.bf16.mxu1 %v2659_v41  ;;  %v2195_v27 = vadd.f32 %v2194_v37, %v8953_v9  ;;  %v2196_v63 = vpop.f32.mrb[63].mxu0  ;;  %3061 = vmatpush1.bf16.msra.mxu0 %v2656_v44  ;;  %v2528_v53 = vmax.f32 %v2191_v49, 0.0 }
 0x365   : > { %v2388_v11 = vadd.f32 %v2387_v55, %v8953_v9  ;;  %v2389_v47 = vpop.f32.mrb[63].mxu1  ;;  %3254 = vmatpush1.bf16.msra.mxu1 %v2658_v2  ;;  %v2197_v18 = vadd.f32 %v2196_v63, %v8953_v9  ;;  %v2530_v61 = vmax.f32 %v2384_v20, 0.0  ;;  %v2529_v58 = vmax.f32 %v2193_v8, 0.0 }
 0x366   : > { %v2390_v56 = vadd.f32 %v2389_v47, %v8953_v9  ;;  %v2532_v46 = vmax.f32 %v2195_v27, 0.0  ;;  %v2531_v17 = vmax.f32 %v2386_v38, 0.0 }
 0x367   : > { %v2534_v28 = vmax.f32 %v2388_v11, 0.0  ;;  %v2533_v26 = vmax.f32 %v2197_v18, 0.0 }
 0x368   : > { %v2535_v59 = vmax.f32 %v2390_v56, 0.0  ;;  %v2660_v57 = vpack.c.bf16 %v2532_v46, %v2528_v53 }
 0x369   : > { %v2662_v40 = vpack.c.bf16 %v2534_v28, %v2530_v61  ;;  %v2661_v30 = vpack.c.bf16 %v2533_v26, %v2529_v58  ;;  %v2200_v43 = vpop.f32.mrb[64].mxu0 }
 0x36a   : > { %v2663_v54 = vpack.c.bf16 %v2535_v59, %v2531_v17  ;;  %v2393_v1 = vpop.f32.mrb[64].mxu1  ;;  %v2201_v23 = vadd.f32 %v2200_v43, %v9049_v45  ;;  %v2202_v19 = vpop.f32.mrb[65].mxu0 }
 0x36b   : > { %v2394_v52 = vadd.f32 %v2393_v1, %v9049_v45  ;;  %v2395_v9 = vpop.f32.mrb[65].mxu1  ;;  %v2203_v35 = vadd.f32 %v2202_v19, %v9049_v45  ;;  %v2204_v12 = vpop.f32.mrb[66].mxu0  ;;  %3062 = vmatprep.subr.bf16.mxu0 %v2661_v30 }
 0x36c   : > { %v2396_v48 = vadd.f32 %v2395_v9, %v9049_v45  ;;  %v2397_v0 = vpop.f32.mrb[66].mxu1  ;;  %3255 = vmatprep.subr.bf16.mxu1 %v2663_v54  ;;  %v2205_v42 = vadd.f32 %v2204_v12, %v8966_v5  ;;  %v2206_v51 = vpop.f32.mrb[67].mxu0  ;;  %3063 = vmatpush1.bf16.msra.mxu0 %v2660_v57  ;;  %v2536_v34 = vmax.f32 %v2201_v23, 0.0 }
 0x36d   : > { %v2398_v6 = vadd.f32 %v2397_v0, %v8966_v5  ;;  %v2399_v50 = vpop.f32.mrb[67].mxu1  ;;  %3256 = vmatpush1.bf16.msra.mxu1 %v2662_v40  ;;  %v2207_v39 = vadd.f32 %v2206_v51, %v8966_v5  ;;  %v2538_v14 = vmax.f32 %v2394_v52, 0.0  ;;  %v2537_v22 = vmax.f32 %v2203_v35, 0.0 }
 0x36e   : > { %v2400_v15 = vadd.f32 %v2399_v50, %v8966_v5  ;;  %v2540_v24 = vmax.f32 %v2205_v42, 0.0  ;;  %v2539_v7 = vmax.f32 %v2396_v48, 0.0 }
 0x36f   : > { %v2542_v45 = vmax.f32 %v2398_v6, 0.0  ;;  %v2541_v4 = vmax.f32 %v2207_v39, 0.0 }
 0x370   : > { %v2543_v29 = vmax.f32 %v2400_v15, 0.0  ;;  %v2664_v32 = vpack.c.bf16 %v2540_v24, %v2536_v34 }
 0x371   : > { %v2666_v60 = vpack.c.bf16 %v2542_v45, %v2538_v14  ;;  %v2665_v62 = vpack.c.bf16 %v2541_v4, %v2537_v22  ;;  %v2210_v2 = vpop.f32.mrb[68].mxu0 }
 0x372   : > { %v2667_v44 = vpack.c.bf16 %v2543_v29, %v2539_v7  ;;  %v2403_v25 = vpop.f32.mrb[68].mxu1  ;;  %v2211_v41 = vadd.f32 %v2210_v2, %v9057_v33  ;;  %v2212_v31 = vpop.f32.mrb[69].mxu0  ;;  %v11453_v29 = vld [vmem:[#allocation27_spill] sm:$0xff] }
 0x373   : > { %v2404_v13 = vadd.f32 %v2403_v25, %v9057_v33  ;;  %v2405_v5 = vpop.f32.mrb[69].mxu1  ;;  %v2213_v49 = vadd.f32 %v2212_v31, %v9057_v33  ;;  %v2214_v16 = vpop.f32.mrb[70].mxu0  ;;  %3064 = vmatprep.subr.bf16.mxu0 %v2665_v62 }
 0x374   : > { %v2406_v20 = vadd.f32 %v2405_v5, %v9057_v33  ;;  %v2407_v36 = vpop.f32.mrb[70].mxu1  ;;  %3257 = vmatprep.subr.bf16.mxu1 %v2667_v44  ;;  %v2215_v8 = vadd.f32 %v2214_v16, %v8979_v10  ;;  %v2216_v37 = vpop.f32.mrb[71].mxu0  ;;  %3065 = vmatpush1.bf16.msra.mxu0 %v2664_v32  ;;  %v2544_v63 = vmax.f32 %v2211_v41, 0.0 }
 0x375   : > { %v2408_v38 = vadd.f32 %v2407_v36, %v8979_v10  ;;  %v2409_v55 = vpop.f32.mrb[71].mxu1  ;;  %3258 = vmatpush1.bf16.msra.mxu1 %v2666_v60  ;;  %v2217_v27 = vadd.f32 %v2216_v37, %v8979_v10  ;;  %v2546_v47 = vmax.f32 %v2404_v13, 0.0  ;;  %v2545_v56 = vmax.f32 %v2213_v49, 0.0  ;;  %v11454_v13 = vld [vmem:[#allocation23_spill] sm:$0xff] }
 0x376   : > { %v2410_v11 = vadd.f32 %v2409_v55, %v8979_v10  ;;  %v2548_v18 = vmax.f32 %v2215_v8, 0.0  ;;  %v2547_v53 = vmax.f32 %v2406_v20, 0.0 }
 0x377   : > { %v2550_v33 = vmax.f32 %v2408_v38, 0.0  ;;  %v2549_v61 = vmax.f32 %v2217_v27, 0.0 }
 0x378   : > { %v2551_v46 = vmax.f32 %v2410_v11, 0.0  ;;  %v2668_v28 = vpack.c.bf16 %v2548_v18, %v2544_v63 }
 0x379   : > { %v2670_v58 = vpack.c.bf16 %v2550_v33, %v2546_v47  ;;  %v2669_v17 = vpack.c.bf16 %v2549_v61, %v2545_v56  ;;  %v2220_v59 = vpop.f32.mrb[72].mxu0 }
 0x37a   : > { %v2671_v26 = vpack.c.bf16 %v2551_v46, %v2547_v53  ;;  %v2413_v57 = vpop.f32.mrb[72].mxu1  ;;  %v2221_v40 = vadd.f32 %v2220_v59, %v9062_v21  ;;  %v2222_v54 = vpop.f32.mrb[73].mxu0 }
 0x37b   : > { %v2414_v30 = vadd.f32 %v2413_v57, %v9062_v21  ;;  %v2415_v10 = vpop.f32.mrb[73].mxu1  ;;  %v2223_v43 = vadd.f32 %v2222_v54, %v9062_v21  ;;  %v2224_v23 = vpop.f32.mrb[74].mxu0  ;;  %3066 = vmatprep.subr.bf16.mxu0 %v2669_v17 }
 0x37c   : > { %v2416_v1 = vadd.f32 %v2415_v10, %v9062_v21  ;;  %v2417_v52 = vpop.f32.mrb[74].mxu1  ;;  %3259 = vmatprep.subr.bf16.mxu1 %v2671_v26  ;;  %v2225_v19 = vadd.f32 %v2224_v23, %v8992_v3  ;;  %v2226_v35 = vpop.f32.mrb[75].mxu0  ;;  %3067 = vmatpush1.bf16.msra.mxu0 %v2668_v28  ;;  %v2552_v42 = vmax.f32 %v2221_v40, 0.0  ;;  %v11455_v28 = vld [vmem:[#allocation28_spill] sm:$0xff] }
 0x37d   : > { %v2418_v9 = vadd.f32 %v2417_v52, %v8992_v3  ;;  %v2419_v48 = vpop.f32.mrb[75].mxu1  ;;  %3260 = vmatpush1.bf16.msra.mxu1 %v2670_v58  ;;  %v2227_v12 = vadd.f32 %v2226_v35, %v8992_v3  ;;  %v2554_v6 = vmax.f32 %v2414_v30, 0.0  ;;  %v2553_v50 = vmax.f32 %v2223_v43, 0.0  ;;  %v11456_v10 = vld [vmem:[#allocation24_spill] sm:$0xff] }
 0x37e   : > { %v2420_v0 = vadd.f32 %v2419_v48, %v8992_v3  ;;  %v2556_v51 = vmax.f32 %v2225_v19, 0.0  ;;  %v2555_v39 = vmax.f32 %v2416_v1, 0.0 }
 0x37f   : > { %v2558_v21 = vmax.f32 %v2418_v9, 0.0  ;;  %v2557_v15 = vmax.f32 %v2227_v12, 0.0 }
 0x380   : > { %v2559_v34 = vmax.f32 %v2420_v0, 0.0  ;;  %v2672_v14 = vpack.c.bf16 %v2556_v51, %v2552_v42 }
 0x381   : > { %v2674_v24 = vpack.c.bf16 %v2558_v21, %v2554_v6  ;;  %v2673_v45 = vpack.c.bf16 %v2557_v15, %v2553_v50  ;;  %v2230_v7 = vpop.f32.mrb[76].mxu0 }
 0x382   : > { %v2675_v22 = vpack.c.bf16 %v2559_v34, %v2555_v39  ;;  %v2423_v4 = vpop.f32.mrb[76].mxu1  ;;  %v2231_v32 = vadd.f32 %v2230_v7, %v11453_v29  ;;  %v2232_v62 = vpop.f32.mrb[77].mxu0 }
 0x383   : > { %v2424_v60 = vadd.f32 %v2423_v4, %v11453_v29  ;;  %v2425_v3 = vpop.f32.mrb[77].mxu1  ;;  %v2233_v44 = vadd.f32 %v2232_v62, %v11453_v29  ;;  %v2234_v25 = vpop.f32.mrb[78].mxu0  ;;  %3068 = vmatprep.subr.bf16.mxu0 %v2673_v45  ;;  %v11457_v45 = vld [vmem:[#allocation29_spill] sm:$0xff] }
 0x384   : > { %v2426_v2 = vadd.f32 %v2425_v3, %v11453_v29  ;;  %v2427_v41 = vpop.f32.mrb[78].mxu1  ;;  %3261 = vmatprep.subr.bf16.mxu1 %v2675_v22  ;;  %v2235_v31 = vadd.f32 %v2234_v25, %v11454_v13  ;;  %v2236_v49 = vpop.f32.mrb[79].mxu0  ;;  %3069 = vmatpush1.bf16.msra.mxu0 %v2672_v14  ;;  %v2560_v8 = vmax.f32 %v2231_v32, 0.0 }
 0x385   : > { %v2428_v5 = vadd.f32 %v2427_v41, %v11454_v13  ;;  %v2429_v20 = vpop.f32.mrb[79].mxu1  ;;  %3262 = vmatpush1.bf16.msra.mxu1 %v2674_v24  ;;  %v2237_v16 = vadd.f32 %v2236_v49, %v11454_v13  ;;  %v2562_v38 = vmax.f32 %v2424_v60, 0.0  ;;  %v2561_v27 = vmax.f32 %v2233_v44, 0.0  ;;  %v11458_v44 = vld [vmem:[#allocation25_spill] sm:$0xff] }
 0x386   : > { %v2430_v36 = vadd.f32 %v2429_v20, %v11454_v13  ;;  %v2564_v37 = vmax.f32 %v2235_v31, 0.0  ;;  %v2563_v11 = vmax.f32 %v2426_v2, 0.0 }
 0x387   : > { %v2566_v55 = vmax.f32 %v2428_v5, 0.0  ;;  %v2565_v63 = vmax.f32 %v2237_v16, 0.0 }
 0x388   : > { %v2567_v47 = vmax.f32 %v2430_v36, 0.0  ;;  %v2676_v18 = vpack.c.bf16 %v2564_v37, %v2560_v8 }
 0x389   : > { %v2678_v33 = vpack.c.bf16 %v2566_v55, %v2562_v38  ;;  %v2677_v56 = vpack.c.bf16 %v2565_v63, %v2561_v27  ;;  %v2240_v61 = vpop.f32.mrb[80].mxu0 }
 0x38a   : > { %v2679_v53 = vpack.c.bf16 %v2567_v47, %v2563_v11  ;;  %v2433_v46 = vpop.f32.mrb[80].mxu1  ;;  %v2241_v58 = vadd.f32 %v2240_v61, %v11455_v28  ;;  %v2242_v26 = vpop.f32.mrb[81].mxu0 }
 0x38b   : > { %v2434_v17 = vadd.f32 %v2433_v46, %v11455_v28  ;;  %v2435_v59 = vpop.f32.mrb[81].mxu1  ;;  %v2243_v57 = vadd.f32 %v2242_v26, %v11455_v28  ;;  %v2244_v30 = vpop.f32.mrb[82].mxu0  ;;  %3070 = vmatprep.subr.bf16.mxu0 %v2677_v56  ;;  %v11459_v56 = vld [vmem:[#allocation30_spill] sm:$0xff] }
 0x38c   : > { %v2436_v40 = vadd.f32 %v2435_v59, %v11455_v28  ;;  %v2437_v54 = vpop.f32.mrb[82].mxu1  ;;  %3263 = vmatprep.subr.bf16.mxu1 %v2679_v53  ;;  %v2245_v43 = vadd.f32 %v2244_v30, %v11456_v10  ;;  %v2246_v23 = vpop.f32.mrb[83].mxu0  ;;  %3071 = vmatpush1.bf16.msra.mxu0 %v2676_v18  ;;  %v2568_v35 = vmax.f32 %v2241_v58, 0.0 }
 0x38d   : > { %v2438_v1 = vadd.f32 %v2437_v54, %v11456_v10  ;;  %v2439_v52 = vpop.f32.mrb[83].mxu1  ;;  %3264 = vmatpush1.bf16.msra.mxu1 %v2678_v33  ;;  %v2247_v19 = vadd.f32 %v2246_v23, %v11456_v10  ;;  %v2570_v48 = vmax.f32 %v2434_v17, 0.0  ;;  %v2569_v42 = vmax.f32 %v2243_v57, 0.0  ;;  %v11460_v57 = vld [vmem:[#allocation26_spill] sm:$0xff] }
 0x38e   : > { %v2440_v9 = vadd.f32 %v2439_v52, %v11456_v10  ;;  %v2572_v12 = vmax.f32 %v2245_v43, 0.0  ;;  %v2571_v6 = vmax.f32 %v2436_v40, 0.0 }
 0x38f   : > { %v2574_v0 = vmax.f32 %v2438_v1, 0.0  ;;  %v2573_v51 = vmax.f32 %v2247_v19, 0.0 }
 0x390   : > { %v2575_v21 = vmax.f32 %v2440_v9, 0.0  ;;  %v2680_v50 = vpack.c.bf16 %v2572_v12, %v2568_v35 }
 0x391   : > { %v2682_v39 = vpack.c.bf16 %v2574_v0, %v2570_v48  ;;  %v2681_v15 = vpack.c.bf16 %v2573_v51, %v2569_v42  ;;  %v2250_v14 = vpop.f32.mrb[84].mxu0  ;;  %v1988_v42 = vpop.permute.xlu0 %1987 }
 0x392   : > { %v2683_v34 = vpack.c.bf16 %v2575_v21, %v2571_v6  ;;  %v2443_v24 = vpop.f32.mrb[84].mxu1  ;;  %v2251_v22 = vadd.f32 %v2250_v14, %v11457_v45  ;;  %v2252_v4 = vpop.f32.mrb[85].mxu0 }
 0x393   : > { %v2444_v7 = vadd.f32 %v2443_v24, %v11457_v45  ;;  %v2445_v29 = vpop.f32.mrb[85].mxu1  ;;  %v2253_v32 = vadd.f32 %v2252_v4, %v11457_v45  ;;  %v2254_v62 = vpop.f32.mrb[86].mxu0  ;;  %3072 = vmatprep.subr.bf16.mxu0 %v2681_v15 }
 0x394   : > { %v2446_v60 = vadd.f32 %v2445_v29, %v11457_v45  ;;  %v2447_v3 = vpop.f32.mrb[86].mxu1  ;;  %3265 = vmatprep.subr.bf16.mxu1 %v2683_v34  ;;  %v2255_v2 = vadd.f32 %v2254_v62, %v11458_v44  ;;  %v2256_v41 = vpop.f32.mrb[87].mxu0  ;;  %3073 = vmatpush1.bf16.msra.mxu0 %v2680_v50  ;;  %v2576_v49 = vmax.f32 %v2251_v22, 0.0 }
 0x395   : > { %v2448_v25 = vadd.f32 %v2447_v3, %v11458_v44  ;;  %v2449_v13 = vpop.f32.mrb[87].mxu1  ;;  %3266 = vmatpush1.bf16.msra.mxu1 %v2682_v39  ;;  %v2257_v31 = vadd.f32 %v2256_v41, %v11458_v44  ;;  %v2578_v20 = vmax.f32 %v2444_v7, 0.0  ;;  %v2577_v8 = vmax.f32 %v2253_v32, 0.0  ;;  %v1983_v6 = vpop.permute.xlu1 %1982 }
 0x396   : > { %v2450_v5 = vadd.f32 %v2449_v13, %v11458_v44  ;;  %v2580_v16 = vmax.f32 %v2255_v2, 0.0  ;;  %v2579_v38 = vmax.f32 %v2446_v60, 0.0 }
 0x397   : > { %v2582_v36 = vmax.f32 %v2448_v25, 0.0  ;;  %v2581_v37 = vmax.f32 %v2257_v31, 0.0 }
 0x398   : > { %v2583_v55 = vmax.f32 %v2450_v5, 0.0  ;;  %v2684_v27 = vpack.c.bf16 %v2580_v16, %v2576_v49 }
 0x399   : > { %v2686_v11 = vpack.c.bf16 %v2582_v36, %v2578_v20  ;;  %v2685_v63 = vpack.c.bf16 %v2581_v37, %v2577_v8  ;;  %v2260_v18 = vpop.f32.mrb[88].mxu0 }
 0x39a   : > { %v2687_v47 = vpack.c.bf16 %v2583_v55, %v2579_v38  ;;  %v2453_v33 = vpop.f32.mrb[88].mxu1  ;;  %v2261_v53 = vadd.f32 %v2260_v18, %v11459_v56  ;;  %v2262_v46 = vpop.f32.mrb[89].mxu0  ;;  %v7506_v18 = vld [vmem:[%s11452_s7 + $0x20] ss:$8 sps:$4 sm:$0xff]  }
 0x39b   : > { %v2454_v61 = vadd.f32 %v2453_v33, %v11459_v56  ;;  %v2455_v28 = vpop.f32.mrb[89].mxu1  ;;  %v2263_v58 = vadd.f32 %v2262_v46, %v11459_v56  ;;  %v2264_v26 = vpop.f32.mrb[90].mxu0  ;;  %3074 = vmatprep.subr.bf16.mxu0 %v2685_v63  ;;  %v7503_v63 = vld [vmem:[%s11452_s7 + $0x10] ss:$8 sps:$4 sm:$0xff]   ;;  %v7507_v33 = vld [vmem:[%s11452_s7 + $0x34] ss:$8 sps:$4 sm:$0xff]  }
 0x39c   : > { %v2456_v17 = vadd.f32 %v2455_v28, %v11459_v56  ;;  %v2457_v59 = vpop.f32.mrb[90].mxu1  ;;  %3267 = vmatprep.subr.bf16.mxu1 %v2687_v47  ;;  %v2265_v40 = vadd.f32 %v2264_v26, %v11460_v57  ;;  %v2266_v54 = vpop.f32.mrb[91].mxu0  ;;  %3075 = vmatpush1.bf16.msra.mxu0 %v2684_v27  ;;  %v2584_v23 = vmax.f32 %v2261_v53, 0.0  ;;  %v7498_v27 = vld [vmem:[%s11452_s7] ss:$8 sps:$4 sm:$0xff]  }
 0x39d   : > { %v2458_v30 = vadd.f32 %v2457_v59, %v11460_v57  ;;  %v2459_v10 = vpop.f32.mrb[91].mxu1  ;;  %3268 = vmatpush1.bf16.msra.mxu1 %v2686_v11  ;;  %v2267_v43 = vadd.f32 %v2266_v54, %v11460_v57  ;;  %v2586_v52 = vmax.f32 %v2454_v61, 0.0  ;;  %v2585_v35 = vmax.f32 %v2263_v58, 0.0  ;;  %v7501_v11 = vld [vmem:[%s11452_s7 + $0x14] ss:$8 sps:$4 sm:$0xff]  }
 0x39e   : > { %v2460_v1 = vadd.f32 %v2459_v10, %v11460_v57  ;;  %v2588_v19 = vmax.f32 %v2265_v40, 0.0  ;;  %v2587_v48 = vmax.f32 %v2456_v17, 0.0  ;;  %v7504_v47 = vld [vmem:[%s11452_s7 + $0x24] ss:$8 sps:$4 sm:$0xff]   ;;  %v7509_v56 = vld [vmem:[%s11452_s7 + $0x30] ss:$8 sps:$4 sm:$0xff]  }
 0x39f   : > { %v2590_v9 = vmax.f32 %v2458_v30, 0.0  ;;  %v2589_v12 = vmax.f32 %v2267_v43, 0.0  ;;  %v7510_v53 = vld [vmem:[%s11452_s7 + $0x44] ss:$8 sps:$4 sm:$0xff]   ;;  %v7512_v61 = vld [vmem:[%s11452_s7 + $0x40] ss:$8 sps:$4 sm:$0xff]  }
 0x3a0   : > { %v2591_v0 = vmax.f32 %v2460_v1, 0.0  ;;  %v2688_v51 = vpack.c.bf16 %v2588_v19, %v2584_v23  ;;  %v7513_v46 = vld [vmem:[%s11452_s7 + $0x54] ss:$8 sps:$4 sm:$0xff]   ;;  %v7515_v28 = vld [vmem:[%s11452_s7 + $0x50] ss:$8 sps:$4 sm:$0xff]  }
 0x3a1   : > { %v2690_v21 = vpack.c.bf16 %v2590_v9, %v2586_v52  ;;  %v2689_v50 = vpack.c.bf16 %v2589_v12, %v2585_v35  ;;  %v2270_v15 = vpop.f32.mrb[92].mxu0  ;;  %v7516_v58 = vld [vmem:[%s11452_s7 + $0x64] ss:$8 sps:$4 sm:$0xff]   ;;  %v7518_v17 = vld [vmem:[%s11452_s7 + $0x60] ss:$8 sps:$4 sm:$0xff]  }
 0x3a2   : > { %v2691_v39 = vpack.c.bf16 %v2591_v0, %v2587_v48  ;;  %v2463_v34 = vpop.f32.mrb[92].mxu1  ;;  %v2271_v14 = vadd.f32 %v2270_v15, %v1983_v6  ;;  %v2272_v45 = vpop.f32.mrb[93].mxu0  ;;  %v7519_v26 = vld [vmem:[%s11452_s7 + $0x74] ss:$8 sps:$4 sm:$0xff]   ;;  %v7521_v59 = vld [vmem:[%s11452_s7 + $0x70] ss:$8 sps:$4 sm:$0xff]  }
 0x3a3   : > { %v2464_v24 = vadd.f32 %v2463_v34, %v1983_v6  ;;  %v2465_v22 = vpop.f32.mrb[93].mxu1  ;;  %v2273_v7 = vadd.f32 %v2272_v45, %v1983_v6  ;;  %v2274_v29 = vpop.f32.mrb[94].mxu0  ;;  %3076 = vmatprep.subr.bf16.mxu0 %v2689_v50  ;;  %v7522_v57 = vld [vmem:[%s11452_s7 + $0x84] ss:$8 sps:$4 sm:$0xff]   ;;  %v7524_v40 = vld [vmem:[%s11452_s7 + $0x80] ss:$8 sps:$4 sm:$0xff]  }
 0x3a4   : > { %v2466_v4 = vadd.f32 %v2465_v22, %v1983_v6  ;;  %v2467_v32 = vpop.f32.mrb[94].mxu1  ;;  %3269 = vmatprep.subr.bf16.mxu1 %v2691_v39  ;;  %v2275_v60 = vadd.f32 %v2274_v29, %v1988_v42  ;;  %v2276_v3 = vpop.f32.mrb[95].mxu0  ;;  %3077 = vmatpush1.bf16.msra.mxu0 %v2688_v51  ;;  %v2592_v41 = vmax.f32 %v2271_v14, 0.0  ;;  %v7525_v30 = vld [vmem:[%s11452_s7 + $0x94] ss:$8 sps:$4 sm:$0xff]  }
 0x3a5   : > { %v2468_v62 = vadd.f32 %v2467_v32, %v1988_v42  ;;  %v2469_v44 = vpop.f32.mrb[95].mxu1  ;;  %3270 = vmatpush1.bf16.msra.mxu1 %v2690_v21  ;;  %v2277_v2 = vadd.f32 %v2276_v3, %v1988_v42  ;;  %v2594_v13 = vmax.f32 %v2464_v24, 0.0  ;;  %v2593_v49 = vmax.f32 %v2273_v7, 0.0  ;;  %v7527_v54 = vld [vmem:[%s11452_s7 + $0x90] ss:$8 sps:$4 sm:$0xff]   ;;  %v2736_v6 = vpop.permute.xlu0 %2735 }
 0x3a6   : > { %v2470_v25 = vadd.f32 %v2469_v44, %v1988_v42  ;;  %v2596_v31 = vmax.f32 %v2275_v60, 0.0  ;;  %v2595_v20 = vmax.f32 %v2466_v4, 0.0  ;;  %v7528_v10 = vld [vmem:[%s11452_s7 + $0xa4] ss:$8 sps:$4 sm:$0xff]   ;;  %v7530_v43 = vld [vmem:[%s11452_s7 + $0xa0] ss:$8 sps:$4 sm:$0xff]   ;;  %v2731_v51 = vpop.permute.xlu1 %2730 }
 0x3a7   : > { %v2598_v5 = vmax.f32 %v2468_v62, 0.0  ;;  %v2597_v16 = vmax.f32 %v2277_v2, 0.0  ;;  %v7531_v1 = vld [vmem:[%s11452_s7 + $0xb4] ss:$8 sps:$4 sm:$0xff]   ;;  %v7533_v23 = vld [vmem:[%s11452_s7 + $0xb0] ss:$8 sps:$4 sm:$0xff]  }
 0x3a8   : > { %v2599_v36 = vmax.f32 %v2470_v25, 0.0  ;;  %v2692_v8 = vpack.c.bf16 %v2596_v31, %v2592_v41  ;;  %v7534_v52 = vld [vmem:[%s11452_s7 + $0xc4] ss:$8 sps:$4 sm:$0xff]   ;;  %v7536_v19 = vld [vmem:[%s11452_s7 + $0xc0] ss:$8 sps:$4 sm:$0xff]  }
 0x3a9   : > { %v2694_v38 = vpack.c.bf16 %v2598_v5, %v2594_v13  ;;  %v2693_v37 = vpack.c.bf16 %v2597_v16, %v2593_v49  ;;  %v7537_v9 = vld [vmem:[%s11452_s7 + $0xd4] ss:$8 sps:$4 sm:$0xff]   ;;  %v7539_v35 = vld [vmem:[%s11452_s7 + $0xd0] ss:$8 sps:$4 sm:$0xff]   ;;  %v7540_v48 = vld [vmem:[%s11452_s7 + $0xe4] ss:$8 sps:$4 sm:$0xff]   ;;  %v2746_v16 = vpop.permute.xlu0 %2745 }
 0x3aa   : > { %v2695_v55 = vpack.c.bf16 %v2599_v36, %v2595_v20  ;;  %v7542_v12 = vld [vmem:[%s11452_s7 + $0xe0] ss:$8 sps:$4 sm:$0xff]   ;;  %v7543_v0 = vld [vmem:[%s11452_s7 + $0xf4] ss:$8 sps:$4 sm:$0xff]   ;;  %v7545_v42 = vld [vmem:[%s11452_s7 + $0xf0] ss:$8 sps:$4 sm:$0xff]   ;;  %v2741_v36 = vpop.permute.xlu1 %2740 }
 0x3ab   : > { %3078 = vmatprep.subr.bf16.mxu0 %v2693_v37  ;;  %v7548_v44 = vld [vmem:[%s11461_s9 + $0x4] ss:$8 sps:$4 sm:$0xff]  }
 0x3ac   : > { %3271 = vmatprep.subr.bf16.mxu1 %v2695_v55  ;;  %3079 = vmatpush1.bf16.msra.mxu0 %v2692_v8 }
 0x3ad   : > { %3272 = vmatpush1.bf16.msra.mxu1 %v2694_v38 }
 0x3af   : > { %3081 = vmatmul.mubr.bf16.vlgmr.msra.gmra.mrb[96].mxu0 %v7498_v27 }
 0x3b0   : > { %3274 = vmatmul.mubr.bf16.vlgmr.msra.gmra.mrb[96].mxu1 %v7498_v27  ;;  %3090 = vmatprep.mubr.bf16.mxu0 %v7501_v11 }
 0x3b1   : > { %3283 = vmatprep.mubr.bf16.mxu1 %v7501_v11 }
 0x3b7   : > { %3091 = vmatmul.mubr.bf16.gmra.mrb[100].mxu0 %v7503_v63 }
 0x3b8   : > { %3284 = vmatmul.mubr.bf16.gmra.mrb[100].mxu1 %v7503_v63  ;;  %3100 = vmatprep.mubr.bf16.mxu0 %v7504_v47 }
 0x3b9   : > { %3293 = vmatprep.mubr.bf16.mxu1 %v7504_v47 }
 0x3bf   : > { %3101 = vmatmul.mubr.bf16.gmra.mrb[104].mxu0 %v7506_v18 }
 0x3c0   : > { %3294 = vmatmul.mubr.bf16.gmra.mrb[104].mxu1 %v7506_v18  ;;  %3110 = vmatprep.mubr.bf16.mxu0 %v7507_v33 }
 0x3c1   : > { %3303 = vmatprep.mubr.bf16.mxu1 %v7507_v33 }
 0x3c7   : > { %3111 = vmatmul.mubr.bf16.gmra.mrb[108].mxu0 %v7509_v56 }
 0x3c8   : > { %3304 = vmatmul.mubr.bf16.gmra.mrb[108].mxu1 %v7509_v56  ;;  %3120 = vmatprep.mubr.bf16.mxu0 %v7510_v53 }
 0x3c9   : > { %3313 = vmatprep.mubr.bf16.mxu1 %v7510_v53 }
 0x3cf   : > { %3121 = vmatmul.mubr.bf16.gmra.mrb[112].mxu0 %v7512_v61 }
 0x3d0   : > { %3314 = vmatmul.mubr.bf16.gmra.mrb[112].mxu1 %v7512_v61  ;;  %3130 = vmatprep.mubr.bf16.mxu0 %v7513_v46 }
 0x3d1   : > { %3323 = vmatprep.mubr.bf16.mxu1 %v7513_v46 }
 0x3d7   : > { %3131 = vmatmul.mubr.bf16.gmra.mrb[116].mxu0 %v7515_v28 }
 0x3d8   : > { %3324 = vmatmul.mubr.bf16.gmra.mrb[116].mxu1 %v7515_v28  ;;  %3140 = vmatprep.mubr.bf16.mxu0 %v7516_v58 }
 0x3d9   : > { %3333 = vmatprep.mubr.bf16.mxu1 %v7516_v58 }
 0x3df   : > { %3141 = vmatmul.mubr.bf16.gmra.mrb[120].mxu0 %v7518_v17 }
 0x3e0   : > { %3334 = vmatmul.mubr.bf16.gmra.mrb[120].mxu1 %v7518_v17  ;;  %3150 = vmatprep.mubr.bf16.mxu0 %v7519_v26 }
 0x3e1   : > { %3343 = vmatprep.mubr.bf16.mxu1 %v7519_v26 }
 0x3e7   : > { %3151 = vmatmul.mubr.bf16.gmra.mrb[124].mxu0 %v7521_v59 }
 0x3e8   : > { %3344 = vmatmul.mubr.bf16.gmra.mrb[124].mxu1 %v7521_v59  ;;  %3160 = vmatprep.mubr.bf16.mxu0 %v7522_v57 }
 0x3e9   : > { %3353 = vmatprep.mubr.bf16.mxu1 %v7522_v57 }
 0x3ef   : > { %3161 = vmatmul.mubr.bf16.gmra.mrb[128].mxu0 %v7524_v40 }
 0x3f0   : > { %3354 = vmatmul.mubr.bf16.gmra.mrb[128].mxu1 %v7524_v40  ;;  %3170 = vmatprep.mubr.bf16.mxu0 %v7525_v30 }
 0x3f1   : > { %3363 = vmatprep.mubr.bf16.mxu1 %v7525_v30 }
 0x3f7   : > { %3171 = vmatmul.mubr.bf16.gmra.mrb[132].mxu0 %v7527_v54 }
 0x3f8   : > { %3364 = vmatmul.mubr.bf16.gmra.mrb[132].mxu1 %v7527_v54  ;;  %3180 = vmatprep.mubr.bf16.mxu0 %v7528_v10 }
 0x3f9   : > { %3373 = vmatprep.mubr.bf16.mxu1 %v7528_v10 }
 0x3ff   : > { %3181 = vmatmul.mubr.bf16.gmra.mrb[136].mxu0 %v7530_v43 }
 0x400   : > { %3374 = vmatmul.mubr.bf16.gmra.mrb[136].mxu1 %v7530_v43  ;;  %3190 = vmatprep.mubr.bf16.mxu0 %v7531_v1 }
 0x401   : > { %3383 = vmatprep.mubr.bf16.mxu1 %v7531_v1 }
 0x407   : > { %3191 = vmatmul.mubr.bf16.gmra.mrb[140].mxu0 %v7533_v23 }
 0x408   : > { %3384 = vmatmul.mubr.bf16.gmra.mrb[140].mxu1 %v7533_v23  ;;  %3200 = vmatprep.mubr.bf16.mxu0 %v7534_v52 }
 0x409   : > { %3393 = vmatprep.mubr.bf16.mxu1 %v7534_v52 }
 0x40f   : > { %3201 = vmatmul.mubr.bf16.gmra.mrb[144].mxu0 %v7536_v19 }
 0x410   : > { %3394 = vmatmul.mubr.bf16.gmra.mrb[144].mxu1 %v7536_v19  ;;  %3210 = vmatprep.mubr.bf16.mxu0 %v7537_v9  ;;  %v2756_v19 = vpop.permute.xlu0 %2755 }
 0x411   : > { %3403 = vmatprep.mubr.bf16.mxu1 %v7537_v9  ;;  %v2751_v9 = vpop.permute.xlu1 %2750 }
 0x417   : > { %3211 = vmatmul.mubr.bf16.gmra.mrb[148].mxu0 %v7539_v35 }
 0x418   : > { %3404 = vmatmul.mubr.bf16.gmra.mrb[148].mxu1 %v7539_v35  ;;  %3220 = vmatprep.mubr.bf16.mxu0 %v7540_v48 }
 0x419   : > { %3413 = vmatprep.mubr.bf16.mxu1 %v7540_v48 }
 0x41f   : > { %3221 = vmatmul.mubr.bf16.gmra.mrb[152].mxu0 %v7542_v12 }
 0x420   : > { %3414 = vmatmul.mubr.bf16.gmra.mrb[152].mxu1 %v7542_v12  ;;  %3230 = vmatprep.mubr.bf16.mxu0 %v7543_v0 }
 0x421   : > { %3423 = vmatprep.mubr.bf16.mxu1 %v7543_v0 }
 0x427   : > { %3231 = vmatmul.mubr.bf16.gmra.mrb[156].mxu0 %v7545_v42 }
 0x428   : > { %3424 = vmatmul.mubr.bf16.gmra.mrb[156].mxu1 %v7545_v42  ;;  %4426 = vmatprep.mubr.bf16.mxu0 %v7548_v44 }
 0x429   : > { %4779 = vmatprep.mubr.bf16.mxu1 %v7548_v44 }
 0x482   : > { %v3082_v21 = vpop.f32.mrb[96].mxu0 }
 0x483   : > { %v3275_v50 = vpop.f32.mrb[96].mxu1  ;;  %v3083_v39 = vadd.f32 %v3082_v21, %v2731_v51  ;;  %v3084_v34 = vpop.f32.mrb[97].mxu0 }
 0x484   : > { %v3276_v15 = vadd.f32 %v3275_v50, %v2731_v51  ;;  %v3277_v14 = vpop.f32.mrb[97].mxu1  ;;  %v3085_v24 = vadd.f32 %v3084_v34, %v2731_v51  ;;  %v3086_v22 = vpop.f32.mrb[98].mxu0 }
 0x485   : > { %v3278_v45 = vadd.f32 %v3277_v14, %v2731_v51  ;;  %v3279_v7 = vpop.f32.mrb[98].mxu1  ;;  %v3087_v4 = vadd.f32 %v3086_v22, %v2736_v6  ;;  %v3088_v32 = vpop.f32.mrb[99].mxu0  ;;  %v3434_v2 = vmax.f32 %v3083_v39, 0.0 }
 0x486   : > { %v3280_v29 = vadd.f32 %v3279_v7, %v2736_v6  ;;  %v3281_v60 = vpop.f32.mrb[99].mxu1  ;;  %v3089_v62 = vadd.f32 %v3088_v32, %v2736_v6  ;;  %v3436_v25 = vmax.f32 %v3276_v15, 0.0  ;;  %v3435_v31 = vmax.f32 %v3085_v24, 0.0 }
 0x487   : > { %v3282_v3 = vadd.f32 %v3281_v60, %v2736_v6  ;;  %v3438_v41 = vmax.f32 %v3087_v4, 0.0  ;;  %v3437_v5 = vmax.f32 %v3278_v45, 0.0 }
 0x488   : > { %v3440_v13 = vmax.f32 %v3280_v29, 0.0  ;;  %v3439_v49 = vmax.f32 %v3089_v62, 0.0 }
 0x489   : > { %v3441_v20 = vmax.f32 %v3282_v3, 0.0  ;;  %v3626_v8 = vpack.c.bf16 %v3438_v41, %v3434_v2 }
 0x48a   : > { %v3628_v38 = vpack.c.bf16 %v3440_v13, %v3436_v25  ;;  %v3627_v37 = vpack.c.bf16 %v3439_v49, %v3435_v31  ;;  %v3092_v27 = vpop.f32.mrb[100].mxu0  ;;  %v2766_v31 = vpop.permute.xlu0 %2765 }
 0x48b   : > { %v3629_v55 = vpack.c.bf16 %v3441_v20, %v3437_v5  ;;  %v3285_v11 = vpop.f32.mrb[100].mxu1  ;;  %v3093_v63 = vadd.f32 %v3092_v27, %v2741_v36  ;;  %v3094_v18 = vpop.f32.mrb[101].mxu0 }
 0x48c   : > { %v3286_v47 = vadd.f32 %v3285_v11, %v2741_v36  ;;  %v3287_v33 = vpop.f32.mrb[101].mxu1  ;;  %v3095_v56 = vadd.f32 %v3094_v18, %v2741_v36  ;;  %v3096_v61 = vpop.f32.mrb[102].mxu0  ;;  %4394 = vmatprep.subr.bf16.mxu0 %v3627_v37 }
 0x48d   : > { %v3288_v53 = vadd.f32 %v3287_v33, %v2741_v36  ;;  %v3289_v46 = vpop.f32.mrb[102].mxu1  ;;  %4747 = vmatprep.subr.bf16.mxu1 %v3629_v55  ;;  %v3097_v28 = vadd.f32 %v3096_v61, %v2746_v16  ;;  %v3098_v17 = vpop.f32.mrb[103].mxu0  ;;  %4395 = vmatpush1.bf16.msra.mxu0 %v3626_v8  ;;  %v3442_v40 = vmax.f32 %v3093_v63, 0.0 }
 0x48e   : > { %v3290_v58 = vadd.f32 %v3289_v46, %v2746_v16  ;;  %v3291_v26 = vpop.f32.mrb[103].mxu1  ;;  %4748 = vmatpush1.bf16.msra.mxu1 %v3628_v38  ;;  %v3099_v59 = vadd.f32 %v3098_v17, %v2746_v16  ;;  %v3444_v30 = vmax.f32 %v3286_v47, 0.0  ;;  %v3443_v43 = vmax.f32 %v3095_v56, 0.0  ;;  %v2761_v5 = vpop.permute.xlu1 %2760 }
 0x48f   : > { %v3292_v57 = vadd.f32 %v3291_v26, %v2746_v16  ;;  %v3446_v54 = vmax.f32 %v3097_v28, 0.0  ;;  %v3445_v1 = vmax.f32 %v3288_v53, 0.0 }
 0x490   : > { %v3448_v10 = vmax.f32 %v3290_v58, 0.0  ;;  %v3447_v23 = vmax.f32 %v3099_v59, 0.0 }
 0x491   : > { %v3449_v52 = vmax.f32 %v3292_v57, 0.0  ;;  %v3630_v35 = vpack.c.bf16 %v3446_v54, %v3442_v40 }
 0x492   : > { %v3632_v48 = vpack.c.bf16 %v3448_v10, %v3444_v30  ;;  %v3631_v12 = vpack.c.bf16 %v3447_v23, %v3443_v43  ;;  %v3102_v42 = vpop.f32.mrb[104].mxu0  ;;  %v2776_v43 = vpop.permute.xlu0 %2775 }
 0x493   : > { %v3633_v0 = vpack.c.bf16 %v3449_v52, %v3445_v1  ;;  %v3295_v6 = vpop.f32.mrb[104].mxu1  ;;  %v3103_v51 = vadd.f32 %v3102_v42, %v2751_v9  ;;  %v3104_v50 = vpop.f32.mrb[105].mxu0 }
 0x494   : > { %v3296_v21 = vadd.f32 %v3295_v6, %v2751_v9  ;;  %v3297_v39 = vpop.f32.mrb[105].mxu1  ;;  %v3105_v15 = vadd.f32 %v3104_v50, %v2751_v9  ;;  %v3106_v14 = vpop.f32.mrb[106].mxu0  ;;  %4396 = vmatprep.subr.bf16.mxu0 %v3631_v12 }
 0x495   : > { %v3298_v34 = vadd.f32 %v3297_v39, %v2751_v9  ;;  %v3299_v24 = vpop.f32.mrb[106].mxu1  ;;  %4749 = vmatprep.subr.bf16.mxu1 %v3633_v0  ;;  %v3107_v45 = vadd.f32 %v3106_v14, %v2756_v19  ;;  %v3108_v7 = vpop.f32.mrb[107].mxu0  ;;  %4397 = vmatpush1.bf16.msra.mxu0 %v3630_v35  ;;  %v3450_v60 = vmax.f32 %v3103_v51, 0.0 }
 0x496   : > { %v3300_v22 = vadd.f32 %v3299_v24, %v2756_v19  ;;  %v3301_v4 = vpop.f32.mrb[107].mxu1  ;;  %4750 = vmatpush1.bf16.msra.mxu1 %v3632_v48  ;;  %v3109_v29 = vadd.f32 %v3108_v7, %v2756_v19  ;;  %v3452_v62 = vmax.f32 %v3296_v21, 0.0  ;;  %v3451_v2 = vmax.f32 %v3105_v15, 0.0  ;;  %v2771_v1 = vpop.permute.xlu1 %2770 }
 0x497   : > { %v3302_v32 = vadd.f32 %v3301_v4, %v2756_v19  ;;  %v3454_v3 = vmax.f32 %v3107_v45, 0.0  ;;  %v3453_v25 = vmax.f32 %v3298_v34, 0.0 }
 0x498   : > { %v3456_v44 = vmax.f32 %v3300_v22, 0.0  ;;  %v3455_v41 = vmax.f32 %v3109_v29, 0.0 }
 0x499   : > { %v3457_v13 = vmax.f32 %v3302_v32, 0.0  ;;  %v3634_v49 = vpack.c.bf16 %v3454_v3, %v3450_v60 }
 0x49a   : > { %v3636_v20 = vpack.c.bf16 %v3456_v44, %v3452_v62  ;;  %v3635_v16 = vpack.c.bf16 %v3455_v41, %v3451_v2  ;;  %v3112_v8 = vpop.f32.mrb[108].mxu0  ;;  %v2786_v2 = vpop.permute.xlu0 %2785 }
 0x49b   : > { %v3637_v36 = vpack.c.bf16 %v3457_v13, %v3453_v25  ;;  %v3305_v38 = vpop.f32.mrb[108].mxu1  ;;  %v3113_v37 = vadd.f32 %v3112_v8, %v2761_v5  ;;  %v3114_v27 = vpop.f32.mrb[109].mxu0 }
 0x49c   : > { %v3306_v55 = vadd.f32 %v3305_v38, %v2761_v5  ;;  %v3307_v11 = vpop.f32.mrb[109].mxu1  ;;  %v3115_v63 = vadd.f32 %v3114_v27, %v2761_v5  ;;  %v3116_v18 = vpop.f32.mrb[110].mxu0  ;;  %4398 = vmatprep.subr.bf16.mxu0 %v3635_v16 }
 0x49d   : > { %v3308_v47 = vadd.f32 %v3307_v11, %v2761_v5  ;;  %v3309_v33 = vpop.f32.mrb[110].mxu1  ;;  %4751 = vmatprep.subr.bf16.mxu1 %v3637_v36  ;;  %v3117_v56 = vadd.f32 %v3116_v18, %v2766_v31  ;;  %v3118_v61 = vpop.f32.mrb[111].mxu0  ;;  %4399 = vmatpush1.bf16.msra.mxu0 %v3634_v49  ;;  %v3458_v17 = vmax.f32 %v3113_v37, 0.0 }
 0x49e   : > { %v3310_v53 = vadd.f32 %v3309_v33, %v2766_v31  ;;  %v3311_v46 = vpop.f32.mrb[111].mxu1  ;;  %4752 = vmatpush1.bf16.msra.mxu1 %v3636_v20  ;;  %v3119_v28 = vadd.f32 %v3118_v61, %v2766_v31  ;;  %v3460_v26 = vmax.f32 %v3306_v55, 0.0  ;;  %v3459_v40 = vmax.f32 %v3115_v63, 0.0  ;;  %v2781_v25 = vpop.permute.xlu1 %2780 }
 0x49f   : > { %v3312_v58 = vadd.f32 %v3311_v46, %v2766_v31  ;;  %v3462_v59 = vmax.f32 %v3117_v56, 0.0  ;;  %v3461_v30 = vmax.f32 %v3308_v47, 0.0 }
 0x4a0   : > { %v3464_v57 = vmax.f32 %v3310_v53, 0.0  ;;  %v3463_v54 = vmax.f32 %v3119_v28, 0.0 }
 0x4a1   : > { %v3465_v10 = vmax.f32 %v3312_v58, 0.0  ;;  %v3638_v23 = vpack.c.bf16 %v3462_v59, %v3458_v17 }
 0x4a2   : > { %v3640_v52 = vpack.c.bf16 %v3464_v57, %v3460_v26  ;;  %v3639_v19 = vpack.c.bf16 %v3463_v54, %v3459_v40  ;;  %v3122_v35 = vpop.f32.mrb[112].mxu0  ;;  %v2796_v40 = vpop.permute.xlu0 %2795 }
 0x4a3   : > { %v3641_v9 = vpack.c.bf16 %v3465_v10, %v3461_v30  ;;  %v3315_v48 = vpop.f32.mrb[112].mxu1  ;;  %v3123_v12 = vadd.f32 %v3122_v35, %v2771_v1  ;;  %v3124_v42 = vpop.f32.mrb[113].mxu0 }
 0x4a4   : > { %v3316_v0 = vadd.f32 %v3315_v48, %v2771_v1  ;;  %v3317_v6 = vpop.f32.mrb[113].mxu1  ;;  %v3125_v51 = vadd.f32 %v3124_v42, %v2771_v1  ;;  %v3126_v50 = vpop.f32.mrb[114].mxu0  ;;  %4400 = vmatprep.subr.bf16.mxu0 %v3639_v19 }
 0x4a5   : > { %v3318_v21 = vadd.f32 %v3317_v6, %v2771_v1  ;;  %v3319_v39 = vpop.f32.mrb[114].mxu1  ;;  %4753 = vmatprep.subr.bf16.mxu1 %v3641_v9  ;;  %v3127_v15 = vadd.f32 %v3126_v50, %v2776_v43  ;;  %v3128_v14 = vpop.f32.mrb[115].mxu0  ;;  %4401 = vmatpush1.bf16.msra.mxu0 %v3638_v23  ;;  %v3466_v7 = vmax.f32 %v3123_v12, 0.0 }
 0x4a6   : > { %v3320_v34 = vadd.f32 %v3319_v39, %v2776_v43  ;;  %v3321_v24 = vpop.f32.mrb[115].mxu1  ;;  %4754 = vmatpush1.bf16.msra.mxu1 %v3640_v52  ;;  %v3129_v45 = vadd.f32 %v3128_v14, %v2776_v43  ;;  %v3468_v4 = vmax.f32 %v3316_v0, 0.0  ;;  %v3467_v60 = vmax.f32 %v3125_v51, 0.0  ;;  %v2791_v30 = vpop.permute.xlu1 %2790 }
 0x4a7   : > { %v3322_v22 = vadd.f32 %v3321_v24, %v2776_v43  ;;  %v3470_v29 = vmax.f32 %v3127_v15, 0.0  ;;  %v3469_v62 = vmax.f32 %v3318_v21, 0.0 }
 0x4a8   : > { %v3472_v32 = vmax.f32 %v3320_v34, 0.0  ;;  %v3471_v3 = vmax.f32 %v3129_v45, 0.0 }
 0x4a9   : > { %v3473_v44 = vmax.f32 %v3322_v22, 0.0  ;;  %v3642_v41 = vpack.c.bf16 %v3470_v29, %v3466_v7 }
 0x4aa   : > { %v3644_v13 = vpack.c.bf16 %v3472_v32, %v3468_v4  ;;  %v3643_v31 = vpack.c.bf16 %v3471_v3, %v3467_v60  ;;  %v3132_v49 = vpop.f32.mrb[116].mxu0  ;;  %v2806_v60 = vpop.permute.xlu0 %2805 }
 0x4ab   : > { %v3645_v5 = vpack.c.bf16 %v3473_v44, %v3469_v62  ;;  %v3325_v20 = vpop.f32.mrb[116].mxu1  ;;  %v3133_v16 = vadd.f32 %v3132_v49, %v2781_v25  ;;  %v3134_v8 = vpop.f32.mrb[117].mxu0 }
 0x4ac   : > { %v3326_v36 = vadd.f32 %v3325_v20, %v2781_v25  ;;  %v3327_v38 = vpop.f32.mrb[117].mxu1  ;;  %v3135_v37 = vadd.f32 %v3134_v8, %v2781_v25  ;;  %v3136_v27 = vpop.f32.mrb[118].mxu0  ;;  %4402 = vmatprep.subr.bf16.mxu0 %v3643_v31 }
 0x4ad   : > { %v3328_v55 = vadd.f32 %v3327_v38, %v2781_v25  ;;  %v3329_v11 = vpop.f32.mrb[118].mxu1  ;;  %4755 = vmatprep.subr.bf16.mxu1 %v3645_v5  ;;  %v3137_v63 = vadd.f32 %v3136_v27, %v2786_v2  ;;  %v3138_v18 = vpop.f32.mrb[119].mxu0  ;;  %4403 = vmatpush1.bf16.msra.mxu0 %v3642_v41  ;;  %v3474_v61 = vmax.f32 %v3133_v16, 0.0 }
 0x4ae   : > { %v3330_v47 = vadd.f32 %v3329_v11, %v2786_v2  ;;  %v3331_v33 = vpop.f32.mrb[119].mxu1  ;;  %4756 = vmatpush1.bf16.msra.mxu1 %v3644_v13  ;;  %v3139_v56 = vadd.f32 %v3138_v18, %v2786_v2  ;;  %v3476_v46 = vmax.f32 %v3326_v36, 0.0  ;;  %v3475_v17 = vmax.f32 %v3135_v37, 0.0  ;;  %v2801_v62 = vpop.permute.xlu1 %2800 }
 0x4af   : > { %v3332_v53 = vadd.f32 %v3331_v33, %v2786_v2  ;;  %v3478_v28 = vmax.f32 %v3137_v63, 0.0  ;;  %v3477_v26 = vmax.f32 %v3328_v55, 0.0 }
 0x4b0   : > { %v3480_v58 = vmax.f32 %v3330_v47, 0.0  ;;  %v3479_v59 = vmax.f32 %v3139_v56, 0.0 }
 0x4b1   : > { %v3481_v57 = vmax.f32 %v3332_v53, 0.0  ;;  %v3646_v54 = vpack.c.bf16 %v3478_v28, %v3474_v61 }
 0x4b2   : > { %v3648_v10 = vpack.c.bf16 %v3480_v58, %v3476_v46  ;;  %v3647_v43 = vpack.c.bf16 %v3479_v59, %v3475_v17  ;;  %v3142_v23 = vpop.f32.mrb[120].mxu0  ;;  %v2816_v17 = vpop.permute.xlu0 %2815 }
 0x4b3   : > { %v3649_v1 = vpack.c.bf16 %v3481_v57, %v3477_v26  ;;  %v3335_v52 = vpop.f32.mrb[120].mxu1  ;;  %v3143_v19 = vadd.f32 %v3142_v23, %v2791_v30  ;;  %v3144_v35 = vpop.f32.mrb[121].mxu0 }
 0x4b4   : > { %v3336_v9 = vadd.f32 %v3335_v52, %v2791_v30  ;;  %v3337_v48 = vpop.f32.mrb[121].mxu1  ;;  %v3145_v12 = vadd.f32 %v3144_v35, %v2791_v30  ;;  %v3146_v42 = vpop.f32.mrb[122].mxu0  ;;  %4404 = vmatprep.subr.bf16.mxu0 %v3647_v43 }
 0x4b5   : > { %v3338_v0 = vadd.f32 %v3337_v48, %v2791_v30  ;;  %v3339_v6 = vpop.f32.mrb[122].mxu1  ;;  %4757 = vmatprep.subr.bf16.mxu1 %v3649_v1  ;;  %v3147_v51 = vadd.f32 %v3146_v42, %v2796_v40  ;;  %v3148_v50 = vpop.f32.mrb[123].mxu0  ;;  %4405 = vmatpush1.bf16.msra.mxu0 %v3646_v54  ;;  %v3482_v14 = vmax.f32 %v3143_v19, 0.0 }
 0x4b6   : > { %v3340_v21 = vadd.f32 %v3339_v6, %v2796_v40  ;;  %v3341_v39 = vpop.f32.mrb[123].mxu1  ;;  %4758 = vmatpush1.bf16.msra.mxu1 %v3648_v10  ;;  %v3149_v15 = vadd.f32 %v3148_v50, %v2796_v40  ;;  %v3484_v24 = vmax.f32 %v3336_v9, 0.0  ;;  %v3483_v7 = vmax.f32 %v3145_v12, 0.0  ;;  %v2811_v26 = vpop.permute.xlu1 %2810 }
 0x4b7   : > { %v3342_v34 = vadd.f32 %v3341_v39, %v2796_v40  ;;  %v3486_v45 = vmax.f32 %v3147_v51, 0.0  ;;  %v3485_v4 = vmax.f32 %v3338_v0, 0.0 }
 0x4b8   : > { %v3488_v22 = vmax.f32 %v3340_v21, 0.0  ;;  %v3487_v29 = vmax.f32 %v3149_v15, 0.0 }
 0x4b9   : > { %v3489_v32 = vmax.f32 %v3342_v34, 0.0  ;;  %v3650_v3 = vpack.c.bf16 %v3486_v45, %v3482_v14 }
 0x4ba   : > { %v3652_v44 = vpack.c.bf16 %v3488_v22, %v3484_v24  ;;  %v3651_v2 = vpack.c.bf16 %v3487_v29, %v3483_v7  ;;  %v3152_v41 = vpop.f32.mrb[124].mxu0  ;;  %v2826_v7 = vpop.permute.xlu0 %2825 }
 0x4bb   : > { %v3653_v25 = vpack.c.bf16 %v3489_v32, %v3485_v4  ;;  %v3345_v13 = vpop.f32.mrb[124].mxu1  ;;  %v3153_v31 = vadd.f32 %v3152_v41, %v2801_v62  ;;  %v3154_v49 = vpop.f32.mrb[125].mxu0 }
 0x4bc   : > { %v3346_v5 = vadd.f32 %v3345_v13, %v2801_v62  ;;  %v3347_v20 = vpop.f32.mrb[125].mxu1  ;;  %v3155_v16 = vadd.f32 %v3154_v49, %v2801_v62  ;;  %v3156_v8 = vpop.f32.mrb[126].mxu0  ;;  %4406 = vmatprep.subr.bf16.mxu0 %v3651_v2 }
 0x4bd   : > { %v3348_v36 = vadd.f32 %v3347_v20, %v2801_v62  ;;  %v3349_v38 = vpop.f32.mrb[126].mxu1  ;;  %4759 = vmatprep.subr.bf16.mxu1 %v3653_v25  ;;  %v3157_v37 = vadd.f32 %v3156_v8, %v2806_v60  ;;  %v3158_v27 = vpop.f32.mrb[127].mxu0  ;;  %4407 = vmatpush1.bf16.msra.mxu0 %v3650_v3  ;;  %v3490_v18 = vmax.f32 %v3153_v31, 0.0 }
 0x4be   : > { %v3350_v55 = vadd.f32 %v3349_v38, %v2806_v60  ;;  %v3351_v11 = vpop.f32.mrb[127].mxu1  ;;  %4760 = vmatpush1.bf16.msra.mxu1 %v3652_v44  ;;  %v3159_v63 = vadd.f32 %v3158_v27, %v2806_v60  ;;  %v3492_v33 = vmax.f32 %v3346_v5, 0.0  ;;  %v3491_v61 = vmax.f32 %v3155_v16, 0.0  ;;  %v2821_v4 = vpop.permute.xlu1 %2820 }
 0x4bf   : > { %v3352_v47 = vadd.f32 %v3351_v11, %v2806_v60  ;;  %v3494_v56 = vmax.f32 %v3157_v37, 0.0  ;;  %v3493_v46 = vmax.f32 %v3348_v36, 0.0 }
 0x4c0   : > { %v3496_v53 = vmax.f32 %v3350_v55, 0.0  ;;  %v3495_v28 = vmax.f32 %v3159_v63, 0.0 }
 0x4c1   : > { %v3497_v58 = vmax.f32 %v3352_v47, 0.0  ;;  %v3654_v59 = vpack.c.bf16 %v3494_v56, %v3490_v18 }
 0x4c2   : > { %v3656_v57 = vpack.c.bf16 %v3496_v53, %v3492_v33  ;;  %v3655_v40 = vpack.c.bf16 %v3495_v28, %v3491_v61  ;;  %v3162_v54 = vpop.f32.mrb[128].mxu0  ;;  %v2836_v61 = vpop.permute.xlu0 %2835 }
 0x4c3   : > { %v3657_v30 = vpack.c.bf16 %v3497_v58, %v3493_v46  ;;  %v3355_v10 = vpop.f32.mrb[128].mxu1  ;;  %v3163_v43 = vadd.f32 %v3162_v54, %v2811_v26  ;;  %v3164_v23 = vpop.f32.mrb[129].mxu0 }
 0x4c4   : > { %v3356_v1 = vadd.f32 %v3355_v10, %v2811_v26  ;;  %v3357_v52 = vpop.f32.mrb[129].mxu1  ;;  %v3165_v19 = vadd.f32 %v3164_v23, %v2811_v26  ;;  %v3166_v35 = vpop.f32.mrb[130].mxu0  ;;  %4408 = vmatprep.subr.bf16.mxu0 %v3655_v40 }
 0x4c5   : > { %v3358_v9 = vadd.f32 %v3357_v52, %v2811_v26  ;;  %v3359_v48 = vpop.f32.mrb[130].mxu1  ;;  %4761 = vmatprep.subr.bf16.mxu1 %v3657_v30  ;;  %v3167_v12 = vadd.f32 %v3166_v35, %v2816_v17  ;;  %v3168_v42 = vpop.f32.mrb[131].mxu0  ;;  %4409 = vmatpush1.bf16.msra.mxu0 %v3654_v59  ;;  %v3498_v50 = vmax.f32 %v3163_v43, 0.0 }
 0x4c6   : > { %v3360_v0 = vadd.f32 %v3359_v48, %v2816_v17  ;;  %v3361_v6 = vpop.f32.mrb[131].mxu1  ;;  %4762 = vmatpush1.bf16.msra.mxu1 %v3656_v57  ;;  %v3169_v51 = vadd.f32 %v3168_v42, %v2816_v17  ;;  %v3500_v39 = vmax.f32 %v3356_v1, 0.0  ;;  %v3499_v14 = vmax.f32 %v3165_v19, 0.0  ;;  %v2831_v46 = vpop.permute.xlu1 %2830 }
 0x4c7   : > { %v3362_v21 = vadd.f32 %v3361_v6, %v2816_v17  ;;  %v3502_v15 = vmax.f32 %v3167_v12, 0.0  ;;  %v3501_v24 = vmax.f32 %v3358_v9, 0.0 }
 0x4c8   : > { %v3504_v34 = vmax.f32 %v3360_v0, 0.0  ;;  %v3503_v45 = vmax.f32 %v3169_v51, 0.0 }
 0x4c9   : > { %v3505_v22 = vmax.f32 %v3362_v21, 0.0  ;;  %v3658_v29 = vpack.c.bf16 %v3502_v15, %v3498_v50 }
 0x4ca   : > { %v3660_v32 = vpack.c.bf16 %v3504_v34, %v3500_v39  ;;  %v3659_v60 = vpack.c.bf16 %v3503_v45, %v3499_v14  ;;  %v3172_v3 = vpop.f32.mrb[132].mxu0  ;;  %v2846_v14 = vpop.permute.xlu0 %2845 }
 0x4cb   : > { %v3661_v62 = vpack.c.bf16 %v3505_v22, %v3501_v24  ;;  %v3365_v44 = vpop.f32.mrb[132].mxu1  ;;  %v3173_v2 = vadd.f32 %v3172_v3, %v2821_v4  ;;  %v3174_v41 = vpop.f32.mrb[133].mxu0 }
 0x4cc   : > { %v3366_v25 = vadd.f32 %v3365_v44, %v2821_v4  ;;  %v3367_v13 = vpop.f32.mrb[133].mxu1  ;;  %v3175_v31 = vadd.f32 %v3174_v41, %v2821_v4  ;;  %v3176_v49 = vpop.f32.mrb[134].mxu0  ;;  %4410 = vmatprep.subr.bf16.mxu0 %v3659_v60 }
 0x4cd   : > { %v3368_v5 = vadd.f32 %v3367_v13, %v2821_v4  ;;  %v3369_v20 = vpop.f32.mrb[134].mxu1  ;;  %4763 = vmatprep.subr.bf16.mxu1 %v3661_v62  ;;  %v3177_v16 = vadd.f32 %v3176_v49, %v2826_v7  ;;  %v3178_v8 = vpop.f32.mrb[135].mxu0  ;;  %4411 = vmatpush1.bf16.msra.mxu0 %v3658_v29  ;;  %v3506_v27 = vmax.f32 %v3173_v2, 0.0 }
 0x4ce   : > { %v3370_v36 = vadd.f32 %v3369_v20, %v2826_v7  ;;  %v3371_v38 = vpop.f32.mrb[135].mxu1  ;;  %4764 = vmatpush1.bf16.msra.mxu1 %v3660_v32  ;;  %v3179_v37 = vadd.f32 %v3178_v8, %v2826_v7  ;;  %v3508_v11 = vmax.f32 %v3366_v25, 0.0  ;;  %v3507_v18 = vmax.f32 %v3175_v31, 0.0  ;;  %v2841_v24 = vpop.permute.xlu1 %2840 }
 0x4cf   : > { %v3372_v55 = vadd.f32 %v3371_v38, %v2826_v7  ;;  %v3510_v63 = vmax.f32 %v3177_v16, 0.0  ;;  %v3509_v33 = vmax.f32 %v3368_v5, 0.0 }
 0x4d0   : > { %v3512_v47 = vmax.f32 %v3370_v36, 0.0  ;;  %v3511_v56 = vmax.f32 %v3179_v37, 0.0 }
 0x4d1   : > { %v3513_v53 = vmax.f32 %v3372_v55, 0.0  ;;  %v3662_v28 = vpack.c.bf16 %v3510_v63, %v3506_v27 }
 0x4d2   : > { %v3664_v58 = vpack.c.bf16 %v3512_v47, %v3508_v11  ;;  %v3663_v17 = vpack.c.bf16 %v3511_v56, %v3507_v18  ;;  %v3182_v59 = vpop.f32.mrb[136].mxu0  ;;  %v2856_v18 = vpop.permute.xlu0 %2855 }
 0x4d3   : > { %v3665_v26 = vpack.c.bf16 %v3513_v53, %v3509_v33  ;;  %v3375_v57 = vpop.f32.mrb[136].mxu1  ;;  %v3183_v40 = vadd.f32 %v3182_v59, %v2831_v46  ;;  %v3184_v54 = vpop.f32.mrb[137].mxu0 }
 0x4d4   : > { %v3376_v30 = vadd.f32 %v3375_v57, %v2831_v46  ;;  %v3377_v10 = vpop.f32.mrb[137].mxu1  ;;  %v3185_v43 = vadd.f32 %v3184_v54, %v2831_v46  ;;  %v3186_v23 = vpop.f32.mrb[138].mxu0  ;;  %4412 = vmatprep.subr.bf16.mxu0 %v3663_v17 }
 0x4d5   : > { %v3378_v1 = vadd.f32 %v3377_v10, %v2831_v46  ;;  %v3379_v52 = vpop.f32.mrb[138].mxu1  ;;  %4765 = vmatprep.subr.bf16.mxu1 %v3665_v26  ;;  %v3187_v19 = vadd.f32 %v3186_v23, %v2836_v61  ;;  %v3188_v35 = vpop.f32.mrb[139].mxu0  ;;  %4413 = vmatpush1.bf16.msra.mxu0 %v3662_v28  ;;  %v3514_v42 = vmax.f32 %v3183_v40, 0.0 }
 0x4d6   : > { %v3380_v9 = vadd.f32 %v3379_v52, %v2836_v61  ;;  %v3381_v48 = vpop.f32.mrb[139].mxu1  ;;  %4766 = vmatpush1.bf16.msra.mxu1 %v3664_v58  ;;  %v3189_v12 = vadd.f32 %v3188_v35, %v2836_v61  ;;  %v3516_v6 = vmax.f32 %v3376_v30, 0.0  ;;  %v3515_v50 = vmax.f32 %v3185_v43, 0.0  ;;  %v2851_v33 = vpop.permute.xlu1 %2850 }
 0x4d7   : > { %v3382_v0 = vadd.f32 %v3381_v48, %v2836_v61  ;;  %v3518_v51 = vmax.f32 %v3187_v19, 0.0  ;;  %v3517_v39 = vmax.f32 %v3378_v1, 0.0 }
 0x4d8   : > { %v3520_v21 = vmax.f32 %v3380_v9, 0.0  ;;  %v3519_v15 = vmax.f32 %v3189_v12, 0.0 }
 0x4d9   : > { %v3521_v34 = vmax.f32 %v3382_v0, 0.0  ;;  %v3666_v45 = vpack.c.bf16 %v3518_v51, %v3514_v42 }
 0x4da   : > { %v3668_v22 = vpack.c.bf16 %v3520_v21, %v3516_v6  ;;  %v3667_v7 = vpack.c.bf16 %v3519_v15, %v3515_v50  ;;  %v3192_v29 = vpop.f32.mrb[140].mxu0  ;;  %v2866_v50 = vpop.permute.xlu0 %2865 }
 0x4db   : > { %v3669_v4 = vpack.c.bf16 %v3521_v34, %v3517_v39  ;;  %v3385_v32 = vpop.f32.mrb[140].mxu1  ;;  %v3193_v60 = vadd.f32 %v3192_v29, %v2841_v24  ;;  %v3194_v3 = vpop.f32.mrb[141].mxu0 }
 0x4dc   : > { %v3386_v62 = vadd.f32 %v3385_v32, %v2841_v24  ;;  %v3387_v44 = vpop.f32.mrb[141].mxu1  ;;  %v3195_v2 = vadd.f32 %v3194_v3, %v2841_v24  ;;  %v3196_v41 = vpop.f32.mrb[142].mxu0  ;;  %4414 = vmatprep.subr.bf16.mxu0 %v3667_v7 }
 0x4dd   : > { %v3388_v25 = vadd.f32 %v3387_v44, %v2841_v24  ;;  %v3389_v13 = vpop.f32.mrb[142].mxu1  ;;  %4767 = vmatprep.subr.bf16.mxu1 %v3669_v4  ;;  %v3197_v31 = vadd.f32 %v3196_v41, %v2846_v14  ;;  %v3198_v49 = vpop.f32.mrb[143].mxu0  ;;  %4415 = vmatpush1.bf16.msra.mxu0 %v3666_v45  ;;  %v3522_v8 = vmax.f32 %v3193_v60, 0.0 }
 0x4de   : > { %v3390_v5 = vadd.f32 %v3389_v13, %v2846_v14  ;;  %v3391_v20 = vpop.f32.mrb[143].mxu1  ;;  %4768 = vmatpush1.bf16.msra.mxu1 %v3668_v22  ;;  %v3199_v16 = vadd.f32 %v3198_v49, %v2846_v14  ;;  %v3524_v38 = vmax.f32 %v3386_v62, 0.0  ;;  %v3523_v27 = vmax.f32 %v3195_v2, 0.0  ;;  %v2861_v39 = vpop.permute.xlu1 %2860 }
 0x4df   : > { %v3392_v36 = vadd.f32 %v3391_v20, %v2846_v14  ;;  %v3526_v37 = vmax.f32 %v3197_v31, 0.0  ;;  %v3525_v11 = vmax.f32 %v3388_v25, 0.0 }
 0x4e0   : > { %v3528_v55 = vmax.f32 %v3390_v5, 0.0  ;;  %v3527_v63 = vmax.f32 %v3199_v16, 0.0 }
 0x4e1   : > { %v3529_v47 = vmax.f32 %v3392_v36, 0.0  ;;  %v3670_v56 = vpack.c.bf16 %v3526_v37, %v3522_v8 }
 0x4e2   : > { %v3672_v53 = vpack.c.bf16 %v3528_v55, %v3524_v38  ;;  %v3671_v61 = vpack.c.bf16 %v3527_v63, %v3523_v27  ;;  %v3202_v28 = vpop.f32.mrb[144].mxu0  ;;  %v2876_v27 = vpop.permute.xlu0 %2875 }
 0x4e3   : > { %v3673_v46 = vpack.c.bf16 %v3529_v47, %v3525_v11  ;;  %v3395_v58 = vpop.f32.mrb[144].mxu1  ;;  %v3203_v17 = vadd.f32 %v3202_v28, %v2851_v33  ;;  %v3204_v59 = vpop.f32.mrb[145].mxu0 }
 0x4e4   : > { %v3396_v26 = vadd.f32 %v3395_v58, %v2851_v33  ;;  %v3397_v57 = vpop.f32.mrb[145].mxu1  ;;  %v3205_v40 = vadd.f32 %v3204_v59, %v2851_v33  ;;  %v3206_v54 = vpop.f32.mrb[146].mxu0  ;;  %4416 = vmatprep.subr.bf16.mxu0 %v3671_v61 }
 0x4e5   : > { %v3398_v30 = vadd.f32 %v3397_v57, %v2851_v33  ;;  %v3399_v10 = vpop.f32.mrb[146].mxu1  ;;  %4769 = vmatprep.subr.bf16.mxu1 %v3673_v46  ;;  %v3207_v43 = vadd.f32 %v3206_v54, %v2856_v18  ;;  %v3208_v23 = vpop.f32.mrb[147].mxu0  ;;  %4417 = vmatpush1.bf16.msra.mxu0 %v3670_v56  ;;  %v3530_v35 = vmax.f32 %v3203_v17, 0.0 }
 0x4e6   : > { %v3400_v1 = vadd.f32 %v3399_v10, %v2856_v18  ;;  %v3401_v52 = vpop.f32.mrb[147].mxu1  ;;  %4770 = vmatpush1.bf16.msra.mxu1 %v3672_v53  ;;  %v3209_v19 = vadd.f32 %v3208_v23, %v2856_v18  ;;  %v3532_v48 = vmax.f32 %v3396_v26, 0.0  ;;  %v3531_v42 = vmax.f32 %v3205_v40, 0.0  ;;  %v2871_v11 = vpop.permute.xlu1 %2870 }
 0x4e7   : > { %v3402_v9 = vadd.f32 %v3401_v52, %v2856_v18  ;;  %v3534_v12 = vmax.f32 %v3207_v43, 0.0  ;;  %v3533_v6 = vmax.f32 %v3398_v30, 0.0 }
 0x4e8   : > { %v3536_v0 = vmax.f32 %v3400_v1, 0.0  ;;  %v3535_v51 = vmax.f32 %v3209_v19, 0.0 }
 0x4e9   : > { %v3537_v21 = vmax.f32 %v3402_v9, 0.0  ;;  %v3674_v15 = vpack.c.bf16 %v3534_v12, %v3530_v35 }
 0x4ea   : > { %v3676_v34 = vpack.c.bf16 %v3536_v0, %v3532_v48  ;;  %v3675_v14 = vpack.c.bf16 %v3535_v51, %v3531_v42  ;;  %v3212_v45 = vpop.f32.mrb[148].mxu0  ;;  %v2886_v42 = vpop.permute.xlu0 %2885 }
 0x4eb   : > { %v3677_v24 = vpack.c.bf16 %v3537_v21, %v3533_v6  ;;  %v3405_v22 = vpop.f32.mrb[148].mxu1  ;;  %v3213_v7 = vadd.f32 %v3212_v45, %v2861_v39  ;;  %v3214_v29 = vpop.f32.mrb[149].mxu0 }
 0x4ec   : > { %v3406_v4 = vadd.f32 %v3405_v22, %v2861_v39  ;;  %v3407_v32 = vpop.f32.mrb[149].mxu1  ;;  %v3215_v60 = vadd.f32 %v3214_v29, %v2861_v39  ;;  %v3216_v3 = vpop.f32.mrb[150].mxu0  ;;  %4418 = vmatprep.subr.bf16.mxu0 %v3675_v14 }
 0x4ed   : > { %v3408_v62 = vadd.f32 %v3407_v32, %v2861_v39  ;;  %v3409_v44 = vpop.f32.mrb[150].mxu1  ;;  %4771 = vmatprep.subr.bf16.mxu1 %v3677_v24  ;;  %v3217_v2 = vadd.f32 %v3216_v3, %v2866_v50  ;;  %v3218_v41 = vpop.f32.mrb[151].mxu0  ;;  %4419 = vmatpush1.bf16.msra.mxu0 %v3674_v15  ;;  %v3538_v49 = vmax.f32 %v3213_v7, 0.0 }
 0x4ee   : > { %v3410_v25 = vadd.f32 %v3409_v44, %v2866_v50  ;;  %v3411_v13 = vpop.f32.mrb[151].mxu1  ;;  %4772 = vmatpush1.bf16.msra.mxu1 %v3676_v34  ;;  %v3219_v31 = vadd.f32 %v3218_v41, %v2866_v50  ;;  %v3540_v20 = vmax.f32 %v3406_v4, 0.0  ;;  %v3539_v8 = vmax.f32 %v3215_v60, 0.0  ;;  %v2881_v6 = vpop.permute.xlu1 %2880 }
 0x4ef   : > { %v3412_v5 = vadd.f32 %v3411_v13, %v2866_v50  ;;  %v3542_v16 = vmax.f32 %v3217_v2, 0.0  ;;  %v3541_v38 = vmax.f32 %v3408_v62, 0.0 }
 0x4f0   : > { %v3544_v36 = vmax.f32 %v3410_v25, 0.0  ;;  %v3543_v37 = vmax.f32 %v3219_v31, 0.0 }
 0x4f1   : > { %v3545_v55 = vmax.f32 %v3412_v5, 0.0  ;;  %v3678_v63 = vpack.c.bf16 %v3542_v16, %v3538_v49 }
 0x4f2   : > { %v3680_v47 = vpack.c.bf16 %v3544_v36, %v3540_v20  ;;  %v3679_v18 = vpack.c.bf16 %v3543_v37, %v3539_v8  ;;  %v3222_v56 = vpop.f32.mrb[152].mxu0 }
 0x4f3   : > { %v3681_v33 = vpack.c.bf16 %v3545_v55, %v3541_v38  ;;  %v3415_v53 = vpop.f32.mrb[152].mxu1  ;;  %v3223_v61 = vadd.f32 %v3222_v56, %v2871_v11  ;;  %v3224_v28 = vpop.f32.mrb[153].mxu0  ;;  %v7557_v56 = vld [vmem:[%s11461_s9 + $0x30] ss:$8 sps:$4 sm:$0xff]  }
 0x4f4   : > { %v3416_v46 = vadd.f32 %v3415_v53, %v2871_v11  ;;  %v3417_v58 = vpop.f32.mrb[153].mxu1  ;;  %v3225_v17 = vadd.f32 %v3224_v28, %v2871_v11  ;;  %v3226_v59 = vpop.f32.mrb[154].mxu0  ;;  %4420 = vmatprep.subr.bf16.mxu0 %v3679_v18  ;;  %v7554_v18 = vld [vmem:[%s11461_s9 + $0x20] ss:$8 sps:$4 sm:$0xff]   ;;  %v7558_v53 = vld [vmem:[%s11461_s9 + $0x44] ss:$8 sps:$4 sm:$0xff]  }
 0x4f5   : > { %v3418_v26 = vadd.f32 %v3417_v58, %v2871_v11  ;;  %v3419_v57 = vpop.f32.mrb[154].mxu1  ;;  %4773 = vmatprep.subr.bf16.mxu1 %v3681_v33  ;;  %v3227_v40 = vadd.f32 %v3226_v59, %v2876_v27  ;;  %v3228_v54 = vpop.f32.mrb[155].mxu0  ;;  %4421 = vmatpush1.bf16.msra.mxu0 %v3678_v63  ;;  %v3546_v23 = vmax.f32 %v3223_v61, 0.0  ;;  %v7549_v11 = vld [vmem:[%s11461_s9 + $0x14] ss:$8 sps:$4 sm:$0xff]  }
 0x4f6   : > { %v3420_v30 = vadd.f32 %v3419_v57, %v2876_v27  ;;  %v3421_v10 = vpop.f32.mrb[155].mxu1  ;;  %4774 = vmatpush1.bf16.msra.mxu1 %v3680_v47  ;;  %v3229_v43 = vadd.f32 %v3228_v54, %v2876_v27  ;;  %v3548_v52 = vmax.f32 %v3416_v46, 0.0  ;;  %v3547_v35 = vmax.f32 %v3225_v17, 0.0  ;;  %v7551_v63 = vld [vmem:[%s11461_s9 + $0x10] ss:$8 sps:$4 sm:$0xff]  }
 0x4f7   : > { %v3422_v1 = vadd.f32 %v3421_v10, %v2876_v27  ;;  %v3550_v19 = vmax.f32 %v3227_v40, 0.0  ;;  %v3549_v48 = vmax.f32 %v3418_v26, 0.0  ;;  %v7546_v27 = vld [vmem:[%s11461_s9] ss:$8 sps:$4 sm:$0xff]   ;;  %v7552_v47 = vld [vmem:[%s11461_s9 + $0x24] ss:$8 sps:$4 sm:$0xff]  }
 0x4f8   : > { %v3552_v9 = vmax.f32 %v3420_v30, 0.0  ;;  %v3551_v12 = vmax.f32 %v3229_v43, 0.0  ;;  %v7555_v33 = vld [vmem:[%s11461_s9 + $0x34] ss:$8 sps:$4 sm:$0xff]   ;;  %v7560_v61 = vld [vmem:[%s11461_s9 + $0x40] ss:$8 sps:$4 sm:$0xff]  }
 0x4f9   : > { %v3553_v0 = vmax.f32 %v3422_v1, 0.0  ;;  %v3682_v51 = vpack.c.bf16 %v3550_v19, %v3546_v23  ;;  %v7561_v46 = vld [vmem:[%s11461_s9 + $0x54] ss:$8 sps:$4 sm:$0xff]   ;;  %v7563_v28 = vld [vmem:[%s11461_s9 + $0x50] ss:$8 sps:$4 sm:$0xff]  }
 0x4fa   : > { %v3684_v21 = vpack.c.bf16 %v3552_v9, %v3548_v52  ;;  %v3683_v50 = vpack.c.bf16 %v3551_v12, %v3547_v35  ;;  %v3232_v15 = vpop.f32.mrb[156].mxu0  ;;  %v7564_v58 = vld [vmem:[%s11461_s9 + $0x64] ss:$8 sps:$4 sm:$0xff]   ;;  %v7566_v17 = vld [vmem:[%s11461_s9 + $0x60] ss:$8 sps:$4 sm:$0xff]  }
 0x4fb   : > { %v3685_v39 = vpack.c.bf16 %v3553_v0, %v3549_v48  ;;  %v3425_v34 = vpop.f32.mrb[156].mxu1  ;;  %v3233_v14 = vadd.f32 %v3232_v15, %v2881_v6  ;;  %v3234_v45 = vpop.f32.mrb[157].mxu0  ;;  %v7567_v26 = vld [vmem:[%s11461_s9 + $0x74] ss:$8 sps:$4 sm:$0xff]   ;;  %v7569_v59 = vld [vmem:[%s11461_s9 + $0x70] ss:$8 sps:$4 sm:$0xff]  }
 0x4fc   : > { %v3426_v24 = vadd.f32 %v3425_v34, %v2881_v6  ;;  %v3427_v22 = vpop.f32.mrb[157].mxu1  ;;  %v3235_v7 = vadd.f32 %v3234_v45, %v2881_v6  ;;  %v3236_v29 = vpop.f32.mrb[158].mxu0  ;;  %4422 = vmatprep.subr.bf16.mxu0 %v3683_v50  ;;  %v7570_v57 = vld [vmem:[%s11461_s9 + $0x84] ss:$8 sps:$4 sm:$0xff]   ;;  %v7572_v40 = vld [vmem:[%s11461_s9 + $0x80] ss:$8 sps:$4 sm:$0xff]  }
 0x4fd   : > { %v3428_v4 = vadd.f32 %v3427_v22, %v2881_v6  ;;  %v3429_v32 = vpop.f32.mrb[158].mxu1  ;;  %4775 = vmatprep.subr.bf16.mxu1 %v3685_v39  ;;  %v3237_v60 = vadd.f32 %v3236_v29, %v2886_v42  ;;  %v3238_v3 = vpop.f32.mrb[159].mxu0  ;;  %4423 = vmatpush1.bf16.msra.mxu0 %v3682_v51  ;;  %v3554_v41 = vmax.f32 %v3233_v14, 0.0  ;;  %v7573_v30 = vld [vmem:[%s11461_s9 + $0x94] ss:$8 sps:$4 sm:$0xff]  }
 0x4fe   : > { %v3430_v62 = vadd.f32 %v3429_v32, %v2886_v42  ;;  %v3431_v44 = vpop.f32.mrb[159].mxu1  ;;  %4776 = vmatpush1.bf16.msra.mxu1 %v3684_v21  ;;  %v3239_v2 = vadd.f32 %v3238_v3, %v2886_v42  ;;  %v3556_v13 = vmax.f32 %v3426_v24, 0.0  ;;  %v3555_v49 = vmax.f32 %v3235_v7, 0.0  ;;  %v7575_v54 = vld [vmem:[%s11461_s9 + $0x90] ss:$8 sps:$4 sm:$0xff]   ;;  %v9559_v15 = vpop.permute.xlu0 %3761 }
 0x4ff   : > { %v3432_v25 = vadd.f32 %v3431_v44, %v2886_v42  ;;  %v3558_v31 = vmax.f32 %v3237_v60, 0.0  ;;  %v3557_v20 = vmax.f32 %v3428_v4, 0.0  ;;  %v7576_v10 = vld [vmem:[%s11461_s9 + $0xa4] ss:$8 sps:$4 sm:$0xff]   ;;  %v7578_v43 = vld [vmem:[%s11461_s9 + $0xa0] ss:$8 sps:$4 sm:$0xff]   ;;  %v9561_v34 = vpop.permute.xlu1 %3756 }
 0x500   : > { %v3560_v5 = vmax.f32 %v3430_v62, 0.0  ;;  %v3559_v16 = vmax.f32 %v3239_v2, 0.0  ;;  %v7579_v1 = vld [vmem:[%s11461_s9 + $0xb4] ss:$8 sps:$4 sm:$0xff]   ;;  %v7581_v23 = vld [vmem:[%s11461_s9 + $0xb0] ss:$8 sps:$4 sm:$0xff]  }
 0x501   : > { %v3561_v36 = vmax.f32 %v3432_v25, 0.0  ;;  %v3686_v8 = vpack.c.bf16 %v3558_v31, %v3554_v41  ;;  %v7582_v52 = vld [vmem:[%s11461_s9 + $0xc4] ss:$8 sps:$4 sm:$0xff]   ;;  %v7584_v19 = vld [vmem:[%s11461_s9 + $0xc0] ss:$8 sps:$4 sm:$0xff]  }
 0x502   : > { %v3688_v38 = vpack.c.bf16 %v3560_v5, %v3556_v13  ;;  %v3687_v37 = vpack.c.bf16 %v3559_v16, %v3555_v49  ;;  %v7585_v9 = vld [vmem:[%s11461_s9 + $0xd4] ss:$8 sps:$4 sm:$0xff]   ;;  %v7587_v35 = vld [vmem:[%s11461_s9 + $0xd0] ss:$8 sps:$4 sm:$0xff]   ;;  %v7588_v48 = vld [vmem:[%s11461_s9 + $0xe4] ss:$8 sps:$4 sm:$0xff]   ;;  %v9569_v45 = vpop.permute.xlu0 %3771 }
 0x503   : > { %v3689_v55 = vpack.c.bf16 %v3561_v36, %v3557_v20  ;;  %v7590_v12 = vld [vmem:[%s11461_s9 + $0xe0] ss:$8 sps:$4 sm:$0xff]   ;;  %v7591_v0 = vld [vmem:[%s11461_s9 + $0xf4] ss:$8 sps:$4 sm:$0xff]   ;;  %v7593_v42 = vld [vmem:[%s11461_s9 + $0xf0] ss:$8 sps:$4 sm:$0xff]   ;;  %v9571_v22 = vpop.permute.xlu1 %3766 }
 0x504   : > { %4424 = vmatprep.subr.bf16.mxu0 %v3687_v37  ;;  %v7594_v6 = vld [vmem:[%s11461_s9 + $0x104] ss:$8 sps:$4 sm:$0xff]   ;;  %v7596_v51 = vld [vmem:[%s11461_s9 + $0x100] ss:$8 sps:$4 sm:$0xff]   ;;  %v7597_v21 = vld [vmem:[%s11461_s9 + $0x114] ss:$8 sps:$4 sm:$0xff]  }
 0x505   : > { %4777 = vmatprep.subr.bf16.mxu1 %v3689_v55  ;;  %4425 = vmatpush1.bf16.msra.mxu0 %v3686_v8  ;;  %v7599_v50 = vld [vmem:[%s11461_s9 + $0x110] ss:$8 sps:$4 sm:$0xff]   ;;  %v7600_v39 = vld [vmem:[%s11461_s9 + $0x124] ss:$8 sps:$4 sm:$0xff]   ;;  %v7602_v14 = vld [vmem:[%s11461_s9 + $0x120] ss:$8 sps:$4 sm:$0xff]  }
 0x506   : > { %4778 = vmatpush1.bf16.msra.mxu1 %v3688_v38  ;;  %v7603_v24 = vld [vmem:[%s11461_s9 + $0x134] ss:$8 sps:$4 sm:$0xff]   ;;  %v7605_v7 = vld [vmem:[%s11461_s9 + $0x130] ss:$8 sps:$4 sm:$0xff]   ;;  %v7606_v4 = vld [vmem:[%s11461_s9 + $0x144] ss:$8 sps:$4 sm:$0xff]   ;;  %v9579_v29 = vpop.permute.xlu0 %3781 }
 0x507   : > { %v9581_v32 = vpop.permute.xlu1 %3776  ;;  %v7608_v3 = vld [vmem:[%s11461_s9 + $0x140] ss:$8 sps:$4 sm:$0xff]   ;;  %v7609_v44 = vld [vmem:[%s11461_s9 + $0x154] ss:$8 sps:$4 sm:$0xff]   ;;  %v7611_v41 = vld [vmem:[%s11461_s9 + $0x150] ss:$8 sps:$4 sm:$0xff]  }
 0x508   : > { %4427 = vmatmul.mubr.bf16.vlgmr.msra.gmra.mrb[160].mxu0 %v7546_v27  ;;  %v7612_v13 = vld [vmem:[%s11461_s9 + $0x164] ss:$8 sps:$4 sm:$0xff]   ;;  %v7614_v49 = vld [vmem:[%s11461_s9 + $0x160] ss:$8 sps:$4 sm:$0xff]   ;;  %v7615_v20 = vld [vmem:[%s11461_s9 + $0x174] ss:$8 sps:$4 sm:$0xff]  }
 0x509   : > { %4780 = vmatmul.mubr.bf16.vlgmr.msra.gmra.mrb[160].mxu1 %v7546_v27  ;;  %4436 = vmatprep.mubr.bf16.mxu0 %v7549_v11  ;;  %v7617_v37 = vld [vmem:[%s11461_s9 + $0x170] ss:$8 sps:$4 sm:$0xff]   ;;  %v7620_v55 = vld [vmem:[%s11461_s9 + $0x184] ss:$8 sps:$4 sm:$0xff]  }
 0x50a   : > { %4789 = vmatprep.mubr.bf16.mxu1 %v7549_v11  ;;  %v9583_v60 = vpop.permute.xlu0 %3791 }
 0x50b   : > { %v9585_v62 = vpop.permute.xlu1 %3786 }
 0x50e   : > { %v9593_v2 = vpop.permute.xlu0 %3801 }
 0x50f   : > { %v9595_v25 = vpop.permute.xlu1 %3796 }
 0x510   : > { %4437 = vmatmul.mubr.bf16.gmra.mrb[164].mxu0 %v7551_v63 }
 0x511   : > { %4790 = vmatmul.mubr.bf16.gmra.mrb[164].mxu1 %v7551_v63  ;;  %4446 = vmatprep.mubr.bf16.mxu0 %v7552_v47  ;;  %v7618_v63 = vld [vmem:[%s11461_s9 + $0x180] ss:$8 sps:$4 sm:$0xff]  }
 0x512   : > { %4799 = vmatprep.mubr.bf16.mxu1 %v7552_v47  ;;  %v9603_v31 = vpop.permute.xlu0 %3811  ;;  %v7623_v47 = vld [vmem:[%s11461_s9 + $0x194] ss:$8 sps:$4 sm:$0xff]  }
 0x513   : > { %v9605_v5 = vpop.permute.xlu1 %3806 }
 0x516   : > { %v9613_v16 = vpop.permute.xlu0 %3821 }
 0x517   : > { %v9615_v36 = vpop.permute.xlu1 %3816 }
 0x518   : > { %4447 = vmatmul.mubr.bf16.gmra.mrb[168].mxu0 %v7554_v18 }
 0x519   : > { %4800 = vmatmul.mubr.bf16.gmra.mrb[168].mxu1 %v7554_v18  ;;  %4456 = vmatprep.mubr.bf16.mxu0 %v7555_v33 }
 0x51a   : > { %4809 = vmatprep.mubr.bf16.mxu1 %v7555_v33  ;;  %v9617_v8 = vpop.permute.xlu0 %3831 }
 0x51b   : > { %v9619_v38 = vpop.permute.xlu1 %3826 }
 0x51e   : > { %v9627_v27 = vpop.permute.xlu0 %3841 }
 0x51f   : > { %v9629_v11 = vpop.permute.xlu1 %3836 }
 0x520   : > { %4457 = vmatmul.mubr.bf16.gmra.mrb[172].mxu0 %v7557_v56 }
 0x521   : > { %4810 = vmatmul.mubr.bf16.gmra.mrb[172].mxu1 %v7557_v56  ;;  %4466 = vmatprep.mubr.bf16.mxu0 %v7558_v53  ;;  %v7621_v56 = vld [vmem:[%s11461_s9 + $0x190] ss:$8 sps:$4 sm:$0xff]  }
 0x522   : > { %4819 = vmatprep.mubr.bf16.mxu1 %v7558_v53  ;;  %v9637_v18 = vpop.permute.xlu0 %3851  ;;  %v7626_v53 = vld [vmem:[%s11461_s9 + $0x1a4] ss:$8 sps:$4 sm:$0xff]  }
 0x523   : > { %v9639_v33 = vpop.permute.xlu1 %3846 }
 0x528   : > { %4467 = vmatmul.mubr.bf16.gmra.mrb[176].mxu0 %v7560_v61 }
 0x529   : > { %4820 = vmatmul.mubr.bf16.gmra.mrb[176].mxu1 %v7560_v61  ;;  %4476 = vmatprep.mubr.bf16.mxu0 %v7561_v46  ;;  %v9647_v61 = vpop.permute.xlu0 %3861 }
 0x52a   : > { %4829 = vmatprep.mubr.bf16.mxu1 %v7561_v46  ;;  %v9649_v46 = vpop.permute.xlu1 %3856 }
 0x530   : > { %4477 = vmatmul.mubr.bf16.gmra.mrb[180].mxu0 %v7563_v28 }
 0x531   : > { %4830 = vmatmul.mubr.bf16.gmra.mrb[180].mxu1 %v7563_v28  ;;  %4486 = vmatprep.mubr.bf16.mxu0 %v7564_v58  ;;  %v11462_v28 = vlaneseq }
 0x532   : > { %4839 = vmatprep.mubr.bf16.mxu1 %v7564_v58 }
 0x533   : > { %v5101_v58 = vand.u32 127, %v11462_v28 }
 0x538   : > { %4487 = vmatmul.mubr.bf16.gmra.mrb[184].mxu0 %v7566_v17 }
 0x539   : > { %4840 = vmatmul.mubr.bf16.gmra.mrb[184].mxu1 %v7566_v17  ;;  %4496 = vmatprep.mubr.bf16.mxu0 %v7567_v26  ;;  %v5102_v17 = vadd.s32 128, %v5101_v58 }
 0x53a   : > { %4849 = vmatprep.mubr.bf16.mxu1 %v7567_v26  ;;  %v5106_v26 = vstv %s7232_s22 }
 0x540   : > { %4497 = vmatmul.mubr.bf16.gmra.mrb[188].mxu0 %v7569_v59 }
 0x541   : > { %4850 = vmatmul.mubr.bf16.gmra.mrb[188].mxu1 %v7569_v59  ;;  %4506 = vmatprep.mubr.bf16.mxu0 %v7570_v57  ;;  %v9653_v59 = vpop.permute.xlu0 %3871 }
 0x542   : > { %4859 = vmatprep.mubr.bf16.mxu1 %v7570_v57  ;;  %v9655_v57 = vpop.permute.xlu1 %3866 }
 0x548   : > { %4507 = vmatmul.mubr.bf16.gmra.mrb[192].mxu0 %v7572_v40 }
 0x549   : > { %4860 = vmatmul.mubr.bf16.gmra.mrb[192].mxu1 %v7572_v40  ;;  %4516 = vmatprep.mubr.bf16.mxu0 %v7573_v30  ;;  %v7624_v40 = vld [vmem:[%s11461_s9 + $0x1a0] ss:$8 sps:$4 sm:$0xff]  }
 0x54a   : > { %4869 = vmatprep.mubr.bf16.mxu1 %v7573_v30  ;;  %v7629_v30 = vld [vmem:[%s11461_s9 + $0x1b4] ss:$8 sps:$4 sm:$0xff]  }
 0x550   : > { %4517 = vmatmul.mubr.bf16.gmra.mrb[196].mxu0 %v7575_v54 }
 0x551   : > { %4870 = vmatmul.mubr.bf16.gmra.mrb[196].mxu1 %v7575_v54  ;;  %4526 = vmatprep.mubr.bf16.mxu0 %v7576_v10  ;;  %v5103_v54 = vadd.s32 256, %v5101_v58 }
 0x552   : > { %4879 = vmatprep.mubr.bf16.mxu1 %v7576_v10  ;;  %v9663_v10 = vadd.s32 %v5106_v26, %v5101_v58 }
 0x554   : > { %vm5111_vm2 = vcmp.lt.s32.totalorder %v9663_v10, 1000 }
 0x558   : > { %4527 = vmatmul.mubr.bf16.gmra.mrb[200].mxu0 %v7578_v43 }
 0x559   : > { %4880 = vmatmul.mubr.bf16.gmra.mrb[200].mxu1 %v7578_v43  ;;  %4536 = vmatprep.mubr.bf16.mxu0 %v7579_v1  ;;  %v5104_v43 = vadd.s32 384, %v5101_v58 }
 0x55a   : > { %4889 = vmatprep.mubr.bf16.mxu1 %v7579_v1  ;;  %v9665_v1 = vadd.s32 %v5106_v26, %v5102_v17 }
 0x55c   : > { %vm5112_vm3 = vcmp.lt.s32.totalorder %v9665_v1, 1000 }
 0x560   : > { %4537 = vmatmul.mubr.bf16.gmra.mrb[204].mxu0 %v7581_v23 }
 0x561   : > { %4890 = vmatmul.mubr.bf16.gmra.mrb[204].mxu1 %v7581_v23  ;;  %4546 = vmatprep.mubr.bf16.mxu0 %v7582_v52  ;;  %v9667_v23 = vadd.s32 %v5106_v26, %v5103_v54 }
 0x562   : > { %4899 = vmatprep.mubr.bf16.mxu1 %v7582_v52  ;;  %v9669_v52 = vpop.permute.xlu0 %3881 }
 0x563   : > { %vm5113_vm4 = vcmp.lt.s32.totalorder %v9667_v23, 1000 }
 0x568   : > { %4547 = vmatmul.mubr.bf16.gmra.mrb[208].mxu0 %v7584_v19 }
 0x569   : > { %4900 = vmatmul.mubr.bf16.gmra.mrb[208].mxu1 %v7584_v19  ;;  %4556 = vmatprep.mubr.bf16.mxu0 %v7585_v9  ;;  %v9671_v19 = vpop.permute.xlu1 %3876 }
 0x56a   : > { %4909 = vmatprep.mubr.bf16.mxu1 %v7585_v9 }
 0x570   : > { %4557 = vmatmul.mubr.bf16.gmra.mrb[212].mxu0 %v7587_v35 }
 0x571   : > { %4910 = vmatmul.mubr.bf16.gmra.mrb[212].mxu1 %v7587_v35  ;;  %4566 = vmatprep.mubr.bf16.mxu0 %v7588_v48 }
 0x572   : > { %4919 = vmatprep.mubr.bf16.mxu1 %v7588_v48  ;;  %v9674_v48 = vadd.s32 %v5106_v26, %v5104_v43 }
 0x574   : > { %vm5114_vm5 = vcmp.lt.s32.totalorder %v9674_v48, 1000  ;;  %v5409_v48 = vld [vmem:[#allocation2 + $0xf0] sm:$0xff] }
 0x578   : > { %4567 = vmatmul.mubr.bf16.gmra.mrb[216].mxu0 %v7590_v12 }
 0x579   : > { %4920 = vmatmul.mubr.bf16.gmra.mrb[216].mxu1 %v7590_v12  ;;  %4576 = vmatprep.mubr.bf16.mxu0 %v7591_v0 }
 0x57a   : > { %4929 = vmatprep.mubr.bf16.mxu1 %v7591_v0 }
 0x580   : > { %4577 = vmatmul.mubr.bf16.gmra.mrb[220].mxu0 %v7593_v42 }
 0x581   : > { %4930 = vmatmul.mubr.bf16.gmra.mrb[220].mxu1 %v7593_v42  ;;  %4586 = vmatprep.mubr.bf16.mxu0 %v7594_v6 }
 0x582   : > { %4939 = vmatprep.mubr.bf16.mxu1 %v7594_v6  ;;  %v7627_v6 = vld [vmem:[%s11461_s9 + $0x1b0] ss:$8 sps:$4 sm:$0xff]  }
 0x588   : > { %4587 = vmatmul.mubr.bf16.gmra.mrb[224].mxu0 %v7596_v51 }
 0x589   : > { %4940 = vmatmul.mubr.bf16.gmra.mrb[224].mxu1 %v7596_v51  ;;  %4596 = vmatprep.mubr.bf16.mxu0 %v7597_v21 }
 0x58a   : > { %4949 = vmatprep.mubr.bf16.mxu1 %v7597_v21 }
 0x590   : > { %4597 = vmatmul.mubr.bf16.gmra.mrb[228].mxu0 %v7599_v50 }
 0x591   : > { %4950 = vmatmul.mubr.bf16.gmra.mrb[228].mxu1 %v7599_v50  ;;  %4606 = vmatprep.mubr.bf16.mxu0 %v7600_v39 }
 0x592   : > { %4959 = vmatprep.mubr.bf16.mxu1 %v7600_v39 }
 0x598   : > { %4607 = vmatmul.mubr.bf16.gmra.mrb[232].mxu0 %v7602_v14 }
 0x599   : > { %4960 = vmatmul.mubr.bf16.gmra.mrb[232].mxu1 %v7602_v14  ;;  %4616 = vmatprep.mubr.bf16.mxu0 %v7603_v24  ;;  %v7632_v14 = vld [vmem:[%s11461_s9 + $0x1c4] ss:$8 sps:$4 sm:$0xff]  }
 0x59a   : > { %4969 = vmatprep.mubr.bf16.mxu1 %v7603_v24 }
 0x5a0   : > { %4617 = vmatmul.mubr.bf16.gmra.mrb[236].mxu0 %v7605_v7 }
 0x5a1   : > { %4970 = vmatmul.mubr.bf16.gmra.mrb[236].mxu1 %v7605_v7  ;;  %4626 = vmatprep.mubr.bf16.mxu0 %v7606_v4 }
 0x5a2   : > { %4979 = vmatprep.mubr.bf16.mxu1 %v7606_v4 }
 0x5a8   : > { %4627 = vmatmul.mubr.bf16.gmra.mrb[240].mxu0 %v7608_v3 }
 0x5a9   : > { %4980 = vmatmul.mubr.bf16.gmra.mrb[240].mxu1 %v7608_v3  ;;  %4636 = vmatprep.mubr.bf16.mxu0 %v7609_v44 }
 0x5aa   : > { %4989 = vmatprep.mubr.bf16.mxu1 %v7609_v44 }
 0x5b0   : > { %4637 = vmatmul.mubr.bf16.gmra.mrb[244].mxu0 %v7611_v41 }
 0x5b1   : > { %4990 = vmatmul.mubr.bf16.gmra.mrb[244].mxu1 %v7611_v41  ;;  %4646 = vmatprep.mubr.bf16.mxu0 %v7612_v13 }
 0x5b2   : > { %4999 = vmatprep.mubr.bf16.mxu1 %v7612_v13 }
 0x5b8   : > { %4647 = vmatmul.mubr.bf16.gmra.mrb[248].mxu0 %v7614_v49 }
 0x5b9   : > { %5000 = vmatmul.mubr.bf16.gmra.mrb[248].mxu1 %v7614_v49  ;;  %4656 = vmatprep.mubr.bf16.mxu0 %v7615_v20 }
 0x5ba   : > { %5009 = vmatprep.mubr.bf16.mxu1 %v7615_v20 }
 0x5c0   : > { %4657 = vmatmul.mubr.bf16.gmra.mrb[252].mxu0 %v7617_v37 }
 0x5c1   : > { %5010 = vmatmul.mubr.bf16.gmra.mrb[252].mxu1 %v7617_v37  ;;  %4666 = vmatprep.mubr.bf16.mxu0 %v7620_v55 }
 0x5c2   : > { %5019 = vmatprep.mubr.bf16.mxu1 %v7620_v55 }
 0x5c8   : > { %4667 = vmatmul.mubr.bf16.gmra.mrb[0].mxu0 %v7618_v63 }
 0x5c9   : > { %5020 = vmatmul.mubr.bf16.gmra.mrb[0].mxu1 %v7618_v63  ;;  %4676 = vmatprep.mubr.bf16.mxu0 %v7623_v47 }
 0x5ca   : > { %5029 = vmatprep.mubr.bf16.mxu1 %v7623_v47  ;;  %v9703_v47 = vpop.permute.xlu0 %3891 }
 0x5d0   : > { %4677 = vmatmul.mubr.bf16.gmra.mrb[4].mxu0 %v7621_v56 }
 0x5d1   : > { %5030 = vmatmul.mubr.bf16.gmra.mrb[4].mxu1 %v7621_v56  ;;  %4686 = vmatprep.mubr.bf16.mxu0 %v7626_v53  ;;  %v9705_v56 = vpop.permute.xlu1 %3886 }
 0x5d2   : > { %5039 = vmatprep.mubr.bf16.mxu1 %v7626_v53 }
 0x5d8   : > { %4687 = vmatmul.mubr.bf16.gmra.mrb[8].mxu0 %v7624_v40 }
 0x5d9   : > { %5040 = vmatmul.mubr.bf16.gmra.mrb[8].mxu1 %v7624_v40  ;;  %4696 = vmatprep.mubr.bf16.mxu0 %v7629_v30 }
 0x5da   : > { %5049 = vmatprep.mubr.bf16.mxu1 %v7629_v30 }
 0x5db   : > { %v4428_v9 = vpop.f32.mrb[160].mxu0 }
 0x5dc   : > { %v4781_v35 = vpop.f32.mrb[160].mxu1  ;;  %v4429_v12 = vadd.f32 %v4428_v9, %v9561_v34  ;;  %v4430_v0 = vpop.f32.mrb[161].mxu0 }
 0x5dd   : > { %v4783_v42 = vpop.f32.mrb[161].mxu1  ;;  %v4782_v51 = vadd.f32 %v4781_v35, %v9561_v34  ;;  %v4431_v21 = vadd.f32 %v4430_v0, %v9561_v34  ;;  %v4432_v50 = vpop.f32.mrb[162].mxu0  ;;  %v7630_v35 = vld [vmem:[%s11461_s9 + $0x1c0] ss:$8 sps:$4 sm:$0xff]  }
 0x5de   : > { %v4785_v39 = vpop.f32.mrb[162].mxu1  ;;  %v5123_v24 = vsel %vm5111_vm2, %v4429_v12, -inf  ;;  %v4433_v7 = vadd.f32 %v4432_v50, %v9559_v15  ;;  %v4434_v4 = vpop.f32.mrb[163].mxu0  ;;  %v4784_v41 = vadd.f32 %v4783_v42, %v9561_v34 }
 0x5df   : > { %v4787_v3 = vpop.f32.mrb[163].mxu1  ;;  %v5124_v44 = vsel %vm5112_vm3, %v4431_v21, -inf  ;;  %v4786_v13 = vadd.f32 %v4785_v39, %v9559_v15  ;;  %v4435_v49 = vadd.f32 %v4434_v4, %v9559_v15  ;;  %v5125_v55 = vsel %vm5113_vm4, %v4782_v51, -inf  ;;  %v7635_v21 = vld [vmem:[%s11461_s9 + $0x1d4] ss:$8 sps:$4 sm:$0xff]  }
 0x5e0   : > { %v5443_v20 = vmax.f32 %v5123_v24, %v5124_v44  ;;  %v5127_v37 = vsel %vm5111_vm2, %v4433_v7, -inf  ;;  %4697 = vmatmul.mubr.bf16.gmra.mrb[12].mxu0 %v7627_v6  ;;  %v4788_v34 = vadd.f32 %v4787_v3, %v9559_v15  ;;  %v5126_v58 = vsel %vm5114_vm5, %v4784_v41, -inf }
 0x5e1   : > { %5050 = vmatmul.mubr.bf16.gmra.mrb[12].mxu1 %v7627_v6  ;;  %v5128_v63 = vsel %vm5112_vm3, %v4435_v49, -inf  ;;  %4706 = vmatprep.mubr.bf16.mxu0 %v7632_v14  ;;  %v5129_v17 = vsel %vm5113_vm4, %v4786_v13, -inf }
 0x5e2   : > { %5059 = vmatprep.mubr.bf16.mxu1 %v7632_v14  ;;  %v5444_v53 = vmax.f32 %v5443_v20, %v5125_v55  ;;  %v5448_v28 = vmax.f32 %v5127_v37, %v5128_v63  ;;  %v5130_v12 = vsel %vm5114_vm5, %v4788_v34, -inf  ;;  %v9739_v63 = vpop.permute.xlu1 %3896 }
 0x5e3   : > { %v4438_v26 = vpop.f32.mrb[164].mxu0 }
 0x5e4   : > { %v4791_v40 = vpop.f32.mrb[164].mxu1  ;;  %v5445_v30 = vmax.f32 %v5444_v53, %v5126_v58  ;;  %v5449_v54 = vmax.f32 %v5448_v28, %v5129_v17  ;;  %v4439_v15 = vadd.f32 %v4438_v26, %v9571_v22  ;;  %v4440_v43 = vpop.f32.mrb[165].mxu0 }
 0x5e5   : > { %v4793_v9 = vpop.f32.mrb[165].mxu1  ;;  %v4792_v0 = vadd.f32 %v4791_v40, %v9571_v22  ;;  %v4441_v42 = vadd.f32 %v4440_v43, %v9571_v22  ;;  %v4442_v6 = vpop.f32.mrb[166].mxu0  ;;  %v7633_v43 = vld [vmem:[%s11461_s9 + $0x1d0] ss:$8 sps:$4 sm:$0xff]  }
 0x5e6   : > { %v4795_v51 = vpop.f32.mrb[166].mxu1  ;;  %v5450_v50 = vmax.f32 %v5449_v54, %v5130_v12  ;;  %v5131_v39 = vsel %vm5111_vm2, %v4439_v15, -inf  ;;  %v4443_v14 = vadd.f32 %v4442_v6, %v9569_v45  ;;  %v4444_v24 = vpop.f32.mrb[167].mxu0  ;;  %5446 = vmax.xlane.f32.xlu1 %v5445_v30  ;;  %v4794_v3 = vadd.f32 %v4793_v9, %v9571_v22  ;;  %v7638_v6 = vld [vmem:[%s11461_s9 + $0x1e4] ss:$8 sps:$4 sm:$0xff]  }
 0x5e7   : > { %v4797_v7 = vpop.f32.mrb[167].mxu1  ;;  %v5132_v4 = vsel %vm5112_vm3, %v4441_v42, -inf  ;;  %v4796_v44 = vadd.f32 %v4795_v51, %v9569_v45  ;;  %v4445_v41 = vadd.f32 %v4444_v24, %v9569_v45  ;;  %v5133_v20 = vsel %vm5113_vm4, %v4792_v0, -inf  ;;  %v9737_v22 = vpop.permute.xlu0 %3901 }
 0x5e8   : > { %v5453_v13 = vmax.f32 %v5131_v39, %v5132_v4  ;;  %v5135_v49 = vsel %vm5111_vm2, %v4443_v14, -inf  ;;  %4707 = vmatmul.mubr.bf16.gmra.mrb[16].mxu0 %v7630_v35  ;;  %v4798_v55 = vadd.f32 %v4797_v7, %v9569_v45  ;;  %5451 = vmax.xlane.f32.xlu0 %v5450_v50  ;;  %v5134_v28 = vsel %vm5114_vm5, %v4794_v3, -inf }
 0x5e9   : > { %5060 = vmatmul.mubr.bf16.gmra.mrb[16].mxu1 %v7630_v35  ;;  %v5136_v37 = vsel %vm5112_vm3, %v4445_v41, -inf  ;;  %4716 = vmatprep.mubr.bf16.mxu0 %v7635_v21  ;;  %v5137_v58 = vsel %vm5113_vm4, %v4796_v44, -inf }
 0x5ea   : > { %v5454_v34 = vmax.f32 %v5453_v13, %v5133_v20  ;;  %v5458_v53 = vmax.f32 %v5135_v49, %v5136_v37  ;;  %5069 = vmatprep.mubr.bf16.mxu1 %v7635_v21  ;;  %v5138_v9 = vsel %vm5114_vm5, %v4798_v55, -inf  ;;  %v9773_v37 = vpop.permute.xlu1 %3906 }
 0x5eb   : > { %v4448_v17 = vpop.f32.mrb[168].mxu0 }
 0x5ec   : > { %v4801_v26 = vpop.f32.mrb[168].mxu1  ;;  %v5455_v40 = vmax.f32 %v5454_v34, %v5134_v28  ;;  %v5459_v30 = vmax.f32 %v5458_v53, %v5137_v58  ;;  %v4449_v45 = vadd.f32 %v4448_v17, %v9581_v32  ;;  %v4450_v54 = vpop.f32.mrb[169].mxu0 }
 0x5ed   : > { %v4803_v15 = vpop.f32.mrb[169].mxu1  ;;  %v4802_v35 = vadd.f32 %v4801_v26, %v9581_v32  ;;  %v4451_v12 = vadd.f32 %v4450_v54, %v9581_v32  ;;  %v4452_v0 = vpop.f32.mrb[170].mxu0  ;;  %v7636_v54 = vld [vmem:[%s11461_s9 + $0x1e0] ss:$8 sps:$4 sm:$0xff]  }
 0x5ee   : > { %v4805_v42 = vpop.f32.mrb[170].mxu1  ;;  %v5460_v51 = vmax.f32 %v5459_v30, %v5138_v9  ;;  %v5139_v21 = vsel %vm5111_vm2, %v4449_v45, -inf  ;;  %v4453_v50 = vadd.f32 %v4452_v0, %v9579_v29  ;;  %v4454_v39 = vpop.f32.mrb[171].mxu0  ;;  %5456 = vmax.xlane.f32.xlu0 %v5455_v40  ;;  %v4804_v7 = vadd.f32 %v4803_v15, %v9581_v32  ;;  %v7641_v0 = vld [vmem:[%s11461_s9 + $0x1f4] ss:$8 sps:$4 sm:$0xff]  }
 0x5ef   : > { %v4807_v14 = vpop.f32.mrb[171].mxu1  ;;  %v5140_v24 = vsel %vm5112_vm3, %v4451_v12, -inf  ;;  %v4806_v4 = vadd.f32 %v4805_v42, %v9579_v29  ;;  %v4455_v3 = vadd.f32 %v4454_v39, %v9579_v29  ;;  %v5141_v13 = vsel %vm5113_vm4, %v4802_v35, -inf  ;;  %v9771_v32 = vpop.permute.xlu0 %3911 }
 0x5f0   : > { %v5463_v44 = vmax.f32 %v5139_v21, %v5140_v24  ;;  %v5143_v41 = vsel %vm5111_vm2, %v4453_v50, -inf  ;;  %4717 = vmatmul.mubr.bf16.gmra.mrb[20].mxu0 %v7633_v43  ;;  %v4808_v20 = vadd.f32 %v4807_v14, %v9579_v29  ;;  %5461 = vmax.xlane.f32.xlu1 %v5460_v51  ;;  %v5142_v53 = vsel %vm5114_vm5, %v4804_v7, -inf }
 0x5f1   : > { %5070 = vmatmul.mubr.bf16.gmra.mrb[20].mxu1 %v7633_v43  ;;  %v5144_v49 = vsel %vm5112_vm3, %v4455_v3, -inf  ;;  %4726 = vmatprep.mubr.bf16.mxu0 %v7638_v6  ;;  %v5145_v28 = vsel %vm5113_vm4, %v4806_v4, -inf }
 0x5f2   : > { %v5464_v55 = vmax.f32 %v5463_v44, %v5141_v13  ;;  %v5468_v34 = vmax.f32 %v5143_v41, %v5144_v49  ;;  %5079 = vmatprep.mubr.bf16.mxu1 %v7638_v6  ;;  %v5146_v15 = vsel %vm5114_vm5, %v4808_v20, -inf  ;;  %v9807_v49 = vpop.permute.xlu1 %3916 }
 0x5f3   : > { %v4458_v58 = vpop.f32.mrb[172].mxu0 }
 0x5f4   : > { %v4811_v17 = vpop.f32.mrb[172].mxu1  ;;  %v5465_v26 = vmax.f32 %v5464_v55, %v5142_v53  ;;  %v5469_v40 = vmax.f32 %v5468_v34, %v5145_v28  ;;  %v4459_v29 = vadd.f32 %v4458_v58, %v9585_v62  ;;  %v4460_v30 = vpop.f32.mrb[173].mxu0 }
 0x5f5   : > { %v4813_v45 = vpop.f32.mrb[173].mxu1  ;;  %v4812_v43 = vadd.f32 %v4811_v17, %v9585_v62  ;;  %v4461_v9 = vadd.f32 %v4460_v30, %v9585_v62  ;;  %v4462_v35 = vpop.f32.mrb[174].mxu0  ;;  %v7639_v30 = vld [vmem:[%s11461_s9 + $0x1f0] ss:$8 sps:$4 sm:$0xff]  }
 0x5f6   : > { %v4815_v12 = vpop.f32.mrb[174].mxu1  ;;  %v5470_v42 = vmax.f32 %v5469_v40, %v5146_v15  ;;  %v5147_v6 = vsel %vm5111_vm2, %v4459_v29, -inf  ;;  %v4463_v51 = vadd.f32 %v4462_v35, %v9583_v60  ;;  %v4464_v21 = vpop.f32.mrb[175].mxu0  ;;  %5466 = vmax.xlane.f32.xlu0 %v5465_v26  ;;  %v4814_v14 = vadd.f32 %v4813_v45, %v9585_v62 }
 0x5f7   : > { %v4817_v50 = vpop.f32.mrb[175].mxu1  ;;  %v5148_v39 = vsel %vm5112_vm3, %v4461_v9, -inf  ;;  %v4816_v24 = vadd.f32 %v4815_v12, %v9583_v60  ;;  %v4465_v7 = vadd.f32 %v4464_v21, %v9583_v60  ;;  %v5149_v44 = vsel %vm5113_vm4, %v4812_v43, -inf  ;;  %v9805_v62 = vpop.permute.xlu0 %3921 }
 0x5f8   : > { %v5473_v4 = vmax.f32 %v5147_v6, %v5148_v39  ;;  %v5151_v3 = vsel %vm5111_vm2, %v4463_v51, -inf  ;;  %4727 = vmatmul.mubr.bf16.gmra.mrb[24].mxu0 %v7636_v54  ;;  %v4818_v13 = vadd.f32 %v4817_v50, %v9583_v60  ;;  %5471 = vmax.xlane.f32.xlu1 %v5470_v42  ;;  %v5150_v34 = vsel %vm5114_vm5, %v4814_v14, -inf }
 0x5f9   : > { %5080 = vmatmul.mubr.bf16.gmra.mrb[24].mxu1 %v7636_v54  ;;  %v5152_v41 = vsel %vm5112_vm3, %v4465_v7, -inf  ;;  %4736 = vmatprep.mubr.bf16.mxu0 %v7641_v0  ;;  %v5153_v53 = vsel %vm5113_vm4, %v4816_v24, -inf }
 0x5fa   : > { %v5474_v20 = vmax.f32 %v5473_v4, %v5149_v44  ;;  %v5478_v55 = vmax.f32 %v5151_v3, %v5152_v41  ;;  %5089 = vmatprep.mubr.bf16.mxu1 %v7641_v0  ;;  %v5154_v45 = vsel %vm5114_vm5, %v4818_v13, -inf  ;;  %v9838_v44 = vpop.permute.xlu1 %3926 }
 0x5fb   : > { %v4468_v28 = vpop.f32.mrb[176].mxu0 }
 0x5fc   : > { %v4821_v58 = vpop.f32.mrb[176].mxu1  ;;  %v5475_v17 = vmax.f32 %v5474_v20, %v5150_v34  ;;  %v5479_v26 = vmax.f32 %v5478_v55, %v5153_v53  ;;  %v4469_v60 = vadd.f32 %v4468_v28, %v9595_v25  ;;  %v4470_v40 = vpop.f32.mrb[177].mxu0 }
 0x5fd   : > { %v4823_v29 = vpop.f32.mrb[177].mxu1  ;;  %v4822_v54 = vadd.f32 %v4821_v58, %v9595_v25  ;;  %v4471_v15 = vadd.f32 %v4470_v40, %v9595_v25  ;;  %v4472_v43 = vpop.f32.mrb[178].mxu0 }
 0x5fe   : > { %v4825_v9 = vpop.f32.mrb[178].mxu1  ;;  %v5480_v35 = vmax.f32 %v5479_v26, %v5154_v45  ;;  %v5155_v12 = vsel %vm5111_vm2, %v4469_v60, -inf  ;;  %v4473_v0 = vadd.f32 %v4472_v43, %v9593_v2  ;;  %v4474_v42 = vpop.f32.mrb[179].mxu0  ;;  %5476 = vmax.xlane.f32.xlu0 %v5475_v17  ;;  %v4824_v21 = vadd.f32 %v4823_v29, %v9595_v25 }
 0x5ff   : > { %v4827_v6 = vpop.f32.mrb[179].mxu1  ;;  %v5156_v51 = vsel %vm5112_vm3, %v4471_v15, -inf  ;;  %v4826_v50 = vadd.f32 %v4825_v9, %v9593_v2  ;;  %v4475_v39 = vadd.f32 %v4474_v42, %v9593_v2  ;;  %v5157_v7 = vsel %vm5113_vm4, %v4822_v54, -inf  ;;  %v9836_v25 = vpop.permute.xlu0 %3931 }
 0x600   : > { %v5483_v14 = vmax.f32 %v5155_v12, %v5156_v51  ;;  %v5159_v24 = vsel %vm5111_vm2, %v4473_v0, -inf  ;;  %4737 = vmatmul.mubr.bf16.gmra.mrb[28].mxu0 %v7639_v30  ;;  %v4828_v3 = vadd.f32 %v4827_v6, %v9593_v2  ;;  %5481 = vmax.xlane.f32.xlu1 %v5480_v35  ;;  %v5158_v20 = vsel %vm5114_vm5, %v4824_v21, -inf }
 0x601   : > { %5090 = vmatmul.mubr.bf16.gmra.mrb[28].mxu1 %v7639_v30  ;;  %v5160_v4 = vsel %vm5112_vm3, %v4475_v39, -inf  ;;  %v5161_v55 = vsel %vm5113_vm4, %v4826_v50, -inf }
 0x602   : > { %v5484_v41 = vmax.f32 %v5483_v14, %v5157_v7  ;;  %v5488_v13 = vmax.f32 %v5159_v24, %v5160_v4  ;;  %v5162_v60 = vsel %vm5114_vm5, %v4828_v3, -inf }
 0x603   : > { %v4478_v34 = vpop.f32.mrb[180].mxu0  ;;  %v9864_v24 = vpop.permute.xlu0 %3941 }
 0x604   : > { %v4831_v53 = vpop.f32.mrb[180].mxu1  ;;  %v5485_v28 = vmax.f32 %v5484_v41, %v5158_v20  ;;  %v5489_v58 = vmax.f32 %v5488_v13, %v5161_v55  ;;  %v4479_v17 = vadd.f32 %v4478_v34, %v9605_v5  ;;  %v4480_v2 = vpop.f32.mrb[181].mxu0 }
 0x605   : > { %v4833_v26 = vpop.f32.mrb[181].mxu1  ;;  %v4832_v40 = vadd.f32 %v4831_v53, %v9605_v5  ;;  %v4481_v29 = vadd.f32 %v4480_v2, %v9605_v5  ;;  %v4482_v30 = vpop.f32.mrb[182].mxu0 }
 0x606   : > { %v4835_v45 = vpop.f32.mrb[182].mxu1  ;;  %v5490_v54 = vmax.f32 %v5489_v58, %v5162_v60  ;;  %v5163_v15 = vsel %vm5111_vm2, %v4479_v17, -inf  ;;  %v4483_v43 = vadd.f32 %v4482_v30, %v9603_v31  ;;  %v4484_v9 = vpop.f32.mrb[183].mxu0  ;;  %5486 = vmax.xlane.f32.xlu0 %v5485_v28  ;;  %v4834_v0 = vadd.f32 %v4833_v26, %v9605_v5 }
 0x607   : > { %v4837_v35 = vpop.f32.mrb[183].mxu1  ;;  %v5164_v12 = vsel %vm5112_vm3, %v4481_v29, -inf  ;;  %v4836_v42 = vadd.f32 %v4835_v45, %v9603_v31  ;;  %v4485_v6 = vadd.f32 %v4484_v9, %v9603_v31  ;;  %v5165_v50 = vsel %vm5113_vm4, %v4832_v40, -inf  ;;  %v9866_v5 = vpop.permute.xlu1 %3936 }
 0x608   : > { %v5493_v51 = vmax.f32 %v5163_v15, %v5164_v12  ;;  %v5167_v21 = vsel %vm5111_vm2, %v4483_v43, -inf  ;;  %5491 = vmax.xlane.f32.xlu1 %v5490_v54  ;;  %v4838_v14 = vadd.f32 %v4837_v35, %v9603_v31  ;;  %v5166_v3 = vsel %vm5114_vm5, %v4834_v0, -inf }
 0x609   : > { %v5168_v39 = vsel %vm5112_vm3, %v4485_v6, -inf  ;;  %v5169_v41 = vsel %vm5113_vm4, %v4836_v42, -inf }
 0x60a   : > { %v5494_v7 = vmax.f32 %v5493_v51, %v5165_v50  ;;  %v5498_v4 = vmax.f32 %v5167_v21, %v5168_v39  ;;  %v5170_v58 = vsel %vm5114_vm5, %v4838_v14, -inf  ;;  %v9892_v21 = vpop.permute.xlu0 %3951 }
 0x60b   : > { %v4488_v13 = vpop.f32.mrb[184].mxu0 }
 0x60c   : > { %v4841_v20 = vpop.f32.mrb[184].mxu1  ;;  %v5495_v55 = vmax.f32 %v5494_v7, %v5166_v3  ;;  %v5499_v34 = vmax.f32 %v5498_v4, %v5169_v41  ;;  %v4489_v53 = vadd.f32 %v4488_v13, %v9615_v36  ;;  %v4490_v28 = vpop.f32.mrb[185].mxu0 }
 0x60d   : > { %v4843_v31 = vpop.f32.mrb[185].mxu1  ;;  %v4842_v17 = vadd.f32 %v4841_v20, %v9615_v36  ;;  %v4491_v2 = vadd.f32 %v4490_v28, %v9615_v36  ;;  %v4492_v26 = vpop.f32.mrb[186].mxu0 }
 0x60e   : > { %v4845_v60 = vpop.f32.mrb[186].mxu1  ;;  %v5500_v40 = vmax.f32 %v5499_v34, %v5170_v58  ;;  %v5171_v29 = vsel %vm5111_vm2, %v4489_v53, -inf  ;;  %v4493_v30 = vadd.f32 %v4492_v26, %v9613_v16  ;;  %v4494_v45 = vpop.f32.mrb[187].mxu0  ;;  %5496 = vmax.xlane.f32.xlu0 %v5495_v55  ;;  %v4844_v43 = vadd.f32 %v4843_v31, %v9615_v36 }
 0x60f   : > { %v4847_v54 = vpop.f32.mrb[187].mxu1  ;;  %v5172_v15 = vsel %vm5112_vm3, %v4491_v2, -inf  ;;  %v4846_v9 = vadd.f32 %v4845_v60, %v9613_v16  ;;  %v4495_v35 = vadd.f32 %v4494_v45, %v9613_v16  ;;  %v5173_v42 = vsel %vm5113_vm4, %v4842_v17, -inf  ;;  %v9894_v36 = vpop.permute.xlu1 %3946 }
 0x610   : > { %v5503_v12 = vmax.f32 %v5171_v29, %v5172_v15  ;;  %v5175_v0 = vsel %vm5111_vm2, %v4493_v30, -inf  ;;  %5501 = vmax.xlane.f32.xlu1 %v5500_v40  ;;  %v4848_v51 = vadd.f32 %v4847_v54, %v9613_v16  ;;  %v5174_v14 = vsel %vm5114_vm5, %v4844_v43, -inf }
 0x611   : > { %v5176_v6 = vsel %vm5112_vm3, %v4495_v35, -inf  ;;  %v5177_v7 = vsel %vm5113_vm4, %v4846_v9, -inf }
 0x612   : > { %v5504_v50 = vmax.f32 %v5503_v12, %v5173_v42  ;;  %v5508_v39 = vmax.f32 %v5175_v0, %v5176_v6  ;;  %v5178_v34 = vsel %vm5114_vm5, %v4848_v51, -inf  ;;  %v9920_v0 = vpop.permute.xlu0 %3961 }
 0x613   : > { %v4498_v4 = vpop.f32.mrb[188].mxu0 }
 0x614   : > { %v4851_v3 = vpop.f32.mrb[188].mxu1  ;;  %v5505_v41 = vmax.f32 %v5504_v50, %v5174_v14  ;;  %v5509_v13 = vmax.f32 %v5508_v39, %v5177_v7  ;;  %v4499_v20 = vadd.f32 %v4498_v4, %v9619_v38  ;;  %v4500_v55 = vpop.f32.mrb[189].mxu0 }
 0x615   : > { %v4853_v16 = vpop.f32.mrb[189].mxu1  ;;  %v4852_v53 = vadd.f32 %v4851_v3, %v9619_v38  ;;  %v4501_v28 = vadd.f32 %v4500_v55, %v9619_v38  ;;  %v4502_v31 = vpop.f32.mrb[190].mxu0 }
 0x616   : > { %v4855_v58 = vpop.f32.mrb[190].mxu1  ;;  %v5510_v17 = vmax.f32 %v5509_v13, %v5178_v34  ;;  %v5179_v2 = vsel %vm5111_vm2, %v4499_v20, -inf  ;;  %v4503_v26 = vadd.f32 %v4502_v31, %v9617_v8  ;;  %v4504_v60 = vpop.f32.mrb[191].mxu0  ;;  %5506 = vmax.xlane.f32.xlu0 %v5505_v41  ;;  %v4854_v30 = vadd.f32 %v4853_v16, %v9619_v38 }
 0x617   : > { %v4857_v40 = vpop.f32.mrb[191].mxu1  ;;  %v5180_v29 = vsel %vm5112_vm3, %v4501_v28, -inf  ;;  %v4856_v45 = vadd.f32 %v4855_v58, %v9617_v8  ;;  %v4505_v54 = vadd.f32 %v4504_v60, %v9617_v8  ;;  %v5181_v9 = vsel %vm5113_vm4, %v4852_v53, -inf  ;;  %v9922_v38 = vpop.permute.xlu1 %3956 }
 0x618   : > { %v5513_v15 = vmax.f32 %v5179_v2, %v5180_v29  ;;  %v5183_v43 = vsel %vm5111_vm2, %v4503_v26, -inf  ;;  %5511 = vmax.xlane.f32.xlu1 %v5510_v17  ;;  %v4858_v12 = vadd.f32 %v4857_v40, %v9617_v8  ;;  %v5182_v51 = vsel %vm5114_vm5, %v4854_v30, -inf }
 0x619   : > { %v5184_v35 = vsel %vm5112_vm3, %v4505_v54, -inf  ;;  %v5185_v50 = vsel %vm5113_vm4, %v4856_v45, -inf }
 0x61a   : > { %v5514_v42 = vmax.f32 %v5513_v15, %v5181_v9  ;;  %v5518_v6 = vmax.f32 %v5183_v43, %v5184_v35  ;;  %v5186_v13 = vsel %vm5114_vm5, %v4858_v12, -inf  ;;  %v9948_v43 = vpop.permute.xlu0 %3971 }
 0x61b   : > { %v4508_v39 = vpop.f32.mrb[192].mxu0 }
 0x61c   : > { %v4861_v14 = vpop.f32.mrb[192].mxu1  ;;  %v5515_v7 = vmax.f32 %v5514_v42, %v5182_v51  ;;  %v5519_v4 = vmax.f32 %v5518_v6, %v5185_v50  ;;  %v4509_v3 = vadd.f32 %v4508_v39, %v9629_v11  ;;  %v4510_v41 = vpop.f32.mrb[193].mxu0 }
 0x61d   : > { %v4863_v8 = vpop.f32.mrb[193].mxu1  ;;  %v4862_v20 = vadd.f32 %v4861_v14, %v9629_v11  ;;  %v4511_v55 = vadd.f32 %v4510_v41, %v9629_v11  ;;  %v4512_v16 = vpop.f32.mrb[194].mxu0 }
 0x61e   : > { %v4865_v34 = vpop.f32.mrb[194].mxu1  ;;  %v5520_v53 = vmax.f32 %v5519_v4, %v5186_v13  ;;  %v5187_v28 = vsel %vm5111_vm2, %v4509_v3, -inf  ;;  %v4513_v31 = vadd.f32 %v4512_v16, %v9627_v27  ;;  %v4514_v58 = vpop.f32.mrb[195].mxu0  ;;  %5516 = vmax.xlane.f32.xlu0 %v5515_v7  ;;  %v4864_v26 = vadd.f32 %v4863_v8, %v9629_v11 }
 0x61f   : > { %v4867_v17 = vpop.f32.mrb[195].mxu1  ;;  %v5188_v2 = vsel %vm5112_vm3, %v4511_v55, -inf  ;;  %v4866_v60 = vadd.f32 %v4865_v34, %v9627_v27  ;;  %v4515_v40 = vadd.f32 %v4514_v58, %v9627_v27  ;;  %v5189_v45 = vsel %vm5113_vm4, %v4862_v20, -inf  ;;  %v9950_v11 = vpop.permute.xlu1 %3966 }
 0x620   : > { %v5523_v29 = vmax.f32 %v5187_v28, %v5188_v2  ;;  %v5191_v30 = vsel %vm5111_vm2, %v4513_v31, -inf  ;;  %5521 = vmax.xlane.f32.xlu1 %v5520_v53  ;;  %v4868_v15 = vadd.f32 %v4867_v17, %v9627_v27  ;;  %v5190_v12 = vsel %vm5114_vm5, %v4864_v26, -inf }
 0x621   : > { %v5192_v54 = vsel %vm5112_vm3, %v4515_v40, -inf  ;;  %v5193_v42 = vsel %vm5113_vm4, %v4866_v60, -inf }
 0x622   : > { %v5524_v9 = vmax.f32 %v5523_v29, %v5189_v45  ;;  %v5528_v35 = vmax.f32 %v5191_v30, %v5192_v54  ;;  %v5194_v4 = vsel %vm5114_vm5, %v4868_v15, -inf  ;;  %v9976_v30 = vpop.permute.xlu0 %3981 }
 0x623   : > { %v4518_v6 = vpop.f32.mrb[196].mxu0 }
 0x624   : > { %v4871_v51 = vpop.f32.mrb[196].mxu1  ;;  %v5525_v50 = vmax.f32 %v5524_v9, %v5190_v12  ;;  %v5529_v39 = vmax.f32 %v5528_v35, %v5193_v42  ;;  %v4519_v14 = vadd.f32 %v4518_v6, %v9639_v33  ;;  %v4520_v7 = vpop.f32.mrb[197].mxu0 }
 0x625   : > { %v4873_v27 = vpop.f32.mrb[197].mxu1  ;;  %v4872_v3 = vadd.f32 %v4871_v51, %v9639_v33  ;;  %v4521_v41 = vadd.f32 %v4520_v7, %v9639_v33  ;;  %v4522_v8 = vpop.f32.mrb[198].mxu0 }
 0x626   : > { %v4875_v13 = vpop.f32.mrb[198].mxu1  ;;  %v5530_v20 = vmax.f32 %v5529_v39, %v5194_v4  ;;  %v5195_v55 = vsel %vm5111_vm2, %v4519_v14, -inf  ;;  %v4523_v16 = vadd.f32 %v4522_v8, %v9637_v18  ;;  %v4524_v34 = vpop.f32.mrb[199].mxu0  ;;  %5526 = vmax.xlane.f32.xlu0 %v5525_v50  ;;  %v4874_v31 = vadd.f32 %v4873_v27, %v9639_v33 }
 0x627   : > { %v4877_v53 = vpop.f32.mrb[199].mxu1  ;;  %v5196_v28 = vsel %vm5112_vm3, %v4521_v41, -inf  ;;  %v4876_v58 = vadd.f32 %v4875_v13, %v9637_v18  ;;  %v4525_v17 = vadd.f32 %v4524_v34, %v9637_v18  ;;  %v5197_v60 = vsel %vm5113_vm4, %v4872_v3, -inf  ;;  %v9978_v33 = vpop.permute.xlu1 %3976 }
 0x628   : > { %v5533_v2 = vmax.f32 %v5195_v55, %v5196_v28  ;;  %v5199_v26 = vsel %vm5111_vm2, %v4523_v16, -inf  ;;  %5531 = vmax.xlane.f32.xlu1 %v5530_v20  ;;  %v4878_v29 = vadd.f32 %v4877_v53, %v9637_v18  ;;  %v5198_v15 = vsel %vm5114_vm5, %v4874_v31, -inf }
 0x629   : > { %v5200_v40 = vsel %vm5112_vm3, %v4525_v17, -inf  ;;  %v5201_v9 = vsel %vm5113_vm4, %v4876_v58, -inf }
 0x62a   : > { %v5534_v45 = vmax.f32 %v5533_v2, %v5197_v60  ;;  %v5538_v54 = vmax.f32 %v5199_v26, %v5200_v40  ;;  %v5202_v39 = vsel %vm5114_vm5, %v4878_v29, -inf  ;;  %v10004_v26 = vpop.permute.xlu0 %3991 }
 0x62b   : > { %v4528_v35 = vpop.f32.mrb[200].mxu0 }
 0x62c   : > { %v4881_v12 = vpop.f32.mrb[200].mxu1  ;;  %v5535_v42 = vmax.f32 %v5534_v45, %v5198_v15  ;;  %v5539_v6 = vmax.f32 %v5538_v54, %v5201_v9  ;;  %v4529_v51 = vadd.f32 %v4528_v35, %v9649_v46  ;;  %v4530_v50 = vpop.f32.mrb[201].mxu0 }
 0x62d   : > { %v4883_v18 = vpop.f32.mrb[201].mxu1  ;;  %v4882_v14 = vadd.f32 %v4881_v12, %v9649_v46  ;;  %v4531_v7 = vadd.f32 %v4530_v50, %v9649_v46  ;;  %v4532_v27 = vpop.f32.mrb[202].mxu0 }
 0x62e   : > { %v4885_v4 = vpop.f32.mrb[202].mxu1  ;;  %v5540_v3 = vmax.f32 %v5539_v6, %v5202_v39  ;;  %v5203_v41 = vsel %vm5111_vm2, %v4529_v51, -inf  ;;  %v4533_v8 = vadd.f32 %v4532_v27, %v9647_v61  ;;  %v4534_v13 = vpop.f32.mrb[203].mxu0  ;;  %5536 = vmax.xlane.f32.xlu0 %v5535_v42  ;;  %v4884_v16 = vadd.f32 %v4883_v18, %v9649_v46 }
 0x62f   : > { %v4887_v20 = vpop.f32.mrb[203].mxu1  ;;  %v5204_v55 = vsel %vm5112_vm3, %v4531_v7, -inf  ;;  %v4886_v34 = vadd.f32 %v4885_v4, %v9647_v61  ;;  %v4535_v53 = vadd.f32 %v4534_v13, %v9647_v61  ;;  %v5205_v58 = vsel %vm5113_vm4, %v4882_v14, -inf  ;;  %v10006_v46 = vpop.permute.xlu1 %3986 }
 0x630   : > { %v5543_v28 = vmax.f32 %v5203_v41, %v5204_v55  ;;  %v5207_v31 = vsel %vm5111_vm2, %v4533_v8, -inf  ;;  %5541 = vmax.xlane.f32.xlu1 %v5540_v3  ;;  %v4888_v2 = vadd.f32 %v4887_v20, %v9647_v61  ;;  %v5206_v29 = vsel %vm5114_vm5, %v4884_v16, -inf }
 0x631   : > { %v5208_v17 = vsel %vm5112_vm3, %v4535_v53, -inf  ;;  %v5209_v45 = vsel %vm5113_vm4, %v4886_v34, -inf }
 0x632   : > { %v5544_v60 = vmax.f32 %v5543_v28, %v5205_v58  ;;  %v5548_v40 = vmax.f32 %v5207_v31, %v5208_v17  ;;  %v5210_v6 = vsel %vm5114_vm5, %v4888_v2, -inf  ;;  %v10032_v31 = vpop.permute.xlu0 %4001 }
 0x633   : > { %v4538_v54 = vpop.f32.mrb[204].mxu0 }
 0x634   : > { %v4891_v15 = vpop.f32.mrb[204].mxu1  ;;  %v5545_v9 = vmax.f32 %v5544_v60, %v5206_v29  ;;  %v5549_v35 = vmax.f32 %v5548_v40, %v5209_v45  ;;  %v4539_v12 = vadd.f32 %v4538_v54, %v9655_v57  ;;  %v4540_v42 = vpop.f32.mrb[205].mxu0 }
 0x635   : > { %v4893_v61 = vpop.f32.mrb[205].mxu1  ;;  %v4892_v51 = vadd.f32 %v4891_v15, %v9655_v57  ;;  %v4541_v50 = vadd.f32 %v4540_v42, %v9655_v57  ;;  %v4542_v18 = vpop.f32.mrb[206].mxu0 }
 0x636   : > { %v4895_v39 = vpop.f32.mrb[206].mxu1  ;;  %v5550_v14 = vmax.f32 %v5549_v35, %v5210_v6  ;;  %v5211_v7 = vsel %vm5111_vm2, %v4539_v12, -inf  ;;  %v4543_v27 = vadd.f32 %v4542_v18, %v9653_v59  ;;  %v4544_v4 = vpop.f32.mrb[207].mxu0  ;;  %5546 = vmax.xlane.f32.xlu0 %v5545_v9  ;;  %v4894_v8 = vadd.f32 %v4893_v61, %v9655_v57 }
 0x637   : > { %v4897_v3 = vpop.f32.mrb[207].mxu1  ;;  %v5212_v41 = vsel %vm5112_vm3, %v4541_v50, -inf  ;;  %v4896_v13 = vadd.f32 %v4895_v39, %v9653_v59  ;;  %v4545_v20 = vadd.f32 %v4544_v4, %v9653_v59  ;;  %v5213_v34 = vsel %vm5113_vm4, %v4892_v51, -inf  ;;  %v10034_v57 = vpop.permute.xlu1 %3996 }
 0x638   : > { %v5553_v55 = vmax.f32 %v5211_v7, %v5212_v41  ;;  %v5215_v16 = vsel %vm5111_vm2, %v4543_v27, -inf  ;;  %5551 = vmax.xlane.f32.xlu1 %v5550_v14  ;;  %v4898_v28 = vadd.f32 %v4897_v3, %v9653_v59  ;;  %v5214_v2 = vsel %vm5114_vm5, %v4894_v8, -inf }
 0x639   : > { %v5216_v53 = vsel %vm5112_vm3, %v4545_v20, -inf  ;;  %v5217_v60 = vsel %vm5113_vm4, %v4896_v13, -inf }
 0x63a   : > { %v5554_v58 = vmax.f32 %v5553_v55, %v5213_v34  ;;  %v5558_v17 = vmax.f32 %v5215_v16, %v5216_v53  ;;  %v5218_v35 = vsel %vm5114_vm5, %v4898_v28, -inf  ;;  %v10060_v16 = vpop.permute.xlu0 %4011 }
 0x63b   : > { %v4548_v40 = vpop.f32.mrb[208].mxu0 }
 0x63c   : > { %v4901_v29 = vpop.f32.mrb[208].mxu1  ;;  %v5555_v45 = vmax.f32 %v5554_v58, %v5214_v2  ;;  %v5559_v54 = vmax.f32 %v5558_v17, %v5217_v60  ;;  %v4549_v15 = vadd.f32 %v4548_v40, %v9671_v19  ;;  %v4550_v9 = vpop.f32.mrb[209].mxu0 }
 0x63d   : > { %v4903_v59 = vpop.f32.mrb[209].mxu1  ;;  %v4902_v12 = vadd.f32 %v4901_v29, %v9671_v19  ;;  %v4551_v42 = vadd.f32 %v4550_v9, %v9671_v19  ;;  %v4552_v61 = vpop.f32.mrb[210].mxu0 }
 0x63e   : > { %v4905_v6 = vpop.f32.mrb[210].mxu1  ;;  %v5560_v51 = vmax.f32 %v5559_v54, %v5218_v35  ;;  %v5219_v50 = vsel %vm5111_vm2, %v4549_v15, -inf  ;;  %v4553_v18 = vadd.f32 %v4552_v61, %v9669_v52  ;;  %v4554_v39 = vpop.f32.mrb[211].mxu0  ;;  %5556 = vmax.xlane.f32.xlu0 %v5555_v45  ;;  %v4904_v27 = vadd.f32 %v4903_v59, %v9671_v19 }
 0x63f   : > { %v4907_v14 = vpop.f32.mrb[211].mxu1  ;;  %v5220_v7 = vsel %vm5112_vm3, %v4551_v42, -inf  ;;  %v4906_v4 = vadd.f32 %v4905_v6, %v9669_v52  ;;  %v4555_v3 = vadd.f32 %v4554_v39, %v9669_v52  ;;  %v5221_v13 = vsel %vm5113_vm4, %v4902_v12, -inf  ;;  %v10062_v19 = vpop.permute.xlu1 %4006 }
 0x640   : > { %v5563_v41 = vmax.f32 %v5219_v50, %v5220_v7  ;;  %v5223_v8 = vsel %vm5111_vm2, %v4553_v18, -inf  ;;  %5561 = vmax.xlane.f32.xlu1 %v5560_v51  ;;  %v4908_v55 = vadd.f32 %v4907_v14, %v9669_v52  ;;  %v5222_v28 = vsel %vm5114_vm5, %v4904_v27, -inf }
 0x641   : > { %v5224_v20 = vsel %vm5112_vm3, %v4555_v3, -inf  ;;  %v5225_v58 = vsel %vm5113_vm4, %v4906_v4, -inf }
 0x642   : > { %v5564_v34 = vmax.f32 %v5563_v41, %v5221_v13  ;;  %v5568_v53 = vmax.f32 %v5223_v8, %v5224_v20  ;;  %v5226_v54 = vsel %vm5114_vm5, %v4908_v55, -inf  ;;  %v10088_v8 = vpop.permute.xlu0 %4021 }
 0x643   : > { %v4558_v17 = vpop.f32.mrb[212].mxu0 }
 0x644   : > { %v4911_v2 = vpop.f32.mrb[212].mxu1  ;;  %v5565_v60 = vmax.f32 %v5564_v34, %v5222_v28  ;;  %v5569_v40 = vmax.f32 %v5568_v53, %v5225_v58  ;;  %v4559_v29 = vadd.f32 %v4558_v17, %v9705_v56  ;;  %v4560_v45 = vpop.f32.mrb[213].mxu0 }
 0x645   : > { %v4913_v52 = vpop.f32.mrb[213].mxu1  ;;  %v4912_v15 = vadd.f32 %v4911_v2, %v9705_v56  ;;  %v4561_v9 = vadd.f32 %v4560_v45, %v9705_v56  ;;  %v4562_v59 = vpop.f32.mrb[214].mxu0 }
 0x646   : > { %v4915_v35 = vpop.f32.mrb[214].mxu1  ;;  %v5570_v12 = vmax.f32 %v5569_v40, %v5226_v54  ;;  %v5227_v42 = vsel %vm5111_vm2, %v4559_v29, -inf  ;;  %v4563_v61 = vadd.f32 %v4562_v59, %v9703_v47  ;;  %v4564_v6 = vpop.f32.mrb[215].mxu0  ;;  %5566 = vmax.xlane.f32.xlu0 %v5565_v60  ;;  %v4914_v18 = vadd.f32 %v4913_v52, %v9705_v56 }
 0x647   : > { %v4917_v51 = vpop.f32.mrb[215].mxu1  ;;  %v5228_v50 = vsel %vm5112_vm3, %v4561_v9, -inf  ;;  %v4916_v39 = vadd.f32 %v4915_v35, %v9703_v47  ;;  %v4565_v14 = vadd.f32 %v4564_v6, %v9703_v47  ;;  %v5229_v4 = vsel %vm5113_vm4, %v4912_v15, -inf  ;;  %v10090_v56 = vpop.permute.xlu1 %4016 }
 0x648   : > { %v5573_v7 = vmax.f32 %v5227_v42, %v5228_v50  ;;  %v5231_v27 = vsel %vm5111_vm2, %v4563_v61, -inf  ;;  %5571 = vmax.xlane.f32.xlu1 %v5570_v12  ;;  %v4918_v41 = vadd.f32 %v4917_v51, %v9703_v47  ;;  %v5230_v55 = vsel %vm5114_vm5, %v4914_v18, -inf }
 0x649   : > { %v5232_v3 = vsel %vm5112_vm3, %v4565_v14, -inf  ;;  %v5233_v34 = vsel %vm5113_vm4, %v4916_v39, -inf }
 0x64a   : > { %v5574_v13 = vmax.f32 %v5573_v7, %v5229_v4  ;;  %v5578_v20 = vmax.f32 %v5231_v27, %v5232_v3  ;;  %v5234_v40 = vsel %vm5114_vm5, %v4918_v41, -inf  ;;  %v10116_v27 = vpop.permute.xlu0 %4031 }
 0x64b   : > { %v4568_v53 = vpop.f32.mrb[216].mxu0 }
 0x64c   : > { %v4921_v28 = vpop.f32.mrb[216].mxu1  ;;  %v5575_v58 = vmax.f32 %v5574_v13, %v5230_v55  ;;  %v5579_v17 = vmax.f32 %v5578_v20, %v5233_v34  ;;  %v4569_v2 = vadd.f32 %v4568_v53, %v9739_v63  ;;  %v4570_v60 = vpop.f32.mrb[217].mxu0 }
 0x64d   : > { %v4923_v47 = vpop.f32.mrb[217].mxu1  ;;  %v4922_v29 = vadd.f32 %v4921_v28, %v9739_v63  ;;  %v4571_v45 = vadd.f32 %v4570_v60, %v9739_v63  ;;  %v4572_v52 = vpop.f32.mrb[218].mxu0 }
 0x64e   : > { %v4925_v54 = vpop.f32.mrb[218].mxu1  ;;  %v5580_v15 = vmax.f32 %v5579_v17, %v5234_v40  ;;  %v5235_v9 = vsel %vm5111_vm2, %v4569_v2, -inf  ;;  %v4573_v59 = vadd.f32 %v4572_v52, %v9737_v22  ;;  %v4574_v35 = vpop.f32.mrb[219].mxu0  ;;  %5576 = vmax.xlane.f32.xlu0 %v5575_v58  ;;  %v4924_v61 = vadd.f32 %v4923_v47, %v9739_v63 }
 0x64f   : > { %v4927_v12 = vpop.f32.mrb[219].mxu1  ;;  %v5236_v42 = vsel %vm5112_vm3, %v4571_v45, -inf  ;;  %v4926_v6 = vadd.f32 %v4925_v54, %v9737_v22  ;;  %v4575_v51 = vadd.f32 %v4574_v35, %v9737_v22  ;;  %v5237_v39 = vsel %vm5113_vm4, %v4922_v29, -inf  ;;  %v10118_v63 = vpop.permute.xlu1 %4026 }
 0x650   : > { %v5583_v50 = vmax.f32 %v5235_v9, %v5236_v42  ;;  %v5239_v18 = vsel %vm5111_vm2, %v4573_v59, -inf  ;;  %5581 = vmax.xlane.f32.xlu1 %v5580_v15  ;;  %v4928_v7 = vadd.f32 %v4927_v12, %v9737_v22  ;;  %v5238_v41 = vsel %vm5114_vm5, %v4924_v61, -inf }
 0x651   : > { %v5240_v14 = vsel %vm5112_vm3, %v4575_v51, -inf  ;;  %v5241_v13 = vsel %vm5113_vm4, %v4926_v6, -inf }
 0x652   : > { %v5584_v4 = vmax.f32 %v5583_v50, %v5237_v39  ;;  %v5588_v3 = vmax.f32 %v5239_v18, %v5240_v14  ;;  %v5242_v17 = vsel %vm5114_vm5, %v4928_v7, -inf  ;;  %v10144_v18 = vpop.permute.xlu0 %4041 }
 0x653   : > { %v4578_v20 = vpop.f32.mrb[220].mxu0 }
 0x654   : > { %v4931_v55 = vpop.f32.mrb[220].mxu1  ;;  %v5585_v34 = vmax.f32 %v5584_v4, %v5238_v41  ;;  %v5589_v53 = vmax.f32 %v5588_v3, %v5241_v13  ;;  %v4579_v28 = vadd.f32 %v4578_v20, %v9773_v37  ;;  %v4580_v58 = vpop.f32.mrb[221].mxu0 }
 0x655   : > { %v4933_v22 = vpop.f32.mrb[221].mxu1  ;;  %v4932_v2 = vadd.f32 %v4931_v55, %v9773_v37  ;;  %v4581_v60 = vadd.f32 %v4580_v58, %v9773_v37  ;;  %v4582_v47 = vpop.f32.mrb[222].mxu0 }
 0x656   : > { %v4935_v40 = vpop.f32.mrb[222].mxu1  ;;  %v5590_v29 = vmax.f32 %v5589_v53, %v5242_v17  ;;  %v5243_v45 = vsel %vm5111_vm2, %v4579_v28, -inf  ;;  %v4583_v52 = vadd.f32 %v4582_v47, %v9771_v32  ;;  %v4584_v54 = vpop.f32.mrb[223].mxu0  ;;  %5586 = vmax.xlane.f32.xlu0 %v5585_v34  ;;  %v4934_v59 = vadd.f32 %v4933_v22, %v9773_v37 }
 0x657   : > { %v4937_v15 = vpop.f32.mrb[223].mxu1  ;;  %v5244_v9 = vsel %vm5112_vm3, %v4581_v60, -inf  ;;  %v4936_v35 = vadd.f32 %v4935_v40, %v9771_v32  ;;  %v4585_v12 = vadd.f32 %v4584_v54, %v9771_v32  ;;  %v5245_v6 = vsel %vm5113_vm4, %v4932_v2, -inf  ;;  %v10146_v37 = vpop.permute.xlu1 %4036 }
 0x658   : > { %v5593_v42 = vmax.f32 %v5243_v45, %v5244_v9  ;;  %v5247_v61 = vsel %vm5111_vm2, %v4583_v52, -inf  ;;  %5591 = vmax.xlane.f32.xlu1 %v5590_v29  ;;  %v4938_v50 = vadd.f32 %v4937_v15, %v9771_v32  ;;  %v5246_v7 = vsel %vm5114_vm5, %v4934_v59, -inf }
 0x659   : > { %v5248_v51 = vsel %vm5112_vm3, %v4585_v12, -inf  ;;  %v5249_v4 = vsel %vm5113_vm4, %v4936_v35, -inf }
 0x65a   : > { %v5594_v39 = vmax.f32 %v5593_v42, %v5245_v6  ;;  %v5598_v14 = vmax.f32 %v5247_v61, %v5248_v51  ;;  %v5250_v53 = vsel %vm5114_vm5, %v4938_v50, -inf  ;;  %v10172_v61 = vpop.permute.xlu0 %4051 }
 0x65b   : > { %v4588_v3 = vpop.f32.mrb[224].mxu0 }
 0x65c   : > { %v4941_v41 = vpop.f32.mrb[224].mxu1  ;;  %v5595_v13 = vmax.f32 %v5594_v39, %v5246_v7  ;;  %v5599_v20 = vmax.f32 %v5598_v14, %v5249_v4  ;;  %v4589_v55 = vadd.f32 %v4588_v3, %v9807_v49  ;;  %v4590_v34 = vpop.f32.mrb[225].mxu0 }
 0x65d   : > { %v4943_v32 = vpop.f32.mrb[225].mxu1  ;;  %v4942_v28 = vadd.f32 %v4941_v41, %v9807_v49  ;;  %v4591_v58 = vadd.f32 %v4590_v34, %v9807_v49  ;;  %v4592_v22 = vpop.f32.mrb[226].mxu0 }
 0x65e   : > { %v4945_v17 = vpop.f32.mrb[226].mxu1  ;;  %v5600_v2 = vmax.f32 %v5599_v20, %v5250_v53  ;;  %v5251_v60 = vsel %vm5111_vm2, %v4589_v55, -inf  ;;  %v4593_v47 = vadd.f32 %v4592_v22, %v9805_v62  ;;  %v4594_v40 = vpop.f32.mrb[227].mxu0  ;;  %5596 = vmax.xlane.f32.xlu0 %v5595_v13  ;;  %v4944_v52 = vadd.f32 %v4943_v32, %v9807_v49 }
 0x65f   : > { %v4947_v29 = vpop.f32.mrb[227].mxu1  ;;  %v5252_v45 = vsel %vm5112_vm3, %v4591_v58, -inf  ;;  %v4946_v54 = vadd.f32 %v4945_v17, %v9805_v62  ;;  %v4595_v15 = vadd.f32 %v4594_v40, %v9805_v62  ;;  %v5253_v35 = vsel %vm5113_vm4, %v4942_v28, -inf  ;;  %v10174_v49 = vpop.permute.xlu1 %4046 }
 0x660   : > { %v5603_v9 = vmax.f32 %v5251_v60, %v5252_v45  ;;  %v5255_v59 = vsel %vm5111_vm2, %v4593_v47, -inf  ;;  %5601 = vmax.xlane.f32.xlu1 %v5600_v2  ;;  %v4948_v42 = vadd.f32 %v4947_v29, %v9805_v62  ;;  %v5254_v50 = vsel %vm5114_vm5, %v4944_v52, -inf }
 0x661   : > { %v5256_v12 = vsel %vm5112_vm3, %v4595_v15, -inf  ;;  %v5257_v39 = vsel %vm5113_vm4, %v4946_v54, -inf }
 0x662   : > { %v5604_v6 = vmax.f32 %v5603_v9, %v5253_v35  ;;  %v5608_v51 = vmax.f32 %v5255_v59, %v5256_v12  ;;  %v5258_v20 = vsel %vm5114_vm5, %v4948_v42, -inf  ;;  %v10200_v59 = vpop.permute.xlu0 %4061 }
 0x663   : > { %v4598_v14 = vpop.f32.mrb[228].mxu0 }
 0x664   : > { %v4951_v7 = vpop.f32.mrb[228].mxu1  ;;  %v5605_v4 = vmax.f32 %v5604_v6, %v5254_v50  ;;  %v5609_v3 = vmax.f32 %v5608_v51, %v5257_v39  ;;  %v4599_v41 = vadd.f32 %v4598_v14, %v9838_v44  ;;  %v4600_v13 = vpop.f32.mrb[229].mxu0 }
 0x665   : > { %v4953_v62 = vpop.f32.mrb[229].mxu1  ;;  %v4952_v55 = vadd.f32 %v4951_v7, %v9838_v44  ;;  %v4601_v34 = vadd.f32 %v4600_v13, %v9838_v44  ;;  %v4602_v32 = vpop.f32.mrb[230].mxu0 }
 0x666   : > { %v4955_v53 = vpop.f32.mrb[230].mxu1  ;;  %v5610_v28 = vmax.f32 %v5609_v3, %v5258_v20  ;;  %v5259_v58 = vsel %vm5111_vm2, %v4599_v41, -inf  ;;  %v4603_v22 = vadd.f32 %v4602_v32, %v9836_v25  ;;  %v4604_v17 = vpop.f32.mrb[231].mxu0  ;;  %5606 = vmax.xlane.f32.xlu0 %v5605_v4  ;;  %v4954_v47 = vadd.f32 %v4953_v62, %v9838_v44 }
 0x667   : > { %v4957_v2 = vpop.f32.mrb[231].mxu1  ;;  %v5260_v60 = vsel %vm5112_vm3, %v4601_v34, -inf  ;;  %v4956_v40 = vadd.f32 %v4955_v53, %v9836_v25  ;;  %v4605_v29 = vadd.f32 %v4604_v17, %v9836_v25  ;;  %v5261_v54 = vsel %vm5113_vm4, %v4952_v55, -inf  ;;  %v10202_v44 = vpop.permute.xlu1 %4056 }
 0x668   : > { %v5613_v45 = vmax.f32 %v5259_v58, %v5260_v60  ;;  %v5263_v52 = vsel %vm5111_vm2, %v4603_v22, -inf  ;;  %5611 = vmax.xlane.f32.xlu1 %v5610_v28  ;;  %v4958_v9 = vadd.f32 %v4957_v2, %v9836_v25  ;;  %v5262_v42 = vsel %vm5114_vm5, %v4954_v47, -inf }
 0x669   : > { %v5264_v15 = vsel %vm5112_vm3, %v4605_v29, -inf  ;;  %v5265_v6 = vsel %vm5113_vm4, %v4956_v40, -inf }
 0x66a   : > { %v5614_v35 = vmax.f32 %v5613_v45, %v5261_v54  ;;  %v5618_v12 = vmax.f32 %v5263_v52, %v5264_v15  ;;  %v5266_v3 = vsel %vm5114_vm5, %v4958_v9, -inf  ;;  %v5379_v9 = vld [vmem:[#allocation2] sm:$0xff] }
 0x66b   : > { %v4608_v51 = vpop.f32.mrb[232].mxu0  ;;  %v10221_v60 = vpop.permute.xlu1 %4066 }
 0x66c   : > { %v4961_v50 = vpop.f32.mrb[232].mxu1  ;;  %v5615_v39 = vmax.f32 %v5614_v35, %v5262_v42  ;;  %v5619_v14 = vmax.f32 %v5618_v12, %v5265_v6  ;;  %v4609_v7 = vadd.f32 %v4608_v51, %v9866_v5  ;;  %v4610_v4 = vpop.f32.mrb[233].mxu0 }
 0x66d   : > { %v4963_v25 = vpop.f32.mrb[233].mxu1  ;;  %v4962_v41 = vadd.f32 %v4961_v50, %v9866_v5  ;;  %v4611_v13 = vadd.f32 %v4610_v4, %v9866_v5  ;;  %v4612_v62 = vpop.f32.mrb[234].mxu0 }
 0x66e   : > { %v4965_v20 = vpop.f32.mrb[234].mxu1  ;;  %v5620_v55 = vmax.f32 %v5619_v14, %v5266_v3  ;;  %v5267_v34 = vsel %vm5111_vm2, %v4609_v7, -inf  ;;  %v4613_v32 = vadd.f32 %v4612_v62, %v9864_v24  ;;  %v4614_v53 = vpop.f32.mrb[235].mxu0  ;;  %5616 = vmax.xlane.f32.xlu0 %v5615_v39  ;;  %v4964_v22 = vadd.f32 %v4963_v25, %v9866_v5  ;;  %v5380_v7 = vld [vmem:[#allocation2 + $0x8] sm:$0xff] }
 0x66f   : > { %v4967_v28 = vpop.f32.mrb[235].mxu1  ;;  %v5268_v58 = vsel %vm5112_vm3, %v4611_v13, -inf  ;;  %v4966_v17 = vadd.f32 %v4965_v20, %v9864_v24  ;;  %v4615_v2 = vadd.f32 %v4614_v53, %v9864_v24  ;;  %v5269_v29 = vsel %vm5113_vm4, %v4962_v41, -inf  ;;  %v10230_v5 = vpop.permute.xlu0 %4071 }
 0x670   : > { %v5623_v47 = vmax.f32 %v5267_v34, %v5268_v58  ;;  %v5271_v40 = vsel %vm5111_vm2, %v4613_v32, -inf  ;;  %5621 = vmax.xlane.f32.xlu1 %v5620_v55  ;;  %v4968_v52 = vadd.f32 %v4967_v28, %v9864_v24  ;;  %v5270_v35 = vsel %vm5114_vm5, %v4964_v22, -inf }
 0x671   : > { %v5272_v45 = vsel %vm5112_vm3, %v4615_v2, -inf  ;;  %v5273_v12 = vsel %vm5113_vm4, %v4966_v17, -inf }
 0x672   : > { %v5624_v54 = vmax.f32 %v5623_v47, %v5269_v29  ;;  %v5628_v15 = vmax.f32 %v5271_v40, %v5272_v45  ;;  %v5274_v4 = vsel %vm5114_vm5, %v4968_v52, -inf }
 0x673   : > { %v4618_v42 = vpop.f32.mrb[236].mxu0  ;;  %v5447_v14 = vpop.xlane.xlu1 %5446 }
 0x674   : > { %v4971_v6 = vpop.f32.mrb[236].mxu1  ;;  %v5625_v51 = vmax.f32 %v5624_v54, %v5270_v35  ;;  %v5629_v50 = vmax.f32 %v5628_v15, %v5273_v12  ;;  %v4619_v39 = vadd.f32 %v4618_v42, %v9894_v36  ;;  %v4620_v24 = vpop.f32.mrb[237].mxu0  ;;  %v5763_v3 = vmax.f32 %v5379_v9, %v5447_v14  ;;  %v5381_v9 = vld [vmem:[#allocation2 + $0x10] sm:$0xff] }
 0x675   : > { %v4972_v25 = vadd.f32 %v4971_v6, %v9894_v36  ;;  %v4621_v41 = vadd.f32 %v4620_v24, %v9894_v36  ;;  %v4973_v13 = vpop.f32.mrb[237].mxu1  ;;  %v4622_v62 = vpop.f32.mrb[238].mxu0 }
 0x676   : > { %v5630_v20 = vmax.f32 %v5629_v50, %v5274_v4  ;;  %v5275_v55 = vsel %vm5111_vm2, %v4619_v39, -inf  ;;  %v4975_v34 = vpop.f32.mrb[238].mxu1  ;;  %v5452_v32 = vpop.xlane.xlu0 %5451  ;;  %5626 = vmax.xlane.f32.xlu0 %v5625_v51  ;;  %5828 = vst.msk [vmem:[#allocation2] sm:$0xff] %vm5827_vm6, %v5763_v3  ;;  %v4974_v28 = vadd.f32 %v4973_v13, %v9894_v36  ;;  %v4623_v58 = vadd.f32 %v4622_v62, %v9892_v21 }
 0x677   : > { %v5276_v53 = vsel %vm5112_vm3, %v4621_v41, -inf  ;;  %v5764_v22 = vmax.f32 %v5380_v7, %v5452_v32  ;;  %v4624_v17 = vpop.f32.mrb[239].mxu0  ;;  %v4977_v2 = vpop.f32.mrb[239].mxu1  ;;  %v4976_v40 = vadd.f32 %v4975_v34, %v9892_v21  ;;  %v5277_v45 = vsel %vm5113_vm4, %v4972_v25, -inf  ;;  %v5382_v7 = vld [vmem:[#allocation2 + $0x18] sm:$0xff] }
 0x678   : > { %v5633_v47 = vmax.f32 %v5275_v55, %v5276_v53  ;;  %v4625_v29 = vadd.f32 %v4624_v17, %v9892_v21  ;;  %5631 = vmax.xlane.f32.xlu1 %v5630_v20  ;;  %v5279_v52 = vsel %vm5111_vm2, %v4623_v58, -inf  ;;  %v4978_v15 = vadd.f32 %v4977_v2, %v9892_v21 }
 0x679   : > { %5829 = vst.msk [vmem:[#allocation2 + $0x8] sm:$0xff] %vm5827_vm6, %v5764_v22  ;;  %v5278_v35 = vsel %vm5114_vm5, %v4974_v28, -inf  ;;  %v5281_v50 = vsel %vm5113_vm4, %v4976_v40, -inf }
 0x67a   : > { %v5634_v36 = vmax.f32 %v5633_v47, %v5277_v45  ;;  %v5280_v54 = vsel %vm5112_vm3, %v4625_v29, -inf  ;;  %v5282_v62 = vsel %vm5114_vm5, %v4978_v15, -inf  ;;  %v5383_v15 = vld [vmem:[#allocation2 + $0x20] sm:$0xff] }
 0x67b   : > { %v5638_v12 = vmax.f32 %v5279_v52, %v5280_v54  ;;  %v4628_v42 = vpop.f32.mrb[240].mxu0  ;;  %v5457_v14 = vpop.xlane.xlu0 %5456 }
 0x67c   : > { %v4981_v6 = vpop.f32.mrb[240].mxu1  ;;  %v5635_v51 = vmax.f32 %v5634_v36, %v5278_v35  ;;  %v4629_v39 = vadd.f32 %v4628_v42, %v9922_v38  ;;  %v4630_v24 = vpop.f32.mrb[241].mxu0  ;;  %v5765_v21 = vmax.f32 %v5381_v9, %v5457_v14 }
 0x67d   : > { %v5639_v4 = vmax.f32 %v5638_v12, %v5281_v50  ;;  %v4982_v25 = vadd.f32 %v4981_v6, %v9922_v38  ;;  %v4631_v3 = vadd.f32 %v4630_v24, %v9922_v38  ;;  %v4983_v41 = vpop.f32.mrb[241].mxu1  ;;  %v4632_v13 = vpop.f32.mrb[242].mxu0  ;;  %v5384_v24 = vld [vmem:[#allocation2 + $0x28] sm:$0xff] }
 0x67e   : > { %v5283_v20 = vsel %vm5111_vm2, %v4629_v39, -inf  ;;  %v4633_v55 = vadd.f32 %v4632_v13, %v9920_v0  ;;  %v4985_v34 = vpop.f32.mrb[242].mxu1  ;;  %v5462_v32 = vpop.xlane.xlu1 %5461  ;;  %5636 = vmax.xlane.f32.xlu0 %v5635_v51  ;;  %5830 = vst.msk [vmem:[#allocation2 + $0x10] sm:$0xff] %vm5827_vm6, %v5765_v21  ;;  %v4984_v58 = vadd.f32 %v4983_v41, %v9922_v38 }
 0x67f   : > { %v5640_v53 = vmax.f32 %v5639_v4, %v5282_v62  ;;  %v5284_v28 = vsel %vm5112_vm3, %v4631_v3, -inf  ;;  %v5766_v22 = vmax.f32 %v5382_v7, %v5462_v32  ;;  %v4634_v17 = vpop.f32.mrb[243].mxu0  ;;  %v4987_v2 = vpop.f32.mrb[243].mxu1  ;;  %v4986_v29 = vadd.f32 %v4985_v34, %v9920_v0 }
 0x680   : > { %v5643_v47 = vmax.f32 %v5283_v20, %v5284_v28  ;;  %v5287_v40 = vsel %vm5111_vm2, %v4633_v55, -inf  ;;  %v4635_v45 = vadd.f32 %v4634_v17, %v9920_v0  ;;  %v5285_v52 = vsel %vm5113_vm4, %v4982_v25, -inf }
 0x681   : > { %5831 = vst.msk [vmem:[#allocation2 + $0x18] sm:$0xff] %vm5827_vm6, %v5766_v22  ;;  %5641 = vmax.xlane.f32.xlu1 %v5640_v53  ;;  %v4988_v54 = vadd.f32 %v4987_v2, %v9920_v0  ;;  %v5286_v9 = vsel %vm5114_vm5, %v4984_v58, -inf  ;;  %v5289_v51 = vsel %vm5113_vm4, %v4986_v29, -inf }
 0x682   : > { %v5644_v36 = vmax.f32 %v5643_v47, %v5285_v52  ;;  %v5288_v38 = vsel %vm5112_vm3, %v4635_v45, -inf }
 0x683   : > { %v5648_v35 = vmax.f32 %v5287_v40, %v5288_v38  ;;  %v4638_v12 = vpop.f32.mrb[244].mxu0  ;;  %v5467_v39 = vpop.xlane.xlu0 %5466  ;;  %v5290_v41 = vsel %vm5114_vm5, %v4988_v54, -inf }
 0x684   : > { %v4991_v42 = vpop.f32.mrb[244].mxu1  ;;  %v5645_v6 = vmax.f32 %v5644_v36, %v5286_v9  ;;  %v4639_v50 = vadd.f32 %v4638_v12, %v9950_v11  ;;  %v4640_v14 = vpop.f32.mrb[245].mxu0  ;;  %v5767_v0 = vmax.f32 %v5383_v15, %v5467_v39  ;;  %v5385_v36 = vld [vmem:[#allocation2 + $0x30] sm:$0xff] }
 0x685   : > { %v5649_v7 = vmax.f32 %v5648_v35, %v5289_v51  ;;  %v4992_v4 = vadd.f32 %v4991_v42, %v9950_v11  ;;  %v4641_v25 = vadd.f32 %v4640_v14, %v9950_v11  ;;  %v4993_v21 = vpop.f32.mrb[245].mxu1  ;;  %v4642_v3 = vpop.f32.mrb[246].mxu0  ;;  %v5386_v51 = vld [vmem:[#allocation2 + $0x38] sm:$0xff] }
 0x686   : > { %v5291_v13 = vsel %vm5111_vm2, %v4639_v50, -inf  ;;  %v4994_v62 = vadd.f32 %v4993_v21, %v9950_v11  ;;  %v4643_v20 = vadd.f32 %v4642_v3, %v9948_v43  ;;  %v4995_v55 = vpop.f32.mrb[246].mxu1  ;;  %v5472_v34 = vpop.xlane.xlu1 %5471  ;;  %5646 = vmax.xlane.f32.xlu0 %v5645_v6  ;;  %5832 = vst.msk [vmem:[#allocation2 + $0x20] sm:$0xff] %vm5827_vm6, %v5767_v0 }
 0x687   : > { %v5650_v32 = vmax.f32 %v5649_v7, %v5290_v41  ;;  %v5292_v53 = vsel %vm5112_vm3, %v4641_v25, -inf  ;;  %v5768_v28 = vmax.f32 %v5384_v24, %v5472_v34  ;;  %v4644_v58 = vpop.f32.mrb[247].mxu0  ;;  %v4997_v22 = vpop.f32.mrb[247].mxu1  ;;  %v4996_v11 = vadd.f32 %v4995_v55, %v9948_v43 }
 0x688   : > { %v5653_v17 = vmax.f32 %v5291_v13, %v5292_v53  ;;  %v5295_v2 = vsel %vm5111_vm2, %v4643_v20, -inf  ;;  %v4645_v47 = vadd.f32 %v4644_v58, %v9948_v43  ;;  %v5293_v40 = vsel %vm5113_vm4, %v4992_v4, -inf }
 0x689   : > { %5833 = vst.msk [vmem:[#allocation2 + $0x28] sm:$0xff] %vm5827_vm6, %v5768_v28  ;;  %v4998_v29 = vadd.f32 %v4997_v22, %v9948_v43  ;;  %5651 = vmax.xlane.f32.xlu1 %v5650_v32  ;;  %v5294_v38 = vsel %vm5114_vm5, %v4994_v62, -inf  ;;  %v5297_v12 = vsel %vm5113_vm4, %v4996_v11, -inf }
 0x68a   : > { %v5654_v45 = vmax.f32 %v5653_v17, %v5293_v40  ;;  %v5296_v52 = vsel %vm5112_vm3, %v4645_v47, -inf  ;;  %v5387_v47 = vld [vmem:[#allocation2 + $0x40] sm:$0xff] }
 0x68b   : > { %v5658_v54 = vmax.f32 %v5295_v2, %v5296_v52  ;;  %v4648_v15 = vpop.f32.mrb[248].mxu0  ;;  %v5477_v6 = vpop.xlane.xlu0 %5476  ;;  %v5298_v0 = vsel %vm5114_vm5, %v4998_v29, -inf }
 0x68c   : > { %v5001_v9 = vpop.f32.mrb[248].mxu1  ;;  %v5655_v35 = vmax.f32 %v5654_v45, %v5294_v38  ;;  %v4649_v42 = vadd.f32 %v4648_v15, %v9978_v33  ;;  %v4650_v43 = vpop.f32.mrb[249].mxu0  ;;  %v5769_v14 = vmax.f32 %v5385_v36, %v5477_v6 }
 0x68d   : > { %v5659_v50 = vmax.f32 %v5658_v54, %v5297_v12  ;;  %v5002_v39 = vadd.f32 %v5001_v9, %v9978_v33  ;;  %v4651_v24 = vadd.f32 %v4650_v43, %v9978_v33  ;;  %v5003_v7 = vpop.f32.mrb[249].mxu1  ;;  %v4652_v4 = vpop.f32.mrb[250].mxu0 }
 0x68e   : > { %v5299_v25 = vsel %vm5111_vm2, %v4649_v42, -inf  ;;  %v4653_v21 = vadd.f32 %v4652_v4, %v9976_v30  ;;  %v5005_v3 = vpop.f32.mrb[250].mxu1  ;;  %v5482_v41 = vpop.xlane.xlu1 %5481  ;;  %5656 = vmax.xlane.f32.xlu0 %v5655_v35  ;;  %5834 = vst.msk [vmem:[#allocation2 + $0x30] sm:$0xff] %vm5827_vm6, %v5769_v14  ;;  %v5004_v20 = vadd.f32 %v5003_v7, %v9978_v33  ;;  %v5388_v35 = vld [vmem:[#allocation2 + $0x48] sm:$0xff] }
 0x68f   : > { %v5660_v13 = vmax.f32 %v5659_v50, %v5298_v0  ;;  %v5300_v62 = vsel %vm5112_vm3, %v4651_v24, -inf  ;;  %v5770_v55 = vmax.f32 %v5386_v51, %v5482_v41  ;;  %v4654_v34 = vpop.f32.mrb[251].mxu0  ;;  %v5007_v32 = vpop.f32.mrb[251].mxu1  ;;  %v5006_v58 = vadd.f32 %v5005_v3, %v9976_v30 }
 0x690   : > { %v5663_v53 = vmax.f32 %v5299_v25, %v5300_v62  ;;  %v5303_v28 = vsel %vm5111_vm2, %v4653_v21, -inf  ;;  %v4655_v22 = vadd.f32 %v4654_v34, %v9976_v30  ;;  %v5301_v17 = vsel %vm5113_vm4, %v5002_v39, -inf }
 0x691   : > { %5835 = vst.msk [vmem:[#allocation2 + $0x38] sm:$0xff] %vm5827_vm6, %v5770_v55  ;;  %5661 = vmax.xlane.f32.xlu1 %v5660_v13  ;;  %v5008_v11 = vadd.f32 %v5007_v32, %v9976_v30  ;;  %v5302_v40 = vsel %vm5114_vm5, %v5004_v20, -inf  ;;  %v5305_v38 = vsel %vm5113_vm4, %v5006_v58, -inf }
 0x692   : > { %v5664_v2 = vmax.f32 %v5663_v53, %v5301_v17  ;;  %v5304_v33 = vsel %vm5112_vm3, %v4655_v22, -inf }
 0x693   : > { %v5668_v29 = vmax.f32 %v5303_v28, %v5304_v33  ;;  %v4658_v45 = vpop.f32.mrb[252].mxu0  ;;  %v5487_v15 = vpop.xlane.xlu0 %5486  ;;  %v5306_v50 = vsel %vm5114_vm5, %v5008_v11, -inf  ;;  %v5389_v28 = vld [vmem:[#allocation2 + $0x50] sm:$0xff] }
 0x694   : > { %v5011_v52 = vpop.f32.mrb[252].mxu1  ;;  %v5665_v36 = vmax.f32 %v5664_v2, %v5302_v40  ;;  %v4659_v54 = vadd.f32 %v4658_v45, %v10006_v46  ;;  %v4660_v9 = vpop.f32.mrb[253].mxu0  ;;  %v5771_v30 = vmax.f32 %v5387_v47, %v5487_v15  ;;  %v5390_v45 = vld [vmem:[#allocation2 + $0x58] sm:$0xff] }
 0x695   : > { %v5669_v12 = vmax.f32 %v5668_v29, %v5305_v38  ;;  %v5012_v42 = vadd.f32 %v5011_v52, %v10006_v46  ;;  %v4661_v6 = vadd.f32 %v4660_v9, %v10006_v46  ;;  %v5013_v43 = vpop.f32.mrb[253].mxu1  ;;  %v4662_v51 = vpop.f32.mrb[254].mxu0 }
 0x696   : > { %v5307_v39 = vsel %vm5111_vm2, %v4659_v54, -inf  ;;  %v4663_v14 = vadd.f32 %v4662_v51, %v10004_v26  ;;  %v5015_v24 = vpop.f32.mrb[254].mxu1  ;;  %v5492_v7 = vpop.xlane.xlu1 %5491  ;;  %5666 = vmax.xlane.f32.xlu0 %v5665_v36  ;;  %5836 = vst.msk [vmem:[#allocation2 + $0x40] sm:$0xff] %vm5827_vm6, %v5771_v30  ;;  %v5014_v25 = vadd.f32 %v5013_v43, %v10006_v46 }
 0x697   : > { %v5670_v4 = vmax.f32 %v5669_v12, %v5306_v50  ;;  %v5308_v0 = vsel %vm5112_vm3, %v4661_v6, -inf  ;;  %v5772_v21 = vmax.f32 %v5388_v35, %v5492_v7  ;;  %v4664_v3 = vpop.f32.mrb[255].mxu0  ;;  %v5017_v41 = vpop.f32.mrb[255].mxu1  ;;  %v5016_v20 = vadd.f32 %v5015_v24, %v10004_v26 }
 0x698   : > { %v5673_v13 = vmax.f32 %v5307_v39, %v5308_v0  ;;  %v5311_v62 = vsel %vm5111_vm2, %v4663_v14, -inf  ;;  %v4665_v55 = vadd.f32 %v4664_v3, %v10004_v26  ;;  %v5309_v34 = vsel %vm5113_vm4, %v5012_v42, -inf }
 0x699   : > { %5837 = vst.msk [vmem:[#allocation2 + $0x48] sm:$0xff] %vm5827_vm6, %v5772_v21  ;;  %5671 = vmax.xlane.f32.xlu1 %v5670_v4  ;;  %v5018_v53 = vadd.f32 %v5017_v41, %v10004_v26  ;;  %v5310_v58 = vsel %vm5114_vm5, %v5014_v25, -inf  ;;  %v5313_v11 = vsel %vm5113_vm4, %v5016_v20, -inf  ;;  %v5391_v41 = vld [vmem:[#allocation2 + $0x60] sm:$0xff] }
 0x69a   : > { %v5674_v32 = vmax.f32 %v5673_v13, %v5309_v34  ;;  %v5312_v46 = vsel %vm5112_vm3, %v4665_v55, -inf }
 0x69b   : > { %v5678_v22 = vmax.f32 %v5311_v62, %v5312_v46  ;;  %v4668_v17 = vpop.f32.mrb[0].mxu0  ;;  %v5497_v40 = vpop.xlane.xlu0 %5496  ;;  %v5314_v9 = vsel %vm5114_vm5, %v5018_v53, -inf }
 0x69c   : > { %v5021_v2 = vpop.f32.mrb[0].mxu1  ;;  %v5675_v33 = vmax.f32 %v5674_v32, %v5310_v58  ;;  %v4669_v47 = vadd.f32 %v4668_v17, %v10034_v57  ;;  %v4670_v29 = vpop.f32.mrb[1].mxu0  ;;  %v5773_v26 = vmax.f32 %v5389_v28, %v5497_v40  ;;  %v5392_v58 = vld [vmem:[#allocation2 + $0x68] sm:$0xff] }
 0x69d   : > { %v5679_v52 = vmax.f32 %v5678_v22, %v5313_v11  ;;  %v5022_v36 = vadd.f32 %v5021_v2, %v10034_v57  ;;  %v4671_v38 = vadd.f32 %v4670_v29, %v10034_v57  ;;  %v5023_v54 = vpop.f32.mrb[1].mxu1  ;;  %v4672_v15 = vpop.f32.mrb[2].mxu0 }
 0x69e   : > { %v5315_v35 = vsel %vm5111_vm2, %v4669_v47, -inf  ;;  %v4673_v12 = vadd.f32 %v4672_v15, %v10032_v31  ;;  %v5025_v42 = vpop.f32.mrb[2].mxu1  ;;  %v5502_v30 = vpop.xlane.xlu1 %5501  ;;  %5676 = vmax.xlane.f32.xlu0 %v5675_v33  ;;  %5838 = vst.msk [vmem:[#allocation2 + $0x50] sm:$0xff] %vm5827_vm6, %v5773_v26  ;;  %v5024_v51 = vadd.f32 %v5023_v54, %v10034_v57 }
 0x69f   : > { %v5680_v6 = vmax.f32 %v5679_v52, %v5314_v9  ;;  %v5316_v43 = vsel %vm5112_vm3, %v4671_v38, -inf  ;;  %v5774_v50 = vmax.f32 %v5390_v45, %v5502_v30  ;;  %v4674_v39 = vpop.f32.mrb[3].mxu0  ;;  %v5027_v14 = vpop.f32.mrb[3].mxu1  ;;  %v5026_v4 = vadd.f32 %v5025_v42, %v10032_v31 }
 0x6a0   : > { %v5683_v24 = vmax.f32 %v5315_v35, %v5316_v43  ;;  %v5319_v7 = vsel %vm5111_vm2, %v4673_v12, -inf  ;;  %v4675_v0 = vadd.f32 %v4674_v39, %v10032_v31  ;;  %v5317_v25 = vsel %vm5113_vm4, %v5022_v36, -inf }
 0x6a1   : > { %5839 = vst.msk [vmem:[#allocation2 + $0x58] sm:$0xff] %vm5827_vm6, %v5774_v50  ;;  %5681 = vmax.xlane.f32.xlu1 %v5680_v6  ;;  %v5028_v3 = vadd.f32 %v5027_v14, %v10032_v31  ;;  %v5318_v13 = vsel %vm5114_vm5, %v5024_v51, -inf  ;;  %v5321_v32 = vsel %vm5113_vm4, %v5026_v4, -inf  ;;  %v5393_v50 = vld [vmem:[#allocation2 + $0x70] sm:$0xff] }
 0x6a2   : > { %v5684_v21 = vmax.f32 %v5683_v24, %v5317_v25  ;;  %v5320_v57 = vsel %vm5112_vm3, %v4675_v0, -inf }
 0x6a3   : > { %v5688_v62 = vmax.f32 %v5319_v7, %v5320_v57  ;;  %v4678_v20 = vpop.f32.mrb[4].mxu0  ;;  %v5507_v53 = vpop.xlane.xlu0 %5506  ;;  %v5322_v47 = vsel %vm5114_vm5, %v5028_v3, -inf  ;;  %v5394_v3 = vld [vmem:[#allocation2 + $0x78] sm:$0xff] }
 0x6a4   : > { %v5031_v55 = vpop.f32.mrb[4].mxu1  ;;  %v5685_v34 = vmax.f32 %v5684_v21, %v5318_v13  ;;  %v4679_v46 = vadd.f32 %v4678_v20, %v10062_v19  ;;  %v4680_v28 = vpop.f32.mrb[5].mxu0  ;;  %v5775_v31 = vmax.f32 %v5391_v41, %v5507_v53 }
 0x6a5   : > { %v5689_v22 = vmax.f32 %v5688_v62, %v5321_v32  ;;  %v5032_v17 = vadd.f32 %v5031_v55, %v10062_v19  ;;  %v4681_v2 = vadd.f32 %v4680_v28, %v10062_v19  ;;  %v5033_v33 = vpop.f32.mrb[5].mxu1  ;;  %v4682_v11 = vpop.f32.mrb[6].mxu0 }
 0x6a6   : > { %v5323_v40 = vsel %vm5111_vm2, %v4679_v46, -inf  ;;  %v4683_v29 = vadd.f32 %v4682_v11, %v10060_v16  ;;  %v5035_v45 = vpop.f32.mrb[6].mxu1  ;;  %v5512_v52 = vpop.xlane.xlu1 %5511  ;;  %5686 = vmax.xlane.f32.xlu0 %v5685_v34  ;;  %5840 = vst.msk [vmem:[#allocation2 + $0x60] sm:$0xff] %vm5827_vm6, %v5775_v31  ;;  %v5034_v38 = vadd.f32 %v5033_v33, %v10062_v19 }
 0x6a7   : > { %v5690_v36 = vmax.f32 %v5689_v22, %v5322_v47  ;;  %v5324_v26 = vsel %vm5112_vm3, %v4681_v2, -inf  ;;  %v5776_v54 = vmax.f32 %v5392_v58, %v5512_v52  ;;  %v4684_v15 = vpop.f32.mrb[7].mxu0  ;;  %v5037_v9 = vpop.f32.mrb[7].mxu1  ;;  %v5036_v42 = vadd.f32 %v5035_v45, %v10060_v16 }
 0x6a8   : > { %v5693_v35 = vmax.f32 %v5323_v40, %v5324_v26  ;;  %v5327_v12 = vsel %vm5111_vm2, %v4683_v29, -inf  ;;  %v4685_v30 = vadd.f32 %v4684_v15, %v10060_v16  ;;  %v5325_v6 = vsel %vm5113_vm4, %v5032_v17, -inf  ;;  %v5395_v26 = vld [vmem:[#allocation2 + $0x80] sm:$0xff] }
 0x6a9   : > { %5841 = vst.msk [vmem:[#allocation2 + $0x68] sm:$0xff] %vm5827_vm6, %v5776_v54  ;;  %5691 = vmax.xlane.f32.xlu1 %v5690_v36  ;;  %v5038_v51 = vadd.f32 %v5037_v9, %v10060_v16  ;;  %v5326_v39 = vsel %vm5114_vm5, %v5034_v38, -inf  ;;  %v5329_v0 = vsel %vm5113_vm4, %v5036_v42, -inf }
 0x6aa   : > { %v5694_v43 = vmax.f32 %v5693_v35, %v5325_v6  ;;  %v5328_v19 = vsel %vm5112_vm3, %v4685_v30, -inf }
 0x6ab   : > { %v5698_v14 = vmax.f32 %v5327_v12, %v5328_v19  ;;  %v4688_v24 = vpop.f32.mrb[8].mxu0  ;;  %v5517_v21 = vpop.xlane.xlu0 %5516  ;;  %v5330_v34 = vsel %vm5114_vm5, %v5038_v51, -inf }
 0x6ac   : > { %v5041_v7 = vpop.f32.mrb[8].mxu1  ;;  %v5695_v4 = vmax.f32 %v5694_v43, %v5326_v39  ;;  %v4689_v25 = vadd.f32 %v4688_v24, %v10090_v56  ;;  %v4690_v57 = vpop.f32.mrb[9].mxu0  ;;  %v5777_v16 = vmax.f32 %v5393_v50, %v5517_v21  ;;  %v5396_v43 = vld [vmem:[#allocation2 + $0x88] sm:$0xff] }
 0x6ad   : > { %v5699_v41 = vmax.f32 %v5698_v14, %v5329_v0  ;;  %v5042_v13 = vadd.f32 %v5041_v7, %v10090_v56  ;;  %v4691_v62 = vadd.f32 %v4690_v57, %v10090_v56  ;;  %v5043_v20 = vpop.f32.mrb[9].mxu1  ;;  %v4692_v55 = vpop.f32.mrb[10].mxu0 }
 0x6ae   : > { %v5331_v32 = vsel %vm5111_vm2, %v4689_v25, -inf  ;;  %v4693_v46 = vadd.f32 %v4692_v55, %v10088_v8  ;;  %v5045_v53 = vpop.f32.mrb[10].mxu1  ;;  %v5522_v28 = vpop.xlane.xlu1 %5521  ;;  %5696 = vmax.xlane.f32.xlu0 %v5695_v4  ;;  %5842 = vst.msk [vmem:[#allocation2 + $0x70] sm:$0xff] %vm5827_vm6, %v5777_v16  ;;  %v5044_v17 = vadd.f32 %v5043_v20, %v10090_v56 }
 0x6af   : > { %v5700_v58 = vmax.f32 %v5699_v41, %v5330_v34  ;;  %v5332_v22 = vsel %vm5112_vm3, %v4691_v62, -inf  ;;  %v5778_v31 = vmax.f32 %v5394_v3, %v5522_v28  ;;  %v4694_v2 = vpop.f32.mrb[11].mxu0  ;;  %v5047_v33 = vpop.f32.mrb[11].mxu1  ;;  %v5046_v40 = vadd.f32 %v5045_v53, %v10088_v8  ;;  %v5397_v28 = vld [vmem:[#allocation2 + $0x90] sm:$0xff] }
 0x6b0   : > { %v5703_v11 = vmax.f32 %v5331_v32, %v5332_v22  ;;  %v5335_v47 = vsel %vm5111_vm2, %v4693_v46, -inf  ;;  %v4695_v29 = vadd.f32 %v4694_v2, %v10088_v8  ;;  %v5333_v45 = vsel %vm5113_vm4, %v5042_v13, -inf }
 0x6b1   : > { %5843 = vst.msk [vmem:[#allocation2 + $0x78] sm:$0xff] %vm5827_vm6, %v5778_v31  ;;  %5701 = vmax.xlane.f32.xlu1 %v5700_v58  ;;  %v5048_v36 = vadd.f32 %v5047_v33, %v10088_v8  ;;  %v5334_v38 = vsel %vm5114_vm5, %v5044_v17, -inf  ;;  %v5337_v12 = vsel %vm5113_vm4, %v5046_v40, -inf }
 0x6b2   : > { %v5704_v52 = vmax.f32 %v5703_v11, %v5333_v45  ;;  %v5336_v56 = vsel %vm5112_vm3, %v4695_v29, -inf  ;;  %v5398_v29 = vld [vmem:[#allocation2 + $0x98] sm:$0xff] }
 0x6b3   : > { %v5708_v54 = vmax.f32 %v5335_v47, %v5336_v56  ;;  %v4698_v15 = vpop.f32.mrb[12].mxu0  ;;  %v5527_v30 = vpop.xlane.xlu0 %5526  ;;  %v5338_v24 = vsel %vm5114_vm5, %v5048_v36, -inf }
 0x6b4   : > { %v5051_v9 = vpop.f32.mrb[12].mxu1  ;;  %v5705_v35 = vmax.f32 %v5704_v52, %v5334_v38  ;;  %v4699_v42 = vadd.f32 %v4698_v15, %v10118_v63  ;;  %v4700_v6 = vpop.f32.mrb[13].mxu0  ;;  %v5779_v8 = vmax.f32 %v5395_v26, %v5527_v30 }
 0x6b5   : > { %v5709_v19 = vmax.f32 %v5708_v54, %v5337_v12  ;;  %v5052_v51 = vadd.f32 %v5051_v9, %v10118_v63  ;;  %v4701_v50 = vadd.f32 %v4700_v6, %v10118_v63  ;;  %v5053_v39 = vpop.f32.mrb[13].mxu1  ;;  %v4702_v14 = vpop.f32.mrb[14].mxu0 }
 0x6b6   : > { %v5339_v7 = vsel %vm5111_vm2, %v4699_v42, -inf  ;;  %v4703_v4 = vadd.f32 %v4702_v14, %v10116_v27  ;;  %v5055_v0 = vpop.f32.mrb[14].mxu1  ;;  %v5532_v25 = vpop.xlane.xlu1 %5531  ;;  %5706 = vmax.xlane.f32.xlu0 %v5705_v35  ;;  %5844 = vst.msk [vmem:[#allocation2 + $0x80] sm:$0xff] %vm5827_vm6, %v5779_v8  ;;  %v5054_v3 = vadd.f32 %v5053_v39, %v10118_v63 }
 0x6b7   : > { %v5710_v21 = vmax.f32 %v5709_v19, %v5338_v24  ;;  %v5340_v57 = vsel %vm5112_vm3, %v4701_v50, -inf  ;;  %v5780_v41 = vmax.f32 %v5396_v43, %v5532_v25  ;;  %v4704_v13 = vpop.f32.mrb[15].mxu0  ;;  %v5057_v16 = vpop.f32.mrb[15].mxu1  ;;  %v5056_v55 = vadd.f32 %v5055_v0, %v10116_v27 }
 0x6b8   : > { %v5713_v62 = vmax.f32 %v5339_v7, %v5340_v57  ;;  %v5343_v20 = vsel %vm5111_vm2, %v4703_v4, -inf  ;;  %v4705_v34 = vadd.f32 %v4704_v13, %v10116_v27  ;;  %v5341_v32 = vsel %vm5113_vm4, %v5052_v51, -inf  ;;  %v5399_v4 = vld [vmem:[#allocation2 + $0xa0] sm:$0xff] }
 0x6b9   : > { %5845 = vst.msk [vmem:[#allocation2 + $0x88] sm:$0xff] %vm5827_vm6, %v5780_v41  ;;  %5711 = vmax.xlane.f32.xlu1 %v5710_v21  ;;  %v5058_v53 = vadd.f32 %v5057_v16, %v10116_v27  ;;  %v5342_v58 = vsel %vm5114_vm5, %v5054_v3, -inf  ;;  %v5345_v33 = vsel %vm5113_vm4, %v5056_v55, -inf }
 0x6ba   : > { %v5714_v46 = vmax.f32 %v5713_v62, %v5341_v32  ;;  %v5344_v63 = vsel %vm5112_vm3, %v4705_v34, -inf }
 0x6bb   : > { %v5718_v22 = vmax.f32 %v5343_v20, %v5344_v63  ;;  %v4708_v17 = vpop.f32.mrb[16].mxu0  ;;  %v5537_v47 = vpop.xlane.xlu0 %5536  ;;  %v5346_v38 = vsel %vm5114_vm5, %v5058_v53, -inf  ;;  %v5400_v20 = vld [vmem:[#allocation2 + $0xa8] sm:$0xff] }
 0x6bc   : > { %v5061_v31 = vpop.f32.mrb[16].mxu1  ;;  %v5715_v2 = vmax.f32 %v5714_v46, %v5342_v58  ;;  %v4709_v11 = vadd.f32 %v4708_v17, %v10146_v37  ;;  %v4710_v40 = vpop.f32.mrb[17].mxu0  ;;  %v5781_v27 = vmax.f32 %v5397_v28, %v5537_v47 }
 0x6bd   : > { %v5719_v45 = vmax.f32 %v5718_v22, %v5345_v33  ;;  %v5062_v52 = vadd.f32 %v5061_v31, %v10146_v37  ;;  %v4711_v56 = vadd.f32 %v4710_v40, %v10146_v37  ;;  %v5063_v36 = vpop.f32.mrb[17].mxu1  ;;  %v4712_v26 = vpop.f32.mrb[18].mxu0 }
 0x6be   : > { %v5347_v54 = vsel %vm5111_vm2, %v4709_v11, -inf  ;;  %v4713_v15 = vadd.f32 %v4712_v26, %v10144_v18  ;;  %v5065_v9 = vpop.f32.mrb[18].mxu1  ;;  %v5542_v35 = vpop.xlane.xlu1 %5541  ;;  %5716 = vmax.xlane.f32.xlu0 %v5715_v2  ;;  %5846 = vst.msk [vmem:[#allocation2 + $0x90] sm:$0xff] %vm5827_vm6, %v5781_v27  ;;  %v5064_v30 = vadd.f32 %v5063_v36, %v10146_v37 }
 0x6bf   : > { %v5720_v12 = vmax.f32 %v5719_v45, %v5346_v38  ;;  %v5348_v42 = vsel %vm5112_vm3, %v4711_v56, -inf  ;;  %v5782_v6 = vmax.f32 %v5398_v29, %v5542_v35  ;;  %v4714_v43 = vpop.f32.mrb[19].mxu0  ;;  %v5067_v19 = vpop.f32.mrb[19].mxu1  ;;  %v5066_v50 = vadd.f32 %v5065_v9, %v10144_v18  ;;  %v5401_v38 = vld [vmem:[#allocation2 + $0xb0] sm:$0xff] }
 0x6c0   : > { %v5723_v51 = vmax.f32 %v5347_v54, %v5348_v42  ;;  %v5351_v8 = vsel %vm5111_vm2, %v4713_v15, -inf  ;;  %v4715_v39 = vadd.f32 %v4714_v43, %v10144_v18  ;;  %v5349_v14 = vsel %vm5113_vm4, %v5062_v52, -inf }
 0x6c1   : > { %5847 = vst.msk [vmem:[#allocation2 + $0x98] sm:$0xff] %vm5827_vm6, %v5782_v6  ;;  %5721 = vmax.xlane.f32.xlu1 %v5720_v12  ;;  %v5068_v7 = vadd.f32 %v5067_v19, %v10144_v18  ;;  %v5350_v0 = vsel %vm5114_vm5, %v5064_v30, -inf  ;;  %v5353_v41 = vsel %vm5113_vm4, %v5066_v50, -inf  ;;  %v5402_v19 = vld [vmem:[#allocation2 + $0xb8] sm:$0xff] }
 0x6c2   : > { %v5724_v24 = vmax.f32 %v5723_v51, %v5349_v14  ;;  %v5352_v37 = vsel %vm5112_vm3, %v4715_v39, -inf }
 0x6c3   : > { %v5728_v25 = vmax.f32 %v5351_v8, %v5352_v37  ;;  %v4718_v21 = vpop.f32.mrb[20].mxu0  ;;  %v5547_v16 = vpop.xlane.xlu0 %5546  ;;  %v5354_v53 = vsel %vm5114_vm5, %v5068_v7, -inf }
 0x6c4   : > { %v5071_v57 = vpop.f32.mrb[20].mxu1  ;;  %v5725_v3 = vmax.f32 %v5724_v24, %v5350_v0  ;;  %v4719_v13 = vadd.f32 %v4718_v21, %v10174_v49  ;;  %v4720_v62 = vpop.f32.mrb[21].mxu0  ;;  %v5783_v18 = vmax.f32 %v5399_v4, %v5547_v16 }
 0x6c5   : > { %v5729_v55 = vmax.f32 %v5728_v25, %v5353_v41  ;;  %v5072_v34 = vadd.f32 %v5071_v57, %v10174_v49  ;;  %v4721_v32 = vadd.f32 %v4720_v62, %v10174_v49  ;;  %v5073_v46 = vpop.f32.mrb[21].mxu1  ;;  %v4722_v63 = vpop.f32.mrb[22].mxu0 }
 0x6c6   : > { %v5355_v28 = vsel %vm5111_vm2, %v4719_v13, -inf  ;;  %v4723_v58 = vadd.f32 %v4722_v63, %v10172_v61  ;;  %v5075_v22 = vpop.f32.mrb[22].mxu1  ;;  %v5552_v17 = vpop.xlane.xlu1 %5551  ;;  %5726 = vmax.xlane.f32.xlu0 %v5725_v3  ;;  %5848 = vst.msk [vmem:[#allocation2 + $0xa0] sm:$0xff] %vm5827_vm6, %v5783_v18  ;;  %v5074_v33 = vadd.f32 %v5073_v46, %v10174_v49  ;;  %v5403_v46 = vld [vmem:[#allocation2 + $0xc0] sm:$0xff] }
 0x6c7   : > { %v5730_v31 = vmax.f32 %v5729_v55, %v5354_v53  ;;  %v5356_v2 = vsel %vm5112_vm3, %v4721_v32, -inf  ;;  %v5784_v11 = vmax.f32 %v5400_v20, %v5552_v17  ;;  %v4724_v47 = vpop.f32.mrb[23].mxu0  ;;  %v5077_v40 = vpop.f32.mrb[23].mxu1  ;;  %v5076_v52 = vadd.f32 %v5075_v22, %v10172_v61 }
 0x6c8   : > { %v5733_v29 = vmax.f32 %v5355_v28, %v5356_v2  ;;  %v5359_v45 = vsel %vm5111_vm2, %v4723_v58, -inf  ;;  %v4725_v27 = vadd.f32 %v4724_v47, %v10172_v61  ;;  %v5357_v56 = vsel %vm5113_vm4, %v5072_v34, -inf }
 0x6c9   : > { %5849 = vst.msk [vmem:[#allocation2 + $0xa8] sm:$0xff] %vm5827_vm6, %v5784_v11  ;;  %5731 = vmax.xlane.f32.xlu1 %v5730_v31  ;;  %v5078_v26 = vadd.f32 %v5077_v40, %v10172_v61  ;;  %v5358_v54 = vsel %vm5114_vm5, %v5074_v33, -inf  ;;  %v5361_v42 = vsel %vm5113_vm4, %v5076_v52, -inf  ;;  %v5404_v11 = vld [vmem:[#allocation2 + $0xc8] sm:$0xff] }
 0x6ca   : > { %v5734_v36 = vmax.f32 %v5733_v29, %v5357_v56  ;;  %v5360_v49 = vsel %vm5112_vm3, %v4725_v27, -inf }
 0x6cb   : > { %v5738_v15 = vmax.f32 %v5359_v45, %v5360_v49  ;;  %v4728_v9 = vpop.f32.mrb[24].mxu0  ;;  %v5557_v6 = vpop.xlane.xlu0 %5556  ;;  %v5362_v24 = vsel %vm5114_vm5, %v5078_v26, -inf }
 0x6cc   : > { %v5081_v35 = vpop.f32.mrb[24].mxu1  ;;  %v5735_v12 = vmax.f32 %v5734_v36, %v5358_v54  ;;  %v4729_v30 = vadd.f32 %v4728_v9, %v10202_v44  ;;  %v4730_v43 = vpop.f32.mrb[25].mxu0  ;;  %v5785_v61 = vmax.f32 %v5401_v38, %v5557_v6 }
 0x6cd   : > { %v5739_v51 = vmax.f32 %v5738_v15, %v5361_v42  ;;  %v5082_v8 = vadd.f32 %v5081_v35, %v10202_v44  ;;  %v4731_v50 = vadd.f32 %v4730_v43, %v10202_v44  ;;  %v5083_v39 = vpop.f32.mrb[25].mxu1  ;;  %v4732_v14 = vpop.f32.mrb[26].mxu0 }
 0x6ce   : > { %v5363_v37 = vsel %vm5111_vm2, %v4729_v30, -inf  ;;  %v4733_v7 = vadd.f32 %v4732_v14, %v10200_v59  ;;  %v5085_v4 = vpop.f32.mrb[26].mxu1  ;;  %v5562_v0 = vpop.xlane.xlu1 %5561  ;;  %5736 = vmax.xlane.f32.xlu0 %v5735_v12  ;;  %5850 = vst.msk [vmem:[#allocation2 + $0xb0] sm:$0xff] %vm5827_vm6, %v5785_v61  ;;  %v5084_v57 = vadd.f32 %v5083_v39, %v10202_v44  ;;  %v5406_v14 = vld [vmem:[#allocation2 + $0xd8] sm:$0xff] }
 0x6cf   : > { %v5740_v25 = vmax.f32 %v5739_v51, %v5362_v24  ;;  %v5364_v21 = vsel %vm5112_vm3, %v4731_v50, -inf  ;;  %v5786_v3 = vmax.f32 %v5402_v19, %v5562_v0  ;;  %v4734_v41 = vpop.f32.mrb[27].mxu0  ;;  %v5087_v13 = vpop.f32.mrb[27].mxu1  ;;  %v5086_v20 = vadd.f32 %v5085_v4, %v10200_v59  ;;  %v5405_v51 = vld [vmem:[#allocation2 + $0xd0] sm:$0xff] }
 0x6d0   : > { %v5743_v16 = vmax.f32 %v5363_v37, %v5364_v21  ;;  %v5367_v62 = vsel %vm5111_vm2, %v4733_v7, -inf  ;;  %v4735_v55 = vadd.f32 %v4734_v41, %v10200_v59  ;;  %v5365_v34 = vsel %vm5113_vm4, %v5082_v8, -inf  ;;  %v5407_v21 = vld [vmem:[#allocation2 + $0xe0] sm:$0xff] }
 0x6d1   : > { %5851 = vst.msk [vmem:[#allocation2 + $0xb8] sm:$0xff] %vm5827_vm6, %v5786_v3  ;;  %5741 = vmax.xlane.f32.xlu1 %v5740_v25  ;;  %v5088_v32 = vadd.f32 %v5087_v13, %v10200_v59  ;;  %v5366_v63 = vsel %vm5114_vm5, %v5084_v57, -inf  ;;  %v5369_v17 = vsel %vm5113_vm4, %v5086_v20, -inf  ;;  %v5408_v3 = vld [vmem:[#allocation2 + $0xe8] sm:$0xff] }
 0x6d2   : > { %v5744_v18 = vmax.f32 %v5743_v16, %v5365_v34  ;;  %v5368_v44 = vsel %vm5112_vm3, %v4735_v55, -inf }
 0x6d3   : > { %v5748_v53 = vmax.f32 %v5367_v62, %v5368_v44  ;;  %v4738_v28 = vpop.f32.mrb[28].mxu0  ;;  %v5567_v2 = vpop.xlane.xlu0 %5566  ;;  %v5370_v27 = vsel %vm5114_vm5, %v5088_v32, -inf  ;;  %v5410_v62 = vld [vmem:[#allocation2 + $0xf8] sm:$0xff]  ;;  %v5412_v32 = vld [vmem:[#allocation2 + $0x108] sm:$0xff] }
 0x6d4   : > { %v5091_v58 = vpop.f32.mrb[28].mxu1  ;;  %v5745_v22 = vmax.f32 %v5744_v18, %v5366_v63  ;;  %v4739_v31 = vadd.f32 %v4738_v28, %v10221_v60  ;;  %v4740_v33 = vpop.f32.mrb[29].mxu0  ;;  %v5787_v59 = vmax.f32 %v5403_v46, %v5567_v2  ;;  %v5411_v18 = vld [vmem:[#allocation2 + $0x100] sm:$0xff]  ;;  %v5413_v28 = vld [vmem:[#allocation2 + $0x110] sm:$0xff] }
 0x6d5   : > { %v5749_v47 = vmax.f32 %v5748_v53, %v5369_v17  ;;  %v5092_v40 = vadd.f32 %v5091_v58, %v10221_v60  ;;  %v4741_v29 = vadd.f32 %v4740_v33, %v10221_v60  ;;  %v5093_v45 = vpop.f32.mrb[29].mxu1  ;;  %v4742_v52 = vpop.f32.mrb[30].mxu0  ;;  %v5415_v33 = vld [vmem:[#allocation2 + $0x120] sm:$0xff] }
 0x6d6   : > { %v5371_v56 = vsel %vm5111_vm2, %v4739_v31, -inf  ;;  %v4743_v36 = vadd.f32 %v4742_v52, %v10230_v5  ;;  %v5095_v49 = vpop.f32.mrb[30].mxu1  ;;  %v5572_v26 = vpop.xlane.xlu1 %5571  ;;  %5746 = vmax.xlane.f32.xlu0 %v5745_v22  ;;  %5852 = vst.msk [vmem:[#allocation2 + $0xc0] sm:$0xff] %vm5827_vm6, %v5787_v59  ;;  %v5094_v15 = vadd.f32 %v5093_v45, %v10221_v60  ;;  %v5414_v22 = vld [vmem:[#allocation2 + $0x118] sm:$0xff]  ;;  %v5417_v45 = vld [vmem:[#allocation2 + $0x130] sm:$0xff] }
 0x6d7   : > { %v5750_v38 = vmax.f32 %v5749_v47, %v5370_v27  ;;  %v5372_v54 = vsel %vm5112_vm3, %v4741_v29, -inf  ;;  %v5788_v9 = vmax.f32 %v5404_v11, %v5572_v26  ;;  %v4744_v35 = vpop.f32.mrb[31].mxu0  ;;  %v5097_v12 = vpop.f32.mrb[31].mxu1  ;;  %v5096_v6 = vadd.f32 %v5095_v49, %v10230_v5  ;;  %v5416_v47 = vld [vmem:[#allocation2 + $0x128] sm:$0xff]  ;;  %v5419_v26 = vld [vmem:[#allocation2 + $0x140] sm:$0xff] }
 0x6d8   : > { %v5753_v42 = vmax.f32 %v5371_v56, %v5372_v54  ;;  %v5375_v30 = vsel %vm5111_vm2, %v4743_v36, -inf  ;;  %v4745_v43 = vadd.f32 %v4744_v35, %v10230_v5  ;;  %v5373_v19 = vsel %vm5113_vm4, %v5092_v40, -inf  ;;  %v5418_v56 = vld [vmem:[#allocation2 + $0x138] sm:$0xff] }
 0x6d9   : > { %5853 = vst.msk [vmem:[#allocation2 + $0xc8] sm:$0xff] %vm5827_vm6, %v5788_v9  ;;  %5751 = vmax.xlane.f32.xlu1 %v5750_v38  ;;  %v5098_v61 = vadd.f32 %v5097_v12, %v10230_v5  ;;  %v5374_v10 = vsel %vm5114_vm5, %v5094_v15, -inf  ;;  %v5377_v37 = vsel %vm5113_vm4, %v5096_v6, -inf  ;;  %v5420_v15 = vld [vmem:[#allocation2 + $0x148] sm:$0xff]  ;;  %v5421_v12 = vld [vmem:[#allocation2 + $0x150] sm:$0xff]  ;;  %v5422_v6 = vld [vmem:[#allocation2 + $0x158] sm:$0xff] }
 0x6da   : > { %v5754_v8 = vmax.f32 %v5753_v42, %v5373_v19  ;;  %v5376_v60 = vsel %vm5112_vm3, %v4745_v43, -inf }
 0x6db   : > { %v5758_v50 = vmax.f32 %v5375_v30, %v5376_v60  ;;  %v5577_v39 = vpop.xlane.xlu0 %5576  ;;  %v5378_v25 = vsel %vm5114_vm5, %v5098_v61, -inf  ;;  %v5424_v61 = vld [vmem:[#allocation2 + $0x168] sm:$0xff] }
 0x6dc   : > { %v5755_v24 = vmax.f32 %v5754_v8, %v5374_v10  ;;  %v5789_v7 = vmax.f32 %v5405_v51, %v5577_v39  ;;  %v5423_v51 = vld [vmem:[#allocation2 + $0x160] sm:$0xff]  ;;  %v5425_v39 = vld [vmem:[#allocation2 + $0x170] sm:$0xff] }
 0x6dd   : > { %v5759_v4 = vmax.f32 %v5758_v50, %v5377_v37  ;;  %v5582_v0 = vpop.xlane.xlu1 %5581  ;;  %v5426_v37 = vld [vmem:[#allocation2 + $0x178] sm:$0xff] }
 0x6de   : > { %5854 = vst.msk [vmem:[#allocation2 + $0xd0] sm:$0xff] %vm5827_vm6, %v5789_v7  ;;  %v5790_v1 = vmax.f32 %v5406_v14, %v5582_v0  ;;  %5756 = vmax.xlane.f32.xlu0 %v5755_v24  ;;  %v5427_v0 = vld [vmem:[#allocation2 + $0x180] sm:$0xff] }
 0x6df   : > { %v5760_v5 = vmax.f32 %v5759_v4, %v5378_v25 }
 0x6e0   : > { %5855 = vst.msk [vmem:[#allocation2 + $0xd8] sm:$0xff] %vm5827_vm6, %v5790_v1 }
 0x6e1   : > { %5761 = vmax.xlane.f32.xlu1 %v5760_v5  ;;  %v5428_v5 = vld [vmem:[#allocation2 + $0x188] sm:$0xff] }
 0x6e3   : > { %v5587_v57 = vpop.xlane.xlu0 %5586 }
 0x6e4   : > { %v5791_v41 = vmax.f32 %v5407_v21, %v5587_v57 }
 0x6e5   : > { %v5592_v23 = vpop.xlane.xlu1 %5591 }
 0x6e6   : > { %5856 = vst.msk [vmem:[#allocation2 + $0xe0] sm:$0xff] %vm5827_vm6, %v5791_v41  ;;  %v5792_v13 = vmax.f32 %v5408_v3, %v5592_v23  ;;  %v5429_v3 = vld [vmem:[#allocation2 + $0x190] sm:$0xff] }
 0x6e8   : > { %5857 = vst.msk [vmem:[#allocation2 + $0xe8] sm:$0xff] %vm5827_vm6, %v5792_v13  ;;  %v5430_v13 = vld [vmem:[#allocation2 + $0x198] sm:$0xff] }
 0x6eb   : > { %v5597_v16 = vpop.xlane.xlu0 %5596 }
 0x6ec   : > { %v5793_v20 = vmax.f32 %v5409_v48, %v5597_v16 }
 0x6ed   : > { %v5602_v55 = vpop.xlane.xlu1 %5601 }
 0x6ee   : > { %5858 = vst.msk [vmem:[#allocation2 + $0xf0] sm:$0xff] %vm5827_vm6, %v5793_v20  ;;  %v5794_v34 = vmax.f32 %v5410_v62, %v5602_v55  ;;  %v5431_v62 = vld [vmem:[#allocation2 + $0x1a0] sm:$0xff] }
 0x6f0   : > { %5859 = vst.msk [vmem:[#allocation2 + $0xf8] sm:$0xff] %vm5827_vm6, %v5794_v34  ;;  %v5432_v34 = vld [vmem:[#allocation2 + $0x1a8] sm:$0xff] }
 0x6f3   : > { %v5607_v44 = vpop.xlane.xlu0 %5606 }
 0x6f4   : > { %v5795_v46 = vmax.f32 %v5411_v18, %v5607_v44 }
 0x6f5   : > { %v5612_v63 = vpop.xlane.xlu1 %5611 }
 0x6f6   : > { %5860 = vst.msk [vmem:[#allocation2 + $0x100] sm:$0xff] %vm5827_vm6, %v5795_v46  ;;  %v5796_v53 = vmax.f32 %v5412_v32, %v5612_v63  ;;  %v5433_v32 = vld [vmem:[#allocation2 + $0x1b0] sm:$0xff] }
 0x6f8   : > { %5861 = vst.msk [vmem:[#allocation2 + $0x108] sm:$0xff] %vm5827_vm6, %v5796_v53  ;;  %v5434_v53 = vld [vmem:[#allocation2 + $0x1b8] sm:$0xff] }
 0x6fb   : > { %v5617_v58 = vpop.xlane.xlu0 %5616 }
 0x6fc   : > { %v5797_v17 = vmax.f32 %v5413_v28, %v5617_v58 }
 0x6fd   : > { %v5622_v31 = vpop.xlane.xlu1 %5621 }
 0x6fe   : > { %5862 = vst.msk [vmem:[#allocation2 + $0x110] sm:$0xff] %vm5827_vm6, %v5797_v17  ;;  %v5798_v2 = vmax.f32 %v5414_v22, %v5622_v31  ;;  %v5435_v22 = vld [vmem:[#allocation2 + $0x1c0] sm:$0xff] }
 0x700   : > { %5863 = vst.msk [vmem:[#allocation2 + $0x118] sm:$0xff] %vm5827_vm6, %v5798_v2  ;;  %v5436_v2 = vld [vmem:[#allocation2 + $0x1c8] sm:$0xff] }
 0x703   : > { %v5627_v11 = vpop.xlane.xlu0 %5626 }
 0x704   : > { %v5799_v40 = vmax.f32 %v5415_v33, %v5627_v11 }
 0x705   : > { %v5632_v59 = vpop.xlane.xlu1 %5631 }
 0x706   : > { %5864 = vst.msk [vmem:[#allocation2 + $0x120] sm:$0xff] %vm5827_vm6, %v5799_v40  ;;  %v5800_v29 = vmax.f32 %v5416_v47, %v5632_v59  ;;  %v5437_v47 = vld [vmem:[#allocation2 + $0x1d0] sm:$0xff] }
 0x708   : > { %5865 = vst.msk [vmem:[#allocation2 + $0x128] sm:$0xff] %vm5827_vm6, %v5800_v29  ;;  %v5438_v29 = vld [vmem:[#allocation2 + $0x1d8] sm:$0xff] }
 0x70b   : > { %v5637_v52 = vpop.xlane.xlu0 %5636 }
 0x70c   : > { %v5801_v27 = vmax.f32 %v5417_v45, %v5637_v52 }
 0x70e   : > { %5866 = vst.msk [vmem:[#allocation2 + $0x130] sm:$0xff] %vm5827_vm6, %v5801_v27  ;;  %v5642_v36 = vpop.xlane.xlu1 %5641  ;;  %v5439_v27 = vld [vmem:[#allocation2 + $0x1e0] sm:$0xff] }
 0x70f   : > { %v5802_v49 = vmax.f32 %v5418_v56, %v5642_v36 }
 0x711   : > { %5867 = vst.msk [vmem:[#allocation2 + $0x138] sm:$0xff] %vm5827_vm6, %v5802_v49  ;;  %v5440_v49 = vld [vmem:[#allocation2 + $0x1e8] sm:$0xff] }
 0x713   : > { %v5647_v38 = vpop.xlane.xlu0 %5646 }
 0x714   : > { %v5803_v54 = vmax.f32 %v5419_v26, %v5647_v38 }
 0x716   : > { %5868 = vst.msk [vmem:[#allocation2 + $0x140] sm:$0xff] %vm5827_vm6, %v5803_v54  ;;  %v5652_v9 = vpop.xlane.xlu1 %5651  ;;  %v5441_v54 = vld [vmem:[#allocation2 + $0x1f0] sm:$0xff] }
 0x717   : > { %v5804_v35 = vmax.f32 %v5420_v15, %v5652_v9 }
 0x719   : > { %5869 = vst.msk [vmem:[#allocation2 + $0x148] sm:$0xff] %vm5827_vm6, %v5804_v35  ;;  %v5442_v35 = vld [vmem:[#allocation2 + $0x1f8] sm:$0xff] }
 0x71b   : > { %v5657_v42 = vpop.xlane.xlu0 %5656 }
 0x71c   : > { %v5805_v30 = vmax.f32 %v5421_v12, %v5657_v42 }
 0x71e   : > { %5870 = vst.msk [vmem:[#allocation2 + $0x150] sm:$0xff] %vm5827_vm6, %v5805_v30  ;;  %v5662_v43 = vpop.xlane.xlu1 %5661  ;;  %v5898_v30 = vld [vmem:[#allocation2 + $0x10] sm:$0xff] (!%p7233_p1) }
 0x71f   : > { %v5806_v19 = vmax.f32 %v5422_v6, %v5662_v43  ;;  %v5896_v6 = vld [vmem:[#allocation2] sm:$0xff] (!%p7233_p1)  ;;  %v7806_v43 = vmov (!%p7233_p1), 0  }
 0x720   : > { %7643 = vset.pattern.permute.xlu1 (!%p7233_p1), %v7806_v43  ;;  %7642 = vset.pattern.permute.xlu0 (!%p7233_p1), %v7806_v43 }
 0x721   : > { %5871 = vst.msk [vmem:[#allocation2 + $0x158] sm:$0xff] %vm5827_vm6, %v5806_v19  ;;  %6100 = vperm.xlu1 (!%p7233_p1), %7643, %v5898_v30   ;;  %6090 = vperm.xlu0 (!%p7233_p1), %7642, %v5896_v6   ;;  %v5899_v19 = vld [vmem:[#allocation2 + $0x18] sm:$0xff] (!%p7233_p1) }
 0x723   : > { %v5667_v8 = vpop.xlane.xlu0 %5666 }
 0x724   : > { %v5807_v60 = vmax.f32 %v5423_v51, %v5667_v8  ;;  %v5897_v51 = vld [vmem:[#allocation2 + $0x8] sm:$0xff] (!%p7233_p1) }
 0x725   : > { %6105 = vperm.xlu1 (!%p7233_p1), %7643, %v5899_v19   ;;  %6095 = vperm.xlu0 (!%p7233_p1), %7642, %v5897_v51   ;;  %v5901_v8 = vld [vmem:[#allocation2 + $0x28] sm:$0xff] (!%p7233_p1)  ;;  %v6690_v51 = vld [vmem:[%s11359_s13] sm:$0xff] (!%p7233_p1) }
 0x726   : > { %5872 = vst.msk [vmem:[#allocation2 + $0x160] sm:$0xff] %vm5827_vm6, %v5807_v60  ;;  %v5672_v10 = vpop.xlane.xlu1 %5671  ;;  %v5900_v60 = vld [vmem:[#allocation2 + $0x20] sm:$0xff] (!%p7233_p1)  ;;  %v6810_v19 = vld [vmem:[%s11361_s15 + $0x88] sm:$0xff] (!%p7233_p1) }
 0x727   : > { %v5808_v50 = vmax.f32 %v5424_v61, %v5672_v10  ;;  %v5903_v61 = vld [vmem:[#allocation2 + $0x38] sm:$0xff] (!%p7233_p1)  ;;  %v5902_v10 = vld [vmem:[#allocation2 + $0x30] sm:$0xff] (!%p7233_p1) }
 0x729   : > { %5873 = vst.msk [vmem:[#allocation2 + $0x168] sm:$0xff] %vm5827_vm6, %v5808_v50  ;;  %6115 = vperm.xlu1 (!%p7233_p1), %7643, %v5901_v8   ;;  %6110 = vperm.xlu0 (!%p7233_p1), %7642, %v5900_v60   ;;  %v5905_v50 = vld [vmem:[#allocation2 + $0x48] sm:$0xff] (!%p7233_p1) }
 0x72a   : > { %v6691_v60 = vld [vmem:[%s11359_s13 + $0x8] sm:$0xff] (!%p7233_p1) }
 0x72b   : > { %v5677_v14 = vpop.xlane.xlu0 %5676 }
 0x72c   : > { %v5809_v24 = vmax.f32 %v5425_v39, %v5677_v14  ;;  %v5904_v39 = vld [vmem:[#allocation2 + $0x40] sm:$0xff] (!%p7233_p1)  ;;  %v5907_v14 = vld [vmem:[#allocation2 + $0x58] sm:$0xff] (!%p7233_p1) }
 0x72d   : > { %6125 = vperm.xlu1 (!%p7233_p1), %7643, %v5903_v61   ;;  %6120 = vperm.xlu0 (!%p7233_p1), %7642, %v5902_v10   ;;  %v6793_v61 = vld [vmem:[%s11361_s15] sm:$0xff] (!%p7233_p1)  ;;  %v6794_v10 = vld [vmem:[%s11361_s15 + $0x8] sm:$0xff] (!%p7233_p1) }
 0x72e   : > { %5874 = vst.msk [vmem:[#allocation2 + $0x170] sm:$0xff] %vm5827_vm6, %v5809_v24  ;;  %v5682_v7 = vpop.xlane.xlu1 %5681  ;;  %v5906_v24 = vld [vmem:[#allocation2 + $0x50] sm:$0xff] (!%p7233_p1) }
 0x72f   : > { %v5810_v4 = vmax.f32 %v5426_v37, %v5682_v7  ;;  %v5909_v37 = vld [vmem:[#allocation2 + $0x68] sm:$0xff] (!%p7233_p1)  ;;  %v5908_v7 = vld [vmem:[#allocation2 + $0x60] sm:$0xff] (!%p7233_p1) }
 0x731   : > { %5875 = vst.msk [vmem:[#allocation2 + $0x178] sm:$0xff] %vm5827_vm6, %v5810_v4  ;;  %6135 = vperm.xlu1 (!%p7233_p1), %7643, %v5905_v50   ;;  %6130 = vperm.xlu0 (!%p7233_p1), %7642, %v5904_v39   ;;  %v5911_v4 = vld [vmem:[#allocation2 + $0x78] sm:$0xff] (!%p7233_p1)  ;;  %v7311_v50 = vpack.c.bf16 (!%p7233_p1), %v6691_v60, %v6690_v51  ;;  %v7343_v39 = vpack.c.bf16 (!%p7233_p1), %v6794_v10, %v6793_v61  ;;  %v6698_v51 = vld [vmem:[%s11359_s13 + $0x40] sm:$0xff] (!%p7233_p1) }
 0x732   : > { %v5967_v61 = vld [vmem:[%s11357_s11 + $0x38] sm:$0xff] (!%p7233_p1) }
 0x733   : > { %v5687_v25 = vpop.xlane.xlu0 %5686 }
 0x734   : > { %v5811_v1 = vmax.f32 %v5427_v0, %v5687_v25  ;;  %v5910_v0 = vld [vmem:[#allocation2 + $0x70] sm:$0xff] (!%p7233_p1)  ;;  %v5913_v25 = vld [vmem:[#allocation2 + $0x88] sm:$0xff] (!%p7233_p1) }
 0x735   : > { %6145 = vperm.xlu1 (!%p7233_p1), %7643, %v5907_v14   ;;  %6140 = vperm.xlu0 (!%p7233_p1), %7642, %v5906_v24   ;;  %v6708_v14 = vld [vmem:[%s11359_s13 + $0x90] sm:$0xff] (!%p7233_p1)  ;;  %v6709_v24 = vld [vmem:[%s11359_s13 + $0x98] sm:$0xff] (!%p7233_p1) }
 0x736   : > { %5876 = vst.msk [vmem:[#allocation2 + $0x180] sm:$0xff] %vm5827_vm6, %v5811_v1  ;;  %v5692_v21 = vpop.xlane.xlu1 %5691  ;;  %v5912_v1 = vld [vmem:[#allocation2 + $0x80] sm:$0xff] (!%p7233_p1) }
 0x737   : > { %v5812_v57 = vmax.f32 %v5428_v5, %v5692_v21  ;;  %v5915_v5 = vld [vmem:[#allocation2 + $0x98] sm:$0xff] (!%p7233_p1)  ;;  %v5914_v21 = vld [vmem:[#allocation2 + $0x90] sm:$0xff] (!%p7233_p1) }
 0x739   : > { %5877 = vst.msk [vmem:[#allocation2 + $0x188] sm:$0xff] %vm5827_vm6, %v5812_v57  ;;  %6155 = vperm.xlu1 (!%p7233_p1), %7643, %v5909_v37   ;;  %6150 = vperm.xlu0 (!%p7233_p1), %7642, %v5908_v7   ;;  %v5917_v57 = vld [vmem:[#allocation2 + $0xa8] sm:$0xff] (!%p7233_p1)  ;;  %v6811_v37 = vld [vmem:[%s11361_s15 + $0x90] sm:$0xff] (!%p7233_p1) }
 0x73b   : > { %v5697_v41 = vpop.xlane.xlu0 %5696 }
 0x73c   : > { %v5813_v23 = vmax.f32 %v5429_v3, %v5697_v41  ;;  %v5916_v3 = vld [vmem:[#allocation2 + $0xa0] sm:$0xff] (!%p7233_p1)  ;;  %v5919_v41 = vld [vmem:[#allocation2 + $0xb8] sm:$0xff] (!%p7233_p1) }
 0x73d   : > { %6165 = vperm.xlu1 (!%p7233_p1), %7643, %v5911_v4   ;;  %6160 = vperm.xlu0 (!%p7233_p1), %7642, %v5910_v0   ;;  %v7313_v4 = vpack.c.bf16 (!%p7233_p1), %v6709_v24, %v6708_v14  ;;  %v6801_v14 = vld [vmem:[%s11361_s15 + $0x40] sm:$0xff] (!%p7233_p1)  ;;  %v6802_v24 = vld [vmem:[%s11361_s15 + $0x48] sm:$0xff] (!%p7233_p1) }
 0x73e   : > { %5878 = vst.msk [vmem:[#allocation2 + $0x190] sm:$0xff] %vm5827_vm6, %v5813_v23  ;;  %v5702_v48 = vpop.xlane.xlu1 %5701  ;;  %v5918_v23 = vld [vmem:[#allocation2 + $0xb0] sm:$0xff] (!%p7233_p1) }
 0x73f   : > { %v5814_v16 = vmax.f32 %v5430_v13, %v5702_v48  ;;  %v5921_v13 = vld [vmem:[#allocation2 + $0xc8] sm:$0xff] (!%p7233_p1)  ;;  %v5920_v48 = vld [vmem:[#allocation2 + $0xc0] sm:$0xff] (!%p7233_p1) }
 0x741   : > { %5879 = vst.msk [vmem:[#allocation2 + $0x198] sm:$0xff] %vm5827_vm6, %v5814_v16  ;;  %6175 = vperm.xlu1 (!%p7233_p1), %7643, %v5913_v25   ;;  %6170 = vperm.xlu0 (!%p7233_p1), %7642, %v5912_v1   ;;  %v5923_v16 = vld [vmem:[#allocation2 + $0xd8] sm:$0xff] (!%p7233_p1)  ;;  %v6692_v1 = vld [vmem:[%s11359_s13 + $0x10] sm:$0xff] (!%p7233_p1) }
 0x742   : > { %v6812_v25 = vld [vmem:[%s11361_s15 + $0x98] sm:$0xff] (!%p7233_p1) }
 0x743   : > { %v5707_v20 = vpop.xlane.xlu0 %5706 }
 0x744   : > { %v5815_v55 = vmax.f32 %v5431_v62, %v5707_v20  ;;  %v5922_v62 = vld [vmem:[#allocation2 + $0xd0] sm:$0xff] (!%p7233_p1)  ;;  %v5925_v20 = vld [vmem:[#allocation2 + $0xe8] sm:$0xff] (!%p7233_p1) }
 0x745   : > { %6185 = vperm.xlu1 (!%p7233_p1), %7643, %v5915_v5   ;;  %6180 = vperm.xlu0 (!%p7233_p1), %7642, %v5914_v21   ;;  %v7345_v5 = vpack.c.bf16 (!%p7233_p1), %v6812_v25, %v6811_v37  ;;  %v6693_v21 = vld [vmem:[%s11359_s13 + $0x18] sm:$0xff] (!%p7233_p1)  ;;  %v5969_v25 = vld [vmem:[%s11357_s11 + $0x48] sm:$0xff] (!%p7233_p1) }
 0x746   : > { %5880 = vst.msk [vmem:[#allocation2 + $0x1a0] sm:$0xff] %vm5827_vm6, %v5815_v55  ;;  %v5712_v18 = vpop.xlane.xlu1 %5711  ;;  %v5924_v55 = vld [vmem:[#allocation2 + $0xe0] sm:$0xff] (!%p7233_p1) }
 0x747   : > { %v5816_v44 = vmax.f32 %v5432_v34, %v5712_v18  ;;  %v5927_v34 = vld [vmem:[#allocation2 + $0xf8] sm:$0xff] (!%p7233_p1)  ;;  %v5926_v18 = vld [vmem:[#allocation2 + $0xf0] sm:$0xff] (!%p7233_p1) }
 0x749   : > { %5881 = vst.msk [vmem:[#allocation2 + $0x1a8] sm:$0xff] %vm5827_vm6, %v5816_v44  ;;  %6195 = vperm.xlu1 (!%p7233_p1), %7643, %v5917_v57   ;;  %6190 = vperm.xlu0 (!%p7233_p1), %7642, %v5916_v3   ;;  %v5929_v44 = vld [vmem:[#allocation2 + $0x108] sm:$0xff] (!%p7233_p1)  ;;  %v6795_v57 = vld [vmem:[%s11361_s15 + $0x10] sm:$0xff] (!%p7233_p1)  ;;  %v6796_v3 = vld [vmem:[%s11361_s15 + $0x18] sm:$0xff] (!%p7233_p1) }
 0x74b   : > { %v5717_v46 = vpop.xlane.xlu0 %5716 }
 0x74c   : > { %v5817_v63 = vmax.f32 %v5433_v32, %v5717_v46  ;;  %v5928_v32 = vld [vmem:[#allocation2 + $0x100] sm:$0xff] (!%p7233_p1)  ;;  %v5931_v46 = vld [vmem:[#allocation2 + $0x118] sm:$0xff] (!%p7233_p1) }
 0x74d   : > { %6205 = vperm.xlu1 (!%p7233_p1), %7643, %v5919_v41   ;;  %6200 = vperm.xlu0 (!%p7233_p1), %7642, %v5918_v23   ;;  %v7315_v41 = vpack.c.bf16 (!%p7233_p1), %v6693_v21, %v6692_v1  ;;  %v7347_v23 = vpack.c.bf16 (!%p7233_p1), %v6796_v3, %v6795_v57  ;;  %v7359_v1 = vpack.c.bf16 (!%p7233_p1), %v6802_v24, %v6801_v14  ;;  %v5971_v21 = vld [vmem:[%s11357_s11 + $0x58] sm:$0xff] (!%p7233_p1) }
 0x74e   : > { %5882 = vst.msk [vmem:[#allocation2 + $0x1b0] sm:$0xff] %vm5827_vm6, %v5817_v63  ;;  %v5722_v28 = vpop.xlane.xlu1 %5721  ;;  %v5930_v63 = vld [vmem:[#allocation2 + $0x110] sm:$0xff] (!%p7233_p1)  ;;  %v6705_v24 = vld [vmem:[%s11359_s13 + $0x78] sm:$0xff] (!%p7233_p1) }
 0x74f   : > { %v5818_v58 = vmax.f32 %v5434_v53, %v5722_v28  ;;  %v5933_v53 = vld [vmem:[#allocation2 + $0x128] sm:$0xff] (!%p7233_p1)  ;;  %v5932_v28 = vld [vmem:[#allocation2 + $0x120] sm:$0xff] (!%p7233_p1) }
 0x751   : > { %5883 = vst.msk [vmem:[#allocation2 + $0x1b8] sm:$0xff] %vm5827_vm6, %v5818_v58  ;;  %6215 = vperm.xlu1 (!%p7233_p1), %7643, %v5921_v13   ;;  %6210 = vperm.xlu0 (!%p7233_p1), %7642, %v5920_v48   ;;  %v5935_v58 = vld [vmem:[#allocation2 + $0x138] sm:$0xff] (!%p7233_p1)  ;;  %v6710_v13 = vld [vmem:[%s11359_s13 + $0xa0] sm:$0xff] (!%p7233_p1)  ;;  %v6711_v48 = vld [vmem:[%s11359_s13 + $0xa8] sm:$0xff] (!%p7233_p1) }
 0x753   : > { %v5727_v17 = vpop.xlane.xlu0 %5726 }
 0x754   : > { %v5819_v31 = vmax.f32 %v5435_v22, %v5727_v17  ;;  %v5934_v22 = vld [vmem:[#allocation2 + $0x130] sm:$0xff] (!%p7233_p1)  ;;  %v5937_v17 = vld [vmem:[#allocation2 + $0x148] sm:$0xff] (!%p7233_p1) }
 0x755   : > { %6225 = vperm.xlu1 (!%p7233_p1), %7643, %v5923_v16   ;;  %6220 = vperm.xlu0 (!%p7233_p1), %7642, %v5922_v62   ;;  %v6813_v16 = vld [vmem:[%s11361_s15 + $0xa0] sm:$0xff] (!%p7233_p1)  ;;  %v7317_v62 = vpack.c.bf16 (!%p7233_p1), %v6711_v48, %v6710_v13  ;;  %v6819_v13 = vld [vmem:[%s11361_s15 + $0xd0] sm:$0xff] (!%p7233_p1) }
 0x756   : > { %5884 = vst.msk [vmem:[#allocation2 + $0x1c0] sm:$0xff] %vm5827_vm6, %v5819_v31  ;;  %v5732_v33 = vpop.xlane.xlu1 %5731  ;;  %v5936_v31 = vld [vmem:[#allocation2 + $0x140] sm:$0xff] (!%p7233_p1) }
 0x757   : > { %v5820_v11 = vmax.f32 %v5436_v2, %v5732_v33  ;;  %v5939_v2 = vld [vmem:[#allocation2 + $0x158] sm:$0xff] (!%p7233_p1)  ;;  %v5938_v33 = vld [vmem:[#allocation2 + $0x150] sm:$0xff] (!%p7233_p1) }
 0x759   : > { %5885 = vst.msk [vmem:[#allocation2 + $0x1c8] sm:$0xff] %vm5827_vm6, %v5820_v11  ;;  %6235 = vperm.xlu1 (!%p7233_p1), %7643, %v5925_v20   ;;  %6230 = vperm.xlu0 (!%p7233_p1), %7642, %v5924_v55   ;;  %v5941_v11 = vld [vmem:[#allocation2 + $0x168] sm:$0xff] (!%p7233_p1)  ;;  %v6694_v55 = vld [vmem:[%s11359_s13 + $0x20] sm:$0xff] (!%p7233_p1) }
 0x75a   : > { %v6814_v20 = vld [vmem:[%s11361_s15 + $0xa8] sm:$0xff] (!%p7233_p1) }
 0x75b   : > { %v5737_v40 = vpop.xlane.xlu0 %5736 }
 0x75c   : > { %v5821_v59 = vmax.f32 %v5437_v47, %v5737_v40  ;;  %v5940_v47 = vld [vmem:[#allocation2 + $0x160] sm:$0xff] (!%p7233_p1)  ;;  %v5943_v40 = vld [vmem:[#allocation2 + $0x178] sm:$0xff] (!%p7233_p1) }
 0x75d   : > { %6245 = vperm.xlu1 (!%p7233_p1), %7643, %v5927_v34   ;;  %6240 = vperm.xlu0 (!%p7233_p1), %7642, %v5926_v18   ;;  %v7349_v34 = vpack.c.bf16 (!%p7233_p1), %v6814_v20, %v6813_v16  ;;  %v6695_v18 = vld [vmem:[%s11359_s13 + $0x28] sm:$0xff] (!%p7233_p1) }
 0x75e   : > { %5886 = vst.msk [vmem:[#allocation2 + $0x1d0] sm:$0xff] %vm5827_vm6, %v5821_v59  ;;  %v5742_v45 = vpop.xlane.xlu1 %5741  ;;  %v5942_v59 = vld [vmem:[#allocation2 + $0x170] sm:$0xff] (!%p7233_p1) }
 0x75f   : > { %v5822_v52 = vmax.f32 %v5438_v29, %v5742_v45  ;;  %v5945_v29 = vld [vmem:[#allocation2 + $0x188] sm:$0xff] (!%p7233_p1)  ;;  %v5944_v45 = vld [vmem:[#allocation2 + $0x180] sm:$0xff] (!%p7233_p1) }
 0x761   : > { %5887 = vst.msk [vmem:[#allocation2 + $0x1d8] sm:$0xff] %vm5827_vm6, %v5822_v52  ;;  %6255 = vperm.xlu1 (!%p7233_p1), %7643, %v5929_v44   ;;  %6250 = vperm.xlu0 (!%p7233_p1), %7642, %v5928_v32   ;;  %v5947_v52 = vld [vmem:[#allocation2 + $0x198] sm:$0xff] (!%p7233_p1)  ;;  %v6797_v44 = vld [vmem:[%s11361_s15 + $0x20] sm:$0xff] (!%p7233_p1)  ;;  %v6798_v32 = vld [vmem:[%s11361_s15 + $0x28] sm:$0xff] (!%p7233_p1) }
 0x763   : > { %v5747_v56 = vpop.xlane.xlu0 %5746 }
 0x764   : > { %v5823_v36 = vmax.f32 %v5439_v27, %v5747_v56  ;;  %v5946_v27 = vld [vmem:[#allocation2 + $0x190] sm:$0xff] (!%p7233_p1)  ;;  %v5949_v56 = vld [vmem:[#allocation2 + $0x1a8] sm:$0xff] (!%p7233_p1) }
 0x765   : > { %6265 = vperm.xlu1 (!%p7233_p1), %7643, %v5931_v46   ;;  %6260 = vperm.xlu0 (!%p7233_p1), %7642, %v5930_v63   ;;  %v5960_v63 = vld [vmem:[%s11357_s11] sm:$0xff] (!%p7233_p1) }
 0x766   : > { %5888 = vst.msk [vmem:[#allocation2 + $0x1e0] sm:$0xff] %vm5827_vm6, %v5823_v36  ;;  %v5752_v26 = vpop.xlane.xlu1 %5751  ;;  %v5948_v36 = vld [vmem:[#allocation2 + $0x1a0] sm:$0xff] (!%p7233_p1) }
 0x767   : > { %v5824_v38 = vmax.f32 %v5440_v49, %v5752_v26  ;;  %v5951_v49 = vld [vmem:[#allocation2 + $0x1b8] sm:$0xff] (!%p7233_p1)  ;;  %v5950_v26 = vld [vmem:[#allocation2 + $0x1b0] sm:$0xff] (!%p7233_p1) }
 0x769   : > { %5889 = vst.msk [vmem:[#allocation2 + $0x1e8] sm:$0xff] %vm5827_vm6, %v5824_v38  ;;  %6275 = vperm.xlu1 (!%p7233_p1), %7643, %v5933_v53   ;;  %6270 = vperm.xlu0 (!%p7233_p1), %7642, %v5932_v28   ;;  %v5953_v38 = vld [vmem:[#allocation2 + $0x1c8] sm:$0xff] (!%p7233_p1) }
 0x76a   : > { %v5961_v53 = vld [vmem:[%s11357_s11 + $0x8] sm:$0xff] (!%p7233_p1) }
 0x76b   : > { %v5757_v15 = vpop.xlane.xlu0 %5756  ;;  %5895 = sbr.rel (%p7233_p1) target bundleno = 2339 (0x923), region = 100 }
 0x76c   : > { %v5825_v9 = vmax.f32 %v5441_v54, %v5757_v15  ;;  %v5952_v54 = vld [vmem:[#allocation2 + $0x1c0] sm:$0xff] (!%p7233_p1)  ;;  %v5955_v15 = vld [vmem:[#allocation2 + $0x1d8] sm:$0xff] (!%p7233_p1) }
 0x76d   : > { %6285 = vperm.xlu1 (!%p7233_p1), %7643, %v5935_v58   ;;  %6280 = vperm.xlu0 (!%p7233_p1), %7642, %v5934_v22   ;;  %v5956_v43 = vld [vmem:[#allocation2 + $0x1e0] sm:$0xff] (!%p7233_p1)  ;;  %v5962_v58 = vld [vmem:[%s11357_s11 + $0x10] sm:$0xff] (!%p7233_p1)  ;;  %v7319_v22 = vpack.c.bf16 (!%p7233_p1), %v6695_v18, %v6694_v55  ;;  %v6820_v18 = vld [vmem:[%s11361_s15 + $0xd8] sm:$0xff] (!%p7233_p1) }
 0x76e   : > { %5890 = vst.msk [vmem:[#allocation2 + $0x1f0] sm:$0xff] %vm5827_vm6, %v5825_v9  ;;  %v5762_v12 = vpop.xlane.xlu1 %5761  ;;  %v5954_v9 = vld [vmem:[#allocation2 + $0x1d0] sm:$0xff] (!%p7233_p1)  ;;  %v5972_v55 = vld [vmem:[%s11357_s11 + $0x60] sm:$0xff] (!%p7233_p1) }
 0x76f   : > { %v5826_v42 = vmax.f32 %v5442_v35, %v5762_v12  ;;  %v6706_v35 = vld [vmem:[%s11359_s13 + $0x80] sm:$0xff] (!%p7233_p1)  ;;  %v6707_v12 = vld [vmem:[%s11359_s13 + $0x88] sm:$0xff] (!%p7233_p1) }
 0x770   : > { %v5957_v30 = vld [vmem:[#allocation2 + $0x1e8] sm:$0xff] (!%p7233_p1)  ;;  %v7309_v6 = vpack.c.bf16 (!%p7233_p1), %v6707_v12, %v6706_v35  ;;  %v6817_v12 = vld [vmem:[%s11361_s15 + $0xc0] sm:$0xff] (!%p7233_p1) }
 0x771   : > { %5891 = vst.msk [vmem:[#allocation2 + $0x1f8] sm:$0xff] %vm5827_vm6, %v5826_v42  ;;  %6295 = vperm.xlu1 (!%p7233_p1), %7643, %v5937_v17   ;;  %6290 = vperm.xlu0 (!%p7233_p1), %7642, %v5936_v31   ;;  %v6809_v42 = vld [vmem:[%s11361_s15 + $0x80] sm:$0xff] (!%p7233_p1)  ;;  %v7351_v17 = vpack.c.bf16 (!%p7233_p1), %v6798_v32, %v6797_v44  ;;  %v6712_v31 = vld [vmem:[%s11359_s13 + $0xb0] sm:$0xff] (!%p7233_p1)  ;;  %v6715_v35 = vld [vmem:[%s11359_s13 + $0xc8] sm:$0xff] (!%p7233_p1) }
 0x772   : > { %7310 = vmatprep.subr.bf16.mxu0 %v7309_v6  ;;  %v7341_v8 = vpack.c.bf16 %v6810_v19, %v6809_v42  ;;  %v6818_v19 = vld [vmem:[%s11361_s15 + $0xc8] sm:$0xff]  ;;  %v6700_v44 = vld [vmem:[%s11359_s13 + $0x50] sm:$0xff]  ;;  %v6701_v32 = vld [vmem:[%s11359_s13 + $0x58] sm:$0xff] }
 0x773   : > { %7312 = vmatpush3.bf16.msra.mxu0 %v7311_v50  ;;  %v7357_v50 = vpack.c.bf16 %v6818_v19, %v6817_v12  ;;  %v5976_v12 = vld [vmem:[%s11357_s11 + $0x80] sm:$0xff] }
 0x774   : > { %7342 = vmatprep.subr.bf16.mxu1 %v7341_v8  ;;  %7314 = vmatprep.subr.bf16.mxu0 %v7313_v4  ;;  %v6699_v8 = vld [vmem:[%s11359_s13 + $0x48] sm:$0xff] }
 0x775   : > { %6305 = vperm.xlu1 %7643, %v5939_v2   ;;  %6300 = vperm.xlu0 %7642, %v5938_v33   ;;  %v5958_v0 = vld [vmem:[#allocation2 + $0x1f0] sm:$0xff]  ;;  %v6713_v2 = vld [vmem:[%s11359_s13 + $0xb8] sm:$0xff] }
 0x776   : > { %7344 = vmatpush3.bf16.msra.mxu1 %v7343_v39  ;;  %v6815_v33 = vld [vmem:[%s11361_s15 + $0xb0] sm:$0xff]  ;;  %v7327_v39 = vpack.c.bf16 %v6699_v8, %v6698_v51 }
 0x777   : > { %7346 = vmatprep.subr.bf16.mxu1 %v7345_v5  ;;  %7316 = vmatpush3.bf16.msra.mxu0 %v7315_v41  ;;  %v5970_v5 = vld [vmem:[%s11357_s11 + $0x50] sm:$0xff] }
 0x778   : > { %v5959_v7 = vld [vmem:[#allocation2 + $0x1f8] sm:$0xff]  ;;  %7318 = vmatprep.subr.bf16.mxu0 %v7317_v62  ;;  %v6716_v41 = vld [vmem:[%s11359_s13 + $0xd0] sm:$0xff] }
 0x779   : > { %6315 = vperm.xlu1 %7643, %v5941_v11   ;;  %6310 = vperm.xlu0 %7642, %v5940_v47   ;;  %v6816_v11 = vld [vmem:[%s11361_s15 + $0xb8] sm:$0xff]  ;;  %v6696_v47 = vld [vmem:[%s11359_s13 + $0x30] sm:$0xff] }
 0x77a   : > { %7348 = vmatpush3.bf16.msra.mxu1 %v7347_v23  ;;  %v6717_v23 = vld [vmem:[%s11359_s13 + $0xd8] sm:$0xff] }
 0x77b   : > { %7350 = vmatprep.subr.bf16.mxu1 %v7349_v34  ;;  %7320 = vmatpush3.bf16.msra.mxu0 %v7319_v22  ;;  %v5973_v34 = vld [vmem:[%s11357_s11 + $0x68] sm:$0xff]  ;;  %v6804_v22 = vld [vmem:[%s11361_s15 + $0x58] sm:$0xff] }
 0x77d   : > { %6325 = vperm.xlu1 %7643, %v5943_v40   ;;  %6320 = vperm.xlu0 %7642, %v5942_v59   ;;  %v6697_v40 = vld [vmem:[%s11359_s13 + $0x38] sm:$0xff] }
 0x77e   : > { %v5963_v59 = vld [vmem:[%s11357_s11 + $0x18] sm:$0xff]  ;;  %7352 = vmatpush3.bf16.msra.mxu1 %v7351_v17  ;;  %v6718_v17 = vld [vmem:[%s11359_s13 + $0xe0] sm:$0xff] }
 0x781   : > { %6335 = vperm.xlu1 %7643, %v5945_v29   ;;  %6330 = vperm.xlu0 %7642, %v5944_v45   ;;  %v7321_v29 = vpack.c.bf16 %v6713_v2, %v6712_v31  ;;  %v7353_v45 = vpack.c.bf16 %v6816_v11, %v6815_v33  ;;  %v7331_v33 = vpack.c.bf16 %v6701_v32, %v6700_v44  ;;  %v5981_v44 = vld [vmem:[%s11357_s11 + $0xa8] sm:$0xff] }
 0x783   : > { %7322 = vmatprep.subr.bf16.mxu0 %v7321_v29  ;;  %7354 = vmatprep.subr.bf16.mxu1 %v7353_v45  ;;  %v5974_v29 = vld [vmem:[%s11357_s11 + $0x70] sm:$0xff]  ;;  %v5975_v45 = vld [vmem:[%s11357_s11 + $0x78] sm:$0xff] }
 0x785   : > { %6345 = vperm.xlu1 %7643, %v5947_v52   ;;  %6340 = vperm.xlu0 %7642, %v5946_v27   ;;  %v7323_v52 = vpack.c.bf16 %v6697_v40, %v6696_v47  ;;  %v6799_v27 = vld [vmem:[%s11361_s15 + $0x30] sm:$0xff]  ;;  %v6719_v47 = vld [vmem:[%s11359_s13 + $0xe8] sm:$0xff]  ;;  %v6821_v40 = vld [vmem:[%s11361_s15 + $0xe0] sm:$0xff] }
 0x787   : > { %7324 = vmatpush3.bf16.msra.mxu0 %v7323_v52 }
 0x789   : > { %6355 = vperm.xlu1 %7643, %v5949_v56   ;;  %6350 = vperm.xlu0 %7642, %v5948_v36   ;;  %v6800_v56 = vld [vmem:[%s11361_s15 + $0x38] sm:$0xff]  ;;  %v5964_v36 = vld [vmem:[%s11357_s11 + $0x20] sm:$0xff] }
 0x78d   : > { %6365 = vperm.xlu1 %7643, %v5951_v49   ;;  %6360 = vperm.xlu0 %7642, %v5950_v26   ;;  %v5965_v49 = vld [vmem:[%s11357_s11 + $0x28] sm:$0xff]  ;;  %v7355_v26 = vpack.c.bf16 %v6800_v56, %v6799_v27  ;;  %v7333_v56 = vpack.c.bf16 %v6719_v47, %v6718_v17  ;;  %v5984_v47 = vld [vmem:[%s11357_s11 + $0xc0] sm:$0xff] }
 0x78f   : > { %7356 = vmatpush3.bf16.msra.mxu1 %v7355_v26  ;;  %v6703_v26 = vld [vmem:[%s11359_s13 + $0x68] sm:$0xff] }
 0x790   : > { %7358 = vmatprep.subr.bf16.mxu1 %v7357_v50 }
 0x791   : > { %6375 = vperm.xlu1 %7643, %v5953_v38   ;;  %6370 = vperm.xlu0 %7642, %v5952_v54   ;;  %v5966_v38 = vld [vmem:[%s11357_s11 + $0x30] sm:$0xff] }
 0x793   : > { %7360 = vmatpush3.bf16.msra.mxu1 %v7359_v1 }
 0x795   : > { %6385 = vperm.xlu1 %7643, %v5955_v15   ;;  %6380 = vperm.xlu0 %7642, %v5954_v9   ;;  %v6714_v9 = vld [vmem:[%s11359_s13 + $0xc0] sm:$0xff] }
 0x796   : > { %v7325_v10 = vpack.c.bf16 %v6715_v35, %v6714_v9 }
 0x798   : > { %7326 = vmatprep.subr.bf16.mxu0 %v7325_v10  ;;  %v6704_v10 = vld [vmem:[%s11359_s13 + $0x70] sm:$0xff] }
 0x799   : > { %6395 = vperm.xlu1 %7643, %v5957_v30   ;;  %6390 = vperm.xlu0 %7642, %v5956_v43  }
 0x79a   : > { %7328 = vmatpush3.bf16.msra.mxu0 %v7327_v39 }
 0x79d   : > { %6405 = vperm.xlu1 %7643, %v5959_v7   ;;  %6400 = vperm.xlu0 %7642, %v5958_v0   ;;  %v5968_v0 = vld [vmem:[%s11357_s11 + $0x40] sm:$0xff] }
 0x7a0   : > { %v6101_v46 = vpop.permute.xlu1 %6100  ;;  %v6091_v28 = vpop.permute.xlu0 %6090 }
 0x7a1   : > { %v6408_v42 = vmul.f32 %v6091_v28, %v5960_v63  ;;  %v6409_v30 = vmul.f32 %v6091_v28, %v5961_v53  ;;  %v6412_v60 = vmul.f32 %v6101_v46, %v5964_v36  ;;  %v6413_v37 = vmul.f32 %v6101_v46, %v5965_v49  ;;  %v6702_v49 = vld [vmem:[%s11359_s13 + $0x60] sm:$0xff] }
 0x7a2   : > { %v7329_v53 = vpack.c.bf16 %v6717_v23, %v6716_v41  ;;  %v7361_v28 = vpack.c.bf16 %v6820_v18, %v6819_v13  ;;  %v7335_v51 = vpack.c.bf16 %v6703_v26, %v6702_v49  ;;  %v5978_v41 = vld [vmem:[%s11357_s11 + $0x90] sm:$0xff]  ;;  %v5979_v23 = vld [vmem:[%s11357_s11 + $0x98] sm:$0xff]  ;;  %v5980_v18 = vld [vmem:[%s11357_s11 + $0xa0] sm:$0xff] }
 0x7a4   : > { %v6106_v54 = vpop.permute.xlu1 %6105  ;;  %v6096_v15 = vpop.permute.xlu0 %6095  ;;  %7330 = vmatprep.subr.bf16.mxu0 %v7329_v53  ;;  %7362 = vmatprep.subr.bf16.mxu1 %v7361_v28 }
 0x7a5   : > { %v6410_v6 = vmul.f32 %v6096_v15, %v5962_v58  ;;  %v6411_v43 = vmul.f32 %v6096_v15, %v5963_v59  ;;  %v6414_v48 = vmul.f32 %v6106_v54, %v5966_v38  ;;  %v6415_v16 = vmul.f32 %v6106_v54, %v5967_v61  ;;  %v6803_v58 = vld [vmem:[%s11361_s15 + $0x50] sm:$0xff]  ;;  %v6822_v59 = vld [vmem:[%s11361_s15 + $0xe8] sm:$0xff]  ;;  %v6805_v38 = vld [vmem:[%s11361_s15 + $0x60] sm:$0xff]  ;;  %7332 = vmatpush3.bf16.msra.mxu0 %v7331_v33 }
 0x7a6   : > { %v7363_v11 = vpack.c.bf16 %v6804_v22, %v6803_v58  ;;  %v7365_v36 = vpack.c.bf16 %v6822_v59, %v6821_v40  ;;  %v6824_v61 = vld [vmem:[%s11361_s15 + $0xf8] sm:$0xff]  ;;  %7334 = vmatprep.subr.bf16.mxu0 %v7333_v56  ;;  %v5982_v58 = vld [vmem:[%s11357_s11 + $0xb0] sm:$0xff]  ;;  %v5985_v40 = vld [vmem:[%s11357_s11 + $0xc8] sm:$0xff] }
 0x7a7   : > { %v6536_v7 = vadd.f32 %v6410_v6, %v6408_v42  ;;  %v6605_v4 = vadd.f32 %v6411_v43, %v6409_v30  ;;  %v6806_v42 = vld [vmem:[%s11361_s15 + $0x68] sm:$0xff]  ;;  %v6720_v30 = vld [vmem:[%s11359_s13 + $0xf0] sm:$0xff]  ;;  %v6721_v6 = vld [vmem:[%s11359_s13 + $0xf8] sm:$0xff] }
 0x7a8   : > { %v6116_v57 = vpop.permute.xlu1 %6115  ;;  %v6111_v3 = vpop.permute.xlu0 %6110  ;;  %v7367_v8 = vpack.c.bf16 %v6806_v42, %v6805_v38  ;;  %7364 = vmatpush3.bf16.msra.mxu1 %v7363_v11  ;;  %v7337_v14 = vpack.c.bf16 %v6721_v6, %v6720_v30  ;;  %v5983_v22 = vld [vmem:[%s11357_s11 + $0xb8] sm:$0xff]  ;;  %v5986_v56 = vld [vmem:[%s11357_s11 + $0xd0] sm:$0xff] }
 0x7a9   : > { %v6537_v62 = vadd.f32 %v6536_v7, %v6412_v60  ;;  %v6606_v20 = vadd.f32 %v6605_v4, %v6413_v37  ;;  %v6416_v46 = vmul.f32 %v6111_v3, %v5968_v0  ;;  %v6417_v63 = vmul.f32 %v6111_v3, %v5969_v25  ;;  %v6823_v60 = vld [vmem:[%s11361_s15 + $0xf0] sm:$0xff]  ;;  %v6808_v7 = vld [vmem:[%s11361_s15 + $0x78] sm:$0xff]  ;;  %v5977_v0 = vld [vmem:[%s11357_s11 + $0x88] sm:$0xff]  ;;  %7366 = vmatprep.subr.bf16.mxu1 %v7365_v36 }
 0x7aa   : > { %v6418_v54 = vmul.f32 %v6116_v57, %v5970_v5  ;;  %v6419_v15 = vmul.f32 %v6116_v57, %v5971_v21  ;;  %v6807_v37 = vld [vmem:[%s11361_s15 + $0x70] sm:$0xff]  ;;  %v7369_v1 = vpack.c.bf16 %v6824_v61, %v6823_v60  ;;  %7336 = vmatpush3.bf16.msra.mxu0 %v7335_v51  ;;  %v5987_v36 = vld [vmem:[%s11357_s11 + $0xd8] sm:$0xff] }
 0x7ab   : > { %v6538_v31 = vadd.f32 %v6537_v62, %v6414_v48  ;;  %v6607_v2 = vadd.f32 %v6606_v20, %v6415_v16  ;;  %v7339_v48 = vpack.c.bf16 %v6705_v24, %v6704_v10  ;;  %v7371_v16 = vpack.c.bf16 %v6808_v7, %v6807_v37  ;;  %7338 = vmatprep.subr.bf16.mxu0 %v7337_v14  ;;  %v5991_v51 = vld [vmem:[%s11357_s11 + $0xf8] sm:$0xff]  ;;  %v5993_v14 = vld [vmem:[%s11357_s11 + $0x108] sm:$0xff] }
 0x7ac   : > { %v6126_v52 = vpop.permute.xlu1 %6125  ;;  %v6121_v27 = vpop.permute.xlu0 %6120  ;;  %7368 = vmatpush3.bf16.msra.mxu1 %v7367_v8 }
 0x7ad   : > { %v6539_v9 = vadd.f32 %v6538_v31, %v6416_v46  ;;  %v6608_v35 = vadd.f32 %v6607_v2, %v6417_v63  ;;  %v6420_v43 = vmul.f32 %v6121_v27, %v5972_v55  ;;  %v6421_v19 = vmul.f32 %v6121_v27, %v5973_v34  ;;  %7370 = vmatprep.subr.bf16.mxu1 %v7369_v1  ;;  %v5995_v1 = vld [vmem:[%s11357_s11 + $0x118] sm:$0xff] }
 0x7ae   : > { %v6422_v5 = vmul.f32 %v6126_v52, %v5974_v29  ;;  %v6423_v21 = vmul.f32 %v6126_v52, %v5975_v45  ;;  %7340 = vmatpush3.bf16.msra.mxu0 %v7339_v48 }
 0x7af   : > { %v6540_v50 = vadd.f32 %v6539_v9, %v6418_v54  ;;  %v6609_v39 = vadd.f32 %v6608_v35, %v6419_v15  ;;  %v5988_v9 = vld [vmem:[%s11357_s11 + $0xe0] sm:$0xff]  ;;  %v5989_v35 = vld [vmem:[%s11357_s11 + $0xe8] sm:$0xff] }
 0x7b0   : > { %v6136_v4 = vpop.permute.xlu1 %6135  ;;  %v6131_v25 = vpop.permute.xlu0 %6130  ;;  %7372 = vmatpush3.bf16.msra.mxu1 %v7371_v16 }
 0x7b1   : > { %v6541_v57 = vadd.f32 %v6540_v50, %v6420_v43  ;;  %v6610_v3 = vadd.f32 %v6609_v39, %v6421_v19  ;;  %v6424_v13 = vmul.f32 %v6131_v25, %v5976_v12  ;;  %v6425_v55 = vmul.f32 %v6131_v25, %v5977_v0  ;;  %v5990_v19 = vld [vmem:[%s11357_s11 + $0xf0] sm:$0xff]  ;;  %v5992_v39 = vld [vmem:[%s11357_s11 + $0x100] sm:$0xff] }
 0x7b2   : > { %v6426_v46 = vmul.f32 %v6136_v4, %v5978_v41  ;;  %v6427_v63 = vmul.f32 %v6136_v4, %v5979_v23  ;;  %v5994_v25 = vld [vmem:[%s11357_s11 + $0x110] sm:$0xff]  ;;  %v5996_v23 = vld [vmem:[%s11357_s11 + $0x120] sm:$0xff] }
 0x7b3   : > { %v6542_v62 = vadd.f32 %v6541_v57, %v6422_v5  ;;  %v6611_v20 = vadd.f32 %v6610_v3, %v6423_v21 }
 0x7b4   : > { %v6146_v34 = vpop.permute.xlu1 %6145  ;;  %v6141_v32 = vpop.permute.xlu0 %6140 }
 0x7b5   : > { %v6543_v53 = vadd.f32 %v6542_v62, %v6424_v13  ;;  %v6612_v28 = vadd.f32 %v6611_v20, %v6425_v55  ;;  %v6428_v2 = vmul.f32 %v6141_v32, %v5980_v18  ;;  %v6429_v33 = vmul.f32 %v6141_v32, %v5981_v44  ;;  %v5997_v13 = vld [vmem:[%s11357_s11 + $0x128] sm:$0xff]  ;;  %v5999_v18 = vld [vmem:[%s11357_s11 + $0x138] sm:$0xff] }
 0x7b6   : > { %v6430_v29 = vmul.f32 %v6146_v34, %v5982_v58  ;;  %v6431_v45 = vmul.f32 %v6146_v34, %v5983_v22  ;;  %v5998_v34 = vld [vmem:[%s11357_s11 + $0x130] sm:$0xff]  ;;  %v6001_v58 = vld [vmem:[%s11357_s11 + $0x148] sm:$0xff] }
 0x7b7   : > { %v6544_v17 = vadd.f32 %v6543_v53, %v6426_v46  ;;  %v6613_v31 = vadd.f32 %v6612_v28, %v6427_v63  ;;  %v6000_v28 = vld [vmem:[%s11357_s11 + $0x140] sm:$0xff] }
 0x7b8   : > { %v6156_v11 = vpop.permute.xlu1 %6155  ;;  %v6151_v59 = vpop.permute.xlu0 %6150 }
 0x7b9   : > { %v6545_v52 = vadd.f32 %v6544_v17, %v6428_v2  ;;  %v6614_v27 = vadd.f32 %v6613_v31, %v6429_v33  ;;  %v6432_v38 = vmul.f32 %v6151_v59, %v5984_v47  ;;  %v6433_v54 = vmul.f32 %v6151_v59, %v5985_v40  ;;  %v6003_v47 = vld [vmem:[%s11357_s11 + $0x158] sm:$0xff] }
 0x7ba   : > { %v6434_v42 = vmul.f32 %v6156_v11, %v5986_v56  ;;  %v6435_v30 = vmul.f32 %v6156_v11, %v5987_v36  ;;  %v6002_v11 = vld [vmem:[%s11357_s11 + $0x150] sm:$0xff]  ;;  %v6005_v56 = vld [vmem:[%s11357_s11 + $0x168] sm:$0xff] }
 0x7bb   : > { %v6546_v49 = vadd.f32 %v6545_v52, %v6430_v29  ;;  %v6615_v26 = vadd.f32 %v6614_v27, %v6431_v45  ;;  %v6004_v27 = vld [vmem:[%s11357_s11 + $0x160] sm:$0xff] }
 0x7bc   : > { %v6166_v15 = vpop.permute.xlu1 %6165  ;;  %v6161_v12 = vpop.permute.xlu0 %6160 }
 0x7bd   : > { %v6547_v6 = vadd.f32 %v6546_v49, %v6432_v38  ;;  %v6616_v43 = vadd.f32 %v6615_v26, %v6433_v54  ;;  %v6436_v61 = vmul.f32 %v6161_v12, %v5988_v9  ;;  %v6437_v10 = vmul.f32 %v6161_v12, %v5989_v35  ;;  %v6007_v9 = vld [vmem:[%s11357_s11 + $0x178] sm:$0xff] }
 0x7be   : > { %v6438_v37 = vmul.f32 %v6166_v15, %v5990_v19  ;;  %v6439_v7 = vmul.f32 %v6166_v15, %v5991_v51  ;;  %v6006_v15 = vld [vmem:[%s11357_s11 + $0x170] sm:$0xff]  ;;  %v6009_v19 = vld [vmem:[%s11357_s11 + $0x188] sm:$0xff] }
 0x7bf   : > { %v6548_v8 = vadd.f32 %v6547_v6, %v6434_v42  ;;  %v6617_v60 = vadd.f32 %v6616_v43, %v6435_v30  ;;  %v6008_v43 = vld [vmem:[%s11357_s11 + $0x180] sm:$0xff] }
 0x7c0   : > { %v6176_v50 = vpop.permute.xlu1 %6175  ;;  %v6171_v24 = vpop.permute.xlu0 %6170 }
 0x7c1   : > { %v6549_v4 = vadd.f32 %v6548_v8, %v6436_v61  ;;  %v6618_v0 = vadd.f32 %v6617_v60, %v6437_v10  ;;  %v6440_v57 = vmul.f32 %v6171_v24, %v5992_v39  ;;  %v6441_v3 = vmul.f32 %v6171_v24, %v5993_v14  ;;  %v6011_v39 = vld [vmem:[%s11357_s11 + $0x198] sm:$0xff] }
 0x7c2   : > { %v6442_v16 = vmul.f32 %v6176_v50, %v5994_v25  ;;  %v6443_v62 = vmul.f32 %v6176_v50, %v5995_v1  ;;  %v6010_v50 = vld [vmem:[%s11357_s11 + $0x190] sm:$0xff]  ;;  %v6013_v25 = vld [vmem:[%s11357_s11 + $0x1a8] sm:$0xff] }
 0x7c3   : > { %v6550_v5 = vadd.f32 %v6549_v4, %v6438_v37  ;;  %v6619_v21 = vadd.f32 %v6618_v0, %v6439_v7  ;;  %v6012_v0 = vld [vmem:[%s11357_s11 + $0x1a0] sm:$0xff] }
 0x7c4   : > { %v6186_v41 = vpop.permute.xlu1 %6185  ;;  %v6181_v48 = vpop.permute.xlu0 %6180 }
 0x7c5   : > { %v6551_v20 = vadd.f32 %v6550_v5, %v6440_v57  ;;  %v6620_v55 = vadd.f32 %v6619_v21, %v6441_v3  ;;  %v6444_v46 = vmul.f32 %v6181_v48, %v5996_v23  ;;  %v6445_v63 = vmul.f32 %v6181_v48, %v5997_v13  ;;  %v6015_v23 = vld [vmem:[%s11357_s11 + $0x1b8] sm:$0xff] }
 0x7c6   : > { %v6446_v17 = vmul.f32 %v6186_v41, %v5998_v34  ;;  %v6447_v31 = vmul.f32 %v6186_v41, %v5999_v18  ;;  %v6014_v41 = vld [vmem:[%s11357_s11 + $0x1b0] sm:$0xff]  ;;  %v6017_v34 = vld [vmem:[%s11357_s11 + $0x1c8] sm:$0xff] }
 0x7c7   : > { %v6552_v44 = vadd.f32 %v6551_v20, %v6442_v16  ;;  %v6621_v32 = vadd.f32 %v6620_v55, %v6443_v62  ;;  %v6016_v55 = vld [vmem:[%s11357_s11 + $0x1c0] sm:$0xff] }
 0x7c8   : > { %v6196_v53 = vpop.permute.xlu1 %6195  ;;  %v6191_v22 = vpop.permute.xlu0 %6190 }
 0x7c9   : > { %v6553_v2 = vadd.f32 %v6552_v44, %v6444_v46  ;;  %v6622_v33 = vadd.f32 %v6621_v32, %v6445_v63  ;;  %v6448_v29 = vmul.f32 %v6191_v22, %v6000_v28  ;;  %v6449_v45 = vmul.f32 %v6191_v22, %v6001_v58  ;;  %v6019_v28 = vld [vmem:[%s11357_s11 + $0x1d8] sm:$0xff] }
 0x7ca   : > { %v6450_v49 = vmul.f32 %v6196_v53, %v6002_v11  ;;  %v6451_v26 = vmul.f32 %v6196_v53, %v6003_v47  ;;  %v6018_v53 = vld [vmem:[%s11357_s11 + $0x1d0] sm:$0xff]  ;;  %v6021_v11 = vld [vmem:[%s11357_s11 + $0x1e8] sm:$0xff] }
 0x7cb   : > { %v6554_v40 = vadd.f32 %v6553_v2, %v6446_v17  ;;  %v6623_v59 = vadd.f32 %v6622_v33, %v6447_v31  ;;  %v6020_v33 = vld [vmem:[%s11357_s11 + $0x1e0] sm:$0xff] }
 0x7cc   : > { %v6206_v52 = vpop.permute.xlu1 %6205  ;;  %v6201_v36 = vpop.permute.xlu0 %6200 }
 0x7cd   : > { %v6555_v38 = vadd.f32 %v6554_v40, %v6448_v29  ;;  %v6624_v54 = vadd.f32 %v6623_v59, %v6449_v45  ;;  %v6452_v42 = vmul.f32 %v6201_v36, %v6004_v27  ;;  %v6453_v30 = vmul.f32 %v6201_v36, %v6005_v56  ;;  %v6023_v27 = vld [vmem:[%s11357_s11 + $0x1f8] sm:$0xff] }
 0x7ce   : > { %v6454_v8 = vmul.f32 %v6206_v52, %v6006_v15  ;;  %v6455_v60 = vmul.f32 %v6206_v52, %v6007_v9  ;;  %v6022_v52 = vld [vmem:[%s11357_s11 + $0x1f0] sm:$0xff]  ;;  %v6025_v15 = vld [vmem:[%s11357_s11 + $0x208] sm:$0xff] }
 0x7cf   : > { %v6556_v35 = vadd.f32 %v6555_v38, %v6450_v49  ;;  %v6625_v12 = vadd.f32 %v6624_v54, %v6451_v26  ;;  %v6024_v54 = vld [vmem:[%s11357_s11 + $0x200] sm:$0xff] }
 0x7d0   : > { %v6216_v6 = vpop.permute.xlu1 %6215  ;;  %v6211_v51 = vpop.permute.xlu0 %6210 }
 0x7d1   : > { %v6557_v61 = vadd.f32 %v6556_v35, %v6452_v42  ;;  %v6626_v10 = vadd.f32 %v6625_v12, %v6453_v30  ;;  %v6456_v37 = vmul.f32 %v6211_v51, %v6008_v43  ;;  %v6457_v7 = vmul.f32 %v6211_v51, %v6009_v19  ;;  %v6027_v43 = vld [vmem:[%s11357_s11 + $0x218] sm:$0xff] }
 0x7d2   : > { %v6458_v5 = vmul.f32 %v6216_v6, %v6010_v50  ;;  %v6459_v21 = vmul.f32 %v6216_v6, %v6011_v39  ;;  %v6026_v6 = vld [vmem:[%s11357_s11 + $0x210] sm:$0xff]  ;;  %v6029_v50 = vld [vmem:[%s11357_s11 + $0x228] sm:$0xff] }
 0x7d3   : > { %v6558_v14 = vadd.f32 %v6557_v61, %v6454_v8  ;;  %v6627_v24 = vadd.f32 %v6626_v10, %v6455_v60  ;;  %v6028_v10 = vld [vmem:[%s11357_s11 + $0x220] sm:$0xff] }
 0x7d4   : > { %v6226_v4 = vpop.permute.xlu1 %6225  ;;  %v6221_v1 = vpop.permute.xlu0 %6220 }
 0x7d5   : > { %v6559_v57 = vadd.f32 %v6558_v14, %v6456_v37  ;;  %v6628_v3 = vadd.f32 %v6627_v24, %v6457_v7  ;;  %v6460_v16 = vmul.f32 %v6221_v1, %v6012_v0  ;;  %v6461_v62 = vmul.f32 %v6221_v1, %v6013_v25  ;;  %v6031_v0 = vld [vmem:[%s11357_s11 + $0x238] sm:$0xff] }
 0x7d6   : > { %v6462_v44 = vmul.f32 %v6226_v4, %v6014_v41  ;;  %v6463_v32 = vmul.f32 %v6226_v4, %v6015_v23  ;;  %v6030_v4 = vld [vmem:[%s11357_s11 + $0x230] sm:$0xff]  ;;  %v6033_v41 = vld [vmem:[%s11357_s11 + $0x248] sm:$0xff] }
 0x7d7   : > { %v6560_v13 = vadd.f32 %v6559_v57, %v6458_v5  ;;  %v6629_v48 = vadd.f32 %v6628_v3, %v6459_v21  ;;  %v6032_v3 = vld [vmem:[%s11357_s11 + $0x240] sm:$0xff] }
 0x7d8   : > { %v6236_v20 = vpop.permute.xlu1 %6235  ;;  %v6231_v18 = vpop.permute.xlu0 %6230 }
 0x7d9   : > { %v6561_v46 = vadd.f32 %v6560_v13, %v6460_v16  ;;  %v6630_v63 = vadd.f32 %v6629_v48, %v6461_v62  ;;  %v6464_v17 = vmul.f32 %v6231_v18, %v6016_v55  ;;  %v6465_v31 = vmul.f32 %v6231_v18, %v6017_v34  ;;  %v6035_v55 = vld [vmem:[%s11357_s11 + $0x258] sm:$0xff] }
 0x7da   : > { %v6466_v40 = vmul.f32 %v6236_v20, %v6018_v53  ;;  %v6467_v59 = vmul.f32 %v6236_v20, %v6019_v28  ;;  %v6034_v20 = vld [vmem:[%s11357_s11 + $0x250] sm:$0xff]  ;;  %v6037_v53 = vld [vmem:[%s11357_s11 + $0x268] sm:$0xff] }
 0x7db   : > { %v6562_v58 = vadd.f32 %v6561_v46, %v6462_v44  ;;  %v6631_v22 = vadd.f32 %v6630_v63, %v6463_v32  ;;  %v6036_v63 = vld [vmem:[%s11357_s11 + $0x260] sm:$0xff] }
 0x7dc   : > { %v6246_v2 = vpop.permute.xlu1 %6245  ;;  %v6241_v47 = vpop.permute.xlu0 %6240 }
 0x7dd   : > { %v6563_v29 = vadd.f32 %v6562_v58, %v6464_v17  ;;  %v6632_v45 = vadd.f32 %v6631_v22, %v6465_v31  ;;  %v6468_v49 = vmul.f32 %v6241_v47, %v6020_v33  ;;  %v6469_v26 = vmul.f32 %v6241_v47, %v6021_v11  ;;  %v6039_v33 = vld [vmem:[%s11357_s11 + $0x278] sm:$0xff] }
 0x7de   : > { %v6470_v35 = vmul.f32 %v6246_v2, %v6022_v52  ;;  %v6471_v12 = vmul.f32 %v6246_v2, %v6023_v27  ;;  %v6038_v2 = vld [vmem:[%s11357_s11 + $0x270] sm:$0xff]  ;;  %v6041_v52 = vld [vmem:[%s11357_s11 + $0x288] sm:$0xff] }
 0x7df   : > { %v6564_v56 = vadd.f32 %v6563_v29, %v6466_v40  ;;  %v6633_v36 = vadd.f32 %v6632_v45, %v6467_v59  ;;  %v6040_v45 = vld [vmem:[%s11357_s11 + $0x280] sm:$0xff] }
 0x7e0   : > { %v6256_v38 = vpop.permute.xlu1 %6255  ;;  %v6251_v9 = vpop.permute.xlu0 %6250 }
 0x7e1   : > { %v6565_v42 = vadd.f32 %v6564_v56, %v6468_v49  ;;  %v6634_v30 = vadd.f32 %v6633_v36, %v6469_v26  ;;  %v6472_v8 = vmul.f32 %v6251_v9, %v6024_v54  ;;  %v6473_v60 = vmul.f32 %v6251_v9, %v6025_v15  ;;  %v6043_v54 = vld [vmem:[%s11357_s11 + $0x298] sm:$0xff] }
 0x7e2   : > { %v6474_v14 = vmul.f32 %v6256_v38, %v6026_v6  ;;  %v6475_v24 = vmul.f32 %v6256_v38, %v6027_v43  ;;  %v6042_v38 = vld [vmem:[%s11357_s11 + $0x290] sm:$0xff]  ;;  %v6045_v6 = vld [vmem:[%s11357_s11 + $0x2a8] sm:$0xff] }
 0x7e3   : > { %v6566_v19 = vadd.f32 %v6565_v42, %v6470_v35  ;;  %v6635_v51 = vadd.f32 %v6634_v30, %v6471_v12  ;;  %v6044_v30 = vld [vmem:[%s11357_s11 + $0x2a0] sm:$0xff] }
 0x7e4   : > { %v6266_v61 = vpop.permute.xlu1 %6265  ;;  %v6261_v39 = vpop.permute.xlu0 %6260 }
 0x7e5   : > { %v6567_v37 = vadd.f32 %v6566_v19, %v6472_v8  ;;  %v6636_v7 = vadd.f32 %v6635_v51, %v6473_v60  ;;  %v6476_v5 = vmul.f32 %v6261_v39, %v6028_v10  ;;  %v6477_v21 = vmul.f32 %v6261_v39, %v6029_v50  ;;  %v6047_v10 = vld [vmem:[%s11357_s11 + $0x2b8] sm:$0xff] }
 0x7e6   : > { %v6478_v13 = vmul.f32 %v6266_v61, %v6030_v4  ;;  %v6479_v48 = vmul.f32 %v6266_v61, %v6031_v0  ;;  %v6046_v61 = vld [vmem:[%s11357_s11 + $0x2b0] sm:$0xff]  ;;  %v6049_v4 = vld [vmem:[%s11357_s11 + $0x2c8] sm:$0xff] }
 0x7e7   : > { %v6568_v25 = vadd.f32 %v6567_v37, %v6474_v14  ;;  %v6637_v1 = vadd.f32 %v6636_v7, %v6475_v24  ;;  %v6048_v7 = vld [vmem:[%s11357_s11 + $0x2c0] sm:$0xff] }
 0x7e8   : > { %v6276_v57 = vpop.permute.xlu1 %6275  ;;  %v6271_v23 = vpop.permute.xlu0 %6270 }
 0x7e9   : > { %v6569_v16 = vadd.f32 %v6568_v25, %v6476_v5  ;;  %v6638_v62 = vadd.f32 %v6637_v1, %v6477_v21  ;;  %v6480_v44 = vmul.f32 %v6271_v23, %v6032_v3  ;;  %v6481_v32 = vmul.f32 %v6271_v23, %v6033_v41  ;;  %v6051_v3 = vld [vmem:[%s11357_s11 + $0x2d8] sm:$0xff] }
 0x7ea   : > { %v6482_v58 = vmul.f32 %v6276_v57, %v6034_v20  ;;  %v6483_v22 = vmul.f32 %v6276_v57, %v6035_v55  ;;  %v6050_v57 = vld [vmem:[%s11357_s11 + $0x2d0] sm:$0xff]  ;;  %v6053_v20 = vld [vmem:[%s11357_s11 + $0x2e8] sm:$0xff] }
 0x7eb   : > { %v6570_v34 = vadd.f32 %v6569_v16, %v6478_v13  ;;  %v6639_v18 = vadd.f32 %v6638_v62, %v6479_v48  ;;  %v6052_v62 = vld [vmem:[%s11357_s11 + $0x2e0] sm:$0xff] }
 0x7ec   : > { %v6286_v46 = vpop.permute.xlu1 %6285  ;;  %v6281_v28 = vpop.permute.xlu0 %6280 }
 0x7ed   : > { %v6571_v17 = vadd.f32 %v6570_v34, %v6480_v44  ;;  %v6640_v31 = vadd.f32 %v6639_v18, %v6481_v32  ;;  %v6484_v40 = vmul.f32 %v6281_v28, %v6036_v63  ;;  %v6485_v59 = vmul.f32 %v6281_v28, %v6037_v53  ;;  %v6055_v63 = vld [vmem:[%s11357_s11 + $0x2f8] sm:$0xff] }
 0x7ee   : > { %v6486_v56 = vmul.f32 %v6286_v46, %v6038_v2  ;;  %v6487_v36 = vmul.f32 %v6286_v46, %v6039_v33  ;;  %v6054_v46 = vld [vmem:[%s11357_s11 + $0x2f0] sm:$0xff]  ;;  %v6057_v2 = vld [vmem:[%s11357_s11 + $0x308] sm:$0xff] }
 0x7ef   : > { %v6572_v11 = vadd.f32 %v6571_v17, %v6482_v58  ;;  %v6641_v47 = vadd.f32 %v6640_v31, %v6483_v22  ;;  %v6056_v31 = vld [vmem:[%s11357_s11 + $0x300] sm:$0xff] }
 0x7f0   : > { %v6296_v29 = vpop.permute.xlu1 %6295  ;;  %v6291_v27 = vpop.permute.xlu0 %6290 }
 0x7f1   : > { %v6573_v49 = vadd.f32 %v6572_v11, %v6484_v40  ;;  %v6642_v26 = vadd.f32 %v6641_v47, %v6485_v59  ;;  %v6488_v35 = vmul.f32 %v6291_v27, %v6040_v45  ;;  %v6489_v12 = vmul.f32 %v6291_v27, %v6041_v52  ;;  %v6059_v45 = vld [vmem:[%s11357_s11 + $0x318] sm:$0xff] }
 0x7f2   : > { %v6490_v19 = vmul.f32 %v6296_v29, %v6042_v38  ;;  %v6491_v51 = vmul.f32 %v6296_v29, %v6043_v54  ;;  %v6058_v29 = vld [vmem:[%s11357_s11 + $0x310] sm:$0xff]  ;;  %v6061_v38 = vld [vmem:[%s11357_s11 + $0x328] sm:$0xff] }
 0x7f3   : > { %v6574_v15 = vadd.f32 %v6573_v49, %v6486_v56  ;;  %v6643_v9 = vadd.f32 %v6642_v26, %v6487_v36  ;;  %v6060_v26 = vld [vmem:[%s11357_s11 + $0x320] sm:$0xff] }
 0x7f4   : > { %v6306_v42 = vpop.permute.xlu1 %6305  ;;  %v6301_v43 = vpop.permute.xlu0 %6300 }
 0x7f5   : > { %v6575_v8 = vadd.f32 %v6574_v15, %v6488_v35  ;;  %v6644_v60 = vadd.f32 %v6643_v9, %v6489_v12  ;;  %v6492_v14 = vmul.f32 %v6301_v43, %v6044_v30  ;;  %v6493_v24 = vmul.f32 %v6301_v43, %v6045_v6  ;;  %v6063_v30 = vld [vmem:[%s11357_s11 + $0x338] sm:$0xff] }
 0x7f6   : > { %v6494_v25 = vmul.f32 %v6306_v42, %v6046_v61  ;;  %v6495_v1 = vmul.f32 %v6306_v42, %v6047_v10  ;;  %v6062_v42 = vld [vmem:[%s11357_s11 + $0x330] sm:$0xff]  ;;  %v6065_v61 = vld [vmem:[%s11357_s11 + $0x348] sm:$0xff] }
 0x7f7   : > { %v6576_v50 = vadd.f32 %v6575_v8, %v6490_v19  ;;  %v6645_v39 = vadd.f32 %v6644_v60, %v6491_v51  ;;  %v6064_v60 = vld [vmem:[%s11357_s11 + $0x340] sm:$0xff] }
 0x7f8   : > { %v6316_v37 = vpop.permute.xlu1 %6315  ;;  %v6311_v0 = vpop.permute.xlu0 %6310 }
 0x7f9   : > { %v6577_v5 = vadd.f32 %v6576_v50, %v6492_v14  ;;  %v6646_v21 = vadd.f32 %v6645_v39, %v6493_v24  ;;  %v6496_v13 = vmul.f32 %v6311_v0, %v6048_v7  ;;  %v6497_v48 = vmul.f32 %v6311_v0, %v6049_v4  ;;  %v6067_v7 = vld [vmem:[%s11357_s11 + $0x358] sm:$0xff] }
 0x7fa   : > { %v6498_v34 = vmul.f32 %v6316_v37, %v6050_v57  ;;  %v6499_v18 = vmul.f32 %v6316_v37, %v6051_v3  ;;  %v6066_v37 = vld [vmem:[%s11357_s11 + $0x350] sm:$0xff]  ;;  %v6069_v57 = vld [vmem:[%s11357_s11 + $0x368] sm:$0xff] }
 0x7fb   : > { %v6578_v41 = vadd.f32 %v6577_v5, %v6494_v25  ;;  %v6647_v23 = vadd.f32 %v6646_v21, %v6495_v1  ;;  %v6068_v21 = vld [vmem:[%s11357_s11 + $0x360] sm:$0xff] }
 0x7fc   : > { %v6326_v16 = vpop.permute.xlu1 %6325  ;;  %v6321_v55 = vpop.permute.xlu0 %6320 }
 0x7fd   : > { %v6579_v44 = vadd.f32 %v6578_v41, %v6496_v13  ;;  %v6648_v32 = vadd.f32 %v6647_v23, %v6497_v48  ;;  %v6500_v58 = vmul.f32 %v6321_v55, %v6052_v62  ;;  %v6501_v22 = vmul.f32 %v6321_v55, %v6053_v20  ;;  %v6071_v62 = vld [vmem:[%s11357_s11 + $0x378] sm:$0xff] }
 0x7fe   : > { %v6502_v11 = vmul.f32 %v6326_v16, %v6054_v46  ;;  %v6503_v47 = vmul.f32 %v6326_v16, %v6055_v63  ;;  %v6070_v16 = vld [vmem:[%s11357_s11 + $0x370] sm:$0xff]  ;;  %v6073_v46 = vld [vmem:[%s11357_s11 + $0x388] sm:$0xff] }
 0x7ff   : > { %v6580_v53 = vadd.f32 %v6579_v44, %v6498_v34  ;;  %v6649_v28 = vadd.f32 %v6648_v32, %v6499_v18  ;;  %v6072_v32 = vld [vmem:[%s11357_s11 + $0x380] sm:$0xff] }
 0x800   : > { %v6336_v17 = vpop.permute.xlu1 %6335  ;;  %v6331_v33 = vpop.permute.xlu0 %6330 }
 0x801   : > { %v6581_v40 = vadd.f32 %v6580_v53, %v6500_v58  ;;  %v6650_v59 = vadd.f32 %v6649_v28, %v6501_v22  ;;  %v6504_v56 = vmul.f32 %v6331_v33, %v6056_v31  ;;  %v6505_v36 = vmul.f32 %v6331_v33, %v6057_v2  ;;  %v6075_v31 = vld [vmem:[%s11357_s11 + $0x398] sm:$0xff] }
 0x802   : > { %v6506_v15 = vmul.f32 %v6336_v17, %v6058_v29  ;;  %v6507_v9 = vmul.f32 %v6336_v17, %v6059_v45  ;;  %v6074_v17 = vld [vmem:[%s11357_s11 + $0x390] sm:$0xff]  ;;  %v6077_v29 = vld [vmem:[%s11357_s11 + $0x3a8] sm:$0xff] }
 0x803   : > { %v6582_v52 = vadd.f32 %v6581_v40, %v6502_v11  ;;  %v6651_v27 = vadd.f32 %v6650_v59, %v6503_v47  ;;  %v6076_v59 = vld [vmem:[%s11357_s11 + $0x3a0] sm:$0xff] }
 0x804   : > { %v6346_v49 = vpop.permute.xlu1 %6345  ;;  %v6341_v54 = vpop.permute.xlu0 %6340 }
 0x805   : > { %v6583_v35 = vadd.f32 %v6582_v52, %v6504_v56  ;;  %v6652_v12 = vadd.f32 %v6651_v27, %v6505_v36  ;;  %v6508_v19 = vmul.f32 %v6341_v54, %v6060_v26  ;;  %v6509_v51 = vmul.f32 %v6341_v54, %v6061_v38  ;;  %v6079_v26 = vld [vmem:[%s11357_s11 + $0x3b8] sm:$0xff] }
 0x806   : > { %v6510_v50 = vmul.f32 %v6346_v49, %v6062_v42  ;;  %v6511_v39 = vmul.f32 %v6346_v49, %v6063_v30  ;;  %v6078_v49 = vld [vmem:[%s11357_s11 + $0x3b0] sm:$0xff]  ;;  %v6081_v42 = vld [vmem:[%s11357_s11 + $0x3c8] sm:$0xff] }
 0x807   : > { %v6584_v6 = vadd.f32 %v6583_v35, %v6506_v15  ;;  %v6653_v43 = vadd.f32 %v6652_v12, %v6507_v9  ;;  %v6080_v12 = vld [vmem:[%s11357_s11 + $0x3c0] sm:$0xff] }
 0x808   : > { %v6356_v8 = vpop.permute.xlu1 %6355  ;;  %v6351_v10 = vpop.permute.xlu0 %6350 }
 0x809   : > { %v6585_v14 = vadd.f32 %v6584_v6, %v6508_v19  ;;  %v6654_v24 = vadd.f32 %v6653_v43, %v6509_v51  ;;  %v6512_v25 = vmul.f32 %v6351_v10, %v6064_v60  ;;  %v6513_v1 = vmul.f32 %v6351_v10, %v6065_v61  ;;  %v6083_v60 = vld [vmem:[%s11357_s11 + $0x3d8] sm:$0xff] }
 0x80a   : > { %v6514_v41 = vmul.f32 %v6356_v8, %v6066_v37  ;;  %v6515_v23 = vmul.f32 %v6356_v8, %v6067_v7  ;;  %v6082_v8 = vld [vmem:[%s11357_s11 + $0x3d0] sm:$0xff] }
 0x80b   : > { %v6586_v4 = vadd.f32 %v6585_v14, %v6510_v50  ;;  %v6655_v0 = vadd.f32 %v6654_v24, %v6511_v39  ;;  %v6084_v14 = vld [vmem:[%s11357_s11 + $0x3e0] sm:$0xff]  ;;  %v6085_v24 = vld [vmem:[%s11357_s11 + $0x3e8] sm:$0xff] }
 0x80c   : > { %v6366_v5 = vpop.permute.xlu1 %6365  ;;  %v6361_v3 = vpop.permute.xlu0 %6360 }
 0x80d   : > { %v6587_v13 = vadd.f32 %v6586_v4, %v6512_v25  ;;  %v6656_v48 = vadd.f32 %v6655_v0, %v6513_v1  ;;  %v6516_v34 = vmul.f32 %v6361_v3, %v6068_v21  ;;  %v6517_v18 = vmul.f32 %v6361_v3, %v6069_v57  ;;  %v6086_v1 = vld [vmem:[%s11357_s11 + $0x3f0] sm:$0xff] }
 0x80e   : > { %v6518_v53 = vmul.f32 %v6366_v5, %v6070_v16  ;;  %v6519_v28 = vmul.f32 %v6366_v5, %v6071_v62  ;;  %v6087_v5 = vld [vmem:[%s11357_s11 + $0x3f8] sm:$0xff] }
 0x80f   : > { %v6588_v20 = vadd.f32 %v6587_v13, %v6514_v41  ;;  %v6657_v55 = vadd.f32 %v6656_v48, %v6515_v23 }
 0x810   : > { %v6376_v44 = vpop.permute.xlu1 %6375  ;;  %v6371_v63 = vpop.permute.xlu0 %6370 }
 0x811   : > { %v6589_v58 = vadd.f32 %v6588_v20, %v6516_v34  ;;  %v6658_v22 = vadd.f32 %v6657_v55, %v6517_v18  ;;  %v6520_v11 = vmul.f32 %v6371_v63, %v6072_v32  ;;  %v6521_v47 = vmul.f32 %v6371_v63, %v6073_v46 }
 0x812   : > { %v6522_v52 = vmul.f32 %v6376_v44, %v6074_v17  ;;  %v6523_v27 = vmul.f32 %v6376_v44, %v6075_v31  ;;  %v11463_v17 = vld [vmem:[#allocation22_spill] sm:$0xff] }
 0x813   : > { %v6590_v2 = vadd.f32 %v6589_v58, %v6518_v53  ;;  %v6659_v33 = vadd.f32 %v6658_v22, %v6519_v28  ;;  %v6674_v53 = vld [vmem:[%s11358_s12] sm:$0x3] }
 0x814   : > { %v6386_v40 = vpop.permute.xlu1 %6385  ;;  %v6381_v45 = vpop.permute.xlu0 %6380  ;;  %v6679_v31 = vrot.slane %v6674_v53, %v11463_v17 }
 0x815   : > { %v6591_v56 = vadd.f32 %v6590_v2, %v6520_v11  ;;  %v6660_v36 = vadd.f32 %v6659_v33, %v6521_v47  ;;  %v6524_v15 = vmul.f32 %v6381_v45, %v6076_v59  ;;  %v6525_v9 = vmul.f32 %v6381_v45, %v6077_v29  ;;  %v11464_v2 = vld [vmem:[#allocation21_spill] sm:$0xff] }
 0x816   : > { %v6526_v6 = vmul.f32 %v6386_v40, %v6078_v49  ;;  %v6527_v43 = vmul.f32 %v6386_v40, %v6079_v26  ;;  %v6683_v33 = vrot.slane %v6674_v53, %v11464_v2  ;;  %v6825_v26 = vld [vmem:[%s11362_s16] sm:$0x1] }
 0x817   : > { %v6592_v38 = vadd.f32 %v6591_v56, %v6522_v52  ;;  %v6661_v54 = vadd.f32 %v6660_v36, %v6523_v27  ;;  %v6722_v36 = vld [vmem:[%s11360_s14] sm:$0x1] }
 0x818   : > { %v6396_v35 = vpop.permute.xlu1 %6395  ;;  %v6391_v30 = vpop.permute.xlu0 %6390 }
 0x819   : > { %v6593_v19 = vadd.f32 %v6592_v38, %v6524_v15  ;;  %v6662_v51 = vadd.f32 %v6661_v54, %v6525_v9  ;;  %v6528_v50 = vmul.f32 %v6391_v30, %v6080_v12  ;;  %v6529_v39 = vmul.f32 %v6391_v30, %v6081_v42  ;;  %v6896_v30 = vld [vmem:[%s11467_s23] sm:$0x1] }
 0x81a   : > { %v6530_v7 = vmul.f32 %v6396_v35, %v6082_v8  ;;  %v6531_v4 = vmul.f32 %v6396_v35, %v6083_v60 }
 0x81b   : > { %v6594_v61 = vadd.f32 %v6593_v19, %v6526_v6  ;;  %v6663_v10 = vadd.f32 %v6662_v51, %v6527_v43 }
 0x81c   : > { %v6401_v37 = vpop.permute.xlu0 %6400  ;;  %v6406_v21 = vpop.permute.xlu1 %6405 }
 0x81d   : > { %v6595_v0 = vadd.f32 %v6594_v61, %v6528_v50  ;;  %v6664_v25 = vadd.f32 %v6663_v10, %v6529_v39  ;;  %v6532_v41 = vmul.f32 %v6401_v37, %v6084_v14  ;;  %v6533_v23 = vmul.f32 %v6401_v37, %v6085_v24 }
 0x81e   : > { %v6534_v13 = vmul.f32 %v6406_v21, %v6086_v1  ;;  %v6535_v48 = vmul.f32 %v6406_v21, %v6087_v5 }
 0x81f   : > { %v6596_v57 = vadd.f32 %v6595_v0, %v6530_v7  ;;  %v6665_v3 = vadd.f32 %v6664_v25, %v6531_v4 }
 0x821   : > { %v6597_v16 = vadd.f32 %v6596_v57, %v6532_v41  ;;  %v6666_v62 = vadd.f32 %v6665_v3, %v6533_v23 }
 0x823   : > { %v6598_v20 = vadd.f32 %v6597_v16, %v6534_v13  ;;  %v6667_v55 = vadd.f32 %v6666_v62, %v6535_v48 }
 0x825   : > { %v6599_v34 = vrot.slane %v6598_v20, 4  ;;  %v6668_v18 = vrot.slane %v6667_v55, 4 }
 0x827   : > { %v6600_v44 = vadd.f32 %v6599_v34, %v6598_v20  ;;  %v6669_v32 = vadd.f32 %v6668_v18, %v6667_v55 }
 0x829   : > { %v6601_v46 = vrot.slane %v6600_v44, 2  ;;  %v6670_v63 = vrot.slane %v6669_v32, 2 }
 0x82b   : > { %v6671_v28 = vadd.f32 %v6670_v63, %v6669_v32  ;;  %v6602_v58 = vadd.f32 %v6601_v46, %v6600_v44 }
 0x82d   : > { %v6672_v22 = vrot.slane %v6671_v28, 1  ;;  %v6603_v11 = vrot.slane %v6602_v58, 1 }
 0x82f   : > { %v6673_v47 = vadd.f32 %v6672_v22, %v6671_v28  ;;  %v6604_v40 = vadd.f32 %v6603_v11, %v6602_v58 }
 0x831   : > { %v6687_v59 = vadd.f32 %v6683_v33, %v6673_v47  ;;  %v6686_v29 = vadd.f32 %v6679_v31, %v6604_v40 }
 0x833   : > { %v6689_v45 = vmax.f32 %v6687_v59, 0.0  ;;  %v6688_v52 = vmax.f32 %v6686_v29, 0.0 }
 0x835   : > { %6787 = vmatprep.mubr.f32.mxu0 %v6689_v45  ;;  %6890 = vmatprep.mubr.f32.mxu1 %v6689_v45 }
 0x836   : > { %6788 = vmatmul.mubr.f32.vlgmr.msra.gmra.mrb[0].mxu0 %v6688_v52  ;;  %6891 = vmatmul.mubr.f32.vlgmr.msra.gmra.mrb[0].mxu1 %v6688_v52 }
 0x909   : > { %v7271_v27 = vpop.f32.mrb[0].mxu0  ;;  %v7306_v56 = vpop.f32.mrb[0].mxu1 }
 0x90a   : > { %v7272_v49 = vpop.f32.mrb[1].mxu0  ;;  %v7307_v38 = vpop.f32.mrb[1].mxu1 }
 0x90b   : > { %v7273_v54 = vadd.f32 %v7272_v49, %v7271_v27  ;;  %v7308_v15 = vadd.f32 %v7307_v38, %v7306_v56 }
 0x90d   : > { %v6790_v9 = vadd.f32 %v7273_v54, %v6722_v36  ;;  %v6893_v35 = vadd.f32 %v7308_v15, %v6825_v26 }
 0x90f   : > { %6904 = vst.msk [vmem:[%s11465_s21] sm:$0x1] %vm6902_vm7, %v6790_v9  ;;  %v6897_v12 = vmul.f32 0.5, %v6893_v35  ;;  %6905 = vst.msk [vmem:[%s11466_s20] sm:$0x1] %vm6902_vm7, %v6893_v35 }
 0x911   : > { %v6898_v42 = vmul.f32 1.442695, %v6897_v12 }
 0x913   : > { %7644 = vpow2.f32 %v6898_v42 }
 0x91d   : > { %v7645_v6 = vpop.eup %7644 }
 0x91e   : > { %v6900_v43 = vmul.f32 %v7645_v6, %v6896_v30 }
 0x920   : > { %v6901_v19 = vadd.f32 %v6900_v43, %v6790_v9 }
 0x922   : > { %6903 = vst.msk [vmem:[%s11468_s3] sm:$0x1] %vm6902_vm7, %v6901_v19 }
 0x923 PF: > { %s11469_s24 = sld [smem:[#allocation15_spill]]  ;;  %s11218_s18 = sshll.u32 %s7788_s2, 4 }
 0x924   : > { %s11472_s20 = sld [smem:[#allocation43_spill]]  ;;  %s11473_s22 = scalar_lea.vmem [#allocation5], %s7989_s28 }
 0x925   : > { %s6940_s23 = sshll.u32 %s11473_s22, 4  ;;  %s11474_s4 = sld [smem:[#allocation42_spill]]  ;;  %s11228_s23 = int_to_ptr.vmem [resolvable:$true] %s6940_s23 }
 0x926   : > { %s7646_s5 = scalar_lea.vmem %s11228_s23, 16  ;;  %s7807_s21 = smov [#allocation5]  }
 0x927   : > { %p7647_p2 = scmp.ne.s32.totalorder %s11228_s23, %s7646_s5  ;;  %s7650_s0 = sshll.u32 %s7807_s21, 4  ;;  %s7651_s0 = int_to_ptr.vmem [resolvable:$false] %s7650_s0 }
 0x928   : > { %s7652_s22 = scalar_lea.vmem %s7651_s0, 32  ;;  %p7653_p6 = scmp.lt.s32.totalorder %s11228_s23, %s7651_s0 }
 0x929   : > { %s11470_s26 = sadd.s32 4294967295, %s11469_s24   ;;  %p7648_p4 = pnand %p7647_p2, %p7966_p3 }
 0x92a   : > { %s11215_s27 = sand.u32 1, %s11470_s26   ;;  %s11224_s1 = scalar_lea.hbm %s11472_s20, %s11218_s18 }
 0x92b   : > { %s11234_s26 = scalar_lea.hbm %s11474_s4, %s11218_s18  ;;  %p7649_p5 = pneg %p7648_p4 }
 0x92c   : > { %p7654_p7 = scmp.lt.s32.totalorder %s7652_s22, %s7646_s5 }
 0x92e   : > { %p7655_p8 = por %p7654_p7, %p7653_p6 }
 0x930   : > { %p7656_p10 = pnand %p7655_p8, %p7649_p5 }
 0x932   : > { %7659 = shalt.err (!%p7656_p10)
}
 0x933   : > { %s7660_s3 = scalar_lea.hbm %s11224_s1, 16  ;;  %s7664_s21 = scalar_lea.hbm %s11472_s20, 32 }
 0x934   : > { %p7661_p11 = scmp.ne.s32.totalorder %s11224_s1, %s7660_s3  ;;  %p7665_p0 = scmp.lt.u32.totalorder %s11224_s1, %s11472_s20 }
 0x935   : > { %p7666_p1 = scmp.lt.u32.totalorder %s7664_s21, %s7660_s3  ;;  %p7668_p4 = scmp.lt.u32.totalorder %s7660_s3, %s11224_s1 }
 0x936   : > { %p7662_p12 = pnand %p7661_p11, %p7966_p3 }
 0x937   : > { %p7667_p2 = por %p7666_p1, %p7665_p0 }
 0x938   : > { %p7663_p13 = pneg %p7662_p12 }
 0x939   : > { %p7669_p5 = por %p7668_p4, %p7667_p2 }
 0x93b   : > { %p7670_p6 = pnand %p7669_p5, %p7663_p13 }
 0x93d   : > { %7673 = shalt.err (!%p7670_p6)
}
 0x93e   : > { %s11475_s5 = scalar_lea.sflag [#allocation6], %s11215_s27  ;;  %s11476_s6 = scalar_lea.vmem [#allocation3], %s7989_s28 }
 0x93f   : > { %7374 = dma.vmem_to_hbm [thread:$0]  (%p7966_p3), %s11228_s23, 16, %s11224_s1, %s11475_s5  }
 0x940   : > { %s6927_s2 = sshll.u32 %s11476_s6, 4  ;;  %s11477_s3 = sld [smem:[#allocation44_spill]]  ;;  %s11268_s2 = int_to_ptr.vmem [resolvable:$true] %s6927_s2 }
 0x941   : > { %s11479_s7 = scalar_lea.vmem [#allocation7], %s7989_s28  ;;  %s6907_s9 = scalar_lea.sflag [#allocation4], %s7989_s28 }
 0x942   : > { %s11272_s8 = sshll.u32 %s11479_s7, 4  ;;  %s7674_s10 = scalar_lea.vmem %s11268_s2, 16  ;;  %s6954_s8 = int_to_ptr.vmem [resolvable:$true] %s11272_s8 }
 0x943   : > { %p7675_p7 = scmp.ne.s32.totalorder %s11268_s2, %s7674_s10  ;;  %s7808_s1 = smov [#allocation3]  }
 0x944   : > { %s7678_s23 = sshll.u32 %s7808_s1, 4  ;;  %s7679_s23 = int_to_ptr.vmem [resolvable:$false] %s7678_s23 }
 0x945   : > { %p7676_p8 = pnand %p7675_p7, %p7966_p3  ;;  %s7680_s5 = scalar_lea.vmem %s7679_s23, 32 }
 0x946   : > { %s11478_s21 = smov %s11477_s3  ;;  %s11266_s0 = scalar_lea.hbm %s11477_s3, %s11218_s18 }
 0x947   : > { %p7677_p10 = pneg %p7676_p8  ;;  %p7681_p11 = scmp.lt.s32.totalorder %s11268_s2, %s7679_s23 }
 0x948   : > { %p7682_p12 = scmp.lt.s32.totalorder %s7680_s5, %s7674_s10 }
 0x94a   : > { %p7683_p13 = por %p7682_p12, %p7681_p11 }
 0x94c   : > { %p7684_p0 = pnand %p7683_p13, %p7677_p10 }
 0x94e   : > { %7687 = shalt.err (!%p7684_p0)
}
 0x94f   : > { %s7688_s7 = scalar_lea.hbm %s11234_s26, 16  ;;  %s7692_s6 = scalar_lea.hbm %s11474_s4, 32 }
 0x950   : > { %p7689_p1 = scmp.ne.s32.totalorder %s11234_s26, %s7688_s7  ;;  %p7693_p5 = scmp.lt.u32.totalorder %s11234_s26, %s11474_s4 }
 0x951   : > { %p7694_p6 = scmp.lt.u32.totalorder %s7692_s6, %s7688_s7  ;;  %p7696_p8 = scmp.lt.u32.totalorder %s7688_s7, %s11234_s26 }
 0x952   : > { %p7690_p2 = pnand %p7689_p1, %p7966_p3 }
 0x953   : > { %p7695_p7 = por %p7694_p6, %p7693_p5 }
 0x954   : > { %p7691_p4 = pneg %p7690_p2 }
 0x955   : > { %p7697_p10 = por %p7696_p8, %p7695_p7 }
 0x957   : > { %p7698_p11 = pnand %p7697_p10, %p7691_p4 }
 0x959   : > { %7701 = shalt.err (!%p7698_p11)
}
 0x95a   : > { %7373 = dma.vmem_to_hbm [thread:$0]  (%p7966_p3), %s11268_s2, 16, %s11234_s26, %s6907_s9  }
 0x95b   : > { %s7702_s10 = scalar_lea.vmem %s6954_s8, 16  ;;  %s7809_s3 = smov [#allocation7]  }
 0x95c   : > { %p7703_p12 = scmp.ne.s32.totalorder %s6954_s8, %s7702_s10  ;;  %s7706_s1 = sshll.u32 %s7809_s3, 4  ;;  %s7707_s1 = int_to_ptr.vmem [resolvable:$false] %s7706_s1 }
 0x95d   : > { %s7708_s23 = scalar_lea.vmem %s7707_s1, 32  ;;  %p7709_p1 = scmp.lt.s32.totalorder %s6954_s8, %s7707_s1 }
 0x95e   : > { %p7704_p13 = pnand %p7703_p12, %p7966_p3  ;;  %p7710_p2 = scmp.lt.s32.totalorder %s7708_s23, %s7702_s10 }
 0x960   : > { %p7705_p0 = pneg %p7704_p13  ;;  %p7711_p4 = por %p7710_p2, %p7709_p1 }
 0x962   : > { %p7712_p5 = pnand %p7711_p4, %p7705_p0 }
 0x964   : > { %7715 = shalt.err (!%p7712_p5)
}
 0x965   : > { %s7716_s9 = scalar_lea.hbm %s11266_s0, 16  ;;  %s7720_s5 = scalar_lea.hbm %s11478_s21, 32 }
 0x966   : > { %p7717_p6 = scmp.ne.s32.totalorder %s11266_s0, %s7716_s9  ;;  %p7721_p10 = scmp.lt.u32.totalorder %s11266_s0, %s11478_s21 }
 0x967   : > { %p7722_p11 = scmp.lt.u32.totalorder %s7720_s5, %s7716_s9  ;;  %p7724_p13 = scmp.lt.u32.totalorder %s7716_s9, %s11266_s0 }
 0x968   : > { %p7718_p7 = pnand %p7717_p6, %p7966_p3 }
 0x969   : > { %p7723_p12 = por %p7722_p11, %p7721_p10 }
 0x96a   : > { %p7719_p8 = pneg %p7718_p7 }
 0x96b   : > { %p7725_p0 = por %p7724_p13, %p7723_p12 }
 0x96d   : > { %p7726_p1 = pnand %p7725_p0, %p7719_p8 }
 0x96f   : > { %7729 = shalt.err (!%p7726_p1)
}
 0x970   : > { %s11480_s18 = scalar_lea.sflag [#allocation6], %s11215_s27 }
 0x971   : > { %7375 = dma.vmem_to_hbm [thread:$0]  (%p7966_p3), %s6954_s8, 16, %s11266_s0, %s11480_s18  }
 0x972 PF: > { %s11481_s6 = sld [smem:[#allocation15_spill]]  ;;  %s11482_s22 = sld [smem:[#allocation10_spill]] }
 0x978   : > { %p7389_p2 = scmp.ge.s32.totalorder %s11481_s6, 2  ;;  %s6965_s10 = sand.u32 1, %s11482_s22  }
 0x979   : > { %s6966_s3 = scalar_lea.sflag [#allocation4], %s6965_s10 }
 0x97a   : > { %p7380_p4 = pnand %p7389_p2, %p7978_p9 }
 0x97c   : > { %7763 = dma.done.wait (!%p7380_p4), %s6966_s3, 16  }
 0x97d   : > { %7765 = vsyncadd (!%p7380_p4), %s6966_s3, 4294967280  ;;  %s11484_s1 = sadd.s32 4294967294, %s11481_s6  }
 0x97e   : > { %s6973_s23 = sand.u32 1, %s11484_s1  }
 0x97f   : > { %s6974_s9 = scalar_lea.sflag [#allocation6], %s6973_s23 }
 0x980   : > { %7767 = dma.done.wait (!%p7380_p4), %s6974_s9, 32  }
 0x981   : > { %7769 = vsyncadd (!%p7380_p4), %s6974_s9, 4294967264  ;;  %s37_s26 = sadd.s32 1, %s11481_s6   ;;  %s11485_s1 = sld [smem:[#allocation11_spill]] }
 0x982   : > { %p34_p3 = scmp.ge.s32.totalorder %s37_s26, 6   ;;  %s11486_s22 = sld [smem:[#allocation12_spill]] }
 0x983   : > { %s11487_s23 = sld [smem:[#allocation20_spill]]  ;;  %s11488_s24 = sld [smem:[#allocation13_spill]] }
 0x984   : > { %s11489_s2 = sld [smem:[#allocation14_spill]]  ;;  %s11490_s25 = sld [smem:[#allocation16_spill]] }
 0x985   : > { %s11491_s3 = sld [smem:[#allocation18_spill]]  ;;  %36 = sbr.rel (!%p34_p3) target bundleno = 22 (0x16), region = 170 }
 0x98c   :  { %6986 = vsyncpa [#allocation4], 1 }
 0x98d   :  { %6988 = vsyncpa [#allocation4 + $0x1], 1 }
 0x98e   :  { %6989 = vsyncpa [#allocation6], 1 }
 0x98f   :  { %6991 = vsyncpa [#allocation6 + $0x1], 1 }

</bundles_post_ra>
